<compile_context>
chip_gen: v5e
topology: v5e:2x2
jax: 0.10.0
libtpu: 0.0.40
codegen_flags: <defaults>
</compile_context>

<pallas_src>
import jax
import jax.numpy as jnp
from jax.experimental import pallas as pl
from jax.experimental.pallas import tpu as pltpu

OBS_SIZE = 21
OBS_WIDTH = 2
INPUT_SIZE = OBS_SIZE * OBS_WIDTH * 2      # 84
IN_PAD = 128                               # lane-padded input width
HIDDEN = 256
HEAD_SIZES = (3, 3, 3, 3, 3, 2, 2, 2, 2)   # throttle..on_ground
NUM_HEADS = len(HEAD_SIZES)
CPAD = 128                                 # lane-dense packed output width
TM_MAX = 512                               # batch-tile rows for large batches

# Lane offsets of each head inside the packed 128-wide output slab.
_offs, _c = [], 0
for _s in HEAD_SIZES:
    _offs.append(_c)
    _c += _s
HEAD_OFFSETS = tuple(_offs)                # (0,3,6,9,12,15,17,19,21)
TOTAL_OUT = _c                             # 23 (<= 128)


def _round_up(n, m):
    return ((n + m - 1) // m) * m


def fused_heads_kernel(x_ref,              # (tm, IN_PAD)            bf16
                       w1_ref, b1_ref,     # (IN_PAD, 9*H) bf16, (1, 9*H) f32
                       whid_ref, bhid_ref, # (3, 9, H, H) bf16, (3, 9, 1, H) f32
                       w5_ref, b5_ref,     # (9, H, CPAD) bf16, (9, 1, CPAD) f32
                       out_ref):           # (tm, CPAD)              f32
    """One batch tile; all 9 heads fused (static Python loop -> fully unrolled)."""
    x = x_ref[...]                                                   # bf16
    tm = x.shape[0]
    col = jax.lax.broadcasted_iota(jnp.int32, (tm, CPAD), 1)

    # Layer 1 fused across all 9 heads: one (tm,128) x (128,2304) matmul.
    a_all = jnp.maximum(
        jnp.dot(x, w1_ref[...], preferred_element_type=jnp.float32)
        + b1_ref[...], 0.0)                                          # (tm, 2304) f32

    acc = jnp.zeros((tm, CPAD), jnp.float32)
    for h in range(NUM_HEADS):
        a = a_all[:, h * HIDDEN:(h + 1) * HIDDEN]                    # (tm, 256) f32
        for l in range(3):                                           # layers 2-4
            a = jnp.maximum(
                jnp.dot(a.astype(jnp.bfloat16), whid_ref[l, h],
                        preferred_element_type=jnp.float32)
                + bhid_ref[l, h], 0.0)
        # Final layer: W5[h] is zero outside this head's lane band, so the
        # logits land directly at lanes [off, off+c) of the packed slab.
        logits = jnp.dot(a.astype(jnp.bfloat16), w5_ref[h],
                         preferred_element_type=jnp.float32) + b5_ref[h]

        off, c = HEAD_OFFSETS[h], HEAD_SIZES[h]
        in_band = (col >= off) & (col < off + c)
        masked = jnp.where(in_band, logits, -jnp.inf)
        m = jnp.max(masked, axis=1, keepdims=True)
        e = jnp.exp(masked - m)                  # out-of-band -> exp(-inf) = 0
        lse = m + jnp.log(jnp.sum(e, axis=1, keepdims=True))
        acc = jnp.where(in_band, logits - lse, acc)

    out_ref[...] = acc


def init_params(key):
    """PyTorch-Linear-style init (uniform +-1/sqrt(fan_in)).

    Layouts: W1 fused across heads (128, 9*256); W2-4 stacked (3, 9, 256, 256);
    W5/b5 placed into per-head lane bands of a 128-wide slab.  Weights bf16,
    biases f32."""
    dims = [(INPUT_SIZE, HIDDEN), (HIDDEN, HIDDEN), (HIDDEN, HIDDEN),
            (HIDDEN, HIDDEN), (HIDDEN, max(HEAD_SIZES))]
    Ws, bs = [], []
    for fan_in, fan_out in dims:
        key, kw, kb = jax.random.split(key, 3)
        bound = 1.0 / jnp.sqrt(jnp.float32(fan_in))
        Ws.append(jax.random.uniform(kw, (NUM_HEADS, fan_in, fan_out),
                                     jnp.float32, -bound, bound))
        bs.append(jax.random.uniform(kb, (NUM_HEADS, 1, fan_out),
                                     jnp.float32, -bound, bound))

    # Layer 1: rows zero-padded 84 -> 128, heads fused along output axis.
    W1p = jnp.zeros((NUM_HEADS, IN_PAD, HIDDEN), jnp.float32)
    W1p = W1p.at[:, :INPUT_SIZE, :].set(Ws[0])
    W1f = jnp.transpose(W1p, (1, 0, 2)).reshape(IN_PAD, NUM_HEADS * HIDDEN)
    b1f = bs[0].reshape(1, NUM_HEADS * HIDDEN)

    # Hidden layers 2-4 stacked into single operands.
    Whid = jnp.stack(Ws[1:4], axis=0)          # (3, 9, 256, 256)
    bhid = jnp.stack(bs[1:4], axis=0)          # (3, 9, 1, 256)

    # Final layer: head h's (<=3) output columns at lanes [off_h, off_h+c_h).
    W5p = jnp.zeros((NUM_HEADS, HIDDEN, CPAD), jnp.float32)
    b5p = jnp.zeros((NUM_HEADS, 1, CPAD), jnp.float32)
    for h, (off, c) in enumerate(zip(HEAD_OFFSETS, HEAD_SIZES)):
        W5p = W5p.at[h, :, off:off + c].set(Ws[4][h, :, :c])
        b5p = b5p.at[h, :, off:off + c].set(bs[4][h, :, :c])

    return dict(
        W1=W1f.astype(jnp.bfloat16), b1=b1f,
        Whid=Whid.astype(jnp.bfloat16), bhid=bhid,
        W5=W5p.astype(jnp.bfloat16), b5=b5p)


@jax.jit
def fully_connected3_forward(seq, params):
    x = seq.reshape(-1, INPUT_SIZE).astype(jnp.float32)
    B = x.shape[0]

    # Batch tiling: multiples of 16 (bf16 sublane tile).  Medium batches split
    # into >=2 grid steps so both v7x TensorCores engage; large batches use
    # TM_MAX-row tiles.
    Bp = _round_up(max(B, 16), 16)
    if Bp <= 16:
        tm = Bp
    elif Bp <= 2 * TM_MAX:
        tm = _round_up((Bp + 1) // 2, 16)
        Bp = 2 * tm
    else:
        tm = TM_MAX
        Bp = _round_up(Bp, TM_MAX)

    # Pad rows to Bp, features 84 -> 128, stream activations in bf16.
    xp = jnp.zeros((Bp, IN_PAD), jnp.float32).at[:B, :INPUT_SIZE].set(x)
    xp = xp.astype(jnp.bfloat16)

    # Weights/biases are grid-invariant (constant index_map) -> single buffer.
    res = dict(pipeline_mode=pl.Buffered(1))

    out = pl.pallas_call(
        fused_heads_kernel,
        out_shape=jax.ShapeDtypeStruct((Bp, CPAD), jnp.float32),
        grid=(Bp // tm,),
        in_specs=[
            pl.BlockSpec((tm, IN_PAD), lambda m: (m, 0)),                       # x tile
            pl.BlockSpec((IN_PAD, NUM_HEADS * HIDDEN), lambda m: (0, 0), **res),    # W1
            pl.BlockSpec((1, NUM_HEADS * HIDDEN), lambda m: (0, 0), **res),         # b1
            pl.BlockSpec((3, NUM_HEADS, HIDDEN, HIDDEN),
                         lambda m: (0, 0, 0, 0), **res),                            # W2-4
            pl.BlockSpec((3, NUM_HEADS, 1, HIDDEN),
                         lambda m: (0, 0, 0, 0), **res),                            # b2-4
            pl.BlockSpec((NUM_HEADS, HIDDEN, CPAD), lambda m: (0, 0, 0), **res),    # W5
            pl.BlockSpec((NUM_HEADS, 1, CPAD), lambda m: (0, 0, 0), **res),         # b5
        ],
        out_specs=pl.BlockSpec((tm, CPAD), lambda m: (m, 0)),
        compiler_params=pltpu.CompilerParams(
            dimension_semantics=("parallel",),
            vmem_limit_bytes=48 * 1024 * 1024),
    )(xp, params["W1"], params["b1"], params["Whid"], params["bhid"],
      params["W5"], params["b5"])

    # Unpack each head's lane band; padded rows/lanes never leave the wrapper.
    return tuple(out[:B, off:off + c]
                 for off, c in zip(HEAD_OFFSETS, HEAD_SIZES))


def reference_forward(seq, params):
    """Plain-JAX reference doing the same math (bf16 weights, f32 accumulate)."""
    x = seq.reshape(-1, INPUT_SIZE).astype(jnp.float32)
    xp = jnp.zeros((x.shape[0], IN_PAD), jnp.float32).at[:, :INPUT_SIZE].set(x)
    xp = xp.astype(jnp.bfloat16)
    a_all = jnp.maximum(
        jnp.dot(xp, params["W1"], preferred_element_type=jnp.float32)
        + params["b1"], 0.0)
    outs = []
    for h, c in enumerate(HEAD_SIZES):
        a = a_all[:, h * HIDDEN:(h + 1) * HIDDEN]
        for l in range(3):
            a = jnp.maximum(
                jnp.dot(a.astype(jnp.bfloat16), params["Whid"][l, h],
                        preferred_element_type=jnp.float32)
                + params["bhid"][l, h], 0.0)
        logits = jnp.dot(a.astype(jnp.bfloat16), params["W5"][h],
                         preferred_element_type=jnp.float32) + params["b5"][h]
        off = HEAD_OFFSETS[h]
        outs.append(jax.nn.log_softmax(logits[:, off:off + c], axis=1))
    return tuple(outs)


if __name__ == "__main__":
    key = jax.random.PRNGKey(0)
    kp, kx = jax.random.split(key)
    params = init_params(kp)

    # seq: (batch=2, frames=4, features=84) -> view(-1, 84) = (8, 84)
    seq = jax.random.normal(kx, (2, 4, INPUT_SIZE), jnp.float32)

    outs = jax.block_until_ready(fully_connected3_forward(seq, params))
    refs = reference_forward(seq, params)
    for o, r, c in zip(outs, refs, HEAD_SIZES):
        assert o.shape == (8, c), o.shape
        assert jnp.allclose(o, r, atol=1e-3, rtol=1e-3), \
            float(jnp.max(jnp.abs(o - r)))

    print("KERNEL_OK")
</pallas_src>

<mosaic_0001>
module attributes {stable_mosaic.version = 11 : i64} {
  func.func @fused_heads_kernel(%arg0: i32, %arg1: memref<16x128xbf16, #tpu.memory_space<vmem>>, %arg2: memref<128x2304xbf16, #tpu.memory_space<vmem>>, %arg3: memref<1x2304xf32, #tpu.memory_space<vmem>>, %arg4: memref<3x9x256x256xbf16, #tpu.memory_space<vmem>>, %arg5: memref<3x9x1x256xf32, #tpu.memory_space<vmem>>, %arg6: memref<9x256x128xbf16, #tpu.memory_space<vmem>>, %arg7: memref<9x1x128xf32, #tpu.memory_space<vmem>>, %arg8: memref<16x128xf32, #tpu.memory_space<vmem>>) attributes {dimension_semantics = [#tpu.dimension_semantics<parallel>], iteration_bounds = array<i64: 1>, scalar_prefetch = 0 : i64, scratch_operands = 0 : i64, tpu.core_type = #tpu.core_type<tc>, window_params = [{transform_indices = @transform_0, window_bounds = array<i64: 16, 128>}, {pipeline_mode = #tpu.pipeline_mode<synchronous>, transform_indices = @transform_1, window_bounds = array<i64: 128, 2304>}, {pipeline_mode = #tpu.pipeline_mode<synchronous>, transform_indices = @transform_2, window_bounds = array<i64: 1, 2304>}, {pipeline_mode = #tpu.pipeline_mode<synchronous>, transform_indices = @transform_3, window_bounds = array<i64: 3, 9, 256, 256>}, {pipeline_mode = #tpu.pipeline_mode<synchronous>, transform_indices = @transform_4, window_bounds = array<i64: 3, 9, 1, 256>}, {pipeline_mode = #tpu.pipeline_mode<synchronous>, transform_indices = @transform_5, window_bounds = array<i64: 9, 256, 128>}, {pipeline_mode = #tpu.pipeline_mode<synchronous>, transform_indices = @transform_6, window_bounds = array<i64: 9, 1, 128>}, {transform_indices = @transform_7, window_bounds = array<i64: 16, 128>}]} {
    %c0 = arith.constant 0 : index
    %c0_0 = arith.constant 0 : index
    %0 = vector.load %arg1[%c0, %c0_0] : memref<16x128xbf16, #tpu.memory_space<vmem>>, vector<16x128xbf16>
    %1 = tpu.iota {dimensions = array<i32: 1>} : vector<16x128xi32>
    %c0_1 = arith.constant 0 : index
    %c0_2 = arith.constant 0 : index
    %2 = vector.load %arg2[%c0_1, %c0_2] : memref<128x2304xbf16, #tpu.memory_space<vmem>>, vector<128x2304xbf16>
    %cst = arith.constant dense<0.000000e+00> : vector<16x2304xf32>
    %3 = tpu.matmul %0, %2, %cst {dimension_numbers = #tpu.dot_dimension_numbers<[1], [0], [0], [1], [0, 0, 1, 1], [], []>} : vector<16x128xbf16>, vector<128x2304xbf16>, vector<16x2304xf32> -> vector<16x2304xf32>
    %c0_3 = arith.constant 0 : index
    %c0_4 = arith.constant 0 : index
    %4 = vector.load %arg3[%c0_3, %c0_4] : memref<1x2304xf32, #tpu.memory_space<vmem>>, vector<1x2304xf32>
    %5 = vector.broadcast %4 : vector<1x2304xf32> to vector<16x2304xf32>
    %6 = arith.addf %3, %5 : vector<16x2304xf32>
    %cst_5 = arith.constant 0.000000e+00 : f32
    %7 = vector.broadcast %cst_5 : f32 to vector<16x2304xf32>
    %8 = arith.maximumf %6, %7 : vector<16x2304xf32>
    %cst_6 = arith.constant 0.000000e+00 : f32
    %9 = vector.broadcast %cst_6 : f32 to vector<16x128xf32>
    %10 = vector.extract_strided_slice %8 {offsets = [0, 0], sizes = [16, 256], strides = [1, 1]} : vector<16x2304xf32> to vector<16x256xf32>
    %11 = arith.truncf %10 : vector<16x256xf32> to vector<16x256xbf16>
    %c0_7 = arith.constant 0 : index
    %c0_8 = arith.constant 0 : index
    %c0_9 = arith.constant 0 : index
    %c0_10 = arith.constant 0 : index
    %12 = vector.load %arg4[%c0_7, %c0_8, %c0_9, %c0_10] : memref<3x9x256x256xbf16, #tpu.memory_space<vmem>>, vector<1x1x256x256xbf16>
    %13 = vector.shape_cast %12 : vector<1x1x256x256xbf16> to vector<256x256xbf16>
    %cst_11 = arith.constant dense<0.000000e+00> : vector<16x256xf32>
    %14 = tpu.matmul %11, %13, %cst_11 {dimension_numbers = #tpu.dot_dimension_numbers<[1], [0], [0], [1], [0, 0, 1, 1], [], []>} : vector<16x256xbf16>, vector<256x256xbf16>, vector<16x256xf32> -> vector<16x256xf32>
    %c0_12 = arith.constant 0 : index
    %c0_13 = arith.constant 0 : index
    %c0_14 = arith.constant 0 : index
    %c0_15 = arith.constant 0 : index
    %15 = vector.load %arg5[%c0_12, %c0_13, %c0_14, %c0_15] : memref<3x9x1x256xf32, #tpu.memory_space<vmem>>, vector<1x1x1x256xf32>
    %16 = vector.shape_cast %15 : vector<1x1x1x256xf32> to vector<1x256xf32>
    %17 = vector.broadcast %16 : vector<1x256xf32> to vector<16x256xf32>
    %18 = arith.addf %14, %17 : vector<16x256xf32>
    %cst_16 = arith.constant 0.000000e+00 : f32
    %19 = vector.broadcast %cst_16 : f32 to vector<16x256xf32>
    %20 = arith.maximumf %18, %19 : vector<16x256xf32>
    %21 = arith.truncf %20 : vector<16x256xf32> to vector<16x256xbf16>
    %c1 = arith.constant 1 : index
    %c0_17 = arith.constant 0 : index
    %c0_18 = arith.constant 0 : index
    %c0_19 = arith.constant 0 : index
    %22 = vector.load %arg4[%c1, %c0_17, %c0_18, %c0_19] : memref<3x9x256x256xbf16, #tpu.memory_space<vmem>>, vector<1x1x256x256xbf16>
    %23 = vector.shape_cast %22 : vector<1x1x256x256xbf16> to vector<256x256xbf16>
    %cst_20 = arith.constant dense<0.000000e+00> : vector<16x256xf32>
    %24 = tpu.matmul %21, %23, %cst_20 {dimension_numbers = #tpu.dot_dimension_numbers<[1], [0], [0], [1], [0, 0, 1, 1], [], []>} : vector<16x256xbf16>, vector<256x256xbf16>, vector<16x256xf32> -> vector<16x256xf32>
    %c1_21 = arith.constant 1 : index
    %c0_22 = arith.constant 0 : index
    %c0_23 = arith.constant 0 : index
    %c0_24 = arith.constant 0 : index
    %25 = vector.load %arg5[%c1_21, %c0_22, %c0_23, %c0_24] : memref<3x9x1x256xf32, #tpu.memory_space<vmem>>, vector<1x1x1x256xf32>
    %26 = vector.shape_cast %25 : vector<1x1x1x256xf32> to vector<1x256xf32>
    %27 = vector.broadcast %26 : vector<1x256xf32> to vector<16x256xf32>
    %28 = arith.addf %24, %27 : vector<16x256xf32>
    %cst_25 = arith.constant 0.000000e+00 : f32
    %29 = vector.broadcast %cst_25 : f32 to vector<16x256xf32>
    %30 = arith.maximumf %28, %29 : vector<16x256xf32>
    %31 = arith.truncf %30 : vector<16x256xf32> to vector<16x256xbf16>
    %c2 = arith.constant 2 : index
    %c0_26 = arith.constant 0 : index
    %c0_27 = arith.constant 0 : index
    %c0_28 = arith.constant 0 : index
    %32 = vector.load %arg4[%c2, %c0_26, %c0_27, %c0_28] : memref<3x9x256x256xbf16, #tpu.memory_space<vmem>>, vector<1x1x256x256xbf16>
    %33 = vector.shape_cast %32 : vector<1x1x256x256xbf16> to vector<256x256xbf16>
    %cst_29 = arith.constant dense<0.000000e+00> : vector<16x256xf32>
    %34 = tpu.matmul %31, %33, %cst_29 {dimension_numbers = #tpu.dot_dimension_numbers<[1], [0], [0], [1], [0, 0, 1, 1], [], []>} : vector<16x256xbf16>, vector<256x256xbf16>, vector<16x256xf32> -> vector<16x256xf32>
    %c2_30 = arith.constant 2 : index
    %c0_31 = arith.constant 0 : index
    %c0_32 = arith.constant 0 : index
    %c0_33 = arith.constant 0 : index
    %35 = vector.load %arg5[%c2_30, %c0_31, %c0_32, %c0_33] : memref<3x9x1x256xf32, #tpu.memory_space<vmem>>, vector<1x1x1x256xf32>
    %36 = vector.shape_cast %35 : vector<1x1x1x256xf32> to vector<1x256xf32>
    %37 = vector.broadcast %36 : vector<1x256xf32> to vector<16x256xf32>
    %38 = arith.addf %34, %37 : vector<16x256xf32>
    %cst_34 = arith.constant 0.000000e+00 : f32
    %39 = vector.broadcast %cst_34 : f32 to vector<16x256xf32>
    %40 = arith.maximumf %38, %39 : vector<16x256xf32>
    %41 = arith.truncf %40 : vector<16x256xf32> to vector<16x256xbf16>
    %c0_35 = arith.constant 0 : index
    %c0_36 = arith.constant 0 : index
    %c0_37 = arith.constant 0 : index
    %42 = vector.load %arg6[%c0_35, %c0_36, %c0_37] : memref<9x256x128xbf16, #tpu.memory_space<vmem>>, vector<1x256x128xbf16>
    %43 = vector.shape_cast %42 : vector<1x256x128xbf16> to vector<256x128xbf16>
    %cst_38 = arith.constant dense<0.000000e+00> : vector<16x128xf32>
    %44 = tpu.matmul %41, %43, %cst_38 {dimension_numbers = #tpu.dot_dimension_numbers<[1], [0], [0], [1], [0, 0, 1, 1], [], []>} : vector<16x256xbf16>, vector<256x128xbf16>, vector<16x128xf32> -> vector<16x128xf32>
    %c0_39 = arith.constant 0 : index
    %c0_40 = arith.constant 0 : index
    %c0_41 = arith.constant 0 : index
    %45 = vector.load %arg7[%c0_39, %c0_40, %c0_41] : memref<9x1x128xf32, #tpu.memory_space<vmem>>, vector<1x1x128xf32>
    %46 = vector.shape_cast %45 : vector<1x1x128xf32> to vector<1x128xf32>
    %47 = vector.broadcast %46 : vector<1x128xf32> to vector<16x128xf32>
    %48 = arith.addf %44, %47 : vector<16x128xf32>
    %c0_i32 = arith.constant 0 : i32
    %49 = vector.broadcast %c0_i32 : i32 to vector<16x128xi32>
    %50 = arith.cmpi sge, %1, %49 : vector<16x128xi32>
    %c3_i32 = arith.constant 3 : i32
    %51 = vector.broadcast %c3_i32 : i32 to vector<16x128xi32>
    %52 = arith.cmpi slt, %1, %51 : vector<16x128xi32>
    %53 = arith.andi %50, %52 : vector<16x128xi1>
    %cst_42 = arith.constant 0xFF800000 : f32
    %54 = vector.broadcast %cst_42 : f32 to vector<16x128xf32>
    %55 = arith.select %53, %48, %54 : vector<16x128xi1>, vector<16x128xf32>
    %cst_43 = arith.constant dense<0xFF800000> : vector<16xf32>
    %56 = vector.multi_reduction <maximumf>, %55, %cst_43 [1] : vector<16x128xf32> to vector<16xf32>
    %57 = vector.shape_cast %56 : vector<16xf32> to vector<16x1xf32>
    %58 = vector.broadcast %57 : vector<16x1xf32> to vector<16x128xf32>
    %59 = arith.subf %55, %58 : vector<16x128xf32>
    %60 = math.exp %59 : vector<16x128xf32>
    %cst_44 = arith.constant dense<0.000000e+00> : vector<16xf32>
    %61 = vector.multi_reduction <add>, %60, %cst_44 [1] : vector<16x128xf32> to vector<16xf32>
    %62 = vector.shape_cast %61 : vector<16xf32> to vector<16x1xf32>
    %63 = math.log %62 : vector<16x1xf32>
    %64 = arith.addf %57, %63 : vector<16x1xf32>
    %65 = vector.broadcast %64 : vector<16x1xf32> to vector<16x128xf32>
    %66 = arith.subf %48, %65 : vector<16x128xf32>
    %67 = arith.select %53, %66, %9 : vector<16x128xi1>, vector<16x128xf32>
    %68 = vector.extract_strided_slice %8 {offsets = [0, 256], sizes = [16, 256], strides = [1, 1]} : vector<16x2304xf32> to vector<16x256xf32>
    %69 = arith.truncf %68 : vector<16x256xf32> to vector<16x256xbf16>
    %c0_45 = arith.constant 0 : index
    %c1_46 = arith.constant 1 : index
    %c0_47 = arith.constant 0 : index
    %c0_48 = arith.constant 0 : index
    %70 = vector.load %arg4[%c0_45, %c1_46, %c0_47, %c0_48] : memref<3x9x256x256xbf16, #tpu.memory_space<vmem>>, vector<1x1x256x256xbf16>
    %71 = vector.shape_cast %70 : vector<1x1x256x256xbf16> to vector<256x256xbf16>
    %cst_49 = arith.constant dense<0.000000e+00> : vector<16x256xf32>
    %72 = tpu.matmul %69, %71, %cst_49 {dimension_numbers = #tpu.dot_dimension_numbers<[1], [0], [0], [1], [0, 0, 1, 1], [], []>} : vector<16x256xbf16>, vector<256x256xbf16>, vector<16x256xf32> -> vector<16x256xf32>
    %c0_50 = arith.constant 0 : index
    %c1_51 = arith.constant 1 : index
    %c0_52 = arith.constant 0 : index
    %c0_53 = arith.constant 0 : index
    %73 = vector.load %arg5[%c0_50, %c1_51, %c0_52, %c0_53] : memref<3x9x1x256xf32, #tpu.memory_space<vmem>>, vector<1x1x1x256xf32>
    %74 = vector.shape_cast %73 : vector<1x1x1x256xf32> to vector<1x256xf32>
    %75 = vector.broadcast %74 : vector<1x256xf32> to vector<16x256xf32>
    %76 = arith.addf %72, %75 : vector<16x256xf32>
    %cst_54 = arith.constant 0.000000e+00 : f32
    %77 = vector.broadcast %cst_54 : f32 to vector<16x256xf32>
    %78 = arith.maximumf %76, %77 : vector<16x256xf32>
    %79 = arith.truncf %78 : vector<16x256xf32> to vector<16x256xbf16>
    %c1_55 = arith.constant 1 : index
    %c1_56 = arith.constant 1 : index
    %c0_57 = arith.constant 0 : index
    %c0_58 = arith.constant 0 : index
    %80 = vector.load %arg4[%c1_55, %c1_56, %c0_57, %c0_58] : memref<3x9x256x256xbf16, #tpu.memory_space<vmem>>, vector<1x1x256x256xbf16>
    %81 = vector.shape_cast %80 : vector<1x1x256x256xbf16> to vector<256x256xbf16>
    %cst_59 = arith.constant dense<0.000000e+00> : vector<16x256xf32>
    %82 = tpu.matmul %79, %81, %cst_59 {dimension_numbers = #tpu.dot_dimension_numbers<[1], [0], [0], [1], [0, 0, 1, 1], [], []>} : vector<16x256xbf16>, vector<256x256xbf16>, vector<16x256xf32> -> vector<16x256xf32>
    %c1_60 = arith.constant 1 : index
    %c1_61 = arith.constant 1 : index
    %c0_62 = arith.constant 0 : index
    %c0_63 = arith.constant 0 : index
    %83 = vector.load %arg5[%c1_60, %c1_61, %c0_62, %c0_63] : memref<3x9x1x256xf32, #tpu.memory_space<vmem>>, vector<1x1x1x256xf32>
    %84 = vector.shape_cast %83 : vector<1x1x1x256xf32> to vector<1x256xf32>
    %85 = vector.broadcast %84 : vector<1x256xf32> to vector<16x256xf32>
    %86 = arith.addf %82, %85 : vector<16x256xf32>
    %cst_64 = arith.constant 0.000000e+00 : f32
    %87 = vector.broadcast %cst_64 : f32 to vector<16x256xf32>
    %88 = arith.maximumf %86, %87 : vector<16x256xf32>
    %89 = arith.truncf %88 : vector<16x256xf32> to vector<16x256xbf16>
    %c2_65 = arith.constant 2 : index
    %c1_66 = arith.constant 1 : index
    %c0_67 = arith.constant 0 : index
    %c0_68 = arith.constant 0 : index
    %90 = vector.load %arg4[%c2_65, %c1_66, %c0_67, %c0_68] : memref<3x9x256x256xbf16, #tpu.memory_space<vmem>>, vector<1x1x256x256xbf16>
    %91 = vector.shape_cast %90 : vector<1x1x256x256xbf16> to vector<256x256xbf16>
    %cst_69 = arith.constant dense<0.000000e+00> : vector<16x256xf32>
    %92 = tpu.matmul %89, %91, %cst_69 {dimension_numbers = #tpu.dot_dimension_numbers<[1], [0], [0], [1], [0, 0, 1, 1], [], []>} : vector<16x256xbf16>, vector<256x256xbf16>, vector<16x256xf32> -> vector<16x256xf32>
    %c2_70 = arith.constant 2 : index
    %c1_71 = arith.constant 1 : index
    %c0_72 = arith.constant 0 : index
    %c0_73 = arith.constant 0 : index
    %93 = vector.load %arg5[%c2_70, %c1_71, %c0_72, %c0_73] : memref<3x9x1x256xf32, #tpu.memory_space<vmem>>, vector<1x1x1x256xf32>
    %94 = vector.shape_cast %93 : vector<1x1x1x256xf32> to vector<1x256xf32>
    %95 = vector.broadcast %94 : vector<1x256xf32> to vector<16x256xf32>
    %96 = arith.addf %92, %95 : vector<16x256xf32>
    %cst_74 = arith.constant 0.000000e+00 : f32
    %97 = vector.broadcast %cst_74 : f32 to vector<16x256xf32>
    %98 = arith.maximumf %96, %97 : vector<16x256xf32>
    %99 = arith.truncf %98 : vector<16x256xf32> to vector<16x256xbf16>
    %c1_75 = arith.constant 1 : index
    %c0_76 = arith.constant 0 : index
    %c0_77 = arith.constant 0 : index
    %100 = vector.load %arg6[%c1_75, %c0_76, %c0_77] : memref<9x256x128xbf16, #tpu.memory_space<vmem>>, vector<1x256x128xbf16>
    %101 = vector.shape_cast %100 : vector<1x256x128xbf16> to vector<256x128xbf16>
    %cst_78 = arith.constant dense<0.000000e+00> : vector<16x128xf32>
    %102 = tpu.matmul %99, %101, %cst_78 {dimension_numbers = #tpu.dot_dimension_numbers<[1], [0], [0], [1], [0, 0, 1, 1], [], []>} : vector<16x256xbf16>, vector<256x128xbf16>, vector<16x128xf32> -> vector<16x128xf32>
    %c1_79 = arith.constant 1 : index
    %c0_80 = arith.constant 0 : index
    %c0_81 = arith.constant 0 : index
    %103 = vector.load %arg7[%c1_79, %c0_80, %c0_81] : memref<9x1x128xf32, #tpu.memory_space<vmem>>, vector<1x1x128xf32>
    %104 = vector.shape_cast %103 : vector<1x1x128xf32> to vector<1x128xf32>
    %105 = vector.broadcast %104 : vector<1x128xf32> to vector<16x128xf32>
    %106 = arith.addf %102, %105 : vector<16x128xf32>
    %c3_i32_82 = arith.constant 3 : i32
    %107 = vector.broadcast %c3_i32_82 : i32 to vector<16x128xi32>
    %108 = arith.cmpi sge, %1, %107 : vector<16x128xi32>
    %c6_i32 = arith.constant 6 : i32
    %109 = vector.broadcast %c6_i32 : i32 to vector<16x128xi32>
    %110 = arith.cmpi slt, %1, %109 : vector<16x128xi32>
    %111 = arith.andi %108, %110 : vector<16x128xi1>
    %cst_83 = arith.constant 0xFF800000 : f32
    %112 = vector.broadcast %cst_83 : f32 to vector<16x128xf32>
    %113 = arith.select %111, %106, %112 : vector<16x128xi1>, vector<16x128xf32>
    %cst_84 = arith.constant dense<0xFF800000> : vector<16xf32>
    %114 = vector.multi_reduction <maximumf>, %113, %cst_84 [1] : vector<16x128xf32> to vector<16xf32>
    %115 = vector.shape_cast %114 : vector<16xf32> to vector<16x1xf32>
    %116 = vector.broadcast %115 : vector<16x1xf32> to vector<16x128xf32>
    %117 = arith.subf %113, %116 : vector<16x128xf32>
    %118 = math.exp %117 : vector<16x128xf32>
    %cst_85 = arith.constant dense<0.000000e+00> : vector<16xf32>
    %119 = vector.multi_reduction <add>, %118, %cst_85 [1] : vector<16x128xf32> to vector<16xf32>
    %120 = vector.shape_cast %119 : vector<16xf32> to vector<16x1xf32>
    %121 = math.log %120 : vector<16x1xf32>
    %122 = arith.addf %115, %121 : vector<16x1xf32>
    %123 = vector.broadcast %122 : vector<16x1xf32> to vector<16x128xf32>
    %124 = arith.subf %106, %123 : vector<16x128xf32>
    %125 = arith.select %111, %124, %67 : vector<16x128xi1>, vector<16x128xf32>
    %126 = vector.extract_strided_slice %8 {offsets = [0, 512], sizes = [16, 256], strides = [1, 1]} : vector<16x2304xf32> to vector<16x256xf32>
    %127 = arith.truncf %126 : vector<16x256xf32> to vector<16x256xbf16>
    %c0_86 = arith.constant 0 : index
    %c2_87 = arith.constant 2 : index
    %c0_88 = arith.constant 0 : index
    %c0_89 = arith.constant 0 : index
    %128 = vector.load %arg4[%c0_86, %c2_87, %c0_88, %c0_89] : memref<3x9x256x256xbf16, #tpu.memory_space<vmem>>, vector<1x1x256x256xbf16>
    %129 = vector.shape_cast %128 : vector<1x1x256x256xbf16> to vector<256x256xbf16>
    %cst_90 = arith.constant dense<0.000000e+00> : vector<16x256xf32>
    %130 = tpu.matmul %127, %129, %cst_90 {dimension_numbers = #tpu.dot_dimension_numbers<[1], [0], [0], [1], [0, 0, 1, 1], [], []>} : vector<16x256xbf16>, vector<256x256xbf16>, vector<16x256xf32> -> vector<16x256xf32>
    %c0_91 = arith.constant 0 : index
    %c2_92 = arith.constant 2 : index
    %c0_93 = arith.constant 0 : index
    %c0_94 = arith.constant 0 : index
    %131 = vector.load %arg5[%c0_91, %c2_92, %c0_93, %c0_94] : memref<3x9x1x256xf32, #tpu.memory_space<vmem>>, vector<1x1x1x256xf32>
    %132 = vector.shape_cast %131 : vector<1x1x1x256xf32> to vector<1x256xf32>
    %133 = vector.broadcast %132 : vector<1x256xf32> to vector<16x256xf32>
    %134 = arith.addf %130, %133 : vector<16x256xf32>
    %cst_95 = arith.constant 0.000000e+00 : f32
    %135 = vector.broadcast %cst_95 : f32 to vector<16x256xf32>
    %136 = arith.maximumf %134, %135 : vector<16x256xf32>
    %137 = arith.truncf %136 : vector<16x256xf32> to vector<16x256xbf16>
    %c1_96 = arith.constant 1 : index
    %c2_97 = arith.constant 2 : index
    %c0_98 = arith.constant 0 : index
    %c0_99 = arith.constant 0 : index
    %138 = vector.load %arg4[%c1_96, %c2_97, %c0_98, %c0_99] : memref<3x9x256x256xbf16, #tpu.memory_space<vmem>>, vector<1x1x256x256xbf16>
    %139 = vector.shape_cast %138 : vector<1x1x256x256xbf16> to vector<256x256xbf16>
    %cst_100 = arith.constant dense<0.000000e+00> : vector<16x256xf32>
    %140 = tpu.matmul %137, %139, %cst_100 {dimension_numbers = #tpu.dot_dimension_numbers<[1], [0], [0], [1], [0, 0, 1, 1], [], []>} : vector<16x256xbf16>, vector<256x256xbf16>, vector<16x256xf32> -> vector<16x256xf32>
    %c1_101 = arith.constant 1 : index
    %c2_102 = arith.constant 2 : index
    %c0_103 = arith.constant 0 : index
    %c0_104 = arith.constant 0 : index
    %141 = vector.load %arg5[%c1_101, %c2_102, %c0_103, %c0_104] : memref<3x9x1x256xf32, #tpu.memory_space<vmem>>, vector<1x1x1x256xf32>
    %142 = vector.shape_cast %141 : vector<1x1x1x256xf32> to vector<1x256xf32>
    %143 = vector.broadcast %142 : vector<1x256xf32> to vector<16x256xf32>
    %144 = arith.addf %140, %143 : vector<16x256xf32>
    %cst_105 = arith.constant 0.000000e+00 : f32
    %145 = vector.broadcast %cst_105 : f32 to vector<16x256xf32>
    %146 = arith.maximumf %144, %145 : vector<16x256xf32>
    %147 = arith.truncf %146 : vector<16x256xf32> to vector<16x256xbf16>
    %c2_106 = arith.constant 2 : index
    %c2_107 = arith.constant 2 : index
    %c0_108 = arith.constant 0 : index
    %c0_109 = arith.constant 0 : index
    %148 = vector.load %arg4[%c2_106, %c2_107, %c0_108, %c0_109] : memref<3x9x256x256xbf16, #tpu.memory_space<vmem>>, vector<1x1x256x256xbf16>
    %149 = vector.shape_cast %148 : vector<1x1x256x256xbf16> to vector<256x256xbf16>
    %cst_110 = arith.constant dense<0.000000e+00> : vector<16x256xf32>
    %150 = tpu.matmul %147, %149, %cst_110 {dimension_numbers = #tpu.dot_dimension_numbers<[1], [0], [0], [1], [0, 0, 1, 1], [], []>} : vector<16x256xbf16>, vector<256x256xbf16>, vector<16x256xf32> -> vector<16x256xf32>
    %c2_111 = arith.constant 2 : index
    %c2_112 = arith.constant 2 : index
    %c0_113 = arith.constant 0 : index
    %c0_114 = arith.constant 0 : index
    %151 = vector.load %arg5[%c2_111, %c2_112, %c0_113, %c0_114] : memref<3x9x1x256xf32, #tpu.memory_space<vmem>>, vector<1x1x1x256xf32>
    %152 = vector.shape_cast %151 : vector<1x1x1x256xf32> to vector<1x256xf32>
    %153 = vector.broadcast %152 : vector<1x256xf32> to vector<16x256xf32>
    %154 = arith.addf %150, %153 : vector<16x256xf32>
    %cst_115 = arith.constant 0.000000e+00 : f32
    %155 = vector.broadcast %cst_115 : f32 to vector<16x256xf32>
    %156 = arith.maximumf %154, %155 : vector<16x256xf32>
    %157 = arith.truncf %156 : vector<16x256xf32> to vector<16x256xbf16>
    %c2_116 = arith.constant 2 : index
    %c0_117 = arith.constant 0 : index
    %c0_118 = arith.constant 0 : index
    %158 = vector.load %arg6[%c2_116, %c0_117, %c0_118] : memref<9x256x128xbf16, #tpu.memory_space<vmem>>, vector<1x256x128xbf16>
    %159 = vector.shape_cast %158 : vector<1x256x128xbf16> to vector<256x128xbf16>
    %cst_119 = arith.constant dense<0.000000e+00> : vector<16x128xf32>
    %160 = tpu.matmul %157, %159, %cst_119 {dimension_numbers = #tpu.dot_dimension_numbers<[1], [0], [0], [1], [0, 0, 1, 1], [], []>} : vector<16x256xbf16>, vector<256x128xbf16>, vector<16x128xf32> -> vector<16x128xf32>
    %c2_120 = arith.constant 2 : index
    %c0_121 = arith.constant 0 : index
    %c0_122 = arith.constant 0 : index
    %161 = vector.load %arg7[%c2_120, %c0_121, %c0_122] : memref<9x1x128xf32, #tpu.memory_space<vmem>>, vector<1x1x128xf32>
    %162 = vector.shape_cast %161 : vector<1x1x128xf32> to vector<1x128xf32>
    %163 = vector.broadcast %162 : vector<1x128xf32> to vector<16x128xf32>
    %164 = arith.addf %160, %163 : vector<16x128xf32>
    %c6_i32_123 = arith.constant 6 : i32
    %165 = vector.broadcast %c6_i32_123 : i32 to vector<16x128xi32>
    %166 = arith.cmpi sge, %1, %165 : vector<16x128xi32>
    %c9_i32 = arith.constant 9 : i32
    %167 = vector.broadcast %c9_i32 : i32 to vector<16x128xi32>
    %168 = arith.cmpi slt, %1, %167 : vector<16x128xi32>
    %169 = arith.andi %166, %168 : vector<16x128xi1>
    %cst_124 = arith.constant 0xFF800000 : f32
    %170 = vector.broadcast %cst_124 : f32 to vector<16x128xf32>
    %171 = arith.select %169, %164, %170 : vector<16x128xi1>, vector<16x128xf32>
    %cst_125 = arith.constant dense<0xFF800000> : vector<16xf32>
    %172 = vector.multi_reduction <maximumf>, %171, %cst_125 [1] : vector<16x128xf32> to vector<16xf32>
    %173 = vector.shape_cast %172 : vector<16xf32> to vector<16x1xf32>
    %174 = vector.broadcast %173 : vector<16x1xf32> to vector<16x128xf32>
    %175 = arith.subf %171, %174 : vector<16x128xf32>
    %176 = math.exp %175 : vector<16x128xf32>
    %cst_126 = arith.constant dense<0.000000e+00> : vector<16xf32>
    %177 = vector.multi_reduction <add>, %176, %cst_126 [1] : vector<16x128xf32> to vector<16xf32>
    %178 = vector.shape_cast %177 : vector<16xf32> to vector<16x1xf32>
    %179 = math.log %178 : vector<16x1xf32>
    %180 = arith.addf %173, %179 : vector<16x1xf32>
    %181 = vector.broadcast %180 : vector<16x1xf32> to vector<16x128xf32>
    %182 = arith.subf %164, %181 : vector<16x128xf32>
    %183 = arith.select %169, %182, %125 : vector<16x128xi1>, vector<16x128xf32>
    %184 = vector.extract_strided_slice %8 {offsets = [0, 768], sizes = [16, 256], strides = [1, 1]} : vector<16x2304xf32> to vector<16x256xf32>
    %185 = arith.truncf %184 : vector<16x256xf32> to vector<16x256xbf16>
    %c0_127 = arith.constant 0 : index
    %c3 = arith.constant 3 : index
    %c0_128 = arith.constant 0 : index
    %c0_129 = arith.constant 0 : index
    %186 = vector.load %arg4[%c0_127, %c3, %c0_128, %c0_129] : memref<3x9x256x256xbf16, #tpu.memory_space<vmem>>, vector<1x1x256x256xbf16>
    %187 = vector.shape_cast %186 : vector<1x1x256x256xbf16> to vector<256x256xbf16>
    %cst_130 = arith.constant dense<0.000000e+00> : vector<16x256xf32>
    %188 = tpu.matmul %185, %187, %cst_130 {dimension_numbers = #tpu.dot_dimension_numbers<[1], [0], [0], [1], [0, 0, 1, 1], [], []>} : vector<16x256xbf16>, vector<256x256xbf16>, vector<16x256xf32> -> vector<16x256xf32>
    %c0_131 = arith.constant 0 : index
    %c3_132 = arith.constant 3 : index
    %c0_133 = arith.constant 0 : index
    %c0_134 = arith.constant 0 : index
    %189 = vector.load %arg5[%c0_131, %c3_132, %c0_133, %c0_134] : memref<3x9x1x256xf32, #tpu.memory_space<vmem>>, vector<1x1x1x256xf32>
    %190 = vector.shape_cast %189 : vector<1x1x1x256xf32> to vector<1x256xf32>
    %191 = vector.broadcast %190 : vector<1x256xf32> to vector<16x256xf32>
    %192 = arith.addf %188, %191 : vector<16x256xf32>
    %cst_135 = arith.constant 0.000000e+00 : f32
    %193 = vector.broadcast %cst_135 : f32 to vector<16x256xf32>
    %194 = arith.maximumf %192, %193 : vector<16x256xf32>
    %195 = arith.truncf %194 : vector<16x256xf32> to vector<16x256xbf16>
    %c1_136 = arith.constant 1 : index
    %c3_137 = arith.constant 3 : index
    %c0_138 = arith.constant 0 : index
    %c0_139 = arith.constant 0 : index
    %196 = vector.load %arg4[%c1_136, %c3_137, %c0_138, %c0_139] : memref<3x9x256x256xbf16, #tpu.memory_space<vmem>>, vector<1x1x256x256xbf16>
    %197 = vector.shape_cast %196 : vector<1x1x256x256xbf16> to vector<256x256xbf16>
    %cst_140 = arith.constant dense<0.000000e+00> : vector<16x256xf32>
    %198 = tpu.matmul %195, %197, %cst_140 {dimension_numbers = #tpu.dot_dimension_numbers<[1], [0], [0], [1], [0, 0, 1, 1], [], []>} : vector<16x256xbf16>, vector<256x256xbf16>, vector<16x256xf32> -> vector<16x256xf32>
    %c1_141 = arith.constant 1 : index
    %c3_142 = arith.constant 3 : index
    %c0_143 = arith.constant 0 : index
    %c0_144 = arith.constant 0 : index
    %199 = vector.load %arg5[%c1_141, %c3_142, %c0_143, %c0_144] : memref<3x9x1x256xf32, #tpu.memory_space<vmem>>, vector<1x1x1x256xf32>
    %200 = vector.shape_cast %199 : vector<1x1x1x256xf32> to vector<1x256xf32>
    %201 = vector.broadcast %200 : vector<1x256xf32> to vector<16x256xf32>
    %202 = arith.addf %198, %201 : vector<16x256xf32>
    %cst_145 = arith.constant 0.000000e+00 : f32
    %203 = vector.broadcast %cst_145 : f32 to vector<16x256xf32>
    %204 = arith.maximumf %202, %203 : vector<16x256xf32>
    %205 = arith.truncf %204 : vector<16x256xf32> to vector<16x256xbf16>
    %c2_146 = arith.constant 2 : index
    %c3_147 = arith.constant 3 : index
    %c0_148 = arith.constant 0 : index
    %c0_149 = arith.constant 0 : index
    %206 = vector.load %arg4[%c2_146, %c3_147, %c0_148, %c0_149] : memref<3x9x256x256xbf16, #tpu.memory_space<vmem>>, vector<1x1x256x256xbf16>
    %207 = vector.shape_cast %206 : vector<1x1x256x256xbf16> to vector<256x256xbf16>
    %cst_150 = arith.constant dense<0.000000e+00> : vector<16x256xf32>
    %208 = tpu.matmul %205, %207, %cst_150 {dimension_numbers = #tpu.dot_dimension_numbers<[1], [0], [0], [1], [0, 0, 1, 1], [], []>} : vector<16x256xbf16>, vector<256x256xbf16>, vector<16x256xf32> -> vector<16x256xf32>
    %c2_151 = arith.constant 2 : index
    %c3_152 = arith.constant 3 : index
    %c0_153 = arith.constant 0 : index
    %c0_154 = arith.constant 0 : index
    %209 = vector.load %arg5[%c2_151, %c3_152, %c0_153, %c0_154] : memref<3x9x1x256xf32, #tpu.memory_space<vmem>>, vector<1x1x1x256xf32>
    %210 = vector.shape_cast %209 : vector<1x1x1x256xf32> to vector<1x256xf32>
    %211 = vector.broadcast %210 : vector<1x256xf32> to vector<16x256xf32>
    %212 = arith.addf %208, %211 : vector<16x256xf32>
    %cst_155 = arith.constant 0.000000e+00 : f32
    %213 = vector.broadcast %cst_155 : f32 to vector<16x256xf32>
    %214 = arith.maximumf %212, %213 : vector<16x256xf32>
    %215 = arith.truncf %214 : vector<16x256xf32> to vector<16x256xbf16>
    %c3_156 = arith.constant 3 : index
    %c0_157 = arith.constant 0 : index
    %c0_158 = arith.constant 0 : index
    %216 = vector.load %arg6[%c3_156, %c0_157, %c0_158] : memref<9x256x128xbf16, #tpu.memory_space<vmem>>, vector<1x256x128xbf16>
    %217 = vector.shape_cast %216 : vector<1x256x128xbf16> to vector<256x128xbf16>
    %cst_159 = arith.constant dense<0.000000e+00> : vector<16x128xf32>
    %218 = tpu.matmul %215, %217, %cst_159 {dimension_numbers = #tpu.dot_dimension_numbers<[1], [0], [0], [1], [0, 0, 1, 1], [], []>} : vector<16x256xbf16>, vector<256x128xbf16>, vector<16x128xf32> -> vector<16x128xf32>
    %c3_160 = arith.constant 3 : index
    %c0_161 = arith.constant 0 : index
    %c0_162 = arith.constant 0 : index
    %219 = vector.load %arg7[%c3_160, %c0_161, %c0_162] : memref<9x1x128xf32, #tpu.memory_space<vmem>>, vector<1x1x128xf32>
    %220 = vector.shape_cast %219 : vector<1x1x128xf32> to vector<1x128xf32>
    %221 = vector.broadcast %220 : vector<1x128xf32> to vector<16x128xf32>
    %222 = arith.addf %218, %221 : vector<16x128xf32>
    %c9_i32_163 = arith.constant 9 : i32
    %223 = vector.broadcast %c9_i32_163 : i32 to vector<16x128xi32>
    %224 = arith.cmpi sge, %1, %223 : vector<16x128xi32>
    %c12_i32 = arith.constant 12 : i32
    %225 = vector.broadcast %c12_i32 : i32 to vector<16x128xi32>
    %226 = arith.cmpi slt, %1, %225 : vector<16x128xi32>
    %227 = arith.andi %224, %226 : vector<16x128xi1>
    %cst_164 = arith.constant 0xFF800000 : f32
    %228 = vector.broadcast %cst_164 : f32 to vector<16x128xf32>
    %229 = arith.select %227, %222, %228 : vector<16x128xi1>, vector<16x128xf32>
    %cst_165 = arith.constant dense<0xFF800000> : vector<16xf32>
    %230 = vector.multi_reduction <maximumf>, %229, %cst_165 [1] : vector<16x128xf32> to vector<16xf32>
    %231 = vector.shape_cast %230 : vector<16xf32> to vector<16x1xf32>
    %232 = vector.broadcast %231 : vector<16x1xf32> to vector<16x128xf32>
    %233 = arith.subf %229, %232 : vector<16x128xf32>
    %234 = math.exp %233 : vector<16x128xf32>
    %cst_166 = arith.constant dense<0.000000e+00> : vector<16xf32>
    %235 = vector.multi_reduction <add>, %234, %cst_166 [1] : vector<16x128xf32> to vector<16xf32>
    %236 = vector.shape_cast %235 : vector<16xf32> to vector<16x1xf32>
    %237 = math.log %236 : vector<16x1xf32>
    %238 = arith.addf %231, %237 : vector<16x1xf32>
    %239 = vector.broadcast %238 : vector<16x1xf32> to vector<16x128xf32>
    %240 = arith.subf %222, %239 : vector<16x128xf32>
    %241 = arith.select %227, %240, %183 : vector<16x128xi1>, vector<16x128xf32>
    %242 = vector.extract_strided_slice %8 {offsets = [0, 1024], sizes = [16, 256], strides = [1, 1]} : vector<16x2304xf32> to vector<16x256xf32>
    %243 = arith.truncf %242 : vector<16x256xf32> to vector<16x256xbf16>
    %c0_167 = arith.constant 0 : index
    %c4 = arith.constant 4 : index
    %c0_168 = arith.constant 0 : index
    %c0_169 = arith.constant 0 : index
    %244 = vector.load %arg4[%c0_167, %c4, %c0_168, %c0_169] : memref<3x9x256x256xbf16, #tpu.memory_space<vmem>>, vector<1x1x256x256xbf16>
    %245 = vector.shape_cast %244 : vector<1x1x256x256xbf16> to vector<256x256xbf16>
    %cst_170 = arith.constant dense<0.000000e+00> : vector<16x256xf32>
    %246 = tpu.matmul %243, %245, %cst_170 {dimension_numbers = #tpu.dot_dimension_numbers<[1], [0], [0], [1], [0, 0, 1, 1], [], []>} : vector<16x256xbf16>, vector<256x256xbf16>, vector<16x256xf32> -> vector<16x256xf32>
    %c0_171 = arith.constant 0 : index
    %c4_172 = arith.constant 4 : index
    %c0_173 = arith.constant 0 : index
    %c0_174 = arith.constant 0 : index
    %247 = vector.load %arg5[%c0_171, %c4_172, %c0_173, %c0_174] : memref<3x9x1x256xf32, #tpu.memory_space<vmem>>, vector<1x1x1x256xf32>
    %248 = vector.shape_cast %247 : vector<1x1x1x256xf32> to vector<1x256xf32>
    %249 = vector.broadcast %248 : vector<1x256xf32> to vector<16x256xf32>
    %250 = arith.addf %246, %249 : vector<16x256xf32>
    %cst_175 = arith.constant 0.000000e+00 : f32
    %251 = vector.broadcast %cst_175 : f32 to vector<16x256xf32>
    %252 = arith.maximumf %250, %251 : vector<16x256xf32>
    %253 = arith.truncf %252 : vector<16x256xf32> to vector<16x256xbf16>
    %c1_176 = arith.constant 1 : index
    %c4_177 = arith.constant 4 : index
    %c0_178 = arith.constant 0 : index
    %c0_179 = arith.constant 0 : index
    %254 = vector.load %arg4[%c1_176, %c4_177, %c0_178, %c0_179] : memref<3x9x256x256xbf16, #tpu.memory_space<vmem>>, vector<1x1x256x256xbf16>
    %255 = vector.shape_cast %254 : vector<1x1x256x256xbf16> to vector<256x256xbf16>
    %cst_180 = arith.constant dense<0.000000e+00> : vector<16x256xf32>
    %256 = tpu.matmul %253, %255, %cst_180 {dimension_numbers = #tpu.dot_dimension_numbers<[1], [0], [0], [1], [0, 0, 1, 1], [], []>} : vector<16x256xbf16>, vector<256x256xbf16>, vector<16x256xf32> -> vector<16x256xf32>
    %c1_181 = arith.constant 1 : index
    %c4_182 = arith.constant 4 : index
    %c0_183 = arith.constant 0 : index
    %c0_184 = arith.constant 0 : index
    %257 = vector.load %arg5[%c1_181, %c4_182, %c0_183, %c0_184] : memref<3x9x1x256xf32, #tpu.memory_space<vmem>>, vector<1x1x1x256xf32>
    %258 = vector.shape_cast %257 : vector<1x1x1x256xf32> to vector<1x256xf32>
    %259 = vector.broadcast %258 : vector<1x256xf32> to vector<16x256xf32>
    %260 = arith.addf %256, %259 : vector<16x256xf32>
    %cst_185 = arith.constant 0.000000e+00 : f32
    %261 = vector.broadcast %cst_185 : f32 to vector<16x256xf32>
    %262 = arith.maximumf %260, %261 : vector<16x256xf32>
    %263 = arith.truncf %262 : vector<16x256xf32> to vector<16x256xbf16>
    %c2_186 = arith.constant 2 : index
    %c4_187 = arith.constant 4 : index
    %c0_188 = arith.constant 0 : index
    %c0_189 = arith.constant 0 : index
    %264 = vector.load %arg4[%c2_186, %c4_187, %c0_188, %c0_189] : memref<3x9x256x256xbf16, #tpu.memory_space<vmem>>, vector<1x1x256x256xbf16>
    %265 = vector.shape_cast %264 : vector<1x1x256x256xbf16> to vector<256x256xbf16>
    %cst_190 = arith.constant dense<0.000000e+00> : vector<16x256xf32>
    %266 = tpu.matmul %263, %265, %cst_190 {dimension_numbers = #tpu.dot_dimension_numbers<[1], [0], [0], [1], [0, 0, 1, 1], [], []>} : vector<16x256xbf16>, vector<256x256xbf16>, vector<16x256xf32> -> vector<16x256xf32>
    %c2_191 = arith.constant 2 : index
    %c4_192 = arith.constant 4 : index
    %c0_193 = arith.constant 0 : index
    %c0_194 = arith.constant 0 : index
    %267 = vector.load %arg5[%c2_191, %c4_192, %c0_193, %c0_194] : memref<3x9x1x256xf32, #tpu.memory_space<vmem>>, vector<1x1x1x256xf32>
    %268 = vector.shape_cast %267 : vector<1x1x1x256xf32> to vector<1x256xf32>
    %269 = vector.broadcast %268 : vector<1x256xf32> to vector<16x256xf32>
    %270 = arith.addf %266, %269 : vector<16x256xf32>
    %cst_195 = arith.constant 0.000000e+00 : f32
    %271 = vector.broadcast %cst_195 : f32 to vector<16x256xf32>
    %272 = arith.maximumf %270, %271 : vector<16x256xf32>
    %273 = arith.truncf %272 : vector<16x256xf32> to vector<16x256xbf16>
    %c4_196 = arith.constant 4 : index
    %c0_197 = arith.constant 0 : index
    %c0_198 = arith.constant 0 : index
    %274 = vector.load %arg6[%c4_196, %c0_197, %c0_198] : memref<9x256x128xbf16, #tpu.memory_space<vmem>>, vector<1x256x128xbf16>
    %275 = vector.shape_cast %274 : vector<1x256x128xbf16> to vector<256x128xbf16>
    %cst_199 = arith.constant dense<0.000000e+00> : vector<16x128xf32>
    %276 = tpu.matmul %273, %275, %cst_199 {dimension_numbers = #tpu.dot_dimension_numbers<[1], [0], [0], [1], [0, 0, 1, 1], [], []>} : vector<16x256xbf16>, vector<256x128xbf16>, vector<16x128xf32> -> vector<16x128xf32>
    %c4_200 = arith.constant 4 : index
    %c0_201 = arith.constant 0 : index
    %c0_202 = arith.constant 0 : index
    %277 = vector.load %arg7[%c4_200, %c0_201, %c0_202] : memref<9x1x128xf32, #tpu.memory_space<vmem>>, vector<1x1x128xf32>
    %278 = vector.shape_cast %277 : vector<1x1x128xf32> to vector<1x128xf32>
    %279 = vector.broadcast %278 : vector<1x128xf32> to vector<16x128xf32>
    %280 = arith.addf %276, %279 : vector<16x128xf32>
    %c12_i32_203 = arith.constant 12 : i32
    %281 = vector.broadcast %c12_i32_203 : i32 to vector<16x128xi32>
    %282 = arith.cmpi sge, %1, %281 : vector<16x128xi32>
    %c15_i32 = arith.constant 15 : i32
    %283 = vector.broadcast %c15_i32 : i32 to vector<16x128xi32>
    %284 = arith.cmpi slt, %1, %283 : vector<16x128xi32>
    %285 = arith.andi %282, %284 : vector<16x128xi1>
    %cst_204 = arith.constant 0xFF800000 : f32
    %286 = vector.broadcast %cst_204 : f32 to vector<16x128xf32>
    %287 = arith.select %285, %280, %286 : vector<16x128xi1>, vector<16x128xf32>
    %cst_205 = arith.constant dense<0xFF800000> : vector<16xf32>
    %288 = vector.multi_reduction <maximumf>, %287, %cst_205 [1] : vector<16x128xf32> to vector<16xf32>
    %289 = vector.shape_cast %288 : vector<16xf32> to vector<16x1xf32>
    %290 = vector.broadcast %289 : vector<16x1xf32> to vector<16x128xf32>
    %291 = arith.subf %287, %290 : vector<16x128xf32>
    %292 = math.exp %291 : vector<16x128xf32>
    %cst_206 = arith.constant dense<0.000000e+00> : vector<16xf32>
    %293 = vector.multi_reduction <add>, %292, %cst_206 [1] : vector<16x128xf32> to vector<16xf32>
    %294 = vector.shape_cast %293 : vector<16xf32> to vector<16x1xf32>
    %295 = math.log %294 : vector<16x1xf32>
    %296 = arith.addf %289, %295 : vector<16x1xf32>
    %297 = vector.broadcast %296 : vector<16x1xf32> to vector<16x128xf32>
    %298 = arith.subf %280, %297 : vector<16x128xf32>
    %299 = arith.select %285, %298, %241 : vector<16x128xi1>, vector<16x128xf32>
    %300 = vector.extract_strided_slice %8 {offsets = [0, 1280], sizes = [16, 256], strides = [1, 1]} : vector<16x2304xf32> to vector<16x256xf32>
    %301 = arith.truncf %300 : vector<16x256xf32> to vector<16x256xbf16>
    %c0_207 = arith.constant 0 : index
    %c5 = arith.constant 5 : index
    %c0_208 = arith.constant 0 : index
    %c0_209 = arith.constant 0 : index
    %302 = vector.load %arg4[%c0_207, %c5, %c0_208, %c0_209] : memref<3x9x256x256xbf16, #tpu.memory_space<vmem>>, vector<1x1x256x256xbf16>
    %303 = vector.shape_cast %302 : vector<1x1x256x256xbf16> to vector<256x256xbf16>
    %cst_210 = arith.constant dense<0.000000e+00> : vector<16x256xf32>
    %304 = tpu.matmul %301, %303, %cst_210 {dimension_numbers = #tpu.dot_dimension_numbers<[1], [0], [0], [1], [0, 0, 1, 1], [], []>} : vector<16x256xbf16>, vector<256x256xbf16>, vector<16x256xf32> -> vector<16x256xf32>
    %c0_211 = arith.constant 0 : index
    %c5_212 = arith.constant 5 : index
    %c0_213 = arith.constant 0 : index
    %c0_214 = arith.constant 0 : index
    %305 = vector.load %arg5[%c0_211, %c5_212, %c0_213, %c0_214] : memref<3x9x1x256xf32, #tpu.memory_space<vmem>>, vector<1x1x1x256xf32>
    %306 = vector.shape_cast %305 : vector<1x1x1x256xf32> to vector<1x256xf32>
    %307 = vector.broadcast %306 : vector<1x256xf32> to vector<16x256xf32>
    %308 = arith.addf %304, %307 : vector<16x256xf32>
    %cst_215 = arith.constant 0.000000e+00 : f32
    %309 = vector.broadcast %cst_215 : f32 to vector<16x256xf32>
    %310 = arith.maximumf %308, %309 : vector<16x256xf32>
    %311 = arith.truncf %310 : vector<16x256xf32> to vector<16x256xbf16>
    %c1_216 = arith.constant 1 : index
    %c5_217 = arith.constant 5 : index
    %c0_218 = arith.constant 0 : index
    %c0_219 = arith.constant 0 : index
    %312 = vector.load %arg4[%c1_216, %c5_217, %c0_218, %c0_219] : memref<3x9x256x256xbf16, #tpu.memory_space<vmem>>, vector<1x1x256x256xbf16>
    %313 = vector.shape_cast %312 : vector<1x1x256x256xbf16> to vector<256x256xbf16>
    %cst_220 = arith.constant dense<0.000000e+00> : vector<16x256xf32>
    %314 = tpu.matmul %311, %313, %cst_220 {dimension_numbers = #tpu.dot_dimension_numbers<[1], [0], [0], [1], [0, 0, 1, 1], [], []>} : vector<16x256xbf16>, vector<256x256xbf16>, vector<16x256xf32> -> vector<16x256xf32>
    %c1_221 = arith.constant 1 : index
    %c5_222 = arith.constant 5 : index
    %c0_223 = arith.constant 0 : index
    %c0_224 = arith.constant 0 : index
    %315 = vector.load %arg5[%c1_221, %c5_222, %c0_223, %c0_224] : memref<3x9x1x256xf32, #tpu.memory_space<vmem>>, vector<1x1x1x256xf32>
    %316 = vector.shape_cast %315 : vector<1x1x1x256xf32> to vector<1x256xf32>
    %317 = vector.broadcast %316 : vector<1x256xf32> to vector<16x256xf32>
    %318 = arith.addf %314, %317 : vector<16x256xf32>
    %cst_225 = arith.constant 0.000000e+00 : f32
    %319 = vector.broadcast %cst_225 : f32 to vector<16x256xf32>
    %320 = arith.maximumf %318, %319 : vector<16x256xf32>
    %321 = arith.truncf %320 : vector<16x256xf32> to vector<16x256xbf16>
    %c2_226 = arith.constant 2 : index
    %c5_227 = arith.constant 5 : index
    %c0_228 = arith.constant 0 : index
    %c0_229 = arith.constant 0 : index
    %322 = vector.load %arg4[%c2_226, %c5_227, %c0_228, %c0_229] : memref<3x9x256x256xbf16, #tpu.memory_space<vmem>>, vector<1x1x256x256xbf16>
    %323 = vector.shape_cast %322 : vector<1x1x256x256xbf16> to vector<256x256xbf16>
    %cst_230 = arith.constant dense<0.000000e+00> : vector<16x256xf32>
    %324 = tpu.matmul %321, %323, %cst_230 {dimension_numbers = #tpu.dot_dimension_numbers<[1], [0], [0], [1], [0, 0, 1, 1], [], []>} : vector<16x256xbf16>, vector<256x256xbf16>, vector<16x256xf32> -> vector<16x256xf32>
    %c2_231 = arith.constant 2 : index
    %c5_232 = arith.constant 5 : index
    %c0_233 = arith.constant 0 : index
    %c0_234 = arith.constant 0 : index
    %325 = vector.load %arg5[%c2_231, %c5_232, %c0_233, %c0_234] : memref<3x9x1x256xf32, #tpu.memory_space<vmem>>, vector<1x1x1x256xf32>
    %326 = vector.shape_cast %325 : vector<1x1x1x256xf32> to vector<1x256xf32>
    %327 = vector.broadcast %326 : vector<1x256xf32> to vector<16x256xf32>
    %328 = arith.addf %324, %327 : vector<16x256xf32>
    %cst_235 = arith.constant 0.000000e+00 : f32
    %329 = vector.broadcast %cst_235 : f32 to vector<16x256xf32>
    %330 = arith.maximumf %328, %329 : vector<16x256xf32>
    %331 = arith.truncf %330 : vector<16x256xf32> to vector<16x256xbf16>
    %c5_236 = arith.constant 5 : index
    %c0_237 = arith.constant 0 : index
    %c0_238 = arith.constant 0 : index
    %332 = vector.load %arg6[%c5_236, %c0_237, %c0_238] : memref<9x256x128xbf16, #tpu.memory_space<vmem>>, vector<1x256x128xbf16>
    %333 = vector.shape_cast %332 : vector<1x256x128xbf16> to vector<256x128xbf16>
    %cst_239 = arith.constant dense<0.000000e+00> : vector<16x128xf32>
    %334 = tpu.matmul %331, %333, %cst_239 {dimension_numbers = #tpu.dot_dimension_numbers<[1], [0], [0], [1], [0, 0, 1, 1], [], []>} : vector<16x256xbf16>, vector<256x128xbf16>, vector<16x128xf32> -> vector<16x128xf32>
    %c5_240 = arith.constant 5 : index
    %c0_241 = arith.constant 0 : index
    %c0_242 = arith.constant 0 : index
    %335 = vector.load %arg7[%c5_240, %c0_241, %c0_242] : memref<9x1x128xf32, #tpu.memory_space<vmem>>, vector<1x1x128xf32>
    %336 = vector.shape_cast %335 : vector<1x1x128xf32> to vector<1x128xf32>
    %337 = vector.broadcast %336 : vector<1x128xf32> to vector<16x128xf32>
    %338 = arith.addf %334, %337 : vector<16x128xf32>
    %c15_i32_243 = arith.constant 15 : i32
    %339 = vector.broadcast %c15_i32_243 : i32 to vector<16x128xi32>
    %340 = arith.cmpi sge, %1, %339 : vector<16x128xi32>
    %c17_i32 = arith.constant 17 : i32
    %341 = vector.broadcast %c17_i32 : i32 to vector<16x128xi32>
    %342 = arith.cmpi slt, %1, %341 : vector<16x128xi32>
    %343 = arith.andi %340, %342 : vector<16x128xi1>
    %cst_244 = arith.constant 0xFF800000 : f32
    %344 = vector.broadcast %cst_244 : f32 to vector<16x128xf32>
    %345 = arith.select %343, %338, %344 : vector<16x128xi1>, vector<16x128xf32>
    %cst_245 = arith.constant dense<0xFF800000> : vector<16xf32>
    %346 = vector.multi_reduction <maximumf>, %345, %cst_245 [1] : vector<16x128xf32> to vector<16xf32>
    %347 = vector.shape_cast %346 : vector<16xf32> to vector<16x1xf32>
    %348 = vector.broadcast %347 : vector<16x1xf32> to vector<16x128xf32>
    %349 = arith.subf %345, %348 : vector<16x128xf32>
    %350 = math.exp %349 : vector<16x128xf32>
    %cst_246 = arith.constant dense<0.000000e+00> : vector<16xf32>
    %351 = vector.multi_reduction <add>, %350, %cst_246 [1] : vector<16x128xf32> to vector<16xf32>
    %352 = vector.shape_cast %351 : vector<16xf32> to vector<16x1xf32>
    %353 = math.log %352 : vector<16x1xf32>
    %354 = arith.addf %347, %353 : vector<16x1xf32>
    %355 = vector.broadcast %354 : vector<16x1xf32> to vector<16x128xf32>
    %356 = arith.subf %338, %355 : vector<16x128xf32>
    %357 = arith.select %343, %356, %299 : vector<16x128xi1>, vector<16x128xf32>
    %358 = vector.extract_strided_slice %8 {offsets = [0, 1536], sizes = [16, 256], strides = [1, 1]} : vector<16x2304xf32> to vector<16x256xf32>
    %359 = arith.truncf %358 : vector<16x256xf32> to vector<16x256xbf16>
    %c0_247 = arith.constant 0 : index
    %c6 = arith.constant 6 : index
    %c0_248 = arith.constant 0 : index
    %c0_249 = arith.constant 0 : index
    %360 = vector.load %arg4[%c0_247, %c6, %c0_248, %c0_249] : memref<3x9x256x256xbf16, #tpu.memory_space<vmem>>, vector<1x1x256x256xbf16>
    %361 = vector.shape_cast %360 : vector<1x1x256x256xbf16> to vector<256x256xbf16>
    %cst_250 = arith.constant dense<0.000000e+00> : vector<16x256xf32>
    %362 = tpu.matmul %359, %361, %cst_250 {dimension_numbers = #tpu.dot_dimension_numbers<[1], [0], [0], [1], [0, 0, 1, 1], [], []>} : vector<16x256xbf16>, vector<256x256xbf16>, vector<16x256xf32> -> vector<16x256xf32>
    %c0_251 = arith.constant 0 : index
    %c6_252 = arith.constant 6 : index
    %c0_253 = arith.constant 0 : index
    %c0_254 = arith.constant 0 : index
    %363 = vector.load %arg5[%c0_251, %c6_252, %c0_253, %c0_254] : memref<3x9x1x256xf32, #tpu.memory_space<vmem>>, vector<1x1x1x256xf32>
    %364 = vector.shape_cast %363 : vector<1x1x1x256xf32> to vector<1x256xf32>
    %365 = vector.broadcast %364 : vector<1x256xf32> to vector<16x256xf32>
    %366 = arith.addf %362, %365 : vector<16x256xf32>
    %cst_255 = arith.constant 0.000000e+00 : f32
    %367 = vector.broadcast %cst_255 : f32 to vector<16x256xf32>
    %368 = arith.maximumf %366, %367 : vector<16x256xf32>
    %369 = arith.truncf %368 : vector<16x256xf32> to vector<16x256xbf16>
    %c1_256 = arith.constant 1 : index
    %c6_257 = arith.constant 6 : index
    %c0_258 = arith.constant 0 : index
    %c0_259 = arith.constant 0 : index
    %370 = vector.load %arg4[%c1_256, %c6_257, %c0_258, %c0_259] : memref<3x9x256x256xbf16, #tpu.memory_space<vmem>>, vector<1x1x256x256xbf16>
    %371 = vector.shape_cast %370 : vector<1x1x256x256xbf16> to vector<256x256xbf16>
    %cst_260 = arith.constant dense<0.000000e+00> : vector<16x256xf32>
    %372 = tpu.matmul %369, %371, %cst_260 {dimension_numbers = #tpu.dot_dimension_numbers<[1], [0], [0], [1], [0, 0, 1, 1], [], []>} : vector<16x256xbf16>, vector<256x256xbf16>, vector<16x256xf32> -> vector<16x256xf32>
    %c1_261 = arith.constant 1 : index
    %c6_262 = arith.constant 6 : index
    %c0_263 = arith.constant 0 : index
    %c0_264 = arith.constant 0 : index
    %373 = vector.load %arg5[%c1_261, %c6_262, %c0_263, %c0_264] : memref<3x9x1x256xf32, #tpu.memory_space<vmem>>, vector<1x1x1x256xf32>
    %374 = vector.shape_cast %373 : vector<1x1x1x256xf32> to vector<1x256xf32>
    %375 = vector.broadcast %374 : vector<1x256xf32> to vector<16x256xf32>
    %376 = arith.addf %372, %375 : vector<16x256xf32>
    %cst_265 = arith.constant 0.000000e+00 : f32
    %377 = vector.broadcast %cst_265 : f32 to vector<16x256xf32>
    %378 = arith.maximumf %376, %377 : vector<16x256xf32>
    %379 = arith.truncf %378 : vector<16x256xf32> to vector<16x256xbf16>
    %c2_266 = arith.constant 2 : index
    %c6_267 = arith.constant 6 : index
    %c0_268 = arith.constant 0 : index
    %c0_269 = arith.constant 0 : index
    %380 = vector.load %arg4[%c2_266, %c6_267, %c0_268, %c0_269] : memref<3x9x256x256xbf16, #tpu.memory_space<vmem>>, vector<1x1x256x256xbf16>
    %381 = vector.shape_cast %380 : vector<1x1x256x256xbf16> to vector<256x256xbf16>
    %cst_270 = arith.constant dense<0.000000e+00> : vector<16x256xf32>
    %382 = tpu.matmul %379, %381, %cst_270 {dimension_numbers = #tpu.dot_dimension_numbers<[1], [0], [0], [1], [0, 0, 1, 1], [], []>} : vector<16x256xbf16>, vector<256x256xbf16>, vector<16x256xf32> -> vector<16x256xf32>
    %c2_271 = arith.constant 2 : index
    %c6_272 = arith.constant 6 : index
    %c0_273 = arith.constant 0 : index
    %c0_274 = arith.constant 0 : index
    %383 = vector.load %arg5[%c2_271, %c6_272, %c0_273, %c0_274] : memref<3x9x1x256xf32, #tpu.memory_space<vmem>>, vector<1x1x1x256xf32>
    %384 = vector.shape_cast %383 : vector<1x1x1x256xf32> to vector<1x256xf32>
    %385 = vector.broadcast %384 : vector<1x256xf32> to vector<16x256xf32>
    %386 = arith.addf %382, %385 : vector<16x256xf32>
    %cst_275 = arith.constant 0.000000e+00 : f32
    %387 = vector.broadcast %cst_275 : f32 to vector<16x256xf32>
    %388 = arith.maximumf %386, %387 : vector<16x256xf32>
    %389 = arith.truncf %388 : vector<16x256xf32> to vector<16x256xbf16>
    %c6_276 = arith.constant 6 : index
    %c0_277 = arith.constant 0 : index
    %c0_278 = arith.constant 0 : index
    %390 = vector.load %arg6[%c6_276, %c0_277, %c0_278] : memref<9x256x128xbf16, #tpu.memory_space<vmem>>, vector<1x256x128xbf16>
    %391 = vector.shape_cast %390 : vector<1x256x128xbf16> to vector<256x128xbf16>
    %cst_279 = arith.constant dense<0.000000e+00> : vector<16x128xf32>
    %392 = tpu.matmul %389, %391, %cst_279 {dimension_numbers = #tpu.dot_dimension_numbers<[1], [0], [0], [1], [0, 0, 1, 1], [], []>} : vector<16x256xbf16>, vector<256x128xbf16>, vector<16x128xf32> -> vector<16x128xf32>
    %c6_280 = arith.constant 6 : index
    %c0_281 = arith.constant 0 : index
    %c0_282 = arith.constant 0 : index
    %393 = vector.load %arg7[%c6_280, %c0_281, %c0_282] : memref<9x1x128xf32, #tpu.memory_space<vmem>>, vector<1x1x128xf32>
    %394 = vector.shape_cast %393 : vector<1x1x128xf32> to vector<1x128xf32>
    %395 = vector.broadcast %394 : vector<1x128xf32> to vector<16x128xf32>
    %396 = arith.addf %392, %395 : vector<16x128xf32>
    %c17_i32_283 = arith.constant 17 : i32
    %397 = vector.broadcast %c17_i32_283 : i32 to vector<16x128xi32>
    %398 = arith.cmpi sge, %1, %397 : vector<16x128xi32>
    %c19_i32 = arith.constant 19 : i32
    %399 = vector.broadcast %c19_i32 : i32 to vector<16x128xi32>
    %400 = arith.cmpi slt, %1, %399 : vector<16x128xi32>
    %401 = arith.andi %398, %400 : vector<16x128xi1>
    %cst_284 = arith.constant 0xFF800000 : f32
    %402 = vector.broadcast %cst_284 : f32 to vector<16x128xf32>
    %403 = arith.select %401, %396, %402 : vector<16x128xi1>, vector<16x128xf32>
    %cst_285 = arith.constant dense<0xFF800000> : vector<16xf32>
    %404 = vector.multi_reduction <maximumf>, %403, %cst_285 [1] : vector<16x128xf32> to vector<16xf32>
    %405 = vector.shape_cast %404 : vector<16xf32> to vector<16x1xf32>
    %406 = vector.broadcast %405 : vector<16x1xf32> to vector<16x128xf32>
    %407 = arith.subf %403, %406 : vector<16x128xf32>
    %408 = math.exp %407 : vector<16x128xf32>
    %cst_286 = arith.constant dense<0.000000e+00> : vector<16xf32>
    %409 = vector.multi_reduction <add>, %408, %cst_286 [1] : vector<16x128xf32> to vector<16xf32>
    %410 = vector.shape_cast %409 : vector<16xf32> to vector<16x1xf32>
    %411 = math.log %410 : vector<16x1xf32>
    %412 = arith.addf %405, %411 : vector<16x1xf32>
    %413 = vector.broadcast %412 : vector<16x1xf32> to vector<16x128xf32>
    %414 = arith.subf %396, %413 : vector<16x128xf32>
    %415 = arith.select %401, %414, %357 : vector<16x128xi1>, vector<16x128xf32>
    %416 = vector.extract_strided_slice %8 {offsets = [0, 1792], sizes = [16, 256], strides = [1, 1]} : vector<16x2304xf32> to vector<16x256xf32>
    %417 = arith.truncf %416 : vector<16x256xf32> to vector<16x256xbf16>
    %c0_287 = arith.constant 0 : index
    %c7 = arith.constant 7 : index
    %c0_288 = arith.constant 0 : index
    %c0_289 = arith.constant 0 : index
    %418 = vector.load %arg4[%c0_287, %c7, %c0_288, %c0_289] : memref<3x9x256x256xbf16, #tpu.memory_space<vmem>>, vector<1x1x256x256xbf16>
    %419 = vector.shape_cast %418 : vector<1x1x256x256xbf16> to vector<256x256xbf16>
    %cst_290 = arith.constant dense<0.000000e+00> : vector<16x256xf32>
    %420 = tpu.matmul %417, %419, %cst_290 {dimension_numbers = #tpu.dot_dimension_numbers<[1], [0], [0], [1], [0, 0, 1, 1], [], []>} : vector<16x256xbf16>, vector<256x256xbf16>, vector<16x256xf32> -> vector<16x256xf32>
    %c0_291 = arith.constant 0 : index
    %c7_292 = arith.constant 7 : index
    %c0_293 = arith.constant 0 : index
    %c0_294 = arith.constant 0 : index
    %421 = vector.load %arg5[%c0_291, %c7_292, %c0_293, %c0_294] : memref<3x9x1x256xf32, #tpu.memory_space<vmem>>, vector<1x1x1x256xf32>
    %422 = vector.shape_cast %421 : vector<1x1x1x256xf32> to vector<1x256xf32>
    %423 = vector.broadcast %422 : vector<1x256xf32> to vector<16x256xf32>
    %424 = arith.addf %420, %423 : vector<16x256xf32>
    %cst_295 = arith.constant 0.000000e+00 : f32
    %425 = vector.broadcast %cst_295 : f32 to vector<16x256xf32>
    %426 = arith.maximumf %424, %425 : vector<16x256xf32>
    %427 = arith.truncf %426 : vector<16x256xf32> to vector<16x256xbf16>
    %c1_296 = arith.constant 1 : index
    %c7_297 = arith.constant 7 : index
    %c0_298 = arith.constant 0 : index
    %c0_299 = arith.constant 0 : index
    %428 = vector.load %arg4[%c1_296, %c7_297, %c0_298, %c0_299] : memref<3x9x256x256xbf16, #tpu.memory_space<vmem>>, vector<1x1x256x256xbf16>
    %429 = vector.shape_cast %428 : vector<1x1x256x256xbf16> to vector<256x256xbf16>
    %cst_300 = arith.constant dense<0.000000e+00> : vector<16x256xf32>
    %430 = tpu.matmul %427, %429, %cst_300 {dimension_numbers = #tpu.dot_dimension_numbers<[1], [0], [0], [1], [0, 0, 1, 1], [], []>} : vector<16x256xbf16>, vector<256x256xbf16>, vector<16x256xf32> -> vector<16x256xf32>
    %c1_301 = arith.constant 1 : index
    %c7_302 = arith.constant 7 : index
    %c0_303 = arith.constant 0 : index
    %c0_304 = arith.constant 0 : index
    %431 = vector.load %arg5[%c1_301, %c7_302, %c0_303, %c0_304] : memref<3x9x1x256xf32, #tpu.memory_space<vmem>>, vector<1x1x1x256xf32>
    %432 = vector.shape_cast %431 : vector<1x1x1x256xf32> to vector<1x256xf32>
    %433 = vector.broadcast %432 : vector<1x256xf32> to vector<16x256xf32>
    %434 = arith.addf %430, %433 : vector<16x256xf32>
    %cst_305 = arith.constant 0.000000e+00 : f32
    %435 = vector.broadcast %cst_305 : f32 to vector<16x256xf32>
    %436 = arith.maximumf %434, %435 : vector<16x256xf32>
    %437 = arith.truncf %436 : vector<16x256xf32> to vector<16x256xbf16>
    %c2_306 = arith.constant 2 : index
    %c7_307 = arith.constant 7 : index
    %c0_308 = arith.constant 0 : index
    %c0_309 = arith.constant 0 : index
    %438 = vector.load %arg4[%c2_306, %c7_307, %c0_308, %c0_309] : memref<3x9x256x256xbf16, #tpu.memory_space<vmem>>, vector<1x1x256x256xbf16>
    %439 = vector.shape_cast %438 : vector<1x1x256x256xbf16> to vector<256x256xbf16>
    %cst_310 = arith.constant dense<0.000000e+00> : vector<16x256xf32>
    %440 = tpu.matmul %437, %439, %cst_310 {dimension_numbers = #tpu.dot_dimension_numbers<[1], [0], [0], [1], [0, 0, 1, 1], [], []>} : vector<16x256xbf16>, vector<256x256xbf16>, vector<16x256xf32> -> vector<16x256xf32>
    %c2_311 = arith.constant 2 : index
    %c7_312 = arith.constant 7 : index
    %c0_313 = arith.constant 0 : index
    %c0_314 = arith.constant 0 : index
    %441 = vector.load %arg5[%c2_311, %c7_312, %c0_313, %c0_314] : memref<3x9x1x256xf32, #tpu.memory_space<vmem>>, vector<1x1x1x256xf32>
    %442 = vector.shape_cast %441 : vector<1x1x1x256xf32> to vector<1x256xf32>
    %443 = vector.broadcast %442 : vector<1x256xf32> to vector<16x256xf32>
    %444 = arith.addf %440, %443 : vector<16x256xf32>
    %cst_315 = arith.constant 0.000000e+00 : f32
    %445 = vector.broadcast %cst_315 : f32 to vector<16x256xf32>
    %446 = arith.maximumf %444, %445 : vector<16x256xf32>
    %447 = arith.truncf %446 : vector<16x256xf32> to vector<16x256xbf16>
    %c7_316 = arith.constant 7 : index
    %c0_317 = arith.constant 0 : index
    %c0_318 = arith.constant 0 : index
    %448 = vector.load %arg6[%c7_316, %c0_317, %c0_318] : memref<9x256x128xbf16, #tpu.memory_space<vmem>>, vector<1x256x128xbf16>
    %449 = vector.shape_cast %448 : vector<1x256x128xbf16> to vector<256x128xbf16>
    %cst_319 = arith.constant dense<0.000000e+00> : vector<16x128xf32>
    %450 = tpu.matmul %447, %449, %cst_319 {dimension_numbers = #tpu.dot_dimension_numbers<[1], [0], [0], [1], [0, 0, 1, 1], [], []>} : vector<16x256xbf16>, vector<256x128xbf16>, vector<16x128xf32> -> vector<16x128xf32>
    %c7_320 = arith.constant 7 : index
    %c0_321 = arith.constant 0 : index
    %c0_322 = arith.constant 0 : index
    %451 = vector.load %arg7[%c7_320, %c0_321, %c0_322] : memref<9x1x128xf32, #tpu.memory_space<vmem>>, vector<1x1x128xf32>
    %452 = vector.shape_cast %451 : vector<1x1x128xf32> to vector<1x128xf32>
    %453 = vector.broadcast %452 : vector<1x128xf32> to vector<16x128xf32>
    %454 = arith.addf %450, %453 : vector<16x128xf32>
    %c19_i32_323 = arith.constant 19 : i32
    %455 = vector.broadcast %c19_i32_323 : i32 to vector<16x128xi32>
    %456 = arith.cmpi sge, %1, %455 : vector<16x128xi32>
    %c21_i32 = arith.constant 21 : i32
    %457 = vector.broadcast %c21_i32 : i32 to vector<16x128xi32>
    %458 = arith.cmpi slt, %1, %457 : vector<16x128xi32>
    %459 = arith.andi %456, %458 : vector<16x128xi1>
    %cst_324 = arith.constant 0xFF800000 : f32
    %460 = vector.broadcast %cst_324 : f32 to vector<16x128xf32>
    %461 = arith.select %459, %454, %460 : vector<16x128xi1>, vector<16x128xf32>
    %cst_325 = arith.constant dense<0xFF800000> : vector<16xf32>
    %462 = vector.multi_reduction <maximumf>, %461, %cst_325 [1] : vector<16x128xf32> to vector<16xf32>
    %463 = vector.shape_cast %462 : vector<16xf32> to vector<16x1xf32>
    %464 = vector.broadcast %463 : vector<16x1xf32> to vector<16x128xf32>
    %465 = arith.subf %461, %464 : vector<16x128xf32>
    %466 = math.exp %465 : vector<16x128xf32>
    %cst_326 = arith.constant dense<0.000000e+00> : vector<16xf32>
    %467 = vector.multi_reduction <add>, %466, %cst_326 [1] : vector<16x128xf32> to vector<16xf32>
    %468 = vector.shape_cast %467 : vector<16xf32> to vector<16x1xf32>
    %469 = math.log %468 : vector<16x1xf32>
    %470 = arith.addf %463, %469 : vector<16x1xf32>
    %471 = vector.broadcast %470 : vector<16x1xf32> to vector<16x128xf32>
    %472 = arith.subf %454, %471 : vector<16x128xf32>
    %473 = arith.select %459, %472, %415 : vector<16x128xi1>, vector<16x128xf32>
    %474 = vector.extract_strided_slice %8 {offsets = [0, 2048], sizes = [16, 256], strides = [1, 1]} : vector<16x2304xf32> to vector<16x256xf32>
    %475 = arith.truncf %474 : vector<16x256xf32> to vector<16x256xbf16>
    %c0_327 = arith.constant 0 : index
    %c8 = arith.constant 8 : index
    %c0_328 = arith.constant 0 : index
    %c0_329 = arith.constant 0 : index
    %476 = vector.load %arg4[%c0_327, %c8, %c0_328, %c0_329] : memref<3x9x256x256xbf16, #tpu.memory_space<vmem>>, vector<1x1x256x256xbf16>
    %477 = vector.shape_cast %476 : vector<1x1x256x256xbf16> to vector<256x256xbf16>
    %cst_330 = arith.constant dense<0.000000e+00> : vector<16x256xf32>
    %478 = tpu.matmul %475, %477, %cst_330 {dimension_numbers = #tpu.dot_dimension_numbers<[1], [0], [0], [1], [0, 0, 1, 1], [], []>} : vector<16x256xbf16>, vector<256x256xbf16>, vector<16x256xf32> -> vector<16x256xf32>
    %c0_331 = arith.constant 0 : index
    %c8_332 = arith.constant 8 : index
    %c0_333 = arith.constant 0 : index
    %c0_334 = arith.constant 0 : index
    %479 = vector.load %arg5[%c0_331, %c8_332, %c0_333, %c0_334] : memref<3x9x1x256xf32, #tpu.memory_space<vmem>>, vector<1x1x1x256xf32>
    %480 = vector.shape_cast %479 : vector<1x1x1x256xf32> to vector<1x256xf32>
    %481 = vector.broadcast %480 : vector<1x256xf32> to vector<16x256xf32>
    %482 = arith.addf %478, %481 : vector<16x256xf32>
    %cst_335 = arith.constant 0.000000e+00 : f32
    %483 = vector.broadcast %cst_335 : f32 to vector<16x256xf32>
    %484 = arith.maximumf %482, %483 : vector<16x256xf32>
    %485 = arith.truncf %484 : vector<16x256xf32> to vector<16x256xbf16>
    %c1_336 = arith.constant 1 : index
    %c8_337 = arith.constant 8 : index
    %c0_338 = arith.constant 0 : index
    %c0_339 = arith.constant 0 : index
    %486 = vector.load %arg4[%c1_336, %c8_337, %c0_338, %c0_339] : memref<3x9x256x256xbf16, #tpu.memory_space<vmem>>, vector<1x1x256x256xbf16>
    %487 = vector.shape_cast %486 : vector<1x1x256x256xbf16> to vector<256x256xbf16>
    %cst_340 = arith.constant dense<0.000000e+00> : vector<16x256xf32>
    %488 = tpu.matmul %485, %487, %cst_340 {dimension_numbers = #tpu.dot_dimension_numbers<[1], [0], [0], [1], [0, 0, 1, 1], [], []>} : vector<16x256xbf16>, vector<256x256xbf16>, vector<16x256xf32> -> vector<16x256xf32>
    %c1_341 = arith.constant 1 : index
    %c8_342 = arith.constant 8 : index
    %c0_343 = arith.constant 0 : index
    %c0_344 = arith.constant 0 : index
    %489 = vector.load %arg5[%c1_341, %c8_342, %c0_343, %c0_344] : memref<3x9x1x256xf32, #tpu.memory_space<vmem>>, vector<1x1x1x256xf32>
    %490 = vector.shape_cast %489 : vector<1x1x1x256xf32> to vector<1x256xf32>
    %491 = vector.broadcast %490 : vector<1x256xf32> to vector<16x256xf32>
    %492 = arith.addf %488, %491 : vector<16x256xf32>
    %cst_345 = arith.constant 0.000000e+00 : f32
    %493 = vector.broadcast %cst_345 : f32 to vector<16x256xf32>
    %494 = arith.maximumf %492, %493 : vector<16x256xf32>
    %495 = arith.truncf %494 : vector<16x256xf32> to vector<16x256xbf16>
    %c2_346 = arith.constant 2 : index
    %c8_347 = arith.constant 8 : index
    %c0_348 = arith.constant 0 : index
    %c0_349 = arith.constant 0 : index
    %496 = vector.load %arg4[%c2_346, %c8_347, %c0_348, %c0_349] : memref<3x9x256x256xbf16, #tpu.memory_space<vmem>>, vector<1x1x256x256xbf16>
    %497 = vector.shape_cast %496 : vector<1x1x256x256xbf16> to vector<256x256xbf16>
    %cst_350 = arith.constant dense<0.000000e+00> : vector<16x256xf32>
    %498 = tpu.matmul %495, %497, %cst_350 {dimension_numbers = #tpu.dot_dimension_numbers<[1], [0], [0], [1], [0, 0, 1, 1], [], []>} : vector<16x256xbf16>, vector<256x256xbf16>, vector<16x256xf32> -> vector<16x256xf32>
    %c2_351 = arith.constant 2 : index
    %c8_352 = arith.constant 8 : index
    %c0_353 = arith.constant 0 : index
    %c0_354 = arith.constant 0 : index
    %499 = vector.load %arg5[%c2_351, %c8_352, %c0_353, %c0_354] : memref<3x9x1x256xf32, #tpu.memory_space<vmem>>, vector<1x1x1x256xf32>
    %500 = vector.shape_cast %499 : vector<1x1x1x256xf32> to vector<1x256xf32>
    %501 = vector.broadcast %500 : vector<1x256xf32> to vector<16x256xf32>
    %502 = arith.addf %498, %501 : vector<16x256xf32>
    %cst_355 = arith.constant 0.000000e+00 : f32
    %503 = vector.broadcast %cst_355 : f32 to vector<16x256xf32>
    %504 = arith.maximumf %502, %503 : vector<16x256xf32>
    %505 = arith.truncf %504 : vector<16x256xf32> to vector<16x256xbf16>
    %c8_356 = arith.constant 8 : index
    %c0_357 = arith.constant 0 : index
    %c0_358 = arith.constant 0 : index
    %506 = vector.load %arg6[%c8_356, %c0_357, %c0_358] : memref<9x256x128xbf16, #tpu.memory_space<vmem>>, vector<1x256x128xbf16>
    %507 = vector.shape_cast %506 : vector<1x256x128xbf16> to vector<256x128xbf16>
    %cst_359 = arith.constant dense<0.000000e+00> : vector<16x128xf32>
    %508 = tpu.matmul %505, %507, %cst_359 {dimension_numbers = #tpu.dot_dimension_numbers<[1], [0], [0], [1], [0, 0, 1, 1], [], []>} : vector<16x256xbf16>, vector<256x128xbf16>, vector<16x128xf32> -> vector<16x128xf32>
    %c8_360 = arith.constant 8 : index
    %c0_361 = arith.constant 0 : index
    %c0_362 = arith.constant 0 : index
    %509 = vector.load %arg7[%c8_360, %c0_361, %c0_362] : memref<9x1x128xf32, #tpu.memory_space<vmem>>, vector<1x1x128xf32>
    %510 = vector.shape_cast %509 : vector<1x1x128xf32> to vector<1x128xf32>
    %511 = vector.broadcast %510 : vector<1x128xf32> to vector<16x128xf32>
    %512 = arith.addf %508, %511 : vector<16x128xf32>
    %c21_i32_363 = arith.constant 21 : i32
    %513 = vector.broadcast %c21_i32_363 : i32 to vector<16x128xi32>
    %514 = arith.cmpi sge, %1, %513 : vector<16x128xi32>
    %c23_i32 = arith.constant 23 : i32
    %515 = vector.broadcast %c23_i32 : i32 to vector<16x128xi32>
    %516 = arith.cmpi slt, %1, %515 : vector<16x128xi32>
    %517 = arith.andi %514, %516 : vector<16x128xi1>
    %cst_364 = arith.constant 0xFF800000 : f32
    %518 = vector.broadcast %cst_364 : f32 to vector<16x128xf32>
    %519 = arith.select %517, %512, %518 : vector<16x128xi1>, vector<16x128xf32>
    %cst_365 = arith.constant dense<0xFF800000> : vector<16xf32>
    %520 = vector.multi_reduction <maximumf>, %519, %cst_365 [1] : vector<16x128xf32> to vector<16xf32>
    %521 = vector.shape_cast %520 : vector<16xf32> to vector<16x1xf32>
    %522 = vector.broadcast %521 : vector<16x1xf32> to vector<16x128xf32>
    %523 = arith.subf %519, %522 : vector<16x128xf32>
    %524 = math.exp %523 : vector<16x128xf32>
    %cst_366 = arith.constant dense<0.000000e+00> : vector<16xf32>
    %525 = vector.multi_reduction <add>, %524, %cst_366 [1] : vector<16x128xf32> to vector<16xf32>
    %526 = vector.shape_cast %525 : vector<16xf32> to vector<16x1xf32>
    %527 = math.log %526 : vector<16x1xf32>
    %528 = arith.addf %521, %527 : vector<16x1xf32>
    %529 = vector.broadcast %528 : vector<16x1xf32> to vector<16x128xf32>
    %530 = arith.subf %512, %529 : vector<16x128xf32>
    %531 = arith.select %517, %530, %473 : vector<16x128xi1>, vector<16x128xf32>
    %c0_367 = arith.constant 0 : index
    %c0_368 = arith.constant 0 : index
    %532 = vector.load %arg8[%c0_367, %c0_368] : memref<16x128xf32, #tpu.memory_space<vmem>>, vector<16x128xf32>
    tpu.vector_store %arg8[%c0_367, %c0_368], %531 {strides = array<i32>} : memref<16x128xf32, #tpu.memory_space<vmem>>, vector<16x128xf32>,
    return
  }
  func.func @transform_0(%arg0: i32) -> (i32, i32) {
    %c0_i32 = arith.constant 0 : i32
    %c0_i32_0 = arith.constant 0 : i32
    return %arg0, %c0_i32 : i32, i32
  }
  func.func @transform_1(%arg0: i32) -> (i32, i32) {
    %c0_i32 = arith.constant 0 : i32
    %c0_i32_0 = arith.constant 0 : i32
    %c0_i32_1 = arith.constant 0 : i32
    return %c0_i32, %c0_i32_0 : i32, i32
  }
  func.func @transform_2(%arg0: i32) -> (i32, i32) {
    %c0_i32 = arith.constant 0 : i32
    %c0_i32_0 = arith.constant 0 : i32
    %c0_i32_1 = arith.constant 0 : i32
    return %c0_i32, %c0_i32_0 : i32, i32
  }
  func.func @transform_3(%arg0: i32) -> (i32, i32, i32, i32) {
    %c0_i32 = arith.constant 0 : i32
    %c0_i32_0 = arith.constant 0 : i32
    %c0_i32_1 = arith.constant 0 : i32
    %c0_i32_2 = arith.constant 0 : i32
    %c0_i32_3 = arith.constant 0 : i32
    return %c0_i32, %c0_i32_0, %c0_i32_1, %c0_i32_2 : i32, i32, i32, i32
  }
  func.func @transform_4(%arg0: i32) -> (i32, i32, i32, i32) {
    %c0_i32 = arith.constant 0 : i32
    %c0_i32_0 = arith.constant 0 : i32
    %c0_i32_1 = arith.constant 0 : i32
    %c0_i32_2 = arith.constant 0 : i32
    %c0_i32_3 = arith.constant 0 : i32
    return %c0_i32, %c0_i32_0, %c0_i32_1, %c0_i32_2 : i32, i32, i32, i32
  }
  func.func @transform_5(%arg0: i32) -> (i32, i32, i32) {
    %c0_i32 = arith.constant 0 : i32
    %c0_i32_0 = arith.constant 0 : i32
    %c0_i32_1 = arith.constant 0 : i32
    %c0_i32_2 = arith.constant 0 : i32
    return %c0_i32, %c0_i32_0, %c0_i32_1 : i32, i32, i32
  }
  func.func @transform_6(%arg0: i32) -> (i32, i32, i32) {
    %c0_i32 = arith.constant 0 : i32
    %c0_i32_0 = arith.constant 0 : i32
    %c0_i32_1 = arith.constant 0 : i32
    %c0_i32_2 = arith.constant 0 : i32
    return %c0_i32, %c0_i32_0, %c0_i32_1 : i32, i32, i32
  }
  func.func @transform_7(%arg0: i32) -> (i32, i32) {
    %c0_i32 = arith.constant 0 : i32
    %c0_i32_0 = arith.constant 0 : i32
    return %arg0, %c0_i32 : i32, i32
  }
}

</mosaic_0001>

<bundles_post_ra>
// kernel: fully_connected3_forward.1
= control target key start
LH: loop header
LB: loop body
LE: loop exit
PB: predicated region body
PF: predicated region fallthrough
CT: control target
= control target key end

     0   :  { %12 = vsyncpa [#allocation3], 0  ;;  %s16736_s0 = inlined_call_operand.vmem [shape: bf16[16,128], index: 0, kind: input, shape index: {}]   ;;  %s16737_s1 = inlined_call_operand.hbm [shape: bf16[128,2304], index: 1, kind: input, shape index: {}]   ;;  %s16738_s2 = inlined_call_operand.hbm [shape: f32[1,2304], index: 2, kind: input, shape index: {}]   ;;  %s16739_s3 = inlined_call_operand.hbm [shape: bf16[3,9,256,256], index: 3, kind: input, shape index: {}]   ;;  %s16740_s4 = inlined_call_operand.hbm [shape: f32[3,9,1,256], index: 4, kind: input, shape index: {}]   ;;  %s16741_s5 = inlined_call_operand.hbm [shape: bf16[9,256,128], index: 5, kind: input, shape index: {}]   ;;  %s16742_s6 = inlined_call_operand.hbm [shape: f32[9,1,128], index: 6, kind: input, shape index: {}]   ;;  %s16743_s7 = inlined_call_operand.vmem [shape: f32[16,128], index: 7, kind: output, shape index: {}]  }
   0x1   :  { %13 = vsyncpa [#allocation5], 0 }
   0x2   :  { %14 = vsyncpa [#allocation8], 0  ;;  %s36_s26 = sshll.u32 %s16738_s2, 4  ;;  %s37_s26 = int_to_ptr.hbm [resolvable:$true] %s36_s26 }
   0x3   :  { %15 = vsyncpa [#allocation11], 0  ;;  %s16155_s27 = smov [#allocation4]   ;;  %s59_s8 = sshll.u32 %s16740_s4, 4  ;;  %s60_s8 = int_to_ptr.hbm [resolvable:$true] %s59_s8 }
   0x4   :  { %s38_s28 = sshll.u32 %s16155_s27, 4  ;;  %s16156_s9 = smov [#allocation7]   ;;  %s39_s28 = int_to_ptr.vmem [resolvable:$true] %s38_s28 }
   0x5   :  { %41 = dma.hbm_to_vmem [thread:$0]  %s37_s26, 288, %s39_s28, [#allocation5]  }
   0x6   :  { %s61_s10 = sshll.u32 %s16156_s9, 4  ;;  %s16157_s11 = smov 32   ;;  %s62_s10 = int_to_ptr.vmem [resolvable:$true] %s61_s10 }
   0x7   :  { %s16158_s12 = smov 2   ;;  %s22_s2 = sshll.u32 %s16737_s1, 4  ;;  %s23_s2 = int_to_ptr.hbm [resolvable:$true] %s22_s2 }
   0x8   :  { %67 = dma.hbm_to_vmem [thread:$0]  %s60_s8, 864, %s62_s10, [#allocation8], %s16157_s11, %s16157_s11, %s16158_s12  }
   0x9   :  { %s16159_s15 = smov [#allocation2]   ;;  %s46_s4 = sshll.u32 %s16739_s3, 4  ;;  %s47_s4 = int_to_ptr.hbm [resolvable:$true] %s46_s4 }
   0xa   :  { %s24_s16 = sshll.u32 %s16159_s15, 4  ;;  %s16160_s19 = smov 1152   ;;  %s25_s16 = int_to_ptr.vmem [resolvable:$true] %s24_s16 }
   0xb   :  { %s16161_s20 = smov 72   ;;  %s16162_s21 = smov [#allocation6]  }
   0xc   :  { %30 = dma.hbm_to_vmem [thread:$0]  %s23_s2, 18432, %s25_s16, [#allocation3], %s16160_s19, %s16160_s19, %s16161_s20  }
   0xd   :  { %s48_s22 = sshll.u32 %s16162_s21, 4  ;;  %s16163_s23 = smov 128   ;;  %s49_s22 = int_to_ptr.vmem [resolvable:$true] %s48_s22 }
   0xe   :  { %s16164_s24 = smov 8   ;;  %s72_s26 = sshll.u32 %s16741_s5, 4  ;;  %s73_s26 = int_to_ptr.hbm [resolvable:$true] %s72_s26 }
   0xf   :  { %54 = dma.hbm_to_vmem [thread:$0]  %s47_s4, 110592, %s49_s22, [#allocation5], %s16163_s23, %s16163_s23, %s16164_s24  }
  0x10   :  { %s16165_s27 = smov [#allocation9]   ;;  %s85_s30 = sshll.u32 %s16742_s6, 4  ;;  %s86_s30 = int_to_ptr.hbm [resolvable:$true] %s85_s30 }
  0x11   :  { %s74_s28 = sshll.u32 %s16165_s27, 4  ;;  %s16166_s8 = smov 64   ;;  %s75_s28 = int_to_ptr.vmem [resolvable:$true] %s74_s28 }
  0x12   :  { %s16167_s9 = smov 4   ;;  %s16168_s10 = smov [#allocation10]  }
  0x13   :  { %80 = dma.hbm_to_vmem [thread:$0]  %s73_s26, 18432, %s75_s28, [#allocation8], %s16166_s8, %s16166_s8, %s16167_s9  }
  0x14   :  { %s87_s11 = sshll.u32 %s16168_s10, 4  ;;  %s16169_s12 = smov 16   ;;  %s88_s11 = int_to_ptr.vmem [resolvable:$true] %s87_s11 }
  0x15   :  { %s16170_s13 = smov 1  }
  0x16   :  { %93 = dma.hbm_to_vmem [thread:$0]  %s86_s30, 144, %s88_s11, [#allocation11], %s16169_s12, %s16169_s12, %s16170_s13  }
  0x17   :  { %16147 = dma.done.wait [#allocation3], 18432  }
  0x18   :  { %16148 = vsyncadd [#allocation3], 4294948864 }
  0x19   :  { %16149 = dma.done.wait [#allocation5], 110880  }
  0x1a   :  { %16150 = vsyncadd [#allocation5], 4294856416 }
  0x1b   :  { %16151 = dma.done.wait [#allocation8], 19296  }
  0x1c   :  { %16152 = vsyncadd [#allocation8], 4294948000 }
  0x1d   :  { %16153 = dma.done.wait [#allocation11], 144  }
  0x1e   :  { %16154 = vsyncadd [#allocation11], 4294967152  ;;  %v10649_v0 = vld [vmem:[#allocation2 + $0x3f0] sm:$0xf]  ;;  %v14887_v1 = vld [vmem:[#allocation2 + $0x434] sm:$0xf0] }
  0x1f   :  { %v14878_v2 = vld [vmem:[#allocation2 + $0x3f4] sm:$0xf]  ;;  %v10650_v3 = vor.u32 %v14887_v1, %v10649_v0  ;;  %v10651_v4 = vld [vmem:[#allocation2 + $0x438] sm:$0xf0]  ;;  %v10577_v5 = vld [vmem:[#allocation2 + $0x360] sm:$0xf] }
  0x20   :  { %v14869_v6 = vld [vmem:[#allocation2 + $0x3a4] sm:$0xf0]  ;;  %v10654_v7 = vor.u32 %v14878_v2, %v10651_v4  ;;  %v14860_v8 = vld [vmem:[#allocation2 + $0x364] sm:$0xf]  ;;  %v10579_v9 = vld [vmem:[#allocation2 + $0x3a8] sm:$0xf0] }
  0x21   :  { %1034 = vmatpush.bf16.msra.mxu0 %v10650_v3  ;;  %v10578_v10 = vor.u32 %v14869_v6, %v10577_v5  ;;  %v10582_v11 = vor.u32 %v14860_v8, %v10579_v9  ;;  %v10505_v12 = vld [vmem:[#allocation2 + $0x2d0] sm:$0xf]  ;;  %v14851_v13 = vld [vmem:[#allocation2 + $0x314] sm:$0xf0]  ;;  %v14842_v14 = vld [vmem:[#allocation2 + $0x2d4] sm:$0xf] }
  0x22   :  { %1048 = vmatpush.bf16.msra.mxu1 %v10654_v7  ;;  %v10507_v15 = vld [vmem:[#allocation2 + $0x318] sm:$0xf0]  ;;  %v10506_v16 = vor.u32 %v14851_v13, %v10505_v12  ;;  %v10433_v18 = vld [vmem:[#allocation2 + $0x240] sm:$0xf]  ;;  %v14833_v19 = vld [vmem:[#allocation2 + $0x284] sm:$0xf0] }
  0x23   :  { %v10510_v17 = vor.u32 %v14842_v14, %v10507_v15  ;;  %v14824_v20 = vld [vmem:[#allocation2 + $0x244] sm:$0xf]  ;;  %v10435_v21 = vld [vmem:[#allocation2 + $0x288] sm:$0xf0]  ;;  %v10657_v22 = vld [vmem:[#allocation2 + $0x3f8] sm:$0xf]  ;;  %v10434_v27 = vor.u32 %v14833_v19, %v10433_v18 }
  0x24   :  { %v14888_v23 = vld [vmem:[#allocation2 + $0x43c] sm:$0xf0]  ;;  %v14879_v25 = vld [vmem:[#allocation2 + $0x3fc] sm:$0xf]  ;;  %v10659_v26 = vld [vmem:[#allocation2 + $0x440] sm:$0xf0]  ;;  %v10438_v31 = vor.u32 %v14824_v20, %v10435_v21 }
  0x25   :  { %1035 = vmatpush.bf16.msra.mxu0 %v10578_v10  ;;  %v10658_v24 = vor.u32 %v14888_v23, %v10657_v22  ;;  %v10361_v28 = vld [vmem:[#allocation2 + $0x1b0] sm:$0xf]  ;;  %v14815_v29 = vld [vmem:[#allocation2 + $0x1f4] sm:$0xf0]  ;;  %v10662_v30 = vor.u32 %v14879_v25, %v10659_v26  ;;  %v10585_v32 = vld [vmem:[#allocation2 + $0x368] sm:$0xf] }
  0x26   :  { %1049 = vmatpush.bf16.msra.mxu1 %v10582_v11  ;;  %v14870_v33 = vld [vmem:[#allocation2 + $0x3ac] sm:$0xf0]  ;;  %v14861_v34 = vld [vmem:[#allocation2 + $0x36c] sm:$0xf]  ;;  %v14806_v35 = vld [vmem:[#allocation2 + $0x1b4] sm:$0xf]  ;;  %v10362_v40 = vor.u32 %v14815_v29, %v10361_v28 }
  0x27   :  { %1062 = vmatpush.bf16.msra.mxu2 %v10658_v24  ;;  %v10363_v36 = vld [vmem:[#allocation2 + $0x1f8] sm:$0xf0]  ;;  %1076 = vmatpush.bf16.msra.mxu3 %v10662_v30  ;;  %v10586_v37 = vor.u32 %v14870_v33, %v10585_v32  ;;  %v10587_v38 = vld [vmem:[#allocation2 + $0x3b0] sm:$0xf0]  ;;  %v10513_v41 = vld [vmem:[#allocation2 + $0x2d8] sm:$0xf] }
  0x28   :  { %v10590_v39 = vor.u32 %v14861_v34, %v10587_v38  ;;  %v14852_v42 = vld [vmem:[#allocation2 + $0x31c] sm:$0xf0]  ;;  %v14843_v43 = vld [vmem:[#allocation2 + $0x2dc] sm:$0xf]  ;;  %v10366_v44 = vor.u32 %v14806_v35, %v10363_v36  ;;  %v14797_v46 = vld [vmem:[#allocation2 + $0x164] sm:$0xf0] }
  0x29   :  { %1036 = vmatpush.bf16.msra.mxu0 %v10506_v16  ;;  %v10289_v45 = vld [vmem:[#allocation2 + $0x120] sm:$0xf]  ;;  %v10514_v47 = vor.u32 %v14852_v42, %v10513_v41  ;;  %v10515_v48 = vld [vmem:[#allocation2 + $0x320] sm:$0xf0]  ;;  %v10291_v50 = vld [vmem:[#allocation2 + $0x168] sm:$0xf0] }
  0x2a   :  { %1050 = vmatpush.bf16.msra.mxu1 %v10510_v17  ;;  %v14788_v49 = vld [vmem:[#allocation2 + $0x124] sm:$0xf]  ;;  %v10518_v51 = vor.u32 %v14843_v43, %v10515_v48  ;;  %v10441_v52 = vld [vmem:[#allocation2 + $0x248] sm:$0xf]  ;;  %v14834_v53 = vld [vmem:[#allocation2 + $0x28c] sm:$0xf0]  ;;  %v10290_v56 = vor.u32 %v14797_v46, %v10289_v45 }
  0x2b   :  { %1063 = vmatpush.bf16.msra.mxu2 %v10586_v37  ;;  %1077 = vmatpush.bf16.msra.mxu3 %v10590_v39  ;;  %v14825_v54 = vld [vmem:[#allocation2 + $0x24c] sm:$0xf]  ;;  %v10443_v55 = vld [vmem:[#allocation2 + $0x290] sm:$0xf0]  ;;  %v10294_v57 = vor.u32 %v14788_v49, %v10291_v50  ;;  %v10217_v58 = vld [vmem:[#allocation2 + $0x90] sm:$0xf]  ;;  %v10442_v61 = vor.u32 %v14834_v53, %v10441_v52 }
  0x2c   :  { %v14779_v59 = vld [vmem:[#allocation2 + $0xd4] sm:$0xf0]  ;;  %v14770_v60 = vld [vmem:[#allocation2 + $0x94] sm:$0xf]  ;;  %v10219_v62 = vld [vmem:[#allocation2 + $0xd8] sm:$0xf0]  ;;  %v10446_v63 = vor.u32 %v14825_v54, %v10443_v55 }
  0x2d   :  { %1037 = vmatpush.bf16.msra.mxu0 %v10434_v27  ;;  %v10369_v0 = vld [vmem:[#allocation2 + $0x1b8] sm:$0xf]  ;;  %v14816_v1 = vld [vmem:[#allocation2 + $0x1fc] sm:$0xf0]  ;;  %v14807_v2 = vld [vmem:[#allocation2 + $0x1bc] sm:$0xf]  ;;  %v10218_v4 = vor.u32 %v14779_v59, %v10217_v58  ;;  %v10222_v6 = vor.u32 %v14770_v60, %v10219_v62 }
  0x2e   :  { %1051 = vmatpush.bf16.msra.mxu1 %v10438_v31  ;;  %v10371_v3 = vld [vmem:[#allocation2 + $0x200] sm:$0xf0]  ;;  %v10145_v5 = vld [vmem:[#allocation2] sm:$0xf]  ;;  %v14761_v7 = vld [vmem:[#allocation2 + $0x44] sm:$0xf0]  ;;  %v10370_v10 = vor.u32 %v14816_v1, %v10369_v0 }
  0x2f   :  { %1064 = vmatpush.bf16.msra.mxu2 %v10514_v47  ;;  %1078 = vmatpush.bf16.msra.mxu3 %v10518_v51  ;;  %v14752_v8 = vld [vmem:[#allocation2 + $0x4] sm:$0xf]  ;;  %v10147_v9 = vld [vmem:[#allocation2 + $0x48] sm:$0xf0]  ;;  %v10665_v11 = vld [vmem:[#allocation2 + $0x400] sm:$0xf]  ;;  %v10374_v14 = vor.u32 %v14807_v2, %v10371_v3  ;;  %v10146_v18 = vor.u32 %v14761_v7, %v10145_v5 }
  0x30   :  { %v14889_v12 = vld [vmem:[#allocation2 + $0x444] sm:$0xf0]  ;;  %v14880_v13 = vld [vmem:[#allocation2 + $0x404] sm:$0xf]  ;;  %v10667_v15 = vld [vmem:[#allocation2 + $0x448] sm:$0xf0]  ;;  %v10150_v21 = vor.u32 %v14752_v8, %v10147_v9 }
  0x31   :  { %1038 = vmatpush.bf16.msra.mxu0 %v10362_v40  ;;  %v10297_v16 = vld [vmem:[#allocation2 + $0x128] sm:$0xf]  ;;  %v14798_v17 = vld [vmem:[#allocation2 + $0x16c] sm:$0xf0]  ;;  %v14789_v19 = vld [vmem:[#allocation2 + $0x12c] sm:$0xf]  ;;  %v10666_v22 = vor.u32 %v14889_v12, %v10665_v11  ;;  %v10670_v24 = vor.u32 %v14880_v13, %v10667_v15 }
  0x32   :  { %1052 = vmatpush.bf16.msra.mxu1 %v10366_v44  ;;  %v10299_v20 = vld [vmem:[#allocation2 + $0x170] sm:$0xf0]  ;;  %v16232_v23 = vld [vmem:[%s16736_s0] sm:$0xff]  ;;  %v10593_v25 = vld [vmem:[#allocation2 + $0x370] sm:$0xf]  ;;  %v10298_v28 = vor.u32 %v14798_v17, %v10297_v16 }
  0x33   :  { %1065 = vmatpush.bf16.msra.mxu2 %v10442_v61  ;;  %1079 = vmatpush.bf16.msra.mxu3 %v10446_v63  ;;  %v14871_v26 = vld [vmem:[#allocation2 + $0x3b4] sm:$0xf0]  ;;  %v14862_v27 = vld [vmem:[#allocation2 + $0x374] sm:$0xf]  ;;  %v10595_v29 = vld [vmem:[#allocation2 + $0x3b8] sm:$0xf0]  ;;  %v10302_v30 = vor.u32 %v14789_v19, %v10299_v20 }
  0x34   :  { %v10225_v31 = vld [vmem:[#allocation2 + $0x98] sm:$0xf]  ;;  %v14780_v32 = vld [vmem:[#allocation2 + $0xdc] sm:$0xf0]  ;;  %v14771_v33 = vld [vmem:[#allocation2 + $0x9c] sm:$0xf]  ;;  %v10594_v35 = vor.u32 %v14871_v26, %v10593_v25  ;;  %v10598_v37 = vor.u32 %v14862_v27, %v10595_v29 }
  0x35   :  { %1039 = vmatpush.bf16.msra.mxu0 %v10290_v56  ;;  %v10227_v34 = vld [vmem:[#allocation2 + $0xe0] sm:$0xf0]  ;;  %v10521_v36 = vld [vmem:[#allocation2 + $0x2e0] sm:$0xf]  ;;  %v14853_v38 = vld [vmem:[#allocation2 + $0x324] sm:$0xf0]  ;;  %v10226_v41 = vor.u32 %v14780_v32, %v10225_v31 }
  0x36   :  { %1053 = vmatpush.bf16.msra.mxu1 %v10294_v57  ;;  %v14844_v39 = vld [vmem:[#allocation2 + $0x2e4] sm:$0xf]  ;;  %v10523_v40 = vld [vmem:[#allocation2 + $0x328] sm:$0xf0]  ;;  %v10230_v42 = vor.u32 %v14771_v33, %v10227_v34  ;;  %v10153_v43 = vld [vmem:[#allocation2 + $0x8] sm:$0xf]  ;;  %v10522_v49 = vor.u32 %v14853_v38, %v10521_v36 }
  0x37   :  { %1066 = vmatpush.bf16.msra.mxu2 %v10370_v10  ;;  %1080 = vmatpush.bf16.msra.mxu3 %v10374_v14  ;;  %v14762_v44 = vld [vmem:[#allocation2 + $0x4c] sm:$0xf0]  ;;  %v14753_v45 = vld [vmem:[#allocation2 + $0xc] sm:$0xf]  ;;  %v10155_v46 = vld [vmem:[#allocation2 + $0x50] sm:$0xf0]  ;;  %v10526_v52 = vor.u32 %v14844_v39, %v10523_v40 }
  0x38   :  { %v10673_v47 = vld [vmem:[#allocation2 + $0x408] sm:$0xf]  ;;  %v14890_v48 = vld [vmem:[#allocation2 + $0x44c] sm:$0xf0]  ;;  %v14881_v50 = vld [vmem:[#allocation2 + $0x40c] sm:$0xf]  ;;  %v10154_v55 = vor.u32 %v14762_v44, %v10153_v43  ;;  %v10158_v58 = vor.u32 %v14753_v45, %v10155_v46 }
  0x39   :  { %1040 = vmatpush.bf16.msra.mxu0 %v10218_v4  ;;  %v10675_v51 = vld [vmem:[#allocation2 + $0x450] sm:$0xf0]  ;;  %v10449_v53 = vld [vmem:[#allocation2 + $0x250] sm:$0xf]  ;;  %v14835_v54 = vld [vmem:[#allocation2 + $0x294] sm:$0xf0]  ;;  %v10674_v59 = vor.u32 %v14890_v48, %v10673_v47 }
  0x3a   :  { %1054 = vmatpush.bf16.msra.mxu1 %v10222_v6  ;;  %v14826_v56 = vld [vmem:[#allocation2 + $0x254] sm:$0xf]  ;;  %v10451_v57 = vld [vmem:[#allocation2 + $0x298] sm:$0xf0]  ;;  %v10678_v60 = vor.u32 %v14881_v50, %v10675_v51  ;;  %v10601_v61 = vld [vmem:[#allocation2 + $0x378] sm:$0xf]  ;;  %v10450_v63 = vor.u32 %v14835_v54, %v10449_v53 }
  0x3b   :  { %1067 = vmatpush.bf16.msra.mxu2 %v10298_v28  ;;  %1081 = vmatpush.bf16.msra.mxu3 %v10302_v30  ;;  %v14872_v62 = vld [vmem:[#allocation2 + $0x3bc] sm:$0xf0]  ;;  %v14863_v0 = vld [vmem:[#allocation2 + $0x37c] sm:$0xf]  ;;  %v10603_v1 = vld [vmem:[#allocation2 + $0x3c0] sm:$0xf0]  ;;  %v10454_v2 = vor.u32 %v14826_v56, %v10451_v57 }
  0x3c   :  { %v10377_v3 = vld [vmem:[#allocation2 + $0x1c0] sm:$0xf]  ;;  %v14817_v4 = vld [vmem:[#allocation2 + $0x204] sm:$0xf0]  ;;  %v14808_v5 = vld [vmem:[#allocation2 + $0x1c4] sm:$0xf]  ;;  %v10602_v7 = vor.u32 %v14872_v62, %v10601_v61  ;;  %v10606_v8 = vor.u32 %v14863_v0, %v10603_v1 }
  0x3d   :  { %1041 = vmatpush.bf16.msra.mxu0 %v10146_v18  ;;  %v10379_v6 = vld [vmem:[#allocation2 + $0x208] sm:$0xf0]  ;;  %v10529_v9 = vld [vmem:[#allocation2 + $0x2e8] sm:$0xf]  ;;  %v14854_v10 = vld [vmem:[#allocation2 + $0x32c] sm:$0xf0]  ;;  %v10378_v11 = vor.u32 %v14817_v4, %v10377_v3 }
  0x3e   :  { %1055 = vmatpush.bf16.msra.mxu1 %v10150_v21  ;;  %v14845_v12 = vld [vmem:[#allocation2 + $0x2ec] sm:$0xf]  ;;  %v10531_v13 = vld [vmem:[#allocation2 + $0x330] sm:$0xf0]  ;;  %v10382_v14 = vor.u32 %v14808_v5, %v10379_v6  ;;  %v10305_v15 = vld [vmem:[#allocation2 + $0x130] sm:$0xf]  ;;  %v10530_v19 = vor.u32 %v14854_v10, %v10529_v9 }
  0x3f   :  { %1068 = vmatpush.bf16.msra.mxu2 %v10226_v41  ;;  %1082 = vmatpush.bf16.msra.mxu3 %v10230_v42  ;;  %v14799_v16 = vld [vmem:[#allocation2 + $0x174] sm:$0xf0]  ;;  %v14790_v17 = vld [vmem:[#allocation2 + $0x134] sm:$0xf]  ;;  %v10307_v18 = vld [vmem:[#allocation2 + $0x178] sm:$0xf0]  ;;  %v10534_v20 = vor.u32 %v14845_v12, %v10531_v13 }
  0x40   :  { %1042 = vmatmul.bf16.vlgmr.msra.gmra.mxu0 %v16232_v23  ;;  %v10457_v21 = vld [vmem:[#allocation2 + $0x258] sm:$0xf]  ;;  %v14827_v25 = vld [vmem:[#allocation2 + $0x25c] sm:$0xf]  ;;  %v10459_v26 = vld [vmem:[#allocation2 + $0x2a0] sm:$0xf0]  ;;  %v10310_v27 = vor.u32 %v14790_v17, %v10307_v18 }
  0x41   :  { %1090 = vmatpush.bf16.msrb.mxu0 %v10666_v22  ;;  %1056 = vmatmul.bf16.vlgmr.msra.gmra.mxu1 %v16232_v23  ;;  %v14836_v22 = vld [vmem:[#allocation2 + $0x29c] sm:$0xf0]  ;;  %v14781_v29 = vld [vmem:[#allocation2 + $0xe4] sm:$0xf0]  ;;  %v14772_v30 = vld [vmem:[#allocation2 + $0xa4] sm:$0xf]  ;;  %v10462_v34 = vor.u32 %v14827_v25, %v10459_v26 }
  0x42   :  { %1104 = vmatpush.bf16.msrb.mxu1 %v10670_v24  ;;  %v10306_v24 = vor.u32 %v14799_v16, %v10305_v15  ;;  %v10233_v28 = vld [vmem:[#allocation2 + $0xa0] sm:$0xf]  ;;  %v10235_v31 = vld [vmem:[#allocation2 + $0xe8] sm:$0xf0]  ;;  %v10458_v32 = vor.u32 %v14836_v22, %v10457_v21  ;;  %v10161_v33 = vld [vmem:[#allocation2 + $0x10] sm:$0xf] }
  0x43   :  { %1069 = vmatpush.bf16.msra.mxu2 %v10154_v55  ;;  %1083 = vmatpush.bf16.msra.mxu3 %v10158_v58  ;;  %v14818_v36 = vld [vmem:[#allocation2 + $0x20c] sm:$0xf0]  ;;  %v14763_v38 = vld [vmem:[#allocation2 + $0x54] sm:$0xf0]  ;;  %v14809_v39 = vld [vmem:[#allocation2 + $0x1cc] sm:$0xf]  ;;  %v10238_v41 = vor.u32 %v14772_v30, %v10235_v31 }
  0x44   :  { %v10387_v40 = vld [vmem:[#allocation2 + $0x210] sm:$0xf0]  ;;  %v10163_v43 = vld [vmem:[#allocation2 + $0x58] sm:$0xf0]  ;;  %v10681_v44 = vld [vmem:[#allocation2 + $0x410] sm:$0xf] }
  0x45   :  { %1091 = vmatpush.bf16.msrb.mxu0 %v10594_v35  ;;  %v10385_v35 = vld [vmem:[#allocation2 + $0x1c8] sm:$0xf]  ;;  %v14754_v42 = vld [vmem:[#allocation2 + $0x14] sm:$0xf]  ;;  %v14891_v45 = vld [vmem:[#allocation2 + $0x454] sm:$0xf0] }
  0x46   :  { %1105 = vmatpush.bf16.msrb.mxu1 %v10598_v37  ;;  %1070 = vmatmul.bf16.vlgmr.msra.gmra.mxu2 %v16232_v23  ;;  %v10234_v37 = vor.u32 %v14781_v29, %v10233_v28  ;;  %v14882_v46 = vld [vmem:[#allocation2 + $0x414] sm:$0xf]  ;;  %v10386_v47 = vor.u32 %v14818_v36, %v10385_v35  ;;  %v10683_v48 = vld [vmem:[#allocation2 + $0x458] sm:$0xf0]  ;;  %v10313_v50 = vld [vmem:[#allocation2 + $0x138] sm:$0xf]  ;;  %v10166_v55 = vor.u32 %v14754_v42, %v10163_v43 }
  0x47   :  { %1118 = vmatpush.bf16.msrb.mxu2 %v10674_v59  ;;  %1132 = vmatpush.bf16.msrb.mxu3 %v10678_v60  ;;  %v14800_v51 = vld [vmem:[#allocation2 + $0x17c] sm:$0xf0]  ;;  %v14791_v53 = vld [vmem:[#allocation2 + $0x13c] sm:$0xf]  ;;  %v10315_v54 = vld [vmem:[#allocation2 + $0x180] sm:$0xf0]  ;;  %v10682_v56 = vor.u32 %v14891_v45, %v10681_v44  ;;  %v10686_v59 = vor.u32 %v14882_v46, %v10683_v48 }
  0x48   :  { %1084 = vmatmul.bf16.vlgmr.msra.gmra.mxu3 %v16232_v23  ;;  %v10609_v57 = vld [vmem:[#allocation2 + $0x380] sm:$0xf]  ;;  %v14873_v58 = vld [vmem:[#allocation2 + $0x3c4] sm:$0xf0]  ;;  %v14864_v60 = vld [vmem:[#allocation2 + $0x384] sm:$0xf]  ;;  %v10314_v61 = vor.u32 %v14800_v51, %v10313_v50 }
  0x49   :  { %1092 = vmatpush.bf16.msrb.mxu0 %v10522_v49  ;;  %v10390_v49 = vor.u32 %v14809_v39, %v10387_v40  ;;  %v10611_v62 = vld [vmem:[#allocation2 + $0x3c8] sm:$0xf0]  ;;  %v10241_v0 = vld [vmem:[#allocation2 + $0xa8] sm:$0xf]  ;;  %v14782_v1 = vld [vmem:[#allocation2 + $0xec] sm:$0xf0]  ;;  %v10610_v6 = vor.u32 %v14873_v58, %v10609_v57 }
  0x4a   :  { %1106 = vmatpush.bf16.msrb.mxu1 %v10526_v52  ;;  %v10162_v52 = vor.u32 %v14763_v38, %v10161_v33  ;;  %v14855_v3 = vld [vmem:[#allocation2 + $0x334] sm:$0xf0]  ;;  %v14773_v4 = vld [vmem:[#allocation2 + $0xac] sm:$0xf]  ;;  %v10243_v5 = vld [vmem:[#allocation2 + $0xf0] sm:$0xf0]  ;;  %v10614_v9 = vor.u32 %v14864_v60, %v10611_v62  ;;  %v10242_v10 = vor.u32 %v14782_v1, %v10241_v0 }
  0x4b   :  { %1119 = vmatpush.bf16.msrb.mxu2 %v10602_v7  ;;  %1133 = vmatpush.bf16.msrb.mxu3 %v10606_v8  ;;  %v14846_v7 = vld [vmem:[#allocation2 + $0x2f4] sm:$0xf]  ;;  %v10539_v8 = vld [vmem:[#allocation2 + $0x338] sm:$0xf0]  ;;  %v10169_v12 = vld [vmem:[#allocation2 + $0x18] sm:$0xf] }
  0x4c   :  { %v14764_v13 = vld [vmem:[#allocation2 + $0x5c] sm:$0xf0]  ;;  %v10171_v15 = vld [vmem:[#allocation2 + $0x60] sm:$0xf0]  ;;  %v10689_v16 = vld [vmem:[#allocation2 + $0x418] sm:$0xf]  ;;  %v10542_v21 = vor.u32 %v14846_v7, %v10539_v8 }
  0x4d   :  { %1093 = vmatpush.bf16.msrb.mxu0 %v10450_v63  ;;  %v10318_v63 = vor.u32 %v14791_v53, %v10315_v54  ;;  %v14892_v17 = vld [vmem:[#allocation2 + $0x45c] sm:$0xf0]  ;;  %v10170_v25 = vor.u32 %v14764_v13, %v10169_v12  ;;  %v14828_v26 = vld [vmem:[#allocation2 + $0x264] sm:$0xf]  ;;  %v10617_v31 = vld [vmem:[#allocation2 + $0x388] sm:$0xf] }
  0x4e   :  { %1107 = vmatpush.bf16.msrb.mxu1 %v10454_v2  ;;  %v10537_v2 = vld [vmem:[#allocation2 + $0x2f0] sm:$0xf]  ;;  %v10465_v22 = vld [vmem:[#allocation2 + $0x260] sm:$0xf]  ;;  %v10690_v29 = vor.u32 %v14892_v17, %v10689_v16  ;;  %v10619_v35 = vld [vmem:[#allocation2 + $0x3d0] sm:$0xf0] }
  0x4f   :  { %1120 = vmatpush.bf16.msrb.mxu2 %v10530_v19  ;;  %1134 = vmatpush.bf16.msrb.mxu3 %v10534_v20  ;;  %v10538_v18 = vor.u32 %v14855_v3, %v10537_v2  ;;  %v14883_v19 = vld [vmem:[#allocation2 + $0x41c] sm:$0xf]  ;;  %v10691_v20 = vld [vmem:[#allocation2 + $0x460] sm:$0xf0]  ;;  %v14819_v38 = vld [vmem:[#allocation2 + $0x214] sm:$0xf0] }
  0x50   :  { %v10694_v30 = vor.u32 %v14883_v19, %v10691_v20  ;;  %v14810_v39 = vld [vmem:[#allocation2 + $0x1d4] sm:$0xf]  ;;  %v10395_v40 = vld [vmem:[#allocation2 + $0x218] sm:$0xf0]  ;;  %v10545_v43 = vld [vmem:[#allocation2 + $0x2f8] sm:$0xf] }
  0x51   :  { %1094 = vmatpush.bf16.msrb.mxu0 %v10378_v11  ;;  %v10246_v11 = vor.u32 %v14773_v4, %v10243_v5  ;;  %v14856_v44 = vld [vmem:[#allocation2 + $0x33c] sm:$0xf0]  ;;  %v14847_v46 = vld [vmem:[#allocation2 + $0x2fc] sm:$0xf]  ;;  %v10398_v48 = vor.u32 %v14810_v39, %v10395_v40  ;;  %v14801_v50 = vld [vmem:[#allocation2 + $0x184] sm:$0xf0] }
  0x52   :  { %1108 = vmatpush.bf16.msrb.mxu1 %v10382_v14  ;;  %v14755_v14 = vld [vmem:[#allocation2 + $0x1c] sm:$0xf]  ;;  %v14792_v51 = vld [vmem:[#allocation2 + $0x144] sm:$0xf]  ;;  %v10546_v53 = vor.u32 %v14856_v44, %v10545_v43  ;;  %v14829_v58 = vld [vmem:[#allocation2 + $0x26c] sm:$0xf] }
  0x53   :  { %1121 = vmatpush.bf16.msrb.mxu2 %v10458_v32  ;;  %1135 = vmatpush.bf16.msrb.mxu3 %v10462_v34  ;;  %v10174_v28 = vor.u32 %v14755_v14, %v10171_v15  ;;  %v14874_v32 = vld [vmem:[#allocation2 + $0x3cc] sm:$0xf0]  ;;  %v14865_v34 = vld [vmem:[#allocation2 + $0x38c] sm:$0xf]  ;;  %v14783_v62 = vld [vmem:[#allocation2 + $0xf4] sm:$0xf0] }
  0x54   :  { %v10622_v42 = vor.u32 %v14865_v34, %v10619_v35  ;;  %v10251_v0 = vld [vmem:[#allocation2 + $0xf8] sm:$0xf0]  ;;  %v10401_v3 = vld [vmem:[#allocation2 + $0x1d8] sm:$0xf]  ;;  %v14820_v4 = vld [vmem:[#allocation2 + $0x21c] sm:$0xf0] }
  0x55   :  { %1095 = vmatpush.bf16.msrb.mxu0 %v10306_v24  ;;  %v14837_v24 = vld [vmem:[#allocation2 + $0x2a4] sm:$0xf0]  ;;  %v14811_v7 = vld [vmem:[#allocation2 + $0x1dc] sm:$0xf]  ;;  %v10403_v8 = vld [vmem:[#allocation2 + $0x220] sm:$0xf0]  ;;  %v10402_v16 = vor.u32 %v14820_v4, %v10401_v3 }
  0x56   :  { %1109 = vmatpush.bf16.msrb.mxu1 %v10310_v27  ;;  %v10467_v27 = vld [vmem:[#allocation2 + $0x2a8] sm:$0xf0]  ;;  %v10466_v33 = vor.u32 %v14837_v24, %v10465_v22  ;;  %v10697_v13 = vld [vmem:[#allocation2 + $0x420] sm:$0xf]  ;;  %v14893_v14 = vld [vmem:[#allocation2 + $0x464] sm:$0xf0] }
  0x57   :  { %1122 = vmatpush.bf16.msrb.mxu2 %v10386_v47  ;;  %1136 = vmatpush.bf16.msrb.mxu3 %v10390_v49  ;;  %v10470_v36 = vor.u32 %v14828_v26, %v10467_v27  ;;  %v10547_v47 = vld [vmem:[#allocation2 + $0x340] sm:$0xf0]  ;;  %v10321_v49 = vld [vmem:[#allocation2 + $0x140] sm:$0xf]  ;;  %v10179_v12 = vld [vmem:[#allocation2 + $0x68] sm:$0xf0]  ;;  %v10698_v26 = vor.u32 %v14893_v14, %v10697_v13 }
  0x58   :  { %v10550_v54 = vor.u32 %v14847_v46, %v10547_v47  ;;  %v10322_v57 = vor.u32 %v14801_v50, %v10321_v49  ;;  %v14884_v15 = vld [vmem:[#allocation2 + $0x424] sm:$0xf]  ;;  %v10699_v17 = vld [vmem:[#allocation2 + $0x468] sm:$0xf0]  ;;  %v10329_v19 = vld [vmem:[#allocation2 + $0x148] sm:$0xf] }
  0x59   :  { %1096 = vmatpush.bf16.msrb.mxu0 %v10234_v37  ;;  %v10393_v37 = vld [vmem:[#allocation2 + $0x1d0] sm:$0xf]  ;;  %v14793_v22 = vld [vmem:[#allocation2 + $0x14c] sm:$0xf]  ;;  %v10331_v24 = vld [vmem:[#allocation2 + $0x190] sm:$0xf0]  ;;  %v10702_v27 = vor.u32 %v14884_v15, %v10699_v17 }
  0x5a   :  { %1110 = vmatpush.bf16.msrb.mxu1 %v10238_v41  ;;  %v10618_v41 = vor.u32 %v14874_v32, %v10617_v31  ;;  %v10394_v45 = vor.u32 %v14819_v38, %v10393_v37  ;;  %v14802_v20 = vld [vmem:[#allocation2 + $0x18c] sm:$0xf0]  ;;  %v10627_v32 = vld [vmem:[#allocation2 + $0x3d8] sm:$0xf0]  ;;  %v10257_v34 = vld [vmem:[#allocation2 + $0xb8] sm:$0xf] }
  0x5b   :  { %1123 = vmatpush.bf16.msrb.mxu2 %v10314_v61  ;;  %1137 = vmatpush.bf16.msrb.mxu3 %v10318_v63  ;;  %v10249_v61 = vld [vmem:[#allocation2 + $0xb0] sm:$0xf]  ;;  %v14774_v63 = vld [vmem:[#allocation2 + $0xb4] sm:$0xf]  ;;  %v10330_v31 = vor.u32 %v14802_v20, %v10329_v19  ;;  %v14784_v35 = vld [vmem:[#allocation2 + $0xfc] sm:$0xf0] }
  0x5c   :  { %v10250_v5 = vor.u32 %v14783_v62, %v10249_v61  ;;  %v10259_v37 = vld [vmem:[#allocation2 + $0x100] sm:$0xf0]  ;;  %v10553_v39 = vld [vmem:[#allocation2 + $0x300] sm:$0xf]  ;;  %v10555_v43 = vld [vmem:[#allocation2 + $0x348] sm:$0xf0]  ;;  %v10258_v44 = vor.u32 %v14784_v35, %v10257_v34 }
  0x5d   :  { %1097 = vmatpush.bf16.msrb.mxu0 %v10162_v52  ;;  %v10323_v52 = vld [vmem:[#allocation2 + $0x188] sm:$0xf0]  ;;  %v10185_v46 = vld [vmem:[#allocation2 + $0x28] sm:$0xf]  ;;  %v14766_v47 = vld [vmem:[#allocation2 + $0x6c] sm:$0xf0] }
  0x5e   :  { %1111 = vmatpush.bf16.msrb.mxu1 %v10166_v55  ;;  %v10473_v55 = vld [vmem:[#allocation2 + $0x268] sm:$0xf]  ;;  %v10326_v60 = vor.u32 %v14792_v51, %v10323_v52  ;;  %v10187_v49 = vld [vmem:[#allocation2 + $0x70] sm:$0xf0]  ;;  %v14894_v51 = vld [vmem:[#allocation2 + $0x46c] sm:$0xf0] }
  0x5f   :  { %1124 = vmatpush.bf16.msrb.mxu2 %v10242_v10  ;;  %1138 = vmatpush.bf16.msrb.mxu3 %v10246_v11  ;;  %v14765_v10 = vld [vmem:[#allocation2 + $0x64] sm:$0xf0]  ;;  %v14756_v11 = vld [vmem:[#allocation2 + $0x24] sm:$0xf]  ;;  %v14867_v3 = vld [vmem:[#allocation2 + $0x39c] sm:$0xf] }
  0x60   :  { %1098 = vmatmul.bf16.vlgmr.msrb.gmra.mxu0 %v16232_v23  ;;  %v10705_v50 = vld [vmem:[#allocation2 + $0x428] sm:$0xf]  ;;  %v10635_v4 = vld [vmem:[#allocation2 + $0x3e0] sm:$0xf0]  ;;  %v14858_v13 = vld [vmem:[#allocation2 + $0x34c] sm:$0xf0] }
  0x61   :  { %1146 = vmatpush.bf16.msra.mxu0 %v10682_v56  ;;  %1112 = vmatmul.bf16.vlgmr.msrb.gmra.mxu1 %v16232_v23  ;;  %v14838_v56 = vld [vmem:[#allocation2 + $0x2ac] sm:$0xf0]  ;;  %v10706_v62 = vor.u32 %v14894_v51, %v10705_v50  ;;  %v14849_v15 = vld [vmem:[#allocation2 + $0x30c] sm:$0xf]  ;;  %v14803_v19 = vld [vmem:[#allocation2 + $0x194] sm:$0xf0] }
  0x62   :  { %1160 = vmatpush.bf16.msra.mxu1 %v10686_v59  ;;  %v10475_v59 = vld [vmem:[#allocation2 + $0x2b0] sm:$0xf0]  ;;  %v10474_v1 = vor.u32 %v14838_v56, %v10473_v55  ;;  %v10481_v56 = vld [vmem:[#allocation2 + $0x270] sm:$0xf]  ;;  %v10267_v34 = vld [vmem:[#allocation2 + $0x108] sm:$0xf0] }
  0x63   :  { %1125 = vmatpush.bf16.msrb.mxu2 %v10170_v25  ;;  %1139 = vmatpush.bf16.msrb.mxu3 %v10174_v28  ;;  %v10478_v2 = vor.u32 %v14829_v58, %v10475_v59  ;;  %v10182_v25 = vor.u32 %v14756_v11, %v10179_v12  ;;  %v10625_v28 = vld [vmem:[#allocation2 + $0x390] sm:$0xf]  ;;  %v10186_v58 = vor.u32 %v14766_v47, %v10185_v46  ;;  %v14830_v59 = vld [vmem:[#allocation2 + $0x274] sm:$0xf]  ;;  %v10561_v12 = vld [vmem:[#allocation2 + $0x308] sm:$0xf] }
  0x64   :  { %v10638_v11 = vor.u32 %v14867_v3, %v10635_v4  ;;  %v14794_v20 = vld [vmem:[#allocation2 + $0x154] sm:$0xf]  ;;  %v10195_v46 = vld [vmem:[#allocation2 + $0x78] sm:$0xf0]  ;;  %v10713_v47 = vld [vmem:[#allocation2 + $0x430] sm:$0xf] }
  0x65   :  { %1147 = vmatpush.bf16.msra.mxu0 %v10610_v6  ;;  %v10177_v6 = vld [vmem:[#allocation2 + $0x20] sm:$0xf]  ;;  %v10715_v51 = vld [vmem:[#allocation2 + $0x478] sm:$0xf0]  ;;  %v10273_v3 = vld [vmem:[#allocation2 + $0xc8] sm:$0xf] }
  0x66   :  { %1161 = vmatpush.bf16.msra.mxu1 %v10614_v9  ;;  %1126 = vmatmul.bf16.vlgmr.msrb.gmra.mxu2 %v16232_v23  ;;  %v10254_v9 = vor.u32 %v14774_v63, %v10251_v0  ;;  %v10633_v0 = vld [vmem:[#allocation2 + $0x398] sm:$0xf]  ;;  %v14786_v4 = vld [vmem:[#allocation2 + $0x10c] sm:$0xf0] }
  0x67   :  { %1174 = vmatpush.bf16.msra.mxu2 %v10690_v29  ;;  %1188 = vmatpush.bf16.msra.mxu3 %v10694_v30  ;;  %v14875_v29 = vld [vmem:[#allocation2 + $0x3d4] sm:$0xf0]  ;;  %v14866_v30 = vld [vmem:[#allocation2 + $0x394] sm:$0xf] }
  0x68   :  { %1140 = vmatmul.bf16.vlgmr.msrb.gmra.mxu3 %v16232_v23  ;;  %v10626_v38 = vor.u32 %v14875_v29, %v10625_v28  ;;  %v10630_v40 = vor.u32 %v14866_v30, %v10627_v32  ;;  %v14831_v28 = vld [vmem:[#allocation2 + $0x27c] sm:$0xf]  ;;  %v10491_v29 = vld [vmem:[#allocation2 + $0x2c0] sm:$0xf0]  ;;  %v14785_v32 = vld [vmem:[#allocation2 + $0x104] sm:$0xf0] }
  0x69   :  { %1148 = vmatpush.bf16.msra.mxu0 %v10538_v18  ;;  %v10406_v18 = vor.u32 %v14811_v7, %v10403_v8  ;;  %v14821_v7 = vld [vmem:[#allocation2 + $0x224] sm:$0xf0]  ;;  %v14812_v8 = vld [vmem:[#allocation2 + $0x1e4] sm:$0xf] }
  0x6a   :  { %1162 = vmatpush.bf16.msra.mxu1 %v10542_v21  ;;  %v10178_v21 = vor.u32 %v14765_v10, %v10177_v6  ;;  %v10409_v6 = vld [vmem:[#allocation2 + $0x1e0] sm:$0xf] }
  0x6b   :  { %1175 = vmatpush.bf16.msra.mxu2 %v10618_v41  ;;  %1189 = vmatpush.bf16.msra.mxu3 %v10622_v42  ;;  %v14857_v41 = vld [vmem:[#allocation2 + $0x344] sm:$0xf0]  ;;  %v14848_v42 = vld [vmem:[#allocation2 + $0x304] sm:$0xf]  ;;  %v10410_v14 = vor.u32 %v14821_v7, %v10409_v6  ;;  %v10275_v6 = vld [vmem:[#allocation2 + $0x110] sm:$0xf0] }
  0x6c   :  { %v10554_v52 = vor.u32 %v14857_v41, %v10553_v39  ;;  %v10558_v55 = vor.u32 %v14848_v42, %v10555_v43  ;;  %v14813_v41 = vld [vmem:[#allocation2 + $0x1ec] sm:$0xf]  ;;  %v10419_v42 = vld [vmem:[#allocation2 + $0x230] sm:$0xf0] }
  0x6d   :  { %1149 = vmatpush.bf16.msra.mxu0 %v10466_v33  ;;  %v10334_v33 = vor.u32 %v14793_v22, %v10331_v24  ;;  %v10562_v22 = vor.u32 %v14858_v13, %v10561_v12  ;;  %v10571_v12 = vld [vmem:[#allocation2 + $0x358] sm:$0xf0]  ;;  %v10274_v13 = vor.u32 %v14786_v4, %v10273_v3 }
  0x6e   :  { %1163 = vmatpush.bf16.msra.mxu1 %v10470_v36  ;;  %v14775_v36 = vld [vmem:[#allocation2 + $0xbc] sm:$0xf] }
  0x6f   :  { %1176 = vmatpush.bf16.msra.mxu2 %v10546_v53  ;;  %1190 = vmatpush.bf16.msra.mxu3 %v10550_v54  ;;  %v14885_v53 = vld [vmem:[#allocation2 + $0x42c] sm:$0xf]  ;;  %v10707_v54 = vld [vmem:[#allocation2 + $0x470] sm:$0xf0]  ;;  %v10283_v3 = vld [vmem:[#allocation2 + $0x118] sm:$0xf0] }
  0x70   :  { %v10710_v63 = vor.u32 %v14885_v53, %v10707_v54  ;;  %v10345_v53 = vld [vmem:[#allocation2 + $0x158] sm:$0xf]  ;;  %v14804_v54 = vld [vmem:[#allocation2 + $0x19c] sm:$0xf0] }
  0x71   :  { %1150 = vmatpush.bf16.msra.mxu0 %v10394_v45  ;;  %v10262_v45 = vor.u32 %v14775_v36, %v10259_v37  ;;  %v10494_v36 = vor.u32 %v14831_v28, %v10491_v29  ;;  %v10417_v37 = vld [vmem:[#allocation2 + $0x1e8] sm:$0xf]  ;;  %v14832_v29 = vld [vmem:[#allocation2 + $0x284] sm:$0xf] }
  0x72   :  { %1164 = vmatpush.bf16.msra.mxu1 %v10398_v48  ;;  %v14757_v48 = vld [vmem:[#allocation2 + $0x2c] sm:$0xf] }
  0x73   :  { %1177 = vmatpush.bf16.msra.mxu2 %v10474_v1  ;;  %1191 = vmatpush.bf16.msra.mxu3 %v10478_v2  ;;  %v10190_v61 = vor.u32 %v14757_v48, %v10187_v49  ;;  %v14876_v1 = vld [vmem:[#allocation2 + $0x3dc] sm:$0xf0]  ;;  %v14895_v48 = vld [vmem:[#allocation2 + $0x474] sm:$0xf0]  ;;  %v14886_v49 = vld [vmem:[#allocation2 + $0x434] sm:$0xf] }
  0x74   :  { %v10634_v10 = vor.u32 %v14876_v1, %v10633_v0  ;;  %v10346_v0 = vor.u32 %v14804_v54, %v10345_v53  ;;  %v10643_v1 = vld [vmem:[#allocation2 + $0x3e8] sm:$0xf0]  ;;  %v14805_v53 = vld [vmem:[#allocation2 + $0x1a4] sm:$0xf0]  ;;  %v14796_v54 = vld [vmem:[#allocation2 + $0x164] sm:$0xf] }
  0x75   :  { %1151 = vmatpush.bf16.msra.mxu0 %v10322_v57  ;;  %v14839_v57 = vld [vmem:[#allocation2 + $0x2b4] sm:$0xf0] }
  0x76   :  { %1165 = vmatpush.bf16.msra.mxu1 %v10326_v60  ;;  %v10483_v60 = vld [vmem:[#allocation2 + $0x2b8] sm:$0xf0]  ;;  %v10482_v2 = vor.u32 %v14839_v57, %v10481_v56  ;;  %v10347_v57 = vld [vmem:[#allocation2 + $0x1a0] sm:$0xf0] }
  0x77   :  { %1178 = vmatpush.bf16.msra.mxu2 %v10402_v16  ;;  %1192 = vmatpush.bf16.msra.mxu3 %v10406_v18  ;;  %v10563_v16 = vld [vmem:[#allocation2 + $0x350] sm:$0xf0]  ;;  %v10337_v18 = vld [vmem:[#allocation2 + $0x150] sm:$0xf]  ;;  %v14795_v56 = vld [vmem:[#allocation2 + $0x15c] sm:$0xf] }
  0x78   :  { %v10566_v24 = vor.u32 %v14849_v15, %v10563_v16  ;;  %v10201_v15 = vld [vmem:[#allocation2 + $0x38] sm:$0xf]  ;;  %v14768_v16 = vld [vmem:[#allocation2 + $0x7c] sm:$0xf0] }
  0x79   :  { %1152 = vmatpush.bf16.msra.mxu0 %v10250_v5  ;;  %v10486_v5 = vor.u32 %v14830_v59, %v10483_v60  ;;  %v10714_v59 = vor.u32 %v14895_v48, %v10713_v47  ;;  %v10718_v60 = vor.u32 %v14886_v49, %v10715_v51  ;;  %v10202_v28 = vor.u32 %v14768_v16, %v10201_v15  ;;  %v14907_v47 = vld [vmem:[#allocation6 + $0x54] sm:$0xf0]  ;;  %v10825_v49 = vld [vmem:[#allocation6 + $0xd0] sm:$0xf]  ;;  %v14910_v15 = vld [vmem:[#allocation6 + $0x74] sm:$0xf] }
  0x7a   :  { %1166 = vmatpush.bf16.msra.mxu1 %v10254_v9  ;;  %v10411_v9 = vld [vmem:[#allocation2 + $0x228] sm:$0xf0] }
  0x7b   :  { %1179 = vmatpush.bf16.msra.mxu2 %v10330_v31  ;;  %1193 = vmatpush.bf16.msra.mxu3 %v10334_v33  ;;  %v10414_v17 = vor.u32 %v14812_v8, %v10411_v9  ;;  %v10265_v31 = vld [vmem:[#allocation2 + $0xc0] sm:$0xf]  ;;  %v14776_v33 = vld [vmem:[#allocation2 + $0xc4] sm:$0xf]  ;;  %v10569_v8 = vld [vmem:[#allocation2 + $0x310] sm:$0xf] }
  0x7c   :  { %v10266_v39 = vor.u32 %v14785_v32, %v10265_v31  ;;  %v10270_v43 = vor.u32 %v14776_v33, %v10267_v34  ;;  %v10769_v34 = vld [vmem:[#allocation6 + $0x60] sm:$0xf]  ;;  %v10779_v16 = vld [vmem:[#allocation6 + $0x78] sm:$0xf0] }
  0x7d   :  { %1153 = vmatpush.bf16.msra.mxu0 %v10178_v21  ;;  %v10339_v21 = vld [vmem:[#allocation2 + $0x198] sm:$0xf0] }
  0x7e   :  { %1167 = vmatpush.bf16.msra.mxu1 %v10182_v25  ;;  %v10489_v25 = vld [vmem:[#allocation2 + $0x278] sm:$0xf]  ;;  %v10342_v30 = vor.u32 %v14794_v20, %v10339_v21  ;;  %v14911_v20 = vld [vmem:[#allocation6 + $0x74] sm:$0xf0] }
  0x7f   :  { %1180 = vmatpush.bf16.msra.mxu2 %v10258_v44  ;;  %1194 = vmatpush.bf16.msra.mxu3 %v10262_v45  ;;  %v14767_v44 = vld [vmem:[#allocation2 + $0x74] sm:$0xf0]  ;;  %v14758_v45 = vld [vmem:[#allocation2 + $0x34] sm:$0xf] }
  0x80   :  { %1154 = vmatmul.bf16.vlgmr.msra.gmra.mxu0 %v16232_v23 }
  0x81   :  { %1202 = vmatpush.bf16.msrb.mxu0 %v10698_v26  ;;  %1168 = vmatmul.bf16.vlgmr.msra.gmra.mxu1 %v16232_v23  ;;  %v14840_v26 = vld [vmem:[#allocation2 + $0x2bc] sm:$0xf0] }
  0x82   :  { %1216 = vmatpush.bf16.msrb.mxu1 %v10702_v27  ;;  %v10338_v27 = vor.u32 %v14803_v19, %v10337_v18  ;;  %v10490_v35 = vor.u32 %v14840_v26, %v10489_v25  ;;  %v10203_v18 = vld [vmem:[#allocation2 + $0x80] sm:$0xf0]  ;;  %v10497_v26 = vld [vmem:[#allocation2 + $0x280] sm:$0xf] }
  0x83   :  { %1181 = vmatpush.bf16.msra.mxu2 %v10186_v58  ;;  %1195 = vmatpush.bf16.msra.mxu3 %v10190_v61  ;;  %v10198_v58 = vor.u32 %v14758_v45, %v10195_v46  ;;  %v10641_v61 = vld [vmem:[#allocation2 + $0x3a0] sm:$0xf] }
  0x84   :  { %v10777_v19 = vld [vmem:[#allocation6 + $0x70] sm:$0xf] }
  0x85   :  { %1203 = vmatpush.bf16.msrb.mxu0 %v10626_v38  ;;  %v14822_v38 = vld [vmem:[#allocation2 + $0x22c] sm:$0xf0]  ;;  %v10778_v32 = vor.u32 %v14911_v20, %v10777_v19  ;;  %v10761_v46 = vld [vmem:[#allocation6 + $0x50] sm:$0xf] }
  0x86   :  { %1217 = vmatpush.bf16.msrb.mxu1 %v10630_v40  ;;  %1182 = vmatmul.bf16.vlgmr.msra.gmra.mxu2 %v16232_v23  ;;  %v10193_v40 = vld [vmem:[#allocation2 + $0x30] sm:$0xf]  ;;  %v10418_v50 = vor.u32 %v14822_v38, %v10417_v37  ;;  %v14925_v38 = vld [vmem:[#allocation6 + $0xe4] sm:$0xf0] }
  0x87   :  { %1230 = vmatpush.bf16.msrb.mxu2 %v10706_v62  ;;  %1244 = vmatpush.bf16.msrb.mxu3 %v10710_v63  ;;  %v14877_v62 = vld [vmem:[#allocation2 + $0x3e4] sm:$0xf0]  ;;  %v14868_v63 = vld [vmem:[#allocation2 + $0x3a4] sm:$0xf]  ;;  %v10833_v37 = vld [vmem:[#allocation6 + $0xe0] sm:$0xf] }
  0x88   :  { %1196 = vmatmul.bf16.vlgmr.msra.gmra.mxu3 %v16232_v23  ;;  %v10642_v7 = vor.u32 %v14877_v62, %v10641_v61  ;;  %v10646_v9 = vor.u32 %v14868_v63, %v10643_v1  ;;  %v10834_v45 = vor.u32 %v14925_v38, %v10833_v37  ;;  %v10817_v61 = vld [vmem:[#allocation6 + $0xc0] sm:$0xf]  ;;  %v14921_v62 = vld [vmem:[#allocation6 + $0xc4] sm:$0xf0]  ;;  %v10843_v19 = vld [vmem:[#allocation6 + $0xf8] sm:$0xf0] }
  0x89   :  { %1204 = vmatpush.bf16.msrb.mxu0 %v10554_v52  ;;  %v10422_v52 = vor.u32 %v14813_v41, %v10419_v42  ;;  %v14823_v41 = vld [vmem:[#allocation2 + $0x234] sm:$0xf0]  ;;  %v14814_v42 = vld [vmem:[#allocation2 + $0x1f4] sm:$0xf]  ;;  %v10818_v4 = vor.u32 %v14921_v62, %v10817_v61  ;;  %v14899_v37 = vld [vmem:[#allocation6 + $0x14] sm:$0xf0] }
  0x8a   :  { %1218 = vmatpush.bf16.msrb.mxu1 %v10558_v55  ;;  %v10194_v55 = vor.u32 %v14767_v44, %v10193_v40  ;;  %v10425_v40 = vld [vmem:[#allocation2 + $0x1f0] sm:$0xf]  ;;  %v14787_v1 = vld [vmem:[#allocation2 + $0x114] sm:$0xf0]  ;;  %v10793_v38 = vld [vmem:[#allocation6 + $0x90] sm:$0xf] }
  0x8b   :  { %1231 = vmatpush.bf16.msrb.mxu2 %v10634_v10  ;;  %1245 = vmatpush.bf16.msrb.mxu3 %v10638_v11  ;;  %v14859_v10 = vld [vmem:[#allocation2 + $0x354] sm:$0xf0]  ;;  %v14850_v11 = vld [vmem:[#allocation2 + $0x314] sm:$0xf]  ;;  %v10426_v48 = vor.u32 %v14823_v41, %v10425_v40 }
  0x8c   :  { %v10570_v21 = vor.u32 %v14859_v10, %v10569_v8  ;;  %v10574_v25 = vor.u32 %v14850_v11, %v10571_v12  ;;  %v10209_v8 = vld [vmem:[#allocation2 + $0x40] sm:$0xf]  ;;  %v14919_v10 = vld [vmem:[#allocation6 + $0xb4] sm:$0xf0] }
  0x8d   :  { %1205 = vmatpush.bf16.msrb.mxu0 %v10482_v2  ;;  %v10350_v2 = vor.u32 %v14795_v56, %v10347_v57  ;;  %v10762_v56 = vor.u32 %v14907_v47, %v10761_v46  ;;  %v14769_v12 = vld [vmem:[#allocation2 + $0x84] sm:$0xf0]  ;;  %v10827_v46 = vld [vmem:[#allocation6 + $0xd8] sm:$0xf0]  ;;  %v16001_v47 = vld [vmem:[%s16736_s0] sm:$0xff] }
  0x8e   :  { %1219 = vmatpush.bf16.msrb.mxu1 %v10486_v5  ;;  %v14777_v5 = vld [vmem:[#allocation2 + $0xcc] sm:$0xf] }
  0x8f   :  { %1232 = vmatpush.bf16.msrb.mxu2 %v10562_v22  ;;  %1246 = vmatpush.bf16.msrb.mxu3 %v10566_v24  ;;  %v10841_v22 = vld [vmem:[#allocation6 + $0xf0] sm:$0xf]  ;;  %v14927_v24 = vld [vmem:[#allocation6 + $0xf4] sm:$0xf0] }
  0x90   :  { %v10842_v33 = vor.u32 %v14927_v24, %v10841_v22  ;;  %v14901_v22 = vld [vmem:[#allocation6 + $0x24] sm:$0xf0]  ;;  %v10210_v24 = vor.u32 %v14769_v12, %v10209_v8  ;;  %v10739_v8 = vld [vmem:[#allocation6 + $0x28] sm:$0xf0] }
  0x91   :  { %1206 = vmatpush.bf16.msrb.mxu0 %v10410_v14  ;;  %v10278_v14 = vor.u32 %v14777_v5, %v10275_v6  ;;  %v10745_v5 = vld [vmem:[#allocation6 + $0x30] sm:$0xf]  ;;  %v14903_v6 = vld [vmem:[#allocation6 + $0x34] sm:$0xf0] }
  0x92   :  { %1220 = vmatpush.bf16.msrb.mxu1 %v10414_v17  ;;  %v14759_v17 = vld [vmem:[#allocation2 + $0x3c] sm:$0xf] }
  0x93   :  { %1233 = vmatpush.bf16.msrb.mxu2 %v10490_v35  ;;  %1247 = vmatpush.bf16.msrb.mxu3 %v10494_v36  ;;  %v10206_v31 = vor.u32 %v14759_v17, %v10203_v18  ;;  %v14909_v35 = vld [vmem:[#allocation6 + $0x64] sm:$0xf0]  ;;  %v14926_v17 = vld [vmem:[#allocation6 + $0xf4] sm:$0xf]  ;;  %v10746_v18 = vor.u32 %v14903_v6, %v10745_v5 }
  0x94   :  { %v10770_v44 = vor.u32 %v14909_v35, %v10769_v34  ;;  %v10835_v34 = vld [vmem:[#allocation6 + $0xe8] sm:$0xf0] }
  0x95   :  { %1207 = vmatpush.bf16.msrb.mxu0 %v10338_v27  ;;  %v14841_v27 = vld [vmem:[#allocation2 + $0x2c4] sm:$0xf0] }
  0x96   :  { %1221 = vmatpush.bf16.msrb.mxu1 %v10342_v30  ;;  %v10499_v30 = vld [vmem:[#allocation2 + $0x2c8] sm:$0xf0]  ;;  %v10498_v36 = vor.u32 %v14841_v27, %v10497_v26  ;;  %v14917_v26 = vld [vmem:[#allocation6 + $0xa4] sm:$0xf0] }
  0x97   :  { %1234 = vmatpush.bf16.msrb.mxu2 %v10418_v50  ;;  %1248 = vmatpush.bf16.msrb.mxu3 %v10422_v52  ;;  %v14923_v50 = vld [vmem:[#allocation6 + $0xd4] sm:$0xf0]  ;;  %v10353_v52 = vld [vmem:[#allocation2 + $0x160] sm:$0xf] }
  0x98   :  { %v10826_v57 = vor.u32 %v14923_v50, %v10825_v49  ;;  %v10721_v49 = vld [vmem:[#allocation6] sm:$0xf]  ;;  %v14897_v50 = vld [vmem:[#allocation6 + $0x4] sm:$0xf0] }
  0x99   :  { %1208 = vmatpush.bf16.msrb.mxu0 %v10266_v39  ;;  %v10502_v39 = vor.u32 %v14832_v29, %v10499_v30  ;;  %v10846_v29 = vor.u32 %v14926_v17, %v10843_v19  ;;  %v14908_v30 = vld [vmem:[#allocation6 + $0x64] sm:$0xf]  ;;  %v10795_v19 = vld [vmem:[#allocation6 + $0x98] sm:$0xf0] }
  0x9a   :  { %1222 = vmatpush.bf16.msrb.mxu1 %v10270_v43  ;;  %v10427_v43 = vld [vmem:[#allocation2 + $0x238] sm:$0xf0] }
  0x9b   :  { %1235 = vmatpush.bf16.msrb.mxu2 %v10346_v0  ;;  %1249 = vmatpush.bf16.msrb.mxu3 %v10350_v2  ;;  %v10430_v51 = vor.u32 %v14814_v42, %v10427_v43  ;;  %v10281_v0 = vld [vmem:[#allocation2 + $0xd0] sm:$0xf]  ;;  %v14778_v2 = vld [vmem:[#allocation2 + $0xd4] sm:$0xf]  ;;  %v14906_v42 = vld [vmem:[#allocation6 + $0x54] sm:$0xf] }
  0x9c   :  { %v10286_v11 = vor.u32 %v14778_v2, %v10283_v3  ;;  %v10763_v43 = vld [vmem:[#allocation6 + $0x58] sm:$0xf0]  ;;  %v16253_v3 = vld [vmem:[#allocation4] sm:$0xff] }
  0x9d   :  { %1209 = vmatpush.bf16.msrb.mxu0 %v10194_v55  ;;  %v10355_v55 = vld [vmem:[#allocation2 + $0x1a8] sm:$0xf0]  ;;  %v273_v12 = vperm.slane %v16253_v3, 1 }
  0x9e   :  { %1223 = vmatpush.bf16.msrb.mxu1 %v10198_v58  ;;  %v10753_v58 = vld [vmem:[#allocation6 + $0x40] sm:$0xf]  ;;  %v10358_v63 = vor.u32 %v14796_v54, %v10355_v55  ;;  %v14904_v55 = vld [vmem:[#allocation6 + $0x44] sm:$0xf]  ;;  %v10811_v2 = vld [vmem:[#allocation6 + $0xb8] sm:$0xf0] }
  0x9f   :  { %1236 = vmatpush.bf16.msrb.mxu2 %v10274_v13  ;;  %1250 = vmatpush.bf16.msrb.mxu3 %v10278_v14  ;;  %v14760_v13 = vld [vmem:[#allocation2 + $0x44] sm:$0xf]  ;;  %v10211_v14 = vld [vmem:[#allocation2 + $0x88] sm:$0xf0] }
  0xa0   :  { %1210 = vmatmul.bf16.vlgmr.msrb.gmra.mxu0 %v16232_v23  ;;  %v10214_v27 = vor.u32 %v14760_v13, %v10211_v14 }
  0xa1   :  { %1258 = vmatpush.bf16.msra.mxu0 %v10714_v59  ;;  %1224 = vmatmul.bf16.vlgmr.msrb.gmra.mxu1 %v16232_v23  ;;  %v14905_v59 = vld [vmem:[#allocation6 + $0x44] sm:$0xf0] }
  0xa2   :  { %1272 = vmatpush.bf16.msra.mxu1 %v10718_v60  ;;  %v10354_v60 = vor.u32 %v14805_v53, %v10353_v52  ;;  %v14913_v52 = vld [vmem:[#allocation6 + $0x84] sm:$0xf0]  ;;  %v10766_v53 = vor.u32 %v14906_v42, %v10763_v43 }
  0xa3   :  { %1237 = vmatpush.bf16.msrb.mxu2 %v10202_v28  ;;  %1251 = vmatpush.bf16.msrb.mxu3 %v10206_v31  ;;  %v10782_v28 = vor.u32 %v14910_v15, %v10779_v16  ;;  %v10771_v31 = vld [vmem:[#allocation6 + $0x68] sm:$0xf0]  ;;  %v14898_v15 = vld [vmem:[#allocation6 + $0x14] sm:$0xf]  ;;  %v10731_v16 = vld [vmem:[#allocation6 + $0x18] sm:$0xf0] }
  0xa4   :  { %v10774_v40 = vor.u32 %v14908_v30, %v10771_v31 }
  0xa5   :  { %1259 = vmatpush.bf16.msra.mxu0 %v10642_v7  ;;  %v10282_v7 = vor.u32 %v14787_v1, %v10281_v0  ;;  %v10747_v0 = vld [vmem:[#allocation6 + $0x38] sm:$0xf0]  ;;  %v14918_v1 = vld [vmem:[#allocation6 + $0xb4] sm:$0xf] }
  0xa6   :  { %1273 = vmatpush.bf16.msra.mxu1 %v10646_v9  ;;  %1238 = vmatmul.bf16.vlgmr.msrb.gmra.mxu2 %v16232_v23  ;;  %v10809_v9 = vld [vmem:[#allocation6 + $0xb0] sm:$0xf]  ;;  %v10814_v6 = vor.u32 %v14918_v1, %v10811_v2 }
  0xa7   :  { %1522 = vmatpush.bf16.msra.mxu2 %v10778_v32  ;;  %1536 = vmatpush.bf16.msra.mxu3 %v10842_v33  ;;  %v10810_v20 = vor.u32 %v14919_v10, %v10809_v9  ;;  %v14924_v32 = vld [vmem:[#allocation6 + $0xe4] sm:$0xf]  ;;  %v272_v9 = vperm.slane %v16253_v3, 0 }
  0xa8   :  { %1252 = vmatmul.bf16.vlgmr.msrb.gmra.mxu3 %v16232_v23  ;;  %v10754_v23 = vor.u32 %v14905_v59, %v10753_v58  ;;  %v10838_v41 = vor.u32 %v14924_v32, %v10835_v34  ;;  %v14920_v58 = vld [vmem:[#allocation6 + $0xc4] sm:$0xf]  ;;  %v10819_v59 = vld [vmem:[#allocation6 + $0xc8] sm:$0xf0] }
  0xa9   :  { %1260 = vmatpush.bf16.msra.mxu0 %v10570_v21  ;;  %v10737_v21 = vld [vmem:[#allocation6 + $0x20] sm:$0xf]  ;;  %v10822_v62 = vor.u32 %v14920_v58, %v10819_v59  ;;  %v14916_v10 = vld [vmem:[#allocation6 + $0xa4] sm:$0xf] }
  0xaa   :  { %1274 = vmatpush.bf16.msra.mxu1 %v10574_v25  ;;  %v10801_v25 = vld [vmem:[#allocation6 + $0xa0] sm:$0xf]  ;;  %v10738_v33 = vor.u32 %v14901_v22, %v10737_v21  ;;  %v14912_v32 = vld [vmem:[#allocation6 + $0x84] sm:$0xf] }
  0xab   :  { %1523 = vmatpush.bf16.msra.mxu2 %v10770_v44  ;;  %1537 = vmatpush.bf16.msra.mxu3 %v10834_v45  ;;  %v10802_v35 = vor.u32 %v14917_v26, %v10801_v25  ;;  %v14922_v44 = vld [vmem:[#allocation6 + $0xd4] sm:$0xf]  ;;  %v10734_v25 = vor.u32 %v14898_v15, %v10731_v16 }
  0xac   :  { %v10830_v54 = vor.u32 %v14922_v44, %v10827_v46 }
  0xad   :  { %1261 = vmatpush.bf16.msra.mxu0 %v10498_v36  ;;  %v10729_v36 = vld [vmem:[#allocation6 + $0x10] sm:$0xf] }
  0xae   :  { %1275 = vmatpush.bf16.msra.mxu1 %v10502_v39  ;;  %v14915_v39 = vld [vmem:[#allocation6 + $0x94] sm:$0xf0]  ;;  %v10730_v45 = vor.u32 %v14899_v37, %v10729_v36 }
  0xaf   :  { %1524 = vmatpush.bf16.msra.mxu2 %v10762_v56  ;;  %1538 = vmatpush.bf16.msra.mxu3 %v10826_v57  ;;  %v10755_v56 = vld [vmem:[#allocation6 + $0x48] sm:$0xf0]  ;;  %v10722_v57 = vor.u32 %v14897_v50, %v10721_v49 }
  0xb0   :  { %v10758_v61 = vor.u32 %v14904_v55, %v10755_v56 }
  0xb1   :  { %1262 = vmatpush.bf16.msra.mxu0 %v10426_v48  ;;  %v10794_v48 = vor.u32 %v14915_v39, %v10793_v38  ;;  %v274_v38 = vperm.slane %v16253_v3, 2 }
  0xb2   :  { %1276 = vmatpush.bf16.msra.mxu1 %v10430_v51  ;;  %v10785_v51 = vld [vmem:[#allocation6 + $0x80] sm:$0xf] }
  0xb3   :  { %1525 = vmatpush.bf16.msra.mxu2 %v10754_v23  ;;  %1539 = vmatpush.bf16.msra.mxu3 %v10818_v4 }
  0xb5   :  { %1263 = vmatpush.bf16.msra.mxu0 %v10354_v60  ;;  %v10786_v60 = vor.u32 %v14913_v52, %v10785_v51  ;;  %v276_v51 = vperm.slane %v16253_v3, 4 }
  0xb6   :  { %1277 = vmatpush.bf16.msra.mxu1 %v10358_v63  ;;  %v14902_v63 = vld [vmem:[#allocation6 + $0x34] sm:$0xf] }
  0xb7   :  { %1526 = vmatpush.bf16.msra.mxu2 %v10746_v18  ;;  %1540 = vmatpush.bf16.msra.mxu3 %v10810_v20  ;;  %v10750_v5 = vor.u32 %v14902_v63, %v10747_v0  ;;  %v14914_v18 = vld [vmem:[#allocation6 + $0x94] sm:$0xf] }
  0xb9   :  { %1264 = vmatpush.bf16.msra.mxu0 %v10282_v7  ;;  %v14900_v7 = vld [vmem:[#allocation6 + $0x24] sm:$0xf] }
  0xba   :  { %1278 = vmatpush.bf16.msra.mxu1 %v10286_v11  ;;  %v10803_v11 = vld [vmem:[#allocation6 + $0xa8] sm:$0xf0]  ;;  %v10742_v13 = vor.u32 %v14900_v7, %v10739_v8  ;;  %v278_v7 = vperm.slane %v16253_v3, 6 }
  0xbb   :  { %1527 = vmatpush.bf16.msra.mxu2 %v10738_v33  ;;  %1541 = vmatpush.bf16.msra.mxu3 %v10802_v35  ;;  %v10806_v14 = vor.u32 %v14916_v10, %v10803_v11  ;;  %v10787_v33 = vld [vmem:[#allocation6 + $0x88] sm:$0xf0] }
  0xbd   :  { %1265 = vmatpush.bf16.msra.mxu0 %v10210_v24  ;;  %v1043_v23 = vpop.f32.mrf.mxu0 }
  0xbe   :  { %1279 = vmatpush.bf16.msra.mxu1 %v10214_v27  ;;  %v1057_v4 = vpop.f32.mrf.mxu1  ;;  %v1044_v17 = vadd.f32 %v1043_v23, %v272_v9  ;;  %v10798_v27 = vor.u32 %v14914_v18, %v10795_v19 }
  0xbf   :  { %1528 = vmatpush.bf16.msra.mxu2 %v10730_v45  ;;  %1542 = vmatpush.bf16.msra.mxu3 %v10794_v48  ;;  %v1058_v20 = vadd.f32 %v1057_v4, %v273_v12 }
  0xc0   :  { %1266 = vmatmul.bf16.vlgmr.msra.gmra.mxu0 %v16001_v47  ;;  %v1286_v30 = vmax.f32 %v1044_v17, 0.0 }
  0xc1   :  { %1550 = vmatpush.bf16.msrb.mxu0 %v10782_v28  ;;  %1280 = vmatmul.bf16.vlgmr.msra.gmra.mxu1 %v16001_v47  ;;  %v14896_v28 = vld [vmem:[#allocation6 + $0x4] sm:$0xf]  ;;  %v1287_v34 = vmax.f32 %v1058_v20, 0.0 }
  0xc2   :  { %1564 = vmatpush.bf16.msrb.mxu1 %v10846_v29  ;;  %v10723_v29 = vld [vmem:[#allocation6 + $0x8] sm:$0xf0] }
  0xc3   :  { %1529 = vmatpush.bf16.msra.mxu2 %v10722_v57  ;;  %1543 = vmatpush.bf16.msra.mxu3 %v10786_v60  ;;  %v10726_v37 = vor.u32 %v14896_v28, %v10723_v29 }
  0xc5   :  { %1551 = vmatpush.bf16.msrb.mxu0 %v10774_v40  ;;  %v1045_v21 = vpop.f32.mrf.mxu0  ;;  %v10790_v40 = vor.u32 %v14912_v32, %v10787_v33 }
  0xc6   :  { %1565 = vmatpush.bf16.msrb.mxu1 %v10838_v41  ;;  %v1046_v22 = vadd.f32 %v1045_v21, %v272_v9  ;;  %v1059_v24 = vpop.f32.mrf.mxu1  ;;  %v275_v41 = vperm.slane %v16253_v3, 3  ;;  %v279_v9 = vperm.slane %v16253_v3, 7 }
  0xc7   :  { %v1060_v26 = vadd.f32 %v1059_v24, %v273_v12 }
  0xc8   :  { %v1304_v31 = vmax.f32 %v1046_v22, 0.0 }
  0xc9   :  { %1552 = vmatpush.bf16.msrb.mxu0 %v10766_v53  ;;  %v1305_v35 = vmax.f32 %v1060_v26, 0.0  ;;  %v1071_v42 = vpop.f32.mrf.mxu2  ;;  %v277_v53 = vperm.slane %v16253_v3, 5  ;;  %v16277_v26 = vld [vmem:[#allocation4 + $0x8] sm:$0xff] }
  0xca   :  { %1566 = vmatpush.bf16.msrb.mxu1 %v10830_v54  ;;  %v1322_v36 = vpack.c.bf16 %v1304_v31, %v1286_v30  ;;  %v1072_v43 = vadd.f32 %v1071_v42, %v274_v38  ;;  %v283_v28 = vperm.slane %v16277_v26, 3  ;;  %v285_v42 = vperm.slane %v16277_v26, 5 }
  0xcb   :  { %v1323_v39 = vpack.c.bf16 %v1305_v35, %v1287_v34  ;;  %v1085_v44 = vpop.f32.mrf.mxu3 }
  0xcc   :  { %1530 = vmatmul.bf16.vlgmr.msra.gmra.mxu2 %v1322_v36  ;;  %v1086_v45 = vadd.f32 %v1085_v44, %v275_v41  ;;  %v1288_v47 = vmax.f32 %v1072_v43, 0.0 }
  0xcd   :  { %1553 = vmatpush.bf16.msrb.mxu0 %v10758_v61  ;;  %1544 = vmatmul.bf16.vlgmr.msra.gmra.mxu3 %v1323_v39 }
  0xce   :  { %1567 = vmatpush.bf16.msrb.mxu1 %v10822_v62  ;;  %v1289_v50 = vmax.f32 %v1086_v45, 0.0 }
  0xd1   :  { %1554 = vmatpush.bf16.msrb.mxu0 %v10750_v5  ;;  %v1073_v46 = vpop.f32.mrf.mxu2 }
  0xd2   :  { %1568 = vmatpush.bf16.msrb.mxu1 %v10814_v6  ;;  %v1074_v48 = vadd.f32 %v1073_v46, %v274_v38 }
  0xd3   :  { %v1087_v49 = vpop.f32.mrf.mxu3 }
  0xd4   :  { %v1088_v52 = vadd.f32 %v1087_v49, %v275_v41  ;;  %v1306_v54 = vmax.f32 %v1074_v48, 0.0 }
  0xd5   :  { %1555 = vmatpush.bf16.msrb.mxu0 %v10742_v13 }
  0xd6   :  { %1569 = vmatpush.bf16.msrb.mxu1 %v10806_v14  ;;  %v1307_v55 = vmax.f32 %v1088_v52, 0.0  ;;  %v16261_v57 = vpack.c.bf16 %v1306_v54, %v1288_v47  ;;  %v14958_v52 = vld [vmem:[#allocation6 + $0x9f4] sm:$0xf] }
  0xd8   :  { %v16263_v60 = vpack.c.bf16 %v1307_v55, %v1289_v50  ;;  %v10969_v50 = vld [vmem:[#allocation6 + $0x9f0] sm:$0xf]  ;;  %v10971_v55 = vld [vmem:[#allocation6 + $0x9f8] sm:$0xf0] }
  0xd9   :  { %1556 = vmatpush.bf16.msrb.mxu0 %v10734_v25 }
  0xda   :  { %1570 = vmatpush.bf16.msrb.mxu1 %v10798_v27  ;;  %v282_v27 = vperm.slane %v16277_v26, 2 }
  0xdd   :  { %1557 = vmatpush.bf16.msrb.mxu0 %v10726_v37  ;;  %v1099_v56 = vpop.f32.mrf.mxu0 }
  0xde   :  { %1571 = vmatpush.bf16.msrb.mxu1 %v10790_v40  ;;  %v1100_v58 = vadd.f32 %v1099_v56, %v276_v51  ;;  %v1113_v59 = vpop.f32.mrf.mxu1  ;;  %v284_v40 = vperm.slane %v16277_v26, 4  ;;  %v10974_v56 = vor.u32 %v14958_v52, %v10971_v55  ;;  %v10947_v55 = vld [vmem:[#allocation6 + $0x9c8] sm:$0xf0] }
  0xdf   :  { %v1114_v61 = vadd.f32 %v1113_v59, %v277_v53 }
  0xe0   :  { %1558 = vmatmul.bf16.vlgmr.msrb.gmra.mxu0 %v1322_v36  ;;  %v1290_v63 = vmax.f32 %v1100_v58, 0.0 }
  0xe1   :  { %1572 = vmatmul.bf16.vlgmr.msrb.gmra.mxu1 %v1323_v39  ;;  %v1291_v2 = vmax.f32 %v1114_v61, 0.0 }
  0xe2   :  { %1826 = vmatpush.bf16.msra.mxu1 %v10974_v56  ;;  %v10881_v56 = vld [vmem:[#allocation6 + $0x940] sm:$0xf] }
  0xe5   :  { %v1101_v62 = vpop.f32.mrf.mxu0 }
  0xe6   :  { %v1102_v0 = vadd.f32 %v1101_v62, %v276_v51  ;;  %v1115_v1 = vpop.f32.mrf.mxu1  ;;  %v14959_v51 = vld [vmem:[#allocation6 + $0x9f4] sm:$0xf0] }
  0xe7   :  { %v1116_v23 = vadd.f32 %v1115_v1, %v277_v53  ;;  %v10970_v54 = vor.u32 %v14959_v51, %v10969_v50  ;;  %v10905_v1 = vld [vmem:[#allocation6 + $0x970] sm:$0xf]  ;;  %v10945_v50 = vld [vmem:[#allocation6 + $0x9c0] sm:$0xf]  ;;  %v14953_v51 = vld [vmem:[#allocation6 + $0x9c4] sm:$0xf0] }
  0xe8   :  { %v1308_v4 = vmax.f32 %v1102_v0, 0.0 }
  0xe9   :  { %v1309_v5 = vmax.f32 %v1116_v23, 0.0  ;;  %v1127_v10 = vpop.f32.mrf.mxu2  ;;  %1798 = vmatpush.bf16.msrb.mxu3 %v10970_v54  ;;  %v14942_v23 = vld [vmem:[#allocation6 + $0x974] sm:$0xf]  ;;  %v14952_v54 = vld [vmem:[#allocation6 + $0x9c4] sm:$0xf] }
  0xea   :  { %v16265_v6 = vpack.c.bf16 %v1308_v4, %v1290_v63  ;;  %v1128_v11 = vadd.f32 %v1127_v10, %v278_v7  ;;  %v10961_v10 = vld [vmem:[#allocation6 + $0x9e0] sm:$0xf] }
  0xeb   :  { %v16268_v8 = vpack.c.bf16 %v1309_v5, %v1291_v2  ;;  %v1141_v12 = vpop.f32.mrf.mxu3  ;;  %v14943_v2 = vld [vmem:[#allocation6 + $0x974] sm:$0xf0]  ;;  %v286_v5 = vperm.slane %v16277_v26, 6 }
  0xec   :  { %v1142_v13 = vadd.f32 %v1141_v12, %v279_v9  ;;  %v1292_v15 = vmax.f32 %v1128_v11, 0.0  ;;  %v287_v12 = vperm.slane %v16277_v26, 7 }
  0xee   :  { %v1293_v18 = vmax.f32 %v1142_v13, 0.0 }
  0xf1   :  { %v1129_v14 = vpop.f32.mrf.mxu2 }
  0xf2   :  { %v1130_v16 = vadd.f32 %v1129_v14, %v278_v7  ;;  %v10906_v7 = vor.u32 %v14943_v2, %v10905_v1  ;;  %v14957_v14 = vld [vmem:[#allocation6 + $0x9e4] sm:$0xf0] }
  0xf3   :  { %v1143_v17 = vpop.f32.mrf.mxu3 }
  0xf4   :  { %v1144_v19 = vadd.f32 %v1143_v17, %v279_v9  ;;  %v1310_v20 = vmax.f32 %v1130_v16, 0.0  ;;  %v10907_v9 = vld [vmem:[#allocation6 + $0x978] sm:$0xf0]  ;;  %1784 = vmatpush.bf16.msrb.mxu2 %v10906_v7  ;;  %v10962_v17 = vor.u32 %v14957_v14, %v10961_v10  ;;  %v14950_v14 = vld [vmem:[#allocation6 + $0x9b4] sm:$0xf] }
  0xf5   :  { %v10910_v13 = vor.u32 %v14942_v23, %v10907_v9 }
  0xf6   :  { %v1311_v21 = vmax.f32 %v1144_v19, 0.0  ;;  %v16271_v22 = vpack.c.bf16 %v1310_v20, %v1292_v15  ;;  %v14956_v15 = vld [vmem:[#allocation6 + $0x9e4] sm:$0xf]  ;;  %v10897_v19 = vld [vmem:[#allocation6 + $0x960] sm:$0xf]  ;;  %1799 = vmatpush.bf16.msrb.mxu3 %v10962_v17 }
  0xf7   :  { %v14941_v20 = vld [vmem:[#allocation6 + $0x964] sm:$0xf0]  ;;  %1812 = vmatpush.bf16.msra.mxu0 %v10910_v13  ;;  %v14951_v13 = vld [vmem:[#allocation6 + $0x9b4] sm:$0xf0] }
  0xf8   :  { %v16273_v24 = vpack.c.bf16 %v1311_v21, %v1293_v18  ;;  %v10963_v18 = vld [vmem:[#allocation6 + $0x9e8] sm:$0xf0] }
  0xfd   :  { %v16275_v25 = vpop.f32.mrf.mxu0 }
  0xfe   :  { %v16279_v3 = vpop.f32.mrf.mxu1 }
 0x105   :  { %v16283_v33 = vpop.f32.mrf.mxu0 }
 0x106   :  { %v16285_v34 = vpop.f32.mrf.mxu1 }
 0x109   :  { %v1183_v29 = vpop.f32.mrf.mxu2 }
 0x10a   :  { %v1184_v30 = vadd.f32 %v1183_v29, %v282_v27  ;;  %v14940_v29 = vld [vmem:[#allocation6 + $0x964] sm:$0xf] }
 0x10b   :  { %v1197_v31 = vpop.f32.mrf.mxu3 }
 0x10c   :  { %v1198_v32 = vadd.f32 %v1197_v31, %v283_v28  ;;  %v1296_v36 = vmax.f32 %v1184_v30, 0.0  ;;  %v10899_v30 = vld [vmem:[#allocation6 + $0x968] sm:$0xf0]  ;;  %v10953_v31 = vld [vmem:[#allocation6 + $0x9d0] sm:$0xf] }
 0x10e   :  { %v1297_v39 = vmax.f32 %v1198_v32, 0.0  ;;  %v10902_v32 = vor.u32 %v14940_v29, %v10899_v30  ;;  %v14934_v29 = vld [vmem:[#allocation6 + $0x934] sm:$0xf] }
 0x110   :  { %1813 = vmatpush.bf16.msra.mxu0 %v10902_v32  ;;  %v10929_v32 = vld [vmem:[#allocation6 + $0x9a0] sm:$0xf] }
 0x111   :  { %v1185_v35 = vpop.f32.mrf.mxu2 }
 0x112   :  { %v1186_v37 = vadd.f32 %v1185_v35, %v282_v27  ;;  %v10966_v27 = vor.u32 %v14956_v15, %v10963_v18  ;;  %v14955_v35 = vld [vmem:[#allocation6 + $0x9d4] sm:$0xf0]  ;;  %v10939_v18 = vld [vmem:[#allocation6 + $0x9b8] sm:$0xf0] }
 0x113   :  { %v1199_v38 = vpop.f32.mrf.mxu3 }
 0x114   :  { %v1200_v41 = vadd.f32 %v1199_v38, %v283_v28  ;;  %v1314_v43 = vmax.f32 %v1186_v37, 0.0  ;;  %v10898_v28 = vor.u32 %v14941_v20, %v10897_v19  ;;  %v10955_v37 = vld [vmem:[#allocation6 + $0x9d8] sm:$0xf0]  ;;  %1827 = vmatpush.bf16.msra.mxu1 %v10966_v27  ;;  %v10873_v19 = vld [vmem:[#allocation6 + $0x930] sm:$0xf]  ;;  %v10942_v27 = vor.u32 %v14950_v14, %v10939_v18 }
 0x115   :  { %v11099_v18 = vld [vmem:[#allocation6 + $0x12f8] sm:$0xf0] }
 0x116   :  { %v1315_v44 = vmax.f32 %v1200_v41, 0.0  ;;  %v16289_v46 = vpack.c.bf16 %v1314_v43, %v1296_v36  ;;  %v14954_v36 = vld [vmem:[#allocation6 + $0x9d4] sm:$0xf]  ;;  %v10889_v41 = vld [vmem:[#allocation6 + $0x950] sm:$0xf]  ;;  %1785 = vmatpush.bf16.msrb.mxu2 %v10898_v28 }
 0x117   :  { %v14938_v43 = vld [vmem:[#allocation6 + $0x954] sm:$0xf]  ;;  %v14935_v28 = vld [vmem:[#allocation6 + $0x934] sm:$0xf0] }
 0x118   :  { %v16291_v49 = vpack.c.bf16 %v1315_v44, %v1297_v39  ;;  %v10954_v39 = vor.u32 %v14955_v35, %v10953_v31  ;;  %v10874_v26 = vor.u32 %v14935_v28, %v10873_v19  ;;  %v14949_v35 = vld [vmem:[#allocation6 + $0x9a4] sm:$0xf0]  ;;  %v14988_v19 = vld [vmem:[#allocation6 + $0x12e4] sm:$0xf]  ;;  %v14974_v28 = vld [vmem:[#allocation6 + $0x1274] sm:$0xf] }
 0x11a   :  { %1800 = vmatpush.bf16.msrb.mxu3 %v10954_v39  ;;  %v10865_v39 = vld [vmem:[#allocation6 + $0x920] sm:$0xf] }
 0x11d   :  { %v1211_v45 = vpop.f32.mrf.mxu0 }
 0x11e   :  { %v1212_v47 = vadd.f32 %v1211_v45, %v284_v40  ;;  %v1225_v48 = vpop.f32.mrf.mxu1 }
 0x11f   :  { %v1226_v53 = vadd.f32 %v1225_v48, %v285_v42  ;;  %v10891_v48 = vld [vmem:[#allocation6 + $0x958] sm:$0xf0] }
 0x120   :  { %v1298_v59 = vmax.f32 %v1212_v47, 0.0 }
 0x121   :  { %v1299_v61 = vmax.f32 %v1226_v53, 0.0  ;;  %v10894_v53 = vor.u32 %v14938_v43, %v10891_v48  ;;  %v14932_v43 = vld [vmem:[#allocation6 + $0x924] sm:$0xf]  ;;  %v14947_v48 = vld [vmem:[#allocation6 + $0x994] sm:$0xf0] }
 0x123   :  { %1814 = vmatpush.bf16.msra.mxu0 %v10894_v53  ;;  %v10857_v53 = vld [vmem:[#allocation6 + $0x910] sm:$0xf] }
 0x125   :  { %v1213_v58 = vpop.f32.mrf.mxu0 }
 0x126   :  { %v1214_v62 = vadd.f32 %v1213_v58, %v284_v40  ;;  %v1227_v63 = vpop.f32.mrf.mxu1  ;;  %v10958_v40 = vor.u32 %v14954_v36, %v10955_v37  ;;  %v10946_v58 = vor.u32 %v14953_v51, %v10945_v50  ;;  %v14948_v36 = vld [vmem:[#allocation6 + $0x9a4] sm:$0xf]  ;;  %v10930_v37 = vor.u32 %v14949_v35, %v10929_v32  ;;  %v14946_v50 = vld [vmem:[#allocation6 + $0x994] sm:$0xf]  ;;  %v11027_v35 = vld [vmem:[#allocation6 + $0x1268] sm:$0xf0] }
 0x127   :  { %v1228_v0 = vadd.f32 %v1227_v63, %v285_v42  ;;  %v14939_v42 = vld [vmem:[#allocation6 + $0x954] sm:$0xf0]  ;;  %v10883_v63 = vld [vmem:[#allocation6 + $0x948] sm:$0xf0]  ;;  %v14986_v32 = vld [vmem:[#allocation6 + $0x12d4] sm:$0xf] }
 0x128   :  { %v1316_v4 = vmax.f32 %v1214_v62, 0.0  ;;  %v10890_v47 = vor.u32 %v14939_v42, %v10889_v41  ;;  %1828 = vmatpush.bf16.msra.mxu1 %v10958_v40  ;;  %v10950_v62 = vor.u32 %v14952_v54, %v10947_v55  ;;  %1801 = vmatpush.bf16.msrb.mxu3 %v10946_v58  ;;  %v14933_v40 = vld [vmem:[#allocation6 + $0x924] sm:$0xf0]  ;;  %v14931_v54 = vld [vmem:[#allocation6 + $0x914] sm:$0xf0] }
 0x129   :  { %v1317_v11 = vmax.f32 %v1228_v0, 0.0  ;;  %v1239_v38 = vpop.f32.mrf.mxu2  ;;  %v10866_v42 = vor.u32 %v14933_v40, %v10865_v39  ;;  %v14930_v58 = vld [vmem:[#allocation6 + $0x914] sm:$0xf]  ;;  %v14991_v39 = vld [vmem:[#allocation6 + $0x12f4] sm:$0xf0] }
 0x12a   :  { %v16295_v16 = vpack.c.bf16 %v1316_v4, %v1298_v59  ;;  %v1240_v44 = vadd.f32 %v1239_v38, %v286_v5  ;;  %v14937_v59 = vld [vmem:[#allocation6 + $0x944] sm:$0xf0]  ;;  %1786 = vmatpush.bf16.msrb.mxu2 %v10890_v47  ;;  %v10931_v38 = vld [vmem:[#allocation6 + $0x9a8] sm:$0xf0]  ;;  %v10921_v47 = vld [vmem:[#allocation6 + $0x990] sm:$0xf] }
 0x12b   :  { %v16297_v21 = vpack.c.bf16 %v1317_v11, %v1299_v61  ;;  %v1253_v45 = vpop.f32.mrf.mxu3  ;;  %v14936_v61 = vld [vmem:[#allocation6 + $0x944] sm:$0xf]  ;;  %v10882_v0 = vor.u32 %v14937_v59, %v10881_v56  ;;  %v10937_v11 = vld [vmem:[#allocation6 + $0x9b0] sm:$0xf]  ;;  %v10934_v41 = vor.u32 %v14948_v36, %v10931_v38  ;;  %v10922_v51 = vor.u32 %v14947_v48, %v10921_v47  ;;  %v10859_v59 = vld [vmem:[#allocation6 + $0x918] sm:$0xf0] }
 0x12c   :  { %v1254_v52 = vadd.f32 %v1253_v45, %v287_v12  ;;  %v10886_v1 = vor.u32 %v14936_v61, %v10883_v63  ;;  %1829 = vmatpush.bf16.msra.mxu1 %v10950_v62  ;;  %v1300_v23 = vmax.f32 %v1240_v44, 0.0  ;;  %v10938_v17 = vor.u32 %v14951_v13, %v10937_v11  ;;  %v10867_v44 = vld [vmem:[#allocation6 + $0x928] sm:$0xf0]  ;;  %v10913_v62 = vld [vmem:[#allocation6 + $0x980] sm:$0xf] }
 0x12d   :  { %v10870_v45 = vor.u32 %v14932_v43, %v10867_v44  ;;  %v10858_v56 = vor.u32 %v14931_v54, %v10857_v53  ;;  %v10862_v61 = vor.u32 %v14930_v58, %v10859_v59  ;;  %v14945_v63 = vld [vmem:[#allocation6 + $0x984] sm:$0xf0]  ;;  %v14928_v11 = vld [vmem:[#allocation6 + $0x904] sm:$0xf]  ;;  %v10851_v13 = vld [vmem:[#allocation6 + $0x908] sm:$0xf0] }
 0x12e   :  { %v1301_v4 = vmax.f32 %v1254_v52, 0.0  ;;  %1787 = vmatpush.bf16.msrb.mxu2 %v10882_v0  ;;  %1815 = vmatpush.bf16.msra.mxu0 %v10886_v1  ;;  %v10923_v52 = vld [vmem:[#allocation6 + $0x998] sm:$0xf0]  ;;  %v14944_v0 = vld [vmem:[#allocation6 + $0x984] sm:$0xf]  ;;  %v10914_v1 = vor.u32 %v14945_v63, %v10913_v62 }
 0x12f   :  { %1802 = vmatpush.bf16.msrb.mxu3 %v10938_v17  ;;  %v10926_v55 = vor.u32 %v14946_v50, %v10923_v52  ;;  %v14990_v17 = vld [vmem:[#allocation6 + $0x12f4] sm:$0xf]  ;;  %v11083_v36 = vld [vmem:[#allocation6 + $0x12d8] sm:$0xf0]  ;;  %v11097_v38 = vld [vmem:[#allocation6 + $0x12f0] sm:$0xf] }
 0x130   :  { %1830 = vmatpush.bf16.msra.mxu1 %v10942_v27  ;;  %v11091_v27 = vld [vmem:[#allocation6 + $0x12e8] sm:$0xf0]  ;;  %v11098_v40 = vor.u32 %v14991_v39, %v11097_v38  ;;  %v11089_v44 = vld [vmem:[#allocation6 + $0x12e0] sm:$0xf]  ;;  %v11086_v48 = vor.u32 %v14986_v32, %v11083_v36  ;;  %v14975_v52 = vld [vmem:[#allocation6 + $0x1274] sm:$0xf0] }
 0x131   :  { %v1241_v2 = vpop.f32.mrf.mxu2  ;;  %v14984_v53 = vld [vmem:[#allocation6 + $0x12c4] sm:$0xf]  ;;  %v11075_v54 = vld [vmem:[#allocation6 + $0x12c8] sm:$0xf0]  ;;  %v11081_v58 = vld [vmem:[#allocation6 + $0x12d0] sm:$0xf] }
 0x132   :  { %v1242_v7 = vadd.f32 %v1241_v2, %v286_v5  ;;  %v10875_v5 = vld [vmem:[#allocation6 + $0x938] sm:$0xf0]  ;;  %1788 = vmatpush.bf16.msrb.mxu2 %v10874_v26  ;;  %v10915_v2 = vld [vmem:[#allocation6 + $0x988] sm:$0xf0]  ;;  %v14968_v59 = vld [vmem:[#allocation6 + $0x1244] sm:$0xf] }
 0x133   :  { %v1255_v9 = vpop.f32.mrf.mxu3  ;;  %1803 = vmatpush.bf16.msrb.mxu3 %v10930_v37  ;;  %v14987_v62 = vld [vmem:[#allocation6 + $0x12d4] sm:$0xf0]  ;;  %v11025_v63 = vld [vmem:[#allocation6 + $0x1260] sm:$0xf]  ;;  %v14980_v32 = vld [vmem:[#allocation6 + $0x12a4] sm:$0xf] }
 0x134   :  { %v1256_v10 = vadd.f32 %v1255_v9, %v287_v12  ;;  %v1318_v15 = vmax.f32 %v1242_v7, 0.0  ;;  %v10878_v12 = vor.u32 %v14934_v29, %v10875_v5  ;;  %1831 = vmatpush.bf16.msra.mxu1 %v10934_v41  ;;  %v10918_v9 = vor.u32 %v14944_v0, %v10915_v2  ;;  %v11035_v29 = vld [vmem:[#allocation6 + $0x1278] sm:$0xf0]  ;;  %v14972_v5 = vld [vmem:[#allocation6 + $0x1264] sm:$0xf] }
 0x135   :  { %v11038_v26 = vor.u32 %v14974_v28, %v11035_v29  ;;  %v11030_v37 = vor.u32 %v14972_v5, %v11027_v35  ;;  %v14970_v41 = vld [vmem:[#allocation6 + $0x1254] sm:$0xf]  ;;  %v14973_v0 = vld [vmem:[#allocation6 + $0x1264] sm:$0xf0]  ;;  %v11078_v2 = vor.u32 %v14984_v53, %v11075_v54  ;;  %v11059_v35 = vld [vmem:[#allocation6 + $0x12a8] sm:$0xf0] }
 0x136   :  { %v1319_v20 = vmax.f32 %v1256_v10, 0.0  ;;  %v16303_v30 = vpack.c.bf16 %v1318_v15, %v1300_v23  ;;  %1816 = vmatpush.bf16.msra.mxu0 %v10878_v12  ;;  %1789 = vmatpush.bf16.msrb.mxu2 %v10866_v42  ;;  %v10849_v23 = vld [vmem:[#allocation6 + $0x900] sm:$0xf]  ;;  %v10854_v15 = vor.u32 %v14928_v11, %v10851_v13  ;;  %v11094_v12 = vor.u32 %v14988_v19, %v11091_v27  ;;  %v11019_v42 = vld [vmem:[#allocation6 + $0x1258] sm:$0xf0] }
 0x137   :  { %1804 = vmatpush.bf16.msrb.mxu3 %v10922_v51  ;;  %v11033_v51 = vld [vmem:[#allocation6 + $0x1270] sm:$0xf]  ;;  %v11073_v13 = vld [vmem:[#allocation6 + $0x12c0] sm:$0xf]  ;;  %v11062_v38 = vor.u32 %v14980_v32, %v11059_v35 }
 0x138   :  { %v16305_v31 = vpack.c.bf16 %v1319_v20, %v1301_v4  ;;  %1832 = vmatpush.bf16.msra.mxu1 %v10926_v55  ;;  %v14929_v4 = vld [vmem:[#allocation6 + $0x904] sm:$0xf0]  ;;  %v11102_v20 = vor.u32 %v14990_v17, %v11099_v18  ;;  %v11022_v55 = vor.u32 %v14970_v41, %v11019_v42  ;;  %v14966_v17 = vld [vmem:[#allocation6 + $0x1234] sm:$0xf]  ;;  %v11003_v18 = vld [vmem:[#allocation6 + $0x1238] sm:$0xf0] }
 0x139   :  { %v10850_v10 = vor.u32 %v14929_v4, %v10849_v23  ;;  %v14982_v23 = vld [vmem:[#allocation6 + $0x12b4] sm:$0xf]  ;;  %v11082_v4 = vor.u32 %v14987_v62, %v11081_v58  ;;  %v11006_v36 = vor.u32 %v14966_v17, %v11003_v18  ;;  %v11051_v41 = vld [vmem:[#allocation6 + $0x1298] sm:$0xf0]  ;;  %v11065_v17 = vld [vmem:[#allocation6 + $0x12b0] sm:$0xf] }
 0x13a   :  { %1817 = vmatpush.bf16.msra.mxu0 %v10870_v45  ;;  %1790 = vmatpush.bf16.msrb.mxu2 %v10858_v56  ;;  %v14989_v45 = vld [vmem:[#allocation6 + $0x12e4] sm:$0xf0]  ;;  %v11034_v56 = vor.u32 %v14975_v52, %v11033_v51  ;;  %v14983_v18 = vld [vmem:[#allocation6 + $0x12b4] sm:$0xf0] }
 0x13b   :  { %1805 = vmatpush.bf16.msrb.mxu3 %v10914_v1  ;;  %v11090_v50 = vor.u32 %v14989_v45, %v11089_v44  ;;  %v1356_v1 = vld [vmem:[#allocation7] sm:$0x3] }
 0x13c   :  { %1833 = vmatpush.bf16.msra.mxu1 %v10918_v9  ;;  %v11026_v9 = vor.u32 %v14973_v0, %v11025_v63  ;;  %v1358_v5 = vperm.slane %v1356_v1, 0 }
 0x13d   :  { %v16307_v7 = vpop.f32.mrf.mxu0 }
 0x13e   :  { %1818 = vmatpush.bf16.msra.mxu0 %v10862_v61  ;;  %v16309_v14 = vpop.f32.mrf.mxu1  ;;  %1791 = vmatpush.bf16.msrb.mxu2 %v10850_v10  ;;  %v11011_v61 = vld [vmem:[#allocation6 + $0x1248] sm:$0xf0]  ;;  %v11067_v10 = vld [vmem:[#allocation6 + $0x12b8] sm:$0xf0] }
 0x13f   :  { %2060 = vmatpush.bf16.msra.mxu3 %v11098_v40  ;;  %v11014_v11 = vor.u32 %v14968_v59, %v11011_v61  ;;  %v11070_v29 = vor.u32 %v14982_v23, %v11067_v10  ;;  %v14978_v40 = vld [vmem:[#allocation6 + $0x1294] sm:$0xf] }
 0x140   :  { %2088 = vmatpush.bf16.msrb.mxu1 %v11102_v20  ;;  %v1359_v20 = vperm.slane %v1356_v1, 1  ;;  %v14964_v1 = vld [vmem:[#allocation6 + $0x1224] sm:$0xf] }
 0x142   :  { %1819 = vmatpush.bf16.msra.mxu0 %v10854_v15  ;;  %2046 = vmatpush.bf16.msra.mxu2 %v11034_v56  ;;  %v14985_v15 = vld [vmem:[#allocation6 + $0x12c4] sm:$0xf0] }
 0x143   :  { %2061 = vmatpush.bf16.msra.mxu3 %v11090_v50  ;;  %v11054_v50 = vor.u32 %v14978_v40, %v11051_v41  ;;  %v15037_v40 = vld [vmem:[#allocation6 + $0x1e4] sm:$0xf0]  ;;  %v14960_v41 = vld [vmem:[#allocation6 + $0x1204] sm:$0xf] }
 0x144   :  { %2089 = vmatpush.bf16.msrb.mxu1 %v11094_v12 }
 0x145   :  { %v16311_v43 = vpop.f32.mrf.mxu0 }
 0x146   :  { %2074 = vmatpush.bf16.msrb.mxu0 %v11038_v26  ;;  %v16313_v47 = vpop.f32.mrf.mxu1  ;;  %2047 = vmatpush.bf16.msra.mxu2 %v11026_v9  ;;  %v11074_v26 = vor.u32 %v14985_v15, %v11073_v13  ;;  %v14971_v9 = vld [vmem:[#allocation6 + $0x1254] sm:$0xf0]  ;;  %v11043_v13 = vld [vmem:[#allocation6 + $0x1288] sm:$0xf0] }
 0x147   :  { %2062 = vmatpush.bf16.msra.mxu3 %v11082_v4  ;;  %v11017_v4 = vld [vmem:[#allocation6 + $0x1250] sm:$0xf] }
 0x148   :  { %2090 = vmatpush.bf16.msrb.mxu1 %v11086_v48  ;;  %v11018_v10 = vor.u32 %v14971_v9, %v11017_v4  ;;  %v11041_v9 = vld [vmem:[#allocation6 + $0x1280] sm:$0xf] }
 0x14a   :  { %2075 = vmatpush.bf16.msrb.mxu0 %v11030_v37  ;;  %2048 = vmatpush.bf16.msra.mxu2 %v11018_v10  ;;  %v14977_v10 = vld [vmem:[#allocation6 + $0x1284] sm:$0xf0] }
 0x14b   :  { %2063 = vmatpush.bf16.msra.mxu3 %v11074_v26  ;;  %v10987_v26 = vld [vmem:[#allocation6 + $0x1218] sm:$0xf0] }
 0x14c   :  { %2091 = vmatpush.bf16.msrb.mxu1 %v11078_v2  ;;  %v10995_v2 = vld [vmem:[#allocation6 + $0x1228] sm:$0xf0] }
 0x14d   :  { %v10998_v23 = vor.u32 %v14964_v1, %v10995_v2  ;;  %v11217_v1 = vld [vmem:[#allocation6 + $0x160] sm:$0xf] }
 0x14e   :  { %2076 = vmatpush.bf16.msrb.mxu0 %v11022_v55 }
 0x14f   :  { %v1531_v28 = vpop.f32.mrf.mxu2 }
 0x150   :  { %v1545_v12 = vpop.f32.mrf.mxu3  ;;  %2092 = vmatpush.bf16.msrb.mxu1 %v11070_v29  ;;  %v1532_v39 = vadd.f32 %v1531_v28, %v1358_v5  ;;  %v14962_v28 = vld [vmem:[#allocation6 + $0x1214] sm:$0xf] }
 0x151   :  { %v10990_v32 = vor.u32 %v14962_v28, %v10987_v26  ;;  %v15019_v28 = vld [vmem:[#allocation6 + $0x154] sm:$0xf0]  ;;  %v11257_v26 = vld [vmem:[#allocation6 + $0x1b0] sm:$0xf] }
 0x152   :  { %2077 = vmatpush.bf16.msrb.mxu0 %v11014_v11  ;;  %v1546_v51 = vadd.f32 %v1545_v12, %v1532_v39  ;;  %v14976_v11 = vld [vmem:[#allocation6 + $0x1284] sm:$0xf]  ;;  %v14969_v12 = vld [vmem:[#allocation6 + $0x1244] sm:$0xf0] }
 0x153   :  { %v11046_v15 = vor.u32 %v14976_v11, %v11043_v13  ;;  %v11265_v11 = vld [vmem:[#allocation6 + $0x1c0] sm:$0xf]  ;;  %v11042_v13 = vor.u32 %v14977_v10, %v11041_v9  ;;  %v15009_v9 = vld [vmem:[#allocation6 + $0x104] sm:$0xf0] }
 0x154   :  { %2093 = vmatpush.bf16.msrb.mxu1 %v11062_v38  ;;  %v1578_v61 = vmax.f32 %v1546_v51, 0.0  ;;  %v11281_v38 = vld [vmem:[#allocation6 + $0x1e0] sm:$0xf] }
 0x156   :  { %2078 = vmatpush.bf16.msrb.mxu0 %v11006_v36  ;;  %v11057_v36 = vld [vmem:[#allocation6 + $0x12a0] sm:$0xf] }
 0x157   :  { %v1533_v48 = vpop.f32.mrf.mxu2 }
 0x158   :  { %v1534_v53 = vadd.f32 %v1533_v48, %v1358_v5  ;;  %v1547_v55 = vpop.f32.mrf.mxu3  ;;  %2094 = vmatpush.bf16.msrb.mxu1 %v11054_v50  ;;  %v11009_v5 = vld [vmem:[#allocation6 + $0x1240] sm:$0xf]  ;;  %v14967_v48 = vld [vmem:[#allocation6 + $0x1234] sm:$0xf0] }
 0x159   :  { %v11010_v35 = vor.u32 %v14969_v12, %v11009_v5  ;;  %v15031_v5 = vld [vmem:[#allocation6 + $0x1b4] sm:$0xf0] }
 0x15a   :  { %v1548_v56 = vadd.f32 %v1547_v55, %v1534_v53  ;;  %2079 = vmatpush.bf16.msrb.mxu0 %v10998_v23  ;;  %v15023_v53 = vld [vmem:[#allocation6 + $0x174] sm:$0xf0]  ;;  %v11049_v55 = vld [vmem:[#allocation6 + $0x1290] sm:$0xf]  ;;  %v15021_v23 = vld [vmem:[#allocation6 + $0x164] sm:$0xf0]  ;;  %v11258_v12 = vor.u32 %v15031_v5, %v11257_v26 }
 0x15b   :  { %2049 = vmatpush.bf16.msra.mxu2 %v11010_v35  ;;  %v11218_v4 = vor.u32 %v15021_v23, %v11217_v1  ;;  %v14961_v35 = vld [vmem:[#allocation6 + $0x1204] sm:$0xf0] }
 0x15c   :  { %v1580_v62 = vmax.f32 %v1548_v56, 0.0  ;;  %2095 = vmatpush.bf16.msrb.mxu1 %v11046_v15  ;;  %v14979_v56 = vld [vmem:[#allocation6 + $0x1294] sm:$0xf0]  ;;  %v15033_v15 = vld [vmem:[#allocation6 + $0x1c4] sm:$0xf0] }
 0x15d   :  { %v1559_v19 = vpop.f32.mrf.mxu0  ;;  %v15006_v26 = vld [vmem:[#allocation9 + $0x70] sm:$0xff] }
 0x15e   :  { %v1573_v27 = vpop.f32.mrf.mxu1  ;;  %v1560_v37 = vadd.f32 %v1559_v19, %v1359_v20  ;;  %v1582_v0 = vpack.c.bf16 %v1580_v62, %v1578_v61  ;;  %v11066_v19 = vor.u32 %v14983_v18, %v11065_v17  ;;  %2080 = vmatpush.bf16.msrb.mxu0 %v10990_v32  ;;  %v15035_v61 = vld [vmem:[#allocation6 + $0x1d4] sm:$0xf0]  ;;  %v11266_v17 = vor.u32 %v15033_v15, %v11265_v11  ;;  %v10985_v18 = vld [vmem:[#allocation6 + $0x1210] sm:$0xf]  ;;  %v10977_v32 = vld [vmem:[#allocation6 + $0x1200] sm:$0xf] }
 0x160   :  { %v1574_v44 = vadd.f32 %v1573_v27, %v1560_v37  ;;  %1792 = vmatmul.bf16.vlgmr.msrb.gmra.mxu2 %v1582_v0  ;;  %1820 = vmatmul.bf16.vlgmr.msra.gmra.mxu0 %v1582_v0  ;;  %v15039_v27 = vld [vmem:[#allocation6 + $0x1f4] sm:$0xf0]  ;;  %v14981_v37 = vld [vmem:[#allocation6 + $0x12a4] sm:$0xf0] }
 0x161   :  { %2064 = vmatpush.bf16.msra.mxu3 %v11066_v19  ;;  %v11058_v39 = vor.u32 %v14981_v37, %v11057_v36  ;;  %v14965_v0 = vld [vmem:[#allocation6 + $0x1224] sm:$0xf0]  ;;  %v14963_v19 = vld [vmem:[#allocation6 + $0x1214] sm:$0xf0]  ;;  %v11201_v36 = vld [vmem:[#allocation6 + $0x140] sm:$0xf]  ;;  %v10978_v37 = vor.u32 %v14961_v35, %v10977_v32 }
 0x162   :  { %v1579_v58 = vmax.f32 %v1574_v44, 0.0  ;;  %v10979_v44 = vld [vmem:[#allocation6 + $0x1208] sm:$0xf0] }
 0x163   :  { %v10982_v50 = vor.u32 %v14960_v41, %v10979_v44  ;;  %v15029_v41 = vld [vmem:[#allocation6 + $0x1a4] sm:$0xf0]  ;;  %v11193_v44 = vld [vmem:[#allocation6 + $0x130] sm:$0xf] }
 0x165   :  { %v1561_v42 = vpop.f32.mrf.mxu0  ;;  %2065 = vmatpush.bf16.msra.mxu3 %v11058_v39  ;;  %2081 = vmatpush.bf16.msrb.mxu0 %v10982_v50  ;;  %v11241_v50 = vld [vmem:[#allocation6 + $0x190] sm:$0xf] }
 0x166   :  { %v1562_v45 = vadd.f32 %v1561_v42, %v1359_v20  ;;  %v1575_v52 = vpop.f32.mrf.mxu1  ;;  %v11289_v20 = vld [vmem:[#allocation6 + $0x1f0] sm:$0xf]  ;;  %v11282_v42 = vor.u32 %v15037_v40, %v11281_v38  ;;  %v15017_v38 = vld [vmem:[#allocation6 + $0x144] sm:$0xf0]  ;;  %v11249_v40 = vld [vmem:[#allocation6 + $0x1a0] sm:$0xf] }
 0x167   :  { %v11290_v29 = vor.u32 %v15039_v27, %v11289_v20  ;;  %v11209_v20 = vld [vmem:[#allocation6 + $0x150] sm:$0xf]  ;;  %v10986_v27 = vor.u32 %v14963_v19, %v10985_v18  ;;  %v11202_v39 = vor.u32 %v15017_v38, %v11201_v36  ;;  %v14997_v38 = vld [vmem:[#allocation9 + $0x28] sm:$0xff] }
 0x168   :  { %v1576_v54 = vadd.f32 %v1575_v52, %v1562_v45  ;;  %v11001_v45 = vld [vmem:[#allocation6 + $0x1230] sm:$0xf] }
 0x169   :  { %v11002_v51 = vor.u32 %v14967_v48, %v11001_v45  ;;  %v11225_v52 = vld [vmem:[#allocation6 + $0x170] sm:$0xf]  ;;  %v15015_v45 = vld [vmem:[#allocation6 + $0x134] sm:$0xf0] }
 0x16a   :  { %v1581_v59 = vmax.f32 %v1576_v54, 0.0  ;;  %v11226_v54 = vor.u32 %v15023_v53, %v11225_v52  ;;  %v11194_v48 = vor.u32 %v15015_v45, %v11193_v44  ;;  %v11185_v52 = vld [vmem:[#allocation6 + $0x120] sm:$0xf]  ;;  %v14999_v18 = vld [vmem:[#allocation9 + $0x38] sm:$0xff] }
 0x16b   :  { %2050 = vmatpush.bf16.msra.mxu2 %v11002_v51  ;;  %v15027_v51 = vld [vmem:[#allocation6 + $0x194] sm:$0xf0]  ;;  %v15007_v19 = vld [vmem:[#allocation9 + $0x78] sm:$0xff] }
 0x16c   :  { %v1583_v63 = vpack.c.bf16 %v1581_v59, %v1579_v58  ;;  %v11273_v58 = vld [vmem:[#allocation6 + $0x1d0] sm:$0xf]  ;;  %v11050_v59 = vor.u32 %v14979_v56, %v11049_v55  ;;  %2499 = vmatpush.bf16.msra.mxu0 %v11226_v54  ;;  %v11242_v53 = vor.u32 %v15027_v51, %v11241_v50  ;;  %v15013_v54 = vld [vmem:[#allocation6 + $0x124] sm:$0xf0]  ;;  %v11233_v55 = vld [vmem:[#allocation6 + $0x180] sm:$0xf] }
 0x16d   :  { %v11274_v62 = vor.u32 %v15035_v61, %v11273_v58  ;;  %v15025_v56 = vld [vmem:[#allocation6 + $0x184] sm:$0xf0]  ;;  %v11186_v58 = vor.u32 %v15013_v54, %v11185_v52  ;;  %v15011_v61 = vld [vmem:[#allocation6 + $0x114] sm:$0xf0]  ;;  %v14995_v54 = vld [vmem:[#allocation9 + $0x18] sm:$0xff] }
 0x16e   :  { %1806 = vmatmul.bf16.vlgmr.msrb.gmra.mxu3 %v1583_v63  ;;  %1834 = vmatmul.bf16.vlgmr.msra.gmra.mxu1 %v1583_v63  ;;  %v10993_v63 = vld [vmem:[#allocation6 + $0x1220] sm:$0xf]  ;;  %v15004_v50 = vld [vmem:[#allocation9 + $0x60] sm:$0xff] }
 0x16f   :  { %2513 = vmatpush.bf16.msra.mxu1 %v11290_v29  ;;  %2066 = vmatpush.bf16.msra.mxu3 %v11050_v59  ;;  %v10994_v2 = vor.u32 %v14965_v0, %v10993_v63  ;;  %v11210_v29 = vor.u32 %v15019_v28, %v11209_v20  ;;  %v11177_v59 = vld [vmem:[#allocation6 + $0x110] sm:$0xf] }
 0x170   :  { %2500 = vmatpush.bf16.msra.mxu0 %v11218_v4  ;;  %v1618_v63 = vld [vmem:[#allocation7 + $0x12] sm:$0x3]  ;;  %v11178_v0 = vor.u32 %v15011_v61, %v11177_v59  ;;  %v11169_v4 = vld [vmem:[#allocation6 + $0x100] sm:$0xf]  ;;  %v14992_v61 = vld [vmem:[#allocation9] sm:$0xff] }
 0x171   :  { %2051 = vmatpush.bf16.msra.mxu2 %v10994_v2  ;;  %v1621_v23 = vperm.slane %v1618_v63, 1  ;;  %v11170_v10 = vor.u32 %v15009_v9, %v11169_v4  ;;  %v14993_v59 = vld [vmem:[#allocation9 + $0x8] sm:$0xff]  ;;  %v15000_v9 = vld [vmem:[#allocation9 + $0x40] sm:$0xff] }
 0x173   :  { %2514 = vmatpush.bf16.msra.mxu1 %v11282_v42  ;;  %2067 = vmatpush.bf16.msra.mxu3 %v11042_v13  ;;  %v11250_v42 = vor.u32 %v15029_v41, %v11249_v40 }
 0x174   :  { %2501 = vmatpush.bf16.msra.mxu0 %v11210_v29  ;;  %v14998_v29 = vld [vmem:[#allocation9 + $0x30] sm:$0xff] }
 0x175   :  { %2052 = vmatpush.bf16.msra.mxu2 %v10986_v27 }
 0x177   :  { %2515 = vmatpush.bf16.msra.mxu1 %v11274_v62  ;;  %v11234_v62 = vor.u32 %v15025_v56, %v11233_v55  ;;  %2254 = vmatpush.bf16.msrb.mxu3 %v15007_v19  ;;  %v15003_v55 = vld [vmem:[#allocation9 + $0x58] sm:$0xff]  ;;  %v14994_v56 = vld [vmem:[#allocation9 + $0x10] sm:$0xff] }
 0x178   :  { %2502 = vmatpush.bf16.msra.mxu0 %v11202_v39  ;;  %v15005_v39 = vld [vmem:[#allocation9 + $0x68] sm:$0xff] }
 0x179   :  { %2053 = vmatpush.bf16.msra.mxu2 %v10978_v37 }
 0x17b   :  { %2516 = vmatpush.bf16.msra.mxu1 %v11266_v17  ;;  %v1620_v17 = vperm.slane %v1618_v63, 0  ;;  %2255 = vmatpush.bf16.msrb.mxu3 %v15006_v26  ;;  %v11227_v63 = vld [vmem:[#allocation6 + $0x178] sm:$0xf0]  ;;  %v11345_v26 = vld [vmem:[#allocation6 + $0xa60] sm:$0xf] }
 0x17c   :  { %2503 = vmatpush.bf16.msra.mxu0 %v11194_v48  ;;  %v14996_v48 = vld [vmem:[#allocation9 + $0x20] sm:$0xff] }
 0x17d   :  { %2240 = vmatpush.bf16.msrb.mxu2 %v14999_v18  ;;  %v15018_v18 = vld [vmem:[#allocation6 + $0x154] sm:$0xf] }
 0x17f   :  { %2517 = vmatpush.bf16.msra.mxu1 %v11258_v12  ;;  %2256 = vmatpush.bf16.msrb.mxu3 %v15005_v39  ;;  %v11275_v39 = vld [vmem:[#allocation6 + $0x1d8] sm:$0xf0] }
 0x180   :  { %2504 = vmatpush.bf16.msra.mxu0 %v11186_v58  ;;  %v15002_v58 = vld [vmem:[#allocation9 + $0x50] sm:$0xff] }
 0x181   :  { %2241 = vmatpush.bf16.msrb.mxu2 %v14998_v29  ;;  %v11283_v29 = vld [vmem:[#allocation6 + $0x1e8] sm:$0xf0] }
 0x183   :  { %2518 = vmatpush.bf16.msra.mxu1 %v11250_v42  ;;  %2257 = vmatpush.bf16.msrb.mxu3 %v15004_v50 }
 0x184   :  { %2505 = vmatpush.bf16.msra.mxu0 %v11178_v0 }
 0x185   :  { %2242 = vmatpush.bf16.msrb.mxu2 %v14997_v38  ;;  %v15034_v38 = vld [vmem:[#allocation6 + $0x1d4] sm:$0xf] }
 0x187   :  { %2519 = vmatpush.bf16.msra.mxu1 %v11242_v53  ;;  %2258 = vmatpush.bf16.msrb.mxu3 %v15003_v55  ;;  %v15049_v55 = vld [vmem:[#allocation6 + $0xa44] sm:$0xf0] }
 0x188   :  { %2506 = vmatpush.bf16.msra.mxu0 %v11170_v10  ;;  %v15038_v10 = vld [vmem:[#allocation6 + $0x1f4] sm:$0xf] }
 0x189   :  { %2243 = vmatpush.bf16.msrb.mxu2 %v14996_v48 }
 0x18b   :  { %2520 = vmatpush.bf16.msra.mxu1 %v11234_v62  ;;  %2259 = vmatpush.bf16.msrb.mxu3 %v15002_v58  ;;  %v15022_v62 = vld [vmem:[#allocation6 + $0x174] sm:$0xf]  ;;  %v11187_v58 = vld [vmem:[#allocation6 + $0x128] sm:$0xf0] }
 0x18c   :  { %v11230_v0 = vor.u32 %v15022_v62, %v11227_v63  ;;  %v15030_v62 = vld [vmem:[#allocation6 + $0x1b4] sm:$0xf]  ;;  %v11259_v63 = vld [vmem:[#allocation6 + $0x1b8] sm:$0xf0] }
 0x18d   :  { %2244 = vmatpush.bf16.msrb.mxu2 %v14995_v54 }
 0x191   :  { %2245 = vmatpush.bf16.msrb.mxu2 %v14994_v56  ;;  %v15012_v56 = vld [vmem:[#allocation6 + $0x124] sm:$0xf] }
 0x195   :  { %2246 = vmatpush.bf16.msrb.mxu2 %v14993_v59 }
 0x199   :  { %2247 = vmatpush.bf16.msrb.mxu2 %v14992_v61  ;;  %v11190_v61 = vor.u32 %v15012_v56, %v11187_v58 }
 0x1dd   :  { %v1821_v2 = vpop.f32.mrf.mxu0 }
 0x1de   :  { %v1822_v11 = vadd.f32 %v1821_v2, %v1621_v23  ;;  %v15020_v2 = vld [vmem:[#allocation6 + $0x164] sm:$0xf] }
 0x1e3   :  { %v1793_v15 = vpop.f32.mrf.mxu2 }
 0x1e4   :  { %v1794_v12 = vadd.f32 %v1793_v15, %v1620_v17  ;;  %v11353_v15 = vld [vmem:[#allocation6 + $0xa70] sm:$0xf] }
 0x1e5   :  { %v1823_v20 = vpop.f32.mrf.mxu0 }
 0x1e6   :  { %v1824_v28 = vadd.f32 %v1823_v20, %v1621_v23  ;;  %v11219_v23 = vld [vmem:[#allocation6 + $0x168] sm:$0xf0]  ;;  %v11211_v20 = vld [vmem:[#allocation6 + $0x158] sm:$0xf0] }
 0x1e7   :  { %v11222_v4 = vor.u32 %v15020_v2, %v11219_v23  ;;  %v15047_v2 = vld [vmem:[#allocation6 + $0xa34] sm:$0xf0]  ;;  %v15010_v23 = vld [vmem:[#allocation6 + $0x114] sm:$0xf] }
 0x1eb   :  { %v1835_v1 = vpop.f32.mrf.mxu1  ;;  %v1795_v37 = vpop.f32.mrf.mxu2 }
 0x1ec   :  { %v1836_v27 = vadd.f32 %v1835_v1, %v1822_v11  ;;  %v1796_v42 = vadd.f32 %v1795_v37, %v1620_v17  ;;  %v15001_v1 = vld [vmem:[#allocation9 + $0x48] sm:$0xff]  ;;  %v15055_v17 = vld [vmem:[#allocation6 + $0xa74] sm:$0xf0] }
 0x1ed   :  { %2260 = vmatpush.bf16.msrb.mxu3 %v15001_v1  ;;  %v11291_v11 = vld [vmem:[#allocation6 + $0x1f8] sm:$0xf0]  ;;  %v11354_v19 = vor.u32 %v15055_v17, %v11353_v15  ;;  %v11321_v1 = vld [vmem:[#allocation6 + $0xa30] sm:$0xf]  ;;  %v11313_v15 = vld [vmem:[#allocation6 + $0xa20] sm:$0xf] }
 0x1ee   :  { %v1841_v35 = vmax.f32 %v1836_v27, 0.0  ;;  %v11214_v27 = vor.u32 %v15018_v18, %v11211_v20  ;;  %v15045_v18 = vld [vmem:[#allocation6 + $0xa24] sm:$0xf0]  ;;  %v11171_v20 = vld [vmem:[#allocation6 + $0x108] sm:$0xf0] }
 0x1f1   :  { %v1807_v13 = vpop.f32.mrf.mxu3  ;;  %2261 = vmatpush.bf16.msrb.mxu3 %v15000_v9  ;;  %v11179_v9 = vld [vmem:[#allocation6 + $0x118] sm:$0xf0] }
 0x1f2   :  { %v1808_v40 = vadd.f32 %v1807_v13, %v1794_v12  ;;  %v11294_v13 = vor.u32 %v15038_v10, %v11291_v11  ;;  %v15053_v12 = vld [vmem:[#allocation6 + $0xa64] sm:$0xf0]  ;;  %v11182_v10 = vor.u32 %v15010_v23, %v11179_v9  ;;  %v15028_v11 = vld [vmem:[#allocation6 + $0x1a4] sm:$0xf] }
 0x1f3   :  { %v1837_v5 = vpop.f32.mrf.mxu1 }
 0x1f4   :  { %v1838_v32 = vadd.f32 %v1837_v5, %v1824_v28  ;;  %v1840_v51 = vmax.f32 %v1808_v40, 0.0  ;;  %v15036_v28 = vld [vmem:[#allocation6 + $0x1e4] sm:$0xf]  ;;  %v11337_v40 = vld [vmem:[#allocation6 + $0xa50] sm:$0xf] }
 0x1f5   :  { %v11286_v5 = vor.u32 %v15036_v28, %v11283_v29  ;;  %v15026_v29 = vld [vmem:[#allocation6 + $0x194] sm:$0xf] }
 0x1f6   :  { %v1843_v36 = vmax.f32 %v1838_v32, 0.0  ;;  %v15016_v32 = vld [vmem:[#allocation6 + $0x144] sm:$0xf] }
 0x1f8   :  { %v1845_v41 = vpack.c.bf16 %v1843_v36, %v1841_v35  ;;  %v11346_v35 = vor.u32 %v15053_v12, %v11345_v26  ;;  %v11203_v36 = vld [vmem:[#allocation6 + $0x148] sm:$0xf0]  ;;  %v11243_v26 = vld [vmem:[#allocation6 + $0x198] sm:$0xf0] }
 0x1f9   :  { %v1809_v44 = vpop.f32.mrf.mxu3  ;;  %v11206_v37 = vor.u32 %v15016_v32, %v11203_v36  ;;  %v11246_v12 = vor.u32 %v15026_v29, %v11243_v26  ;;  %v15043_v32 = vld [vmem:[#allocation6 + $0xa14] sm:$0xf0]  ;;  %v15052_v26 = vld [vmem:[#allocation6 + $0xa64] sm:$0xf] }
 0x1fa   :  { %v1810_v45 = vadd.f32 %v1809_v44, %v1796_v42  ;;  %2068 = vmatmul.bf16.vlgmr.msra.gmra.mxu3 %v1845_v41  ;;  %2096 = vmatmul.bf16.vlgmr.msrb.gmra.mxu1 %v1845_v41  ;;  %v11278_v41 = vor.u32 %v15034_v38, %v11275_v39  ;;  %v15051_v42 = vld [vmem:[#allocation6 + $0xa54] sm:$0xf0]  ;;  %v15014_v44 = vld [vmem:[#allocation6 + $0x134] sm:$0xf]  ;;  %v11235_v38 = vld [vmem:[#allocation6 + $0x188] sm:$0xf0] }
 0x1fb   :  { %2541 = vmatpush.bf16.msra.mxu3 %v11294_v13  ;;  %v11338_v48 = vor.u32 %v15051_v42, %v11337_v40  ;;  %v11251_v13 = vld [vmem:[#allocation6 + $0x1a8] sm:$0xf0]  ;;  %v11297_v39 = vld [vmem:[#allocation6 + $0xa00] sm:$0xf]  ;;  %v1880_v42 = vld [vmem:[#allocation7 + $0x24] sm:$0x3] }
 0x1fc   :  { %v1842_v52 = vmax.f32 %v1810_v45, 0.0  ;;  %v11195_v45 = vld [vmem:[#allocation6 + $0x138] sm:$0xf0]  ;;  %v11254_v17 = vor.u32 %v15028_v11, %v11251_v13 }
 0x1fd   :  { %v11198_v50 = vor.u32 %v15014_v44, %v11195_v45 }
 0x1fe   :  { %v1844_v53 = vpack.c.bf16 %v1842_v52, %v1840_v51  ;;  %v15032_v51 = vld [vmem:[#allocation6 + $0x1c4] sm:$0xf]  ;;  %v11267_v52 = vld [vmem:[#allocation6 + $0x1c8] sm:$0xf0] }
 0x1ff   :  { %2542 = vmatpush.bf16.msra.mxu3 %v11286_v5  ;;  %v11270_v54 = vor.u32 %v15032_v51, %v11267_v52  ;;  %v11305_v5 = vld [vmem:[#allocation6 + $0xa10] sm:$0xf] }
 0x200   :  { %2054 = vmatmul.bf16.vlgmr.msra.gmra.mxu2 %v1844_v53  ;;  %2082 = vmatmul.bf16.vlgmr.msrb.gmra.mxu0 %v1844_v53  ;;  %v11329_v53 = vld [vmem:[#allocation6 + $0xa40] sm:$0xf] }
 0x201   :  { %2527 = vmatpush.bf16.msra.mxu2 %v11230_v0  ;;  %2761 = vmatpush.bf16.msrb.mxu0 %v11354_v19  ;;  %v11330_v59 = vor.u32 %v15049_v55, %v11329_v53  ;;  %v11262_v0 = vor.u32 %v15030_v62, %v11259_v63  ;;  %v15008_v19 = vld [vmem:[#allocation6 + $0x104] sm:$0xf] }
 0x202   :  { %v11174_v28 = vor.u32 %v15008_v19, %v11171_v20 }
 0x203   :  { %2543 = vmatpush.bf16.msra.mxu3 %v11278_v41  ;;  %v15041_v41 = vld [vmem:[#allocation6 + $0xa04] sm:$0xf0] }
 0x204   :  { %v11298_v44 = vor.u32 %v15041_v41, %v11297_v39 }
 0x205   :  { %2528 = vmatpush.bf16.msra.mxu2 %v11222_v4  ;;  %2762 = vmatpush.bf16.msrb.mxu0 %v11346_v35  ;;  %v11322_v4 = vor.u32 %v15047_v2, %v11321_v1  ;;  %v11306_v35 = vor.u32 %v15043_v32, %v11305_v5  ;;  %v16317_v1 = vld [vmem:[#allocation7 + $0x2] sm:$0x3]  ;;  %v11347_v5 = vld [vmem:[#allocation6 + $0xa68] sm:$0xf0] }
 0x206   :  { %v11350_v32 = vor.u32 %v15052_v26, %v11347_v5  ;;  %v11403_v26 = vld [vmem:[#allocation6 + $0xad8] sm:$0xf0] }
 0x207   :  { %2544 = vmatpush.bf16.msra.mxu3 %v11270_v54  ;;  %v1882_v54 = vperm.slane %v1880_v42, 0 }
 0x209   :  { %2529 = vmatpush.bf16.msra.mxu2 %v11214_v27  ;;  %2763 = vmatpush.bf16.msrb.mxu0 %v11338_v48  ;;  %v11314_v27 = vor.u32 %v15045_v18, %v11313_v15  ;;  %v1883_v48 = vperm.slane %v1880_v42, 1  ;;  %v2335_v15 = vperm.slane %v16317_v1, 0  ;;  %v11355_v18 = vld [vmem:[#allocation6 + $0xa78] sm:$0xf0] }
 0x20a   :  { %2521 = vmatmul.bf16.vlgmr.msra.gmra.mxu1 %v16263_v60 }
 0x20b   :  { %2545 = vmatpush.bf16.msra.mxu3 %v11262_v0 }
 0x20d   :  { %2530 = vmatpush.bf16.msra.mxu2 %v11206_v37  ;;  %2764 = vmatpush.bf16.msrb.mxu0 %v11330_v59  ;;  %v15024_v37 = vld [vmem:[#allocation6 + $0x184] sm:$0xf] }
 0x20e   :  { %v11238_v40 = vor.u32 %v15024_v37, %v11235_v38  ;;  %v15050_v37 = vld [vmem:[#allocation6 + $0xa54] sm:$0xf]  ;;  %v11339_v38 = vld [vmem:[#allocation6 + $0xa58] sm:$0xf0] }
 0x20f   :  { %2546 = vmatpush.bf16.msra.mxu3 %v11254_v17  ;;  %v15054_v17 = vld [vmem:[#allocation6 + $0xa74] sm:$0xf]  ;;  %v11342_v41 = vor.u32 %v15050_v37, %v11339_v38  ;;  %v11395_v37 = vld [vmem:[#allocation6 + $0xac8] sm:$0xf0] }
 0x210   :  { %2507 = vmatmul.bf16.vlgmr.msra.gmra.mxu0 %v16261_v57 }
 0x211   :  { %2531 = vmatpush.bf16.msra.mxu2 %v11198_v50  ;;  %2765 = vmatpush.bf16.msrb.mxu0 %v11322_v4 }
 0x213   :  { %2547 = vmatpush.bf16.msra.mxu3 %v11246_v12 }
 0x215   :  { %2532 = vmatpush.bf16.msra.mxu2 %v11190_v61  ;;  %2766 = vmatpush.bf16.msrb.mxu0 %v11314_v27  ;;  %v11358_v27 = vor.u32 %v15054_v17, %v11355_v18  ;;  %v11411_v18 = vld [vmem:[#allocation6 + $0xae8] sm:$0xf0] }
 0x217   :  { %2548 = vmatpush.bf16.msra.mxu3 %v11238_v40 }
 0x219   :  { %2533 = vmatpush.bf16.msra.mxu2 %v11182_v10  ;;  %2767 = vmatpush.bf16.msrb.mxu0 %v11306_v35 }
 0x21d   :  { %2534 = vmatpush.bf16.msra.mxu2 %v11174_v28  ;;  %2768 = vmatpush.bf16.msrb.mxu0 %v11298_v44 }
 0x277   :  { %v2097_v36 = vpop.f32.mrf.mxu1 }
 0x27d   :  { %v2083_v45 = vpop.f32.mrf.mxu0  ;;  %v2069_v50 = vpop.f32.mrf.mxu3 }
 0x27e   :  { %v2084_v51 = vadd.f32 %v2083_v45, %v1883_v48  ;;  %v15048_v45 = vld [vmem:[#allocation6 + $0xa44] sm:$0xf] }
 0x27f   :  { %v2099_v52 = vpop.f32.mrf.mxu1 }
 0x280   :  { %v2098_v56 = vadd.f32 %v2097_v36, %v2084_v51 }
 0x282   :  { %v2103_v62 = vmax.f32 %v2098_v56, 0.0  ;;  %v11315_v56 = vld [vmem:[#allocation6 + $0xa28] sm:$0xf0] }
 0x283   :  { %v2055_v53 = vpop.f32.mrf.mxu2 }
 0x284   :  { %v2056_v59 = vadd.f32 %v2055_v53, %v1882_v54  ;;  %v11323_v53 = vld [vmem:[#allocation6 + $0xa38] sm:$0xf0] }
 0x285   :  { %v2085_v55 = vpop.f32.mrf.mxu0  ;;  %v2071_v23 = vpop.f32.mrf.mxu3 }
 0x286   :  { %v2086_v58 = vadd.f32 %v2085_v55, %v1883_v48  ;;  %v2070_v2 = vadd.f32 %v2069_v50, %v2056_v59  ;;  %v11331_v48 = vld [vmem:[#allocation6 + $0xa48] sm:$0xf0]  ;;  %v15044_v55 = vld [vmem:[#allocation6 + $0xa24] sm:$0xf]  ;;  %v15042_v59 = vld [vmem:[#allocation6 + $0xa14] sm:$0xf] }
 0x287   :  { %v2522_v10 = vpop.f32.mrf.mxu1  ;;  %v11334_v51 = vor.u32 %v15048_v45, %v11331_v48  ;;  %v11377_v48 = vld [vmem:[#allocation6 + $0xaa0] sm:$0xf] }
 0x288   :  { %v2100_v61 = vadd.f32 %v2099_v52, %v2086_v58  ;;  %v2102_v19 = vmax.f32 %v2070_v2, 0.0  ;;  %v15046_v52 = vld [vmem:[#allocation6 + $0xa34] sm:$0xf]  ;;  %v11318_v58 = vor.u32 %v15044_v55, %v11315_v56  ;;  %v11369_v55 = vld [vmem:[#allocation6 + $0xa90] sm:$0xf] }
 0x289   :  { %v15059_v56 = vld [vmem:[#allocation6 + $0xa94] sm:$0xf0] }
 0x28a   :  { %v2105_v63 = vmax.f32 %v2100_v61, 0.0  ;;  %v11307_v61 = vld [vmem:[#allocation6 + $0xa18] sm:$0xf0] }
 0x28b   :  { %v2057_v0 = vpop.f32.mrf.mxu2 }
 0x28c   :  { %v2107_v4 = vpack.c.bf16 %v2105_v63, %v2103_v62  ;;  %v2058_v9 = vadd.f32 %v2057_v0, %v1882_v54  ;;  %v11326_v54 = vor.u32 %v15046_v52, %v11323_v53  ;;  %v11310_v62 = vor.u32 %v15042_v59, %v11307_v61  ;;  %v15040_v63 = vld [vmem:[#allocation6 + $0xa04] sm:$0xf]  ;;  %v11299_v0 = vld [vmem:[#allocation6 + $0xa08] sm:$0xf0]  ;;  %v11371_v61 = vld [vmem:[#allocation6 + $0xa98] sm:$0xf0] }
 0x28d   :  { %v2508_v11 = vpop.f32.mrf.mxu0  ;;  %v11302_v2 = vor.u32 %v15040_v63, %v11299_v0  ;;  %v11379_v53 = vld [vmem:[#allocation6 + $0xaa8] sm:$0xf0]  ;;  %v11370_v59 = vor.u32 %v15059_v56, %v11369_v55  ;;  %v15082_v55 = vld [vmem:[#allocation6 + $0x1354] sm:$0xf]  ;;  %v11467_v56 = vld [vmem:[#allocation6 + $0x1358] sm:$0xf0] }
 0x28e   :  { %v2072_v13 = vadd.f32 %v2071_v23, %v2058_v9  ;;  %2262 = vmatmul.bf16.vlgmr.msrb.gmra.mxu3 %v2107_v4  ;;  %v2509_v29 = vadd.f32 %v2508_v11, %v2335_v15  ;;  %v15071_v23 = vld [vmem:[#allocation6 + $0xaf4] sm:$0xf0]  ;;  %v15070_v4 = vld [vmem:[#allocation6 + $0xaf4] sm:$0xf] }
 0x28f   :  { %v2524_v39 = vpop.f32.mrf.mxu1 }
 0x290   :  { %v2104_v20 = vmax.f32 %v2072_v13, 0.0  ;;  %v2523_v35 = vadd.f32 %v2522_v10, %v2509_v29  ;;  %v11419_v10 = vld [vmem:[#allocation6 + $0xaf8] sm:$0xf0]  ;;  %v15069_v13 = vld [vmem:[#allocation6 + $0xae4] sm:$0xf0] }
 0x291   :  { %v11422_v11 = vor.u32 %v15070_v4, %v11419_v10  ;;  %v15920_v4 = vld [vmem:[#allocation10] ss:$0 sm:$0xff]  ;;  %v11363_v10 = vld [vmem:[#allocation6 + $0xa88] sm:$0xf0] }
 0x292   :  { %v2106_v28 = vpack.c.bf16 %v2104_v20, %v2102_v19  ;;  %v2555_v42 = vmax.f32 %v2523_v35, 0.0  ;;  %v11401_v20 = vld [vmem:[#allocation6 + $0xad0] sm:$0xf]  ;;  %v15064_v35 = vld [vmem:[#allocation6 + $0xac4] sm:$0xf] }
 0x293   :  { %2803 = vmatpush.bf16.msrb.mxu3 %v11422_v11  ;;  %v11398_v38 = vor.u32 %v15064_v35, %v11395_v37 }
 0x294   :  { %2248 = vmatmul.bf16.vlgmr.msrb.gmra.mxu2 %v2106_v28  ;;  %v15066_v28 = vld [vmem:[#allocation6 + $0xad4] sm:$0xf] }
 0x295   :  { %v2510_v12 = vpop.f32.mrf.mxu0  ;;  %2789 = vmatpush.bf16.msrb.mxu2 %v11358_v27  ;;  %v15067_v27 = vld [vmem:[#allocation6 + $0xad4] sm:$0xf0]  ;;  %v11406_v5 = vor.u32 %v15066_v28, %v11403_v26 }
 0x296   :  { %v2511_v36 = vadd.f32 %v2510_v12, %v2335_v15  ;;  %v15068_v15 = vld [vmem:[#allocation6 + $0xae4] sm:$0xf]  ;;  %v11402_v29 = vor.u32 %v15067_v27, %v11401_v20  ;;  %v11393_v12 = vld [vmem:[#allocation6 + $0xac0] sm:$0xf] }
 0x297   :  { %v11414_v19 = vor.u32 %v15068_v15, %v11411_v18 }
 0x298   :  { %v2525_v40 = vadd.f32 %v2524_v39, %v2511_v36  ;;  %v11385_v39 = vld [vmem:[#allocation6 + $0xab0] sm:$0xf] }
 0x299   :  { %2790 = vmatpush.bf16.msrb.mxu2 %v11350_v32  ;;  %2804 = vmatpush.bf16.msrb.mxu3 %v11414_v19  ;;  %v15065_v32 = vld [vmem:[#allocation6 + $0xac4] sm:$0xf0] }
 0x29a   :  { %v2557_v44 = vmax.f32 %v2525_v40, 0.0  ;;  %v11394_v36 = vor.u32 %v15065_v32, %v11393_v12  ;;  %v15063_v40 = vld [vmem:[#allocation6 + $0xab4] sm:$0xf0]  ;;  %v2336_v12 = vperm.slane %v16317_v1, 1  ;;  %v11547_v1 = vld [vmem:[#allocation6 + $0x13f8] sm:$0xf0] }
 0x29c   :  { %v2559_v50 = vpack.c.bf16 %v2557_v44, %v2555_v42  ;;  %v11386_v42 = vor.u32 %v15063_v40, %v11385_v39  ;;  %v11387_v44 = vld [vmem:[#allocation6 + $0xab8] sm:$0xf0] }
 0x29d   :  { %2791 = vmatpush.bf16.msrb.mxu2 %v11342_v41  ;;  %2805 = vmatpush.bf16.msrb.mxu3 %v11406_v5  ;;  %v15062_v41 = vld [vmem:[#allocation6 + $0xab4] sm:$0xf] }
 0x29e   :  { %2549 = vmatmul.bf16.vlgmr.msra.gmra.mxu3 %v16263_v60  ;;  %2769 = vmatmul.bf16.vlgmr.msrb.gmra.mxu0 %v2559_v50  ;;  %v11417_v60 = vld [vmem:[#allocation6 + $0xaf0] sm:$0xf]  ;;  %v11390_v45 = vor.u32 %v15062_v41, %v11387_v44  ;;  %v15086_v44 = vld [vmem:[#allocation6 + $0x1374] sm:$0xf] }
 0x29f   :  { %v11418_v9 = vor.u32 %v15071_v23, %v11417_v60  ;;  %v15057_v60 = vld [vmem:[#allocation6 + $0xa84] sm:$0xf0]  ;;  %v15056_v23 = vld [vmem:[#allocation6 + $0xa84] sm:$0xf] }
 0x2a1   :  { %2792 = vmatpush.bf16.msrb.mxu2 %v11334_v51  ;;  %2775 = vmatpush.bf16.msrb.mxu1 %v11418_v9  ;;  %v15060_v51 = vld [vmem:[#allocation6 + $0xaa4] sm:$0xf] }
 0x2a2   :  { %2806 = vmatpush.bf16.msrb.mxu3 %v11398_v38 }
 0x2a4   :  { %2535 = vmatmul.bf16.vlgmr.msra.gmra.mxu2 %v16261_v57  ;;  %v11409_v57 = vld [vmem:[#allocation6 + $0xae0] sm:$0xf] }
 0x2a5   :  { %2793 = vmatpush.bf16.msrb.mxu2 %v11326_v54  ;;  %v11410_v17 = vor.u32 %v15069_v13, %v11409_v57  ;;  %v11382_v54 = vor.u32 %v15060_v51, %v11379_v53  ;;  %v11366_v57 = vor.u32 %v15056_v23, %v11363_v10  ;;  %v11475_v51 = vld [vmem:[#allocation6 + $0x1368] sm:$0xf0]  ;;  %v15102_v53 = vld [vmem:[#allocation6 + $0x13f4] sm:$0xf] }
 0x2a6   :  { %2807 = vmatpush.bf16.msrb.mxu3 %v11390_v45  ;;  %v11483_v45 = vld [vmem:[#allocation6 + $0x1378] sm:$0xf0] }
 0x2a7   :  { %2776 = vmatpush.bf16.msrb.mxu1 %v11410_v17 }
 0x2a9   :  { %2794 = vmatpush.bf16.msrb.mxu2 %v11318_v58  ;;  %v15058_v58 = vld [vmem:[#allocation6 + $0xa94] sm:$0xf] }
 0x2aa   :  { %2808 = vmatpush.bf16.msrb.mxu3 %v11382_v54  ;;  %v11374_v63 = vor.u32 %v15058_v58, %v11371_v61  ;;  %v11550_v54 = vor.u32 %v15102_v53, %v11547_v1  ;;  %v15100_v58 = vld [vmem:[#allocation6 + $0x13e4] sm:$0xf]  ;;  %v11539_v61 = vld [vmem:[#allocation6 + $0x13e8] sm:$0xf0]  ;;  %v15094_v53 = vld [vmem:[#allocation6 + $0x13b4] sm:$0xf] }
 0x2ab   :  { %2777 = vmatpush.bf16.msrb.mxu1 %v11402_v29  ;;  %v11515_v1 = vld [vmem:[#allocation6 + $0x13b8] sm:$0xf0] }
 0x2ad   :  { %2795 = vmatpush.bf16.msrb.mxu2 %v11310_v62  ;;  %v120_v62 = vlaneseq }
 0x2ae   :  { %2809 = vmatpush.bf16.msrb.mxu3 %v11374_v63  ;;  %v11459_v63 = vld [vmem:[#allocation6 + $0x1348] sm:$0xf0] }
 0x2af   :  { %2778 = vmatpush.bf16.msrb.mxu1 %v11394_v36  ;;  %v16322_v11 = vand.u32 127, %v120_v62  ;;  %v15080_v62 = vld [vmem:[#allocation6 + $0x1344] sm:$0xf] }
 0x2b0   :  { %v11462_v10 = vor.u32 %v15080_v62, %v11459_v63  ;;  %v11518_v62 = vor.u32 %v15094_v53, %v11515_v1  ;;  %v15092_v63 = vld [vmem:[#allocation6 + $0x13a4] sm:$0xf]  ;;  %v15151_v53 = vld [vmem:[#allocation6 + $0x2f4] sm:$0xf0] }
 0x2b1   :  { %2796 = vmatpush.bf16.msrb.mxu2 %v11302_v2  ;;  %v11361_v2 = vld [vmem:[#allocation6 + $0xa80] sm:$0xf]  ;;  %vm2269_vm0 = vcmp.lt.s32.totalorder %v16322_v11, 3  ;;  %vm3247_vm1 = vcmp.ge.s32.totalorder %v16322_v11, 3  ;;  %vm3248_vm2 = vcmp.lt.s32.totalorder %v16322_v11, 6  ;;  %vm4226_vm4 = vcmp.ge.s32.totalorder %v16322_v11, 6 }
 0x2b2   :  { %v11362_v9 = vor.u32 %v15057_v60, %v11361_v2  ;;  %2810 = vmatpush.bf16.msrb.mxu3 %v11366_v57  ;;  %v11481_v2 = vld [vmem:[#allocation6 + $0x1370] sm:$0xf]  ;;  %v15087_v60 = vld [vmem:[#allocation6 + $0x1374] sm:$0xf0]  ;;  %v15078_v57 = vld [vmem:[#allocation6 + $0x1334] sm:$0xf] }
 0x2b3   :  { %2779 = vmatpush.bf16.msrb.mxu1 %v11386_v42  ;;  %v11482_v23 = vor.u32 %v15087_v60, %v11481_v2  ;;  %v15072_v60 = vld [vmem:[#allocation6 + $0x1304] sm:$0xf]  ;;  %vm16351_vm3 = vmand %vm3247_vm1, %vm3248_vm2  ;;  %vm4227_vm5 = vcmp.lt.s32.totalorder %v16322_v11, 9  ;;  %vm5205_vm7 = vcmp.ge.s32.totalorder %v16322_v11, 9  ;;  %vm5206_vm8 = vcmp.lt.s32.totalorder %v16322_v11, 12 }
 0x2b4   :  { %2797 = vmatmul.bf16.vlgmr.msrb.gmra.mxu2 %v2559_v50  ;;  %v15061_v50 = vld [vmem:[#allocation6 + $0xaa4] sm:$0xf0]  ;;  %vm16381_vm6 = vmand %vm4226_vm4, %vm4227_vm5  ;;  %vm6184_vm10 = vcmp.ge.s32.totalorder %v16322_v11, 12  ;;  %vm6185_vm11 = vcmp.lt.s32.totalorder %v16322_v11, 15  ;;  %vm7163_vm13 = vcmp.ge.s32.totalorder %v16322_v11, 15  ;;  %vm7164_vm14 = vcmp.lt.s32.totalorder %v16322_v11, 17 }
 0x2b5   :  { %v11378_v52 = vor.u32 %v15061_v50, %v11377_v48  ;;  %v11486_v48 = vor.u32 %v15086_v44, %v11483_v45  ;;  %v15084_v50 = vld [vmem:[#allocation6 + $0x1364] sm:$0xf]  ;;  %3023 = vmatpush.bf16.msra.mxu0 %v11482_v23  ;;  %v11427_v23 = vld [vmem:[#allocation6 + $0x1308] sm:$0xf0]  ;;  %vm16419_vm9 = vmand %vm5205_vm7, %vm5206_vm8  ;;  %vm8142_vm1 = vcmp.ge.s32.totalorder %v16322_v11, 17  ;;  %vm8143_vm2 = vcmp.lt.s32.totalorder %v16322_v11, 19 }
 0x2b6   :  { %3065 = vmatpush.bf16.msra.mxu3 %v11550_v54  ;;  %v15099_v54 = vld [vmem:[#allocation6 + $0x13d4] sm:$0xf0]  ;;  %vm16449_vm12 = vmand %vm6184_vm10, %vm6185_vm11  ;;  %vm9121_vm5 = vcmp.ge.s32.totalorder %v16322_v11, 19  ;;  %vm9122_vm7 = vcmp.lt.s32.totalorder %v16322_v11, 21  ;;  %vm10100_vm10 = vcmp.ge.s32.totalorder %v16322_v11, 21  ;;  %vm10101_vm11 = vcmp.lt.s32.totalorder %v16322_v11, 23 }
 0x2b7   :  { %2780 = vmatpush.bf16.msrb.mxu1 %v11378_v52  ;;  %3051 = vmatpush.bf16.msra.mxu2 %v11486_v48  ;;  %v11478_v52 = vor.u32 %v15084_v50, %v11475_v51  ;;  %v11457_v50 = vld [vmem:[#allocation6 + $0x1340] sm:$0xf]  ;;  %v15081_v51 = vld [vmem:[#allocation6 + $0x1344] sm:$0xf0]  ;;  %vm16479_vm15 = vmand %vm7163_vm13, %vm7164_vm14 }
 0x2b8   :  { %vm16509_vm4 = vmand %vm8142_vm1, %vm8143_vm2 }
 0x2b9   :  { %vm16551_vm8 = vmand %vm9121_vm5, %vm9122_vm7 }
 0x2ba   :  { %vm16602_vm13 = vmand %vm10100_vm10, %vm10101_vm11 }
 0x2bb   :  { %2781 = vmatpush.bf16.msrb.mxu1 %v11370_v59  ;;  %3052 = vmatpush.bf16.msra.mxu2 %v11478_v52  ;;  %v11470_v59 = vor.u32 %v15082_v55, %v11467_v56  ;;  %v11529_v52 = vld [vmem:[#allocation6 + $0x13d0] sm:$0xf] }
 0x2bc   :  { %v11530_v56 = vor.u32 %v15099_v54, %v11529_v52  ;;  %v11433_v54 = vld [vmem:[#allocation6 + $0x1310] sm:$0xf] }
 0x2bf   :  { %2782 = vmatpush.bf16.msrb.mxu1 %v11362_v9  ;;  %v11531_v9 = vld [vmem:[#allocation6 + $0x13d8] sm:$0xf0]  ;;  %3053 = vmatpush.bf16.msra.mxu2 %v11470_v59 }
 0x2c0   :  { %v11435_v59 = vld [vmem:[#allocation6 + $0x1318] sm:$0xf0] }
 0x2c3   :  { %3054 = vmatpush.bf16.msra.mxu2 %v11462_v10  ;;  %v11449_v10 = vld [vmem:[#allocation6 + $0x1330] sm:$0xf] }
 0x311   :  { %v2263_v0 = vpop.f32.mrf.mxu3 }
 0x317   :  { %v2249_v13 = vpop.f32.mrf.mxu2 }
 0x318   :  { %v2250_v15 = vadd.f32 %v15920_v4, %v2249_v13  ;;  %v11473_v13 = vld [vmem:[#allocation6 + $0x1360] sm:$0xf] }
 0x319   :  { %v2265_v19 = vpop.f32.mrf.mxu3 }
 0x31a   :  { %v16325_v17 = vadd.f32 %v2263_v0, %v2250_v15  ;;  %v11542_v0 = vor.u32 %v15100_v58, %v11539_v61  ;;  %v15085_v15 = vld [vmem:[#allocation6 + $0x1364] sm:$0xf0]  ;;  %v15074_v58 = vld [vmem:[#allocation6 + $0x1314] sm:$0xf]  ;;  %v11458_v61 = vor.u32 %v15081_v51, %v11457_v50  ;;  %v15095_v50 = vld [vmem:[#allocation6 + $0x13b4] sm:$0xf0] }
 0x31b   :  { %v11438_v2 = vor.u32 %v15074_v58, %v11435_v59  ;;  %v11737_v51 = vld [vmem:[#allocation6 + $0x2f0] sm:$0xf]  ;;  %v15131_v59 = vld [vmem:[#allocation6 + $0x254] sm:$0xf0] }
 0x31c   :  { %v16330_v18 = vsel %vm2269_vm0, %v16325_v17, -inf  ;;  %3066 = vmatpush.bf16.msra.mxu3 %v11542_v0  ;;  %v11507_v0 = vld [vmem:[#allocation6 + $0x13a8] sm:$0xf0]  ;;  %v11738_v1 = vor.u32 %v15151_v53, %v11737_v51  ;;  %v11657_v58 = vld [vmem:[#allocation6 + $0x250] sm:$0xf] }
 0x31d   :  { %2273 = vmax.xlane.f32.xlu0 %v16330_v18  ;;  %v15143_v51 = vld [vmem:[#allocation6 + $0x2b4] sm:$0xf0]  ;;  %v11625_v53 = vld [vmem:[#allocation6 + $0x210] sm:$0xf] }
 0x31f   :  { %v2251_v20 = vpop.f32.mrf.mxu2 }
 0x320   :  { %v2252_v27 = vadd.f32 %v15920_v4, %v2251_v20  ;;  %v15098_v4 = vld [vmem:[#allocation6 + $0x13d4] sm:$0xf]  ;;  %v11474_v20 = vor.u32 %v15085_v15, %v11473_v13  ;;  %v11673_v15 = vld [vmem:[#allocation6 + $0x270] sm:$0xf] }
 0x321   :  { %v2550_v26 = vpop.f32.mrf.mxu3 }
 0x322   :  { %v16333_v28 = vadd.f32 %v2265_v19, %v2252_v27  ;;  %v11451_v19 = vld [vmem:[#allocation6 + $0x1338] sm:$0xf0]  ;;  %v11545_v27 = vld [vmem:[#allocation6 + $0x13f0] sm:$0xf]  ;;  %3024 = vmatpush.bf16.msra.mxu0 %v11474_v20  ;;  %v15090_v20 = vld [vmem:[#allocation6 + $0x1394] sm:$0xf] }
 0x324   :  { %v16338_v29 = vsel %vm2269_vm0, %v16333_v28, -inf }
 0x325   :  { %2275 = vmax.xlane.f32.xlu0 %v16338_v29 }
 0x327   :  { %v2536_v5 = vpop.f32.mrf.mxu2 }
 0x328   :  { %v2537_v32 = vadd.f32 %v2536_v5, %v2336_v12  ;;  %v11534_v5 = vor.u32 %v15098_v4, %v11531_v9  ;;  %v11510_v4 = vor.u32 %v15092_v63, %v11507_v0  ;;  %v11430_v9 = vor.u32 %v15072_v60, %v11427_v23  ;;  %v15093_v63 = vld [vmem:[#allocation6 + $0x13a4] sm:$0xf0]  ;;  %v11729_v0 = vld [vmem:[#allocation6 + $0x2e0] sm:$0xf] }
 0x329   :  { %v2552_v38 = vpop.f32.mrf.mxu3  ;;  %v15149_v60 = vld [vmem:[#allocation6 + $0x2e4] sm:$0xf0] }
 0x32a   :  { %v2551_v36 = vadd.f32 %v2550_v26, %v2537_v32  ;;  %v15103_v26 = vld [vmem:[#allocation6 + $0x13f4] sm:$0xf0]  ;;  %v11465_v32 = vld [vmem:[#allocation6 + $0x1350] sm:$0xf]  ;;  %3067 = vmatpush.bf16.msra.mxu3 %v11534_v5  ;;  %v11521_v5 = vld [vmem:[#allocation6 + $0x13c0] sm:$0xf]  ;;  %v11730_v23 = vor.u32 %v15149_v60, %v11729_v0  ;;  %v2770_v0 = vpop.f32.mrf.mxu0 }
 0x32c   :  { %v2556_v40 = vmax.f32 %v2551_v36, 0.0  ;;  %v11523_v36 = vld [vmem:[#allocation6 + $0x13c8] sm:$0xf0] }
 0x32f   :  { %v2538_v35 = vpop.f32.mrf.mxu2 }
 0x330   :  { %v2539_v37 = vadd.f32 %v2538_v35, %v2336_v12  ;;  %v11546_v12 = vor.u32 %v15103_v26, %v11545_v27  ;;  %v15096_v35 = vld [vmem:[#allocation6 + $0x13c4] sm:$0xf]  ;;  %v11499_v26 = vld [vmem:[#allocation6 + $0x1398] sm:$0xf0] }
 0x331   :  { %v11526_v48 = vor.u32 %v15096_v35, %v11523_v36  ;;  %v11441_v36 = vld [vmem:[#allocation6 + $0x1320] sm:$0xf] }
 0x332   :  { %v2553_v39 = vadd.f32 %v2552_v38, %v2539_v37  ;;  %v15083_v37 = vld [vmem:[#allocation6 + $0x1354] sm:$0xf0]  ;;  %v11454_v38 = vor.u32 %v15078_v57, %v11451_v19  ;;  %3037 = vmatpush.bf16.msra.mxu1 %v11546_v12  ;;  %v15097_v12 = vld [vmem:[#allocation6 + $0x13c4] sm:$0xf0] }
 0x333   :  { %v11466_v44 = vor.u32 %v15083_v37, %v11465_v32  ;;  %3068 = vmatpush.bf16.msra.mxu3 %v11526_v48  ;;  %v15079_v57 = vld [vmem:[#allocation6 + $0x1334] sm:$0xf0]  ;;  %v11502_v32 = vor.u32 %v15090_v20, %v11499_v26  ;;  %v11522_v35 = vor.u32 %v15097_v12, %v11521_v5  ;;  %v15077_v37 = vld [vmem:[#allocation6 + $0x1324] sm:$0xf0]  ;;  %v11513_v48 = vld [vmem:[#allocation6 + $0x13b0] sm:$0xf] }
 0x334   :  { %v2558_v41 = vmax.f32 %v2553_v39, 0.0  ;;  %v11537_v39 = vld [vmem:[#allocation6 + $0x13e0] sm:$0xf]  ;;  %3055 = vmatpush.bf16.msra.mxu2 %v11454_v38  ;;  %v11450_v13 = vor.u32 %v15079_v57, %v11449_v10  ;;  %v15135_v19 = vld [vmem:[#allocation6 + $0x274] sm:$0xf0]  ;;  %v11514_v52 = vor.u32 %v15095_v50, %v11513_v48 }
 0x335   :  { %3025 = vmatpush.bf16.msra.mxu0 %v11466_v44  ;;  %v11674_v27 = vor.u32 %v15135_v19, %v11673_v15  ;;  %v11665_v38 = vld [vmem:[#allocation6 + $0x260] sm:$0xf]  ;;  %v11497_v19 = vld [vmem:[#allocation6 + $0x1390] sm:$0xf]  ;;  %v15091_v20 = vld [vmem:[#allocation6 + $0x1394] sm:$0xf0] }
 0x336   :  { %v2560_v42 = vpack.c.bf16 %v2558_v41, %v2556_v40  ;;  %v15101_v40 = vld [vmem:[#allocation6 + $0x13e4] sm:$0xf0]  ;;  %v15076_v41 = vld [vmem:[#allocation6 + $0x1324] sm:$0xf]  ;;  %v11649_v10 = vld [vmem:[#allocation6 + $0x240] sm:$0xf]  ;;  %v11498_v26 = vor.u32 %v15091_v20, %v11497_v19  ;;  %v2772_v19 = vpop.f32.mrf.mxu0 }
 0x337   :  { %v11538_v45 = vor.u32 %v15101_v40, %v11537_v39  ;;  %3069 = vmatpush.bf16.msra.mxu3 %v11518_v62  ;;  %v11442_v39 = vor.u32 %v15077_v37, %v11441_v36  ;;  %v15133_v40 = vld [vmem:[#allocation6 + $0x264] sm:$0xf0]  ;;  %v11505_v62 = vld [vmem:[#allocation6 + $0x13a0] sm:$0xf]  ;;  %v15147_v5 = vld [vmem:[#allocation6 + $0x2d4] sm:$0xf0] }
 0x338   :  { %2783 = vmatmul.bf16.vlgmr.msrb.gmra.mxu1 %v2560_v42  ;;  %2811 = vmatmul.bf16.vlgmr.msrb.gmra.mxu3 %v2560_v42  ;;  %v11443_v42 = vld [vmem:[#allocation6 + $0x1328] sm:$0xf0]  ;;  %v11666_v44 = vor.u32 %v15133_v40, %v11665_v38  ;;  %v11489_v37 = vld [vmem:[#allocation6 + $0x1380] sm:$0xf]  ;;  %v15089_v38 = vld [vmem:[#allocation6 + $0x1384] sm:$0xf0] }
 0x339   :  { %v11446_v55 = vor.u32 %v15076_v41, %v11443_v42  ;;  %3038 = vmatpush.bf16.msra.mxu1 %v11538_v45  ;;  %3026 = vmatpush.bf16.msra.mxu0 %v11458_v61  ;;  %v15088_v41 = vld [vmem:[#allocation6 + $0x1384] sm:$0xf]  ;;  %v11491_v42 = vld [vmem:[#allocation6 + $0x1388] sm:$0xf0]  ;;  %v11658_v61 = vor.u32 %v15131_v59, %v11657_v58  ;;  %v11490_v40 = vor.u32 %v15089_v38, %v11489_v37  ;;  %v11705_v50 = vld [vmem:[#allocation6 + $0x2b0] sm:$0xf] }
 0x33a   :  { %v11494_v45 = vor.u32 %v15088_v41, %v11491_v42  ;;  %v15145_v41 = vld [vmem:[#allocation6 + $0x2c4] sm:$0xf0]  ;;  %v11617_v58 = vld [vmem:[#allocation6 + $0x200] sm:$0xf] }
 0x33b   :  { %3056 = vmatpush.bf16.msra.mxu2 %v11446_v55  ;;  %3070 = vmatpush.bf16.msra.mxu3 %v11510_v4  ;;  %v15075_v55 = vld [vmem:[#allocation6 + $0x1314] sm:$0xf0]  ;;  %v11425_v4 = vld [vmem:[#allocation6 + $0x1300] sm:$0xf]  ;;  %v15121_v59 = vld [vmem:[#allocation6 + $0x204] sm:$0xf0] }
 0x33c   :  { %v15118_v38 = vld [vmem:[#allocation9 + $0xf0] sm:$0xff] }
 0x33d   :  { %3039 = vmatpush.bf16.msra.mxu1 %v11530_v56  ;;  %3027 = vmatpush.bf16.msra.mxu0 %v11450_v13  ;;  %v11434_v56 = vor.u32 %v15075_v55, %v11433_v54  ;;  %v15129_v13 = vld [vmem:[#allocation6 + $0x244] sm:$0xf0]  ;;  %v11697_v54 = vld [vmem:[#allocation6 + $0x2a0] sm:$0xf] }
 0x33e   :  { %v11650_v15 = vor.u32 %v15129_v13, %v11649_v10  ;;  %v2798_v10 = vpop.f32.mrf.mxu2 }
 0x33f   :  { %3057 = vmatpush.bf16.msra.mxu2 %v11438_v2  ;;  %3071 = vmatpush.bf16.msra.mxu3 %v11502_v32  ;;  %v11506_v2 = vor.u32 %v15093_v63, %v11505_v62  ;;  %v11641_v32 = vld [vmem:[#allocation6 + $0x230] sm:$0xf]  ;;  %v15139_v63 = vld [vmem:[#allocation6 + $0x294] sm:$0xf0] }
 0x340   :  { %v11689_v62 = vld [vmem:[#allocation6 + $0x290] sm:$0xf] }
 0x341   :  { %3040 = vmatpush.bf16.msra.mxu1 %v11522_v35  ;;  %3028 = vmatpush.bf16.msra.mxu0 %v11442_v39  ;;  %v15127_v35 = vld [vmem:[#allocation6 + $0x234] sm:$0xf0]  ;;  %v11713_v39 = vld [vmem:[#allocation6 + $0x2c0] sm:$0xf]  ;;  %v11690_v60 = vor.u32 %v15139_v63, %v11689_v62  ;;  %v15115_v62 = vld [vmem:[#allocation9 + $0xd8] sm:$0xff] }
 0x342   :  { %v11642_v36 = vor.u32 %v15127_v35, %v11641_v32  ;;  %v11714_v42 = vor.u32 %v15145_v41, %v11713_v39  ;;  %v15106_v63 = vld [vmem:[#allocation9 + $0x90] sm:$0xff] }
 0x343   :  { %3058 = vmatpush.bf16.msra.mxu2 %v11430_v9  ;;  %3072 = vmatpush.bf16.msra.mxu3 %v11494_v45  ;;  %v15073_v9 = vld [vmem:[#allocation6 + $0x1304] sm:$0xf0] }
 0x344   :  { %v11426_v57 = vor.u32 %v15073_v9, %v11425_v4  ;;  %v15125_v45 = vld [vmem:[#allocation6 + $0x224] sm:$0xf0]  ;;  %v11681_v4 = vld [vmem:[#allocation6 + $0x280] sm:$0xf] }
 0x345   :  { %3041 = vmatpush.bf16.msra.mxu1 %v11514_v52  ;;  %3029 = vmatpush.bf16.msra.mxu0 %v11434_v56  ;;  %v11706_v52 = vor.u32 %v15143_v51, %v11705_v50  ;;  %v15141_v56 = vld [vmem:[#allocation6 + $0x2a4] sm:$0xf0] }
 0x346   :  { %v15137_v9 = vld [vmem:[#allocation6 + $0x284] sm:$0xf0] }
 0x347   :  { %3478 = vmatpush.bf16.msrb.mxu2 %v11674_v27  ;;  %3492 = vmatpush.bf16.msrb.mxu3 %v11738_v1  ;;  %v11721_v27 = vld [vmem:[#allocation6 + $0x2d0] sm:$0xf]  ;;  %v15123_v1 = vld [vmem:[#allocation6 + $0x214] sm:$0xf0]  ;;  %v11682_v13 = vor.u32 %v15137_v9, %v11681_v4  ;;  %v15132_v9 = vld [vmem:[#allocation6 + $0x264] sm:$0xf] }
 0x348   :  { %v11722_v12 = vor.u32 %v15147_v5, %v11721_v27  ;;  %v11626_v55 = vor.u32 %v15123_v1, %v11625_v53  ;;  %v15111_v27 = vld [vmem:[#allocation9 + $0xb8] sm:$0xff] }
 0x349   :  { %3042 = vmatpush.bf16.msra.mxu1 %v11506_v2  ;;  %3030 = vmatpush.bf16.msra.mxu0 %v11426_v57  ;;  %v11618_v2 = vor.u32 %v15121_v59, %v11617_v58  ;;  %v15119_v5 = vld [vmem:[#allocation9 + $0xf8] sm:$0xff] }
 0x34b   :  { %3479 = vmatpush.bf16.msrb.mxu2 %v11666_v44  ;;  %3493 = vmatpush.bf16.msrb.mxu3 %v11730_v23  ;;  %v11633_v44 = vld [vmem:[#allocation6 + $0x220] sm:$0xf]  ;;  %v2595_v23 = vld [vmem:[#allocation7 + $0x14] sm:$0x3] }
 0x34c   :  { %v11634_v48 = vor.u32 %v15125_v45, %v11633_v44  ;;  %v2598_v32 = vperm.slane %v2595_v23, 1  ;;  %v15109_v45 = vld [vmem:[#allocation9 + $0xa8] sm:$0xff] }
 0x34d   :  { %3043 = vmatpush.bf16.msra.mxu1 %v11498_v26  ;;  %3219 = vmatpush.bf16.msrb.mxu0 %v15111_v27  ;;  %v15128_v27 = vld [vmem:[#allocation6 + $0x244] sm:$0xf] }
 0x34e   :  { %v2799_v41 = vadd.f32 %v2798_v10, %v2598_v32  ;;  %v11667_v10 = vld [vmem:[#allocation6 + $0x268] sm:$0xf0] }
 0x34f   :  { %3480 = vmatpush.bf16.msrb.mxu2 %v11658_v61  ;;  %3494 = vmatpush.bf16.msrb.mxu3 %v11722_v12  ;;  %v11698_v61 = vor.u32 %v15141_v56, %v11697_v54  ;;  %v15108_v54 = vld [vmem:[#allocation9 + $0xa0] sm:$0xff] }
 0x351   :  { %3044 = vmatpush.bf16.msra.mxu1 %v11490_v40  ;;  %v2800_v40 = vpop.f32.mrf.mxu2 }
 0x352   :  { %v2801_v50 = vadd.f32 %v2800_v40, %v2598_v32  ;;  %v15126_v32 = vld [vmem:[#allocation6 + $0x234] sm:$0xf]  ;;  %v11801_v40 = vld [vmem:[#allocation6 + $0xb70] sm:$0xf] }
 0x353   :  { %3481 = vmatpush.bf16.msrb.mxu2 %v11650_v15  ;;  %3495 = vmatpush.bf16.msrb.mxu3 %v11714_v42  ;;  %v2597_v15 = vperm.slane %v2595_v23, 0  ;;  %v15104_v23 = vld [vmem:[#allocation9 + $0x80] sm:$0xff] }
 0x355   :  { %v2771_v20 = vadd.f32 %v2770_v0, %v2597_v15  ;;  %v2773_v12 = vadd.f32 %v2772_v19, %v2597_v15  ;;  %3233 = vmatpush.bf16.msrb.mxu1 %v15119_v5  ;;  %v15105_v0 = vld [vmem:[#allocation9 + $0x88] sm:$0xff] }
 0x356   :  { %v11659_v15 = vld [vmem:[#allocation6 + $0x258] sm:$0xf0] }
 0x357   :  { %3482 = vmatpush.bf16.msrb.mxu2 %v11642_v36  ;;  %3496 = vmatpush.bf16.msrb.mxu3 %v11706_v52  ;;  %v15110_v36 = vld [vmem:[#allocation9 + $0xb0] sm:$0xff] }
 0x358   :  { %3220 = vmatpush.bf16.msrb.mxu0 %v15110_v36 }
 0x359   :  { %3234 = vmatpush.bf16.msrb.mxu1 %v15118_v38  ;;  %v15150_v38 = vld [vmem:[#allocation6 + $0x2f4] sm:$0xf] }
 0x35b   :  { %3483 = vmatpush.bf16.msrb.mxu2 %v11634_v48  ;;  %3497 = vmatpush.bf16.msrb.mxu3 %v11698_v61  ;;  %v15117_v48 = vld [vmem:[#allocation9 + $0xe8] sm:$0xff]  ;;  %v15107_v61 = vld [vmem:[#allocation9 + $0x98] sm:$0xff] }
 0x35c   :  { %3221 = vmatpush.bf16.msrb.mxu0 %v15109_v45  ;;  %v11635_v45 = vld [vmem:[#allocation6 + $0x228] sm:$0xf0] }
 0x35d   :  { %3235 = vmatpush.bf16.msrb.mxu1 %v15117_v48 }
 0x35f   :  { %3484 = vmatpush.bf16.msrb.mxu2 %v11626_v55  ;;  %3498 = vmatpush.bf16.msrb.mxu3 %v11690_v60  ;;  %v15116_v55 = vld [vmem:[#allocation9 + $0xe0] sm:$0xff] }
 0x360   :  { %3222 = vmatpush.bf16.msrb.mxu0 %v15108_v54  ;;  %v11675_v60 = vld [vmem:[#allocation6 + $0x278] sm:$0xf0]  ;;  %v15165_v54 = vld [vmem:[#allocation6 + $0xb64] sm:$0xf0] }
 0x361   :  { %3236 = vmatpush.bf16.msrb.mxu1 %v15116_v55  ;;  %v15122_v55 = vld [vmem:[#allocation6 + $0x214] sm:$0xf] }
 0x363   :  { %3485 = vmatpush.bf16.msrb.mxu2 %v11618_v2  ;;  %3499 = vmatpush.bf16.msrb.mxu3 %v11682_v13  ;;  %v15134_v2 = vld [vmem:[#allocation6 + $0x274] sm:$0xf] }
 0x364   :  { %3223 = vmatpush.bf16.msrb.mxu0 %v15107_v61  ;;  %v11678_v4 = vor.u32 %v15134_v2, %v11675_v60  ;;  %v15130_v13 = vld [vmem:[#allocation6 + $0x254] sm:$0xf]  ;;  %v15163_v2 = vld [vmem:[#allocation6 + $0xb54] sm:$0xf0]  ;;  %v15120_v60 = vld [vmem:[#allocation6 + $0x204] sm:$0xf] }
 0x365   :  { %3237 = vmatpush.bf16.msrb.mxu1 %v15115_v62  ;;  %v11662_v19 = vor.u32 %v15130_v13, %v11659_v15  ;;  %v15146_v61 = vld [vmem:[#allocation6 + $0x2d4] sm:$0xf]  ;;  %v11723_v62 = vld [vmem:[#allocation6 + $0x2d8] sm:$0xf0]  ;;  %v11777_v15 = vld [vmem:[#allocation6 + $0xb40] sm:$0xf] }
 0x368   :  { %3224 = vmatpush.bf16.msrb.mxu0 %v15106_v63  ;;  %v11785_v63 = vld [vmem:[#allocation6 + $0xb50] sm:$0xf] }
 0x36c   :  { %3225 = vmatpush.bf16.msrb.mxu0 %v15105_v0  ;;  %v11726_v0 = vor.u32 %v15146_v61, %v11723_v62  ;;  %v15153_v62 = vld [vmem:[#allocation6 + $0xb04] sm:$0xf0] }
 0x370   :  { %3226 = vmatpush.bf16.msrb.mxu0 %v15104_v23  ;;  %v11619_v23 = vld [vmem:[#allocation6 + $0x208] sm:$0xf0] }
 0x3b5   :  { %v2784_v57 = vpop.f32.mrf.mxu1 }
 0x3b6   :  { %v2785_v35 = vadd.f32 %v2784_v57, %v2771_v20  ;;  %v11670_v57 = vor.u32 %v15132_v9, %v11667_v10  ;;  %v15114_v20 = vld [vmem:[#allocation9 + $0xd0] sm:$0xff]  ;;  %v11622_v9 = vor.u32 %v15120_v60, %v11619_v23 }
 0x3b7   :  { %3238 = vmatpush.bf16.msrb.mxu1 %v15114_v20  ;;  %v15144_v10 = vld [vmem:[#allocation6 + $0x2c4] sm:$0xf] }
 0x3b8   :  { %v2817_v42 = vmax.f32 %v2785_v35, 0.0  ;;  %v11643_v35 = vld [vmem:[#allocation6 + $0x238] sm:$0xf0] }
 0x3b9   :  { %v11646_v36 = vor.u32 %v15126_v32, %v11643_v35  ;;  %v15159_v32 = vld [vmem:[#allocation6 + $0xb34] sm:$0xf0] }
 0x3bb   :  { %v2812_v26 = vpop.f32.mrf.mxu3 }
 0x3bc   :  { %v2813_v51 = vadd.f32 %v2812_v26, %v2799_v41  ;;  %v11651_v26 = vld [vmem:[#allocation6 + $0x248] sm:$0xf0] }
 0x3bd   :  { %v2786_v37 = vpop.f32.mrf.mxu1  ;;  %v11654_v5 = vor.u32 %v15128_v27, %v11651_v26  ;;  %v15142_v27 = vld [vmem:[#allocation6 + $0x2b4] sm:$0xf]  ;;  %v11707_v26 = vld [vmem:[#allocation6 + $0x2b8] sm:$0xf0] }
 0x3be   :  { %v2787_v39 = vadd.f32 %v2786_v37, %v2773_v12  ;;  %v2818_v56 = vmax.f32 %v2813_v51, 0.0  ;;  %v15113_v12 = vld [vmem:[#allocation9 + $0xc8] sm:$0xff]  ;;  %v15112_v37 = vld [vmem:[#allocation9 + $0xc0] sm:$0xff] }
 0x3bf   :  { %3239 = vmatpush.bf16.msrb.mxu1 %v15113_v12  ;;  %v15148_v51 = vld [vmem:[#allocation6 + $0x2e4] sm:$0xf]  ;;  %v11710_v12 = vor.u32 %v15142_v27, %v11707_v26 }
 0x3c0   :  { %v2819_v44 = vmax.f32 %v2787_v39, 0.0  ;;  %v11739_v39 = vld [vmem:[#allocation6 + $0x2f8] sm:$0xf0] }
 0x3c1   :  { %v11742_v41 = vor.u32 %v15150_v38, %v11739_v39  ;;  %v11761_v38 = vld [vmem:[#allocation6 + $0xb20] sm:$0xf] }
 0x3c2   :  { %v2821_v52 = vpack.c.bf16 %v2819_v44, %v2817_v42  ;;  %v15167_v42 = vld [vmem:[#allocation6 + $0xb74] sm:$0xf0]  ;;  %v15124_v44 = vld [vmem:[#allocation6 + $0x224] sm:$0xf] }
 0x3c3   :  { %v2814_v53 = vpop.f32.mrf.mxu3  ;;  %3240 = vmatpush.bf16.msrb.mxu1 %v15112_v37  ;;  %v11802_v48 = vor.u32 %v15167_v42, %v11801_v40  ;;  %v11699_v37 = vld [vmem:[#allocation6 + $0x2a8] sm:$0xf0]  ;;  %v15157_v40 = vld [vmem:[#allocation6 + $0xb24] sm:$0xf0] }
 0x3c4   :  { %v2815_v1 = vadd.f32 %v2814_v53, %v2801_v50  ;;  %3031 = vmatmul.bf16.vlgmr.msra.gmra.mxu0 %v2821_v52  ;;  %3059 = vmatmul.bf16.vlgmr.msra.gmra.mxu2 %v2821_v52  ;;  %v11638_v50 = vor.u32 %v15124_v44, %v11635_v45  ;;  %v11731_v52 = vld [vmem:[#allocation6 + $0x2e8] sm:$0xf0]  ;;  %v11793_v53 = vld [vmem:[#allocation6 + $0xb60] sm:$0xf]  ;;  %v11762_v42 = vor.u32 %v15157_v40, %v11761_v38  ;;  %v15138_v44 = vld [vmem:[#allocation6 + $0x294] sm:$0xf] }
 0x3c5   :  { %3506 = vmatpush.bf16.msra.mxu0 %v11678_v4  ;;  %3740 = vmatpush.bf16.msra.mxu2 %v11802_v48  ;;  %v11786_v4 = vor.u32 %v15163_v2, %v11785_v63  ;;  %v11691_v45 = vld [vmem:[#allocation6 + $0x298] sm:$0xf0]  ;;  %v11753_v48 = vld [vmem:[#allocation6 + $0xb10] sm:$0xf] }
 0x3c6   :  { %v2820_v58 = vmax.f32 %v2815_v1, 0.0  ;;  %v11734_v1 = vor.u32 %v15148_v51, %v11731_v52  ;;  %v15155_v51 = vld [vmem:[#allocation6 + $0xb14] sm:$0xf0]  ;;  %v2857_v52 = vld [vmem:[#allocation7 + $0x26] sm:$0x3] }
 0x3c8   :  { %v2822_v59 = vpack.c.bf16 %v2820_v58, %v2818_v56  ;;  %v11627_v56 = vld [vmem:[#allocation6 + $0x218] sm:$0xf0]  ;;  %v11794_v58 = vor.u32 %v15165_v54, %v11793_v53  ;;  %v11754_v53 = vor.u32 %v15155_v51, %v11753_v48  ;;  %v16344_v51 = vld [vmem:[#allocation7 + $0x4] sm:$0x3] }
 0x3c9   :  { %3507 = vmatpush.bf16.msra.mxu0 %v11670_v57  ;;  %v11715_v57 = vld [vmem:[#allocation6 + $0x2c8] sm:$0xf0]  ;;  %v11787_v48 = vld [vmem:[#allocation6 + $0xb58] sm:$0xf0] }
 0x3ca   :  { %3045 = vmatmul.bf16.vlgmr.msra.gmra.mxu1 %v2822_v59  ;;  %3073 = vmatmul.bf16.vlgmr.msra.gmra.mxu3 %v2822_v59  ;;  %v11630_v59 = vor.u32 %v15122_v55, %v11627_v56  ;;  %v11718_v13 = vor.u32 %v15144_v10, %v11715_v57  ;;  %v15136_v55 = vld [vmem:[#allocation6 + $0x284] sm:$0xf]  ;;  %v11683_v56 = vld [vmem:[#allocation6 + $0x288] sm:$0xf0] }
 0x3cb   :  { %3520 = vmatpush.bf16.msra.mxu1 %v11742_v41  ;;  %3741 = vmatpush.bf16.msra.mxu2 %v11794_v58  ;;  %v11745_v58 = vld [vmem:[#allocation6 + $0xb00] sm:$0xf]  ;;  %v11686_v61 = vor.u32 %v15136_v55, %v11683_v56  ;;  %v3314_v55 = vperm.slane %v16344_v51, 0 }
 0x3cc   :  { %v11746_v63 = vor.u32 %v15153_v62, %v11745_v58  ;;  %v15158_v58 = vld [vmem:[#allocation6 + $0xb34] sm:$0xf] }
 0x3cd   :  { %3508 = vmatpush.bf16.msra.mxu0 %v11662_v19  ;;  %v15161_v19 = vld [vmem:[#allocation6 + $0xb44] sm:$0xf0] }
 0x3ce   :  { %v11778_v20 = vor.u32 %v15161_v19, %v11777_v15  ;;  %v15166_v15 = vld [vmem:[#allocation6 + $0xb74] sm:$0xf]  ;;  %v11803_v19 = vld [vmem:[#allocation6 + $0xb78] sm:$0xf0] }
 0x3cf   :  { %3521 = vmatpush.bf16.msra.mxu1 %v11734_v1  ;;  %3742 = vmatpush.bf16.msra.mxu2 %v11786_v4  ;;  %v2860_v4 = vperm.slane %v2857_v52, 1 }
 0x3d1   :  { %3509 = vmatpush.bf16.msra.mxu0 %v11654_v5  ;;  %v11769_v5 = vld [vmem:[#allocation6 + $0xb30] sm:$0xf] }
 0x3d2   :  { %v11770_v35 = vor.u32 %v15159_v32, %v11769_v5  ;;  %v11806_v5 = vor.u32 %v15166_v15, %v11803_v19  ;;  %v15154_v15 = vld [vmem:[#allocation6 + $0xb14] sm:$0xf]  ;;  %v11755_v19 = vld [vmem:[#allocation6 + $0xb18] sm:$0xf0] }
 0x3d3   :  { %3522 = vmatpush.bf16.msra.mxu1 %v11726_v0  ;;  %3743 = vmatpush.bf16.msra.mxu2 %v11778_v20 }
 0x3d4   :  { %3486 = vmatmul.bf16.vlgmr.msrb.gmra.mxu2 %v16265_v6 }
 0x3d5   :  { %3510 = vmatpush.bf16.msra.mxu0 %v11646_v36  ;;  %v15140_v36 = vld [vmem:[#allocation6 + $0x2a4] sm:$0xf] }
 0x3d6   :  { %v11702_v39 = vor.u32 %v15140_v36, %v11699_v37  ;;  %v15164_v36 = vld [vmem:[#allocation6 + $0xb64] sm:$0xf]  ;;  %v11795_v37 = vld [vmem:[#allocation6 + $0xb68] sm:$0xf0] }
 0x3d7   :  { %3523 = vmatpush.bf16.msra.mxu1 %v11718_v13  ;;  %3744 = vmatpush.bf16.msra.mxu2 %v11770_v35 }
 0x3d9   :  { %3511 = vmatpush.bf16.msra.mxu0 %v11638_v50  ;;  %v11694_v50 = vor.u32 %v15138_v44, %v11691_v45  ;;  %v15162_v45 = vld [vmem:[#allocation6 + $0xb54] sm:$0xf] }
 0x3da   :  { %3500 = vmatmul.bf16.vlgmr.msrb.gmra.mxu3 %v16268_v8 }
 0x3db   :  { %3524 = vmatpush.bf16.msra.mxu1 %v11710_v12  ;;  %3745 = vmatpush.bf16.msra.mxu2 %v11762_v42 }
 0x3dd   :  { %3512 = vmatpush.bf16.msra.mxu0 %v11630_v59  ;;  %v2859_v59 = vperm.slane %v2857_v52, 0  ;;  %v11790_v52 = vor.u32 %v15162_v45, %v11787_v48  ;;  %v11849_v45 = vld [vmem:[#allocation6 + $0xbd0] sm:$0xf]  ;;  %v15179_v48 = vld [vmem:[#allocation6 + $0xbd4] sm:$0xf0] }
 0x3df   :  { %3525 = vmatpush.bf16.msra.mxu1 %v11702_v39  ;;  %3746 = vmatpush.bf16.msra.mxu2 %v11754_v53  ;;  %v15160_v53 = vld [vmem:[#allocation6 + $0xb44] sm:$0xf] }
 0x3e1   :  { %3513 = vmatpush.bf16.msra.mxu0 %v11622_v9 }
 0x3e3   :  { %3526 = vmatpush.bf16.msra.mxu1 %v11694_v50  ;;  %3747 = vmatpush.bf16.msra.mxu2 %v11746_v63 }
 0x3e7   :  { %3527 = vmatpush.bf16.msra.mxu1 %v11686_v61 }
 0x441   :  { %v3032_v41 = vpop.f32.mrf.mxu0 }
 0x442   :  { %v3033_v2 = vadd.f32 %v3032_v41, %v2859_v59  ;;  %v11798_v41 = vor.u32 %v15164_v36, %v11795_v37  ;;  %v11867_v37 = vld [vmem:[#allocation6 + $0xbf8] sm:$0xf0] }
 0x447   :  { %v3046_v1 = vpop.f32.mrf.mxu1  ;;  %v3060_v54 = vpop.f32.mrf.mxu2 }
 0x448   :  { %v3047_v23 = vadd.f32 %v3046_v1, %v3033_v2  ;;  %v3061_v27 = vadd.f32 %v3060_v54, %v2860_v4  ;;  %v11779_v1 = vld [vmem:[#allocation6 + $0xb48] sm:$0xf0] }
 0x449   :  { %v3034_v0 = vpop.f32.mrf.mxu0  ;;  %v11782_v56 = vor.u32 %v15160_v53, %v11779_v1  ;;  %v11851_v53 = vld [vmem:[#allocation6 + $0xbd8] sm:$0xf0] }
 0x44a   :  { %v3035_v9 = vadd.f32 %v3034_v0, %v2859_v59  ;;  %v3079_v20 = vmax.f32 %v3047_v23, 0.0  ;;  %v11771_v59 = vld [vmem:[#allocation6 + $0xb38] sm:$0xf0]  ;;  %v11763_v23 = vld [vmem:[#allocation6 + $0xb28] sm:$0xf0] }
 0x44b   :  { %v11774_v63 = vor.u32 %v15158_v58, %v11771_v59  ;;  %v11843_v59 = vld [vmem:[#allocation6 + $0xbc8] sm:$0xf0] }
 0x44d   :  { %v3074_v60 = vpop.f32.mrf.mxu3 }
 0x44e   :  { %v3075_v12 = vadd.f32 %v3074_v60, %v3061_v27  ;;  %v15156_v60 = vld [vmem:[#allocation6 + $0xb24] sm:$0xf]  ;;  %v11758_v27 = vor.u32 %v15154_v15, %v11755_v19  ;;  %v11817_v19 = vld [vmem:[#allocation6 + $0xb90] sm:$0xf] }
 0x44f   :  { %v3048_v10 = vpop.f32.mrf.mxu1  ;;  %v3062_v57 = vpop.f32.mrf.mxu2 }
 0x450   :  { %v3049_v13 = vadd.f32 %v3048_v10, %v3035_v9  ;;  %v3063_v35 = vadd.f32 %v3062_v57, %v2860_v4  ;;  %v3080_v42 = vmax.f32 %v3075_v12, 0.0  ;;  %v11766_v10 = vor.u32 %v15156_v60, %v11763_v23  ;;  %v11835_v60 = vld [vmem:[#allocation6 + $0xbb8] sm:$0xf0] }
 0x452   :  { %v3081_v26 = vmax.f32 %v3049_v13, 0.0 }
 0x454   :  { %v3083_v32 = vpack.c.bf16 %v3081_v26, %v3079_v20  ;;  %v15152_v26 = vld [vmem:[#allocation6 + $0xb04] sm:$0xf] }
 0x455   :  { %v3076_v38 = vpop.f32.mrf.mxu3 }
 0x456   :  { %v3077_v39 = vadd.f32 %v3076_v38, %v3063_v35  ;;  %3227 = vmatmul.bf16.vlgmr.msrb.gmra.mxu0 %v3083_v32  ;;  %v11865_v32 = vld [vmem:[#allocation6 + $0xbf0] sm:$0xf]  ;;  %v15182_v35 = vld [vmem:[#allocation6 + $0xbf4] sm:$0xf] }
 0x457   :  { %v3487_v40 = vpop.f32.mrf.mxu2  ;;  %3768 = vmatpush.bf16.msrb.mxu0 %v11806_v5  ;;  %v11747_v5 = vld [vmem:[#allocation6 + $0xb08] sm:$0xf0]  ;;  %v11870_v38 = vor.u32 %v15182_v35, %v11867_v37  ;;  %v15169_v35 = vld [vmem:[#allocation6 + $0xb84] sm:$0xf0] }
 0x458   :  { %v3082_v44 = vmax.f32 %v3077_v39, 0.0  ;;  %v3488_v62 = vadd.f32 %v3487_v40, %v3314_v55  ;;  %v11750_v12 = vor.u32 %v15152_v26, %v11747_v5  ;;  %v11857_v39 = vld [vmem:[#allocation6 + $0xbe0] sm:$0xf]  ;;  %v15181_v40 = vld [vmem:[#allocation6 + $0xbe4] sm:$0xf0] }
 0x459   :  { %v11819_v5 = vld [vmem:[#allocation6 + $0xb98] sm:$0xf0] }
 0x45a   :  { %v3084_v50 = vpack.c.bf16 %v3082_v44, %v3080_v42  ;;  %v11858_v42 = vor.u32 %v15181_v40, %v11857_v39  ;;  %v11811_v39 = vld [vmem:[#allocation6 + $0xb88] sm:$0xf0] }
 0x45b   :  { %3769 = vmatpush.bf16.msrb.mxu0 %v11798_v41  ;;  %v15180_v41 = vld [vmem:[#allocation6 + $0xbe4] sm:$0xf] }
 0x45c   :  { %3241 = vmatmul.bf16.vlgmr.msrb.gmra.mxu1 %v3084_v50  ;;  %v15178_v50 = vld [vmem:[#allocation6 + $0xbd4] sm:$0xf] }
 0x45d   :  { %v3501_v54 = vpop.f32.mrf.mxu3  ;;  %3782 = vmatpush.bf16.msrb.mxu1 %v11870_v38  ;;  %v11854_v1 = vor.u32 %v15178_v50, %v11851_v53  ;;  %v15168_v38 = vld [vmem:[#allocation6 + $0xb84] sm:$0xf] }
 0x45e   :  { %v3502_v0 = vadd.f32 %v3501_v54, %v3488_v62  ;;  %v11841_v54 = vld [vmem:[#allocation6 + $0xbc0] sm:$0xf]  ;;  %v11833_v62 = vld [vmem:[#allocation6 + $0xbb0] sm:$0xf]  ;;  %v11814_v40 = vor.u32 %v15168_v38, %v11811_v39  ;;  %v15215_v38 = vld [vmem:[#allocation6 + $0x14f4] sm:$0xf0] }
 0x45f   :  { %3770 = vmatpush.bf16.msrb.mxu0 %v11790_v52  ;;  %v3489_v61 = vpop.f32.mrf.mxu2  ;;  %v11850_v52 = vor.u32 %v15179_v48, %v11849_v45 }
 0x460   :  { %v3490_v2 = vadd.f32 %v3489_v61, %v3314_v55  ;;  %v3534_v57 = vmax.f32 %v3502_v0, 0.0  ;;  %v15177_v55 = vld [vmem:[#allocation6 + $0xbc4] sm:$0xf0]  ;;  %v15174_v0 = vld [vmem:[#allocation6 + $0xbb4] sm:$0xf] }
 0x461   :  { %v11842_v58 = vor.u32 %v15177_v55, %v11841_v54  ;;  %v11838_v23 = vor.u32 %v15174_v0, %v11835_v60 }
 0x463   :  { %3771 = vmatpush.bf16.msrb.mxu0 %v11782_v56  ;;  %v15176_v56 = vld [vmem:[#allocation6 + $0xbc4] sm:$0xf] }
 0x464   :  { %v11846_v61 = vor.u32 %v15176_v56, %v11843_v59  ;;  %v3315_v56 = vperm.slane %v16344_v51, 1  ;;  %v11931_v51 = vld [vmem:[#allocation6 + $0x1478] sm:$0xf0] }
 0x465   :  { %v3503_v4 = vpop.f32.mrf.mxu3 }
 0x466   :  { %v3504_v9 = vadd.f32 %v3503_v4, %v3490_v2  ;;  %3514 = vmatmul.bf16.vlgmr.msra.gmra.mxu0 %v16265_v6  ;;  %v15183_v6 = vld [vmem:[#allocation6 + $0xbf4] sm:$0xf0]  ;;  %v11825_v4 = vld [vmem:[#allocation6 + $0xba0] sm:$0xf] }
 0x467   :  { %3772 = vmatpush.bf16.msrb.mxu0 %v11774_v63  ;;  %v11866_v36 = vor.u32 %v15183_v6, %v11865_v32  ;;  %v15175_v63 = vld [vmem:[#allocation6 + $0xbb4] sm:$0xf0]  ;;  %v11809_v6 = vld [vmem:[#allocation6 + $0xb80] sm:$0xf] }
 0x468   :  { %v3536_v13 = vmax.f32 %v3504_v9, 0.0  ;;  %v11834_v2 = vor.u32 %v15175_v63, %v11833_v62  ;;  %v15173_v9 = vld [vmem:[#allocation6 + $0xba4] sm:$0xf0]  ;;  %v11810_v37 = vor.u32 %v15169_v35, %v11809_v6  ;;  %v15208_v6 = vld [vmem:[#allocation6 + $0x14c4] sm:$0xf] }
 0x469   :  { %3754 = vmatpush.bf16.msra.mxu3 %v11866_v36  ;;  %v15921_v36 = vld [vmem:[#allocation10 + $0x1] ss:$0 sm:$0xff]  ;;  %v11971_v35 = vld [vmem:[#allocation6 + $0x14c8] sm:$0xf0] }
 0x46a   :  { %v3538_v20 = vpack.c.bf16 %v3536_v13, %v3534_v57  ;;  %v11826_v57 = vor.u32 %v15173_v9, %v11825_v4  ;;  %v11827_v13 = vld [vmem:[#allocation6 + $0xba8] sm:$0xf0]  ;;  %v15214_v4 = vld [vmem:[#allocation6 + $0x14f4] sm:$0xf]  ;;  %v11995_v9 = vld [vmem:[#allocation6 + $0x14f8] sm:$0xf0] }
 0x46b   :  { %3773 = vmatpush.bf16.msrb.mxu0 %v11766_v10  ;;  %v15172_v10 = vld [vmem:[#allocation6 + $0xba4] sm:$0xf] }
 0x46c   :  { %3528 = vmatmul.bf16.vlgmr.msra.gmra.mxu1 %v16268_v8  ;;  %3748 = vmatmul.bf16.vlgmr.msra.gmra.mxu2 %v3538_v20  ;;  %v11859_v8 = vld [vmem:[#allocation6 + $0xbe8] sm:$0xf0]  ;;  %v11830_v15 = vor.u32 %v15172_v10, %v11827_v13  ;;  %v11998_v10 = vor.u32 %v15214_v4, %v11995_v9  ;;  %v15197_v4 = vld [vmem:[#allocation6 + $0x1464] sm:$0xf0]  ;;  %v15204_v9 = vld [vmem:[#allocation6 + $0x14a4] sm:$0xf] }
 0x46d   :  { %v11862_v44 = vor.u32 %v15180_v41, %v11859_v8  ;;  %3755 = vmatpush.bf16.msra.mxu3 %v11858_v42  ;;  %v11987_v13 = vld [vmem:[#allocation6 + $0x14e8] sm:$0xf0] }
 0x46f   :  { %3774 = vmatpush.bf16.msrb.mxu0 %v11758_v27  ;;  %3783 = vmatpush.bf16.msrb.mxu1 %v11862_v44  ;;  %v15170_v27 = vld [vmem:[#allocation6 + $0xb94] sm:$0xf] }
 0x471   :  { %3756 = vmatpush.bf16.msra.mxu3 %v11850_v52 }
 0x473   :  { %3775 = vmatpush.bf16.msrb.mxu0 %v11750_v12  ;;  %3784 = vmatpush.bf16.msrb.mxu1 %v11854_v1  ;;  %v11822_v12 = vor.u32 %v15170_v27, %v11819_v5  ;;  %v15210_v27 = vld [vmem:[#allocation6 + $0x14d4] sm:$0xf]  ;;  %v15196_v5 = vld [vmem:[#allocation6 + $0x1464] sm:$0xf] }
 0x475   :  { %3757 = vmatpush.bf16.msra.mxu3 %v11842_v58 }
 0x476   :  { %3776 = vmatmul.bf16.vlgmr.msrb.gmra.mxu0 %v3538_v20  ;;  %v15171_v20 = vld [vmem:[#allocation6 + $0xb94] sm:$0xf0] }
 0x477   :  { %3785 = vmatpush.bf16.msrb.mxu1 %v11846_v61  ;;  %v11818_v26 = vor.u32 %v15171_v20, %v11817_v19  ;;  %v15198_v19 = vld [vmem:[#allocation6 + $0x1474] sm:$0xf] }
 0x478   :  { %v11934_v20 = vor.u32 %v15198_v19, %v11931_v51  ;;  %v11969_v19 = vld [vmem:[#allocation6 + $0x14c0] sm:$0xf]  ;;  %v15209_v51 = vld [vmem:[#allocation6 + $0x14c4] sm:$0xf0] }
 0x479   :  { %3758 = vmatpush.bf16.msra.mxu3 %v11834_v2 }
 0x47a   :  { %4030 = vmatpush.bf16.msra.mxu0 %v11934_v20  ;;  %v11913_v20 = vld [vmem:[#allocation6 + $0x1450] sm:$0xf] }
 0x47b   :  { %3786 = vmatpush.bf16.msrb.mxu1 %v11838_v23 }
 0x47d   :  { %3759 = vmatpush.bf16.msra.mxu3 %v11826_v57  ;;  %v15212_v57 = vld [vmem:[#allocation6 + $0x14e4] sm:$0xf] }
 0x47f   :  { %3787 = vmatpush.bf16.msrb.mxu1 %v11830_v15  ;;  %v11990_v15 = vor.u32 %v15212_v57, %v11987_v13 }
 0x481   :  { %3760 = vmatpush.bf16.msra.mxu3 %v11818_v26  ;;  %v11979_v26 = vld [vmem:[#allocation6 + $0x14d8] sm:$0xf0] }
 0x483   :  { %3788 = vmatpush.bf16.msrb.mxu1 %v11822_v12  ;;  %v11982_v12 = vor.u32 %v15210_v27, %v11979_v26  ;;  %v15190_v27 = vld [vmem:[#allocation6 + $0x1434] sm:$0xf]  ;;  %v11899_v26 = vld [vmem:[#allocation6 + $0x1438] sm:$0xf0] }
 0x485   :  { %3761 = vmatpush.bf16.msra.mxu3 %v11810_v37  ;;  %v11993_v37 = vld [vmem:[#allocation6 + $0x14f0] sm:$0xf] }
 0x486   :  { %v11994_v39 = vor.u32 %v15215_v38, %v11993_v37  ;;  %v11902_v37 = vor.u32 %v15190_v27, %v11899_v26  ;;  %v15188_v38 = vld [vmem:[#allocation6 + $0x1424] sm:$0xf]  ;;  %v15191_v27 = vld [vmem:[#allocation6 + $0x1434] sm:$0xf0]  ;;  %v12121_v26 = vld [vmem:[#allocation6 + $0x370] sm:$0xf] }
 0x487   :  { %3789 = vmatpush.bf16.msrb.mxu1 %v11814_v40  ;;  %v15194_v40 = vld [vmem:[#allocation6 + $0x1454] sm:$0xf] }
 0x489   :  { %4016 = vmatpush.bf16.msrb.mxu3 %v11994_v39  ;;  %v11891_v39 = vld [vmem:[#allocation6 + $0x1428] sm:$0xf0] }
 0x48b   :  { %4044 = vmatpush.bf16.msra.mxu1 %v11998_v10  ;;  %v11955_v10 = vld [vmem:[#allocation6 + $0x14a8] sm:$0xf0] }
 0x48f   :  { %4045 = vmatpush.bf16.msra.mxu1 %v11990_v15 }
 0x493   :  { %4046 = vmatpush.bf16.msra.mxu1 %v11982_v12  ;;  %v11958_v12 = vor.u32 %v15204_v9, %v11955_v10  ;;  %v12177_v9 = vld [vmem:[#allocation6 + $0x3e0] sm:$0xf] }
 0x4d3   :  { %v3228_v32 = vpop.f32.mrf.mxu0 }
 0x4d4   :  { %v3229_v41 = vadd.f32 %v15921_v36, %v3228_v32  ;;  %v11923_v32 = vld [vmem:[#allocation6 + $0x1468] sm:$0xf0] }
 0x4d9   :  { %v3242_v42 = vpop.f32.mrf.mxu1 }
 0x4da   :  { %v16355_v44 = vadd.f32 %v3242_v42, %v3229_v41  ;;  %v11915_v41 = vld [vmem:[#allocation6 + $0x1458] sm:$0xf0]  ;;  %v11974_v42 = vor.u32 %v15208_v6, %v11971_v35  ;;  %v15202_v6 = vld [vmem:[#allocation6 + $0x1494] sm:$0xf] }
 0x4db   :  { %v3230_v45 = vpop.f32.mrf.mxu0  ;;  %v11947_v35 = vld [vmem:[#allocation6 + $0x1498] sm:$0xf0] }
 0x4dc   :  { %v16360_v48 = vsel %vm16351_vm3, %v16355_v44, -inf  ;;  %v3231_v50 = vadd.f32 %v15921_v36, %v3230_v45  ;;  %v11926_v36 = vor.u32 %v15196_v5, %v11923_v32  ;;  %v15206_v45 = vld [vmem:[#allocation6 + $0x14b4] sm:$0xf]  ;;  %4047 = vmatpush.bf16.msra.mxu1 %v11974_v42  ;;  %v15195_v5 = vld [vmem:[#allocation6 + $0x1454] sm:$0xf0] }
 0x4dd   :  { %3252 = vmax.xlane.f32.xlu1 %v16360_v48  ;;  %v11914_v32 = vor.u32 %v15195_v5, %v11913_v20  ;;  %v11939_v42 = vld [vmem:[#allocation6 + $0x1488] sm:$0xf0]  ;;  %v11897_v20 = vld [vmem:[#allocation6 + $0x1430] sm:$0xf] }
 0x4de   :  { %4031 = vmatpush.bf16.msra.mxu0 %v11926_v36  ;;  %v11970_v36 = vor.u32 %v15209_v51, %v11969_v19  ;;  %v11898_v5 = vor.u32 %v15191_v27, %v11897_v20  ;;  %v12145_v27 = vld [vmem:[#allocation6 + $0x3a0] sm:$0xf] }
 0x4e1   :  { %v3244_v52 = vpop.f32.mrf.mxu1 }
 0x4e2   :  { %v16363_v53 = vadd.f32 %v3244_v52, %v3231_v50  ;;  %v11985_v50 = vld [vmem:[#allocation6 + $0x14e0] sm:$0xf]  ;;  %v15213_v52 = vld [vmem:[#allocation6 + $0x14e4] sm:$0xf0] }
 0x4e3   :  { %v3515_v1 = vpop.f32.mrf.mxu0 }
 0x4e4   :  { %v16368_v54 = vsel %vm16351_vm3, %v16363_v53, -inf  ;;  %v3516_v59 = vadd.f32 %v3515_v1, %v3315_v56  ;;  %v11963_v1 = vld [vmem:[#allocation6 + $0x14b8] sm:$0xf0] }
 0x4e5   :  { %3254 = vmax.xlane.f32.xlu1 %v16368_v54 }
 0x4e9   :  { %v3529_v55 = vpop.f32.mrf.mxu1 }
 0x4ea   :  { %v3530_v61 = vadd.f32 %v3529_v55, %v3516_v59  ;;  %v11986_v55 = vor.u32 %v15213_v52, %v11985_v50  ;;  %v11918_v59 = vor.u32 %v15194_v40, %v11915_v41  ;;  %v11950_v40 = vor.u32 %v15202_v6, %v11947_v35  ;;  %v15200_v41 = vld [vmem:[#allocation6 + $0x1484] sm:$0xf]  ;;  %v11961_v52 = vld [vmem:[#allocation6 + $0x14b0] sm:$0xf]  ;;  %v15203_v35 = vld [vmem:[#allocation6 + $0x1494] sm:$0xf0] }
 0x4eb   :  { %v3517_v58 = vpop.f32.mrf.mxu0  ;;  %v11942_v50 = vor.u32 %v15200_v41, %v11939_v42  ;;  %v11945_v6 = vld [vmem:[#allocation6 + $0x1490] sm:$0xf]  ;;  %v15189_v41 = vld [vmem:[#allocation6 + $0x1424] sm:$0xf0]  ;;  %v12113_v42 = vld [vmem:[#allocation6 + $0x360] sm:$0xf] }
 0x4ec   :  { %v3518_v62 = vadd.f32 %v3517_v58, %v3315_v56  ;;  %v3535_v2 = vmax.f32 %v3530_v61, 0.0  ;;  %v11929_v56 = vld [vmem:[#allocation6 + $0x1470] sm:$0xf]  ;;  %v15199_v58 = vld [vmem:[#allocation6 + $0x1474] sm:$0xf0]  ;;  %4017 = vmatpush.bf16.msrb.mxu3 %v11986_v55  ;;  %4032 = vmatpush.bf16.msra.mxu0 %v11918_v59 }
 0x4ed   :  { %v11930_v61 = vor.u32 %v15199_v58, %v11929_v56  ;;  %v12185_v56 = vld [vmem:[#allocation6 + $0x3f0] sm:$0xf]  ;;  %v15263_v58 = vld [vmem:[#allocation6 + $0x3f4] sm:$0xf0]  ;;  %v15186_v59 = vld [vmem:[#allocation6 + $0x1414] sm:$0xf] }
 0x4ef   :  { %4002 = vmatpush.bf16.msrb.mxu2 %v11930_v61  ;;  %v12186_v61 = vor.u32 %v15263_v58, %v12185_v56  ;;  %v12161_v56 = vld [vmem:[#allocation6 + $0x3c0] sm:$0xf] }
 0x4f1   :  { %v3531_v63 = vpop.f32.mrf.mxu1 }
 0x4f2   :  { %v3532_v0 = vadd.f32 %v3531_v63, %v3518_v62  ;;  %v11977_v62 = vld [vmem:[#allocation6 + $0x14d0] sm:$0xf]  ;;  %v15192_v63 = vld [vmem:[#allocation6 + $0x1444] sm:$0xf] }
 0x4f4   :  { %v3537_v60 = vmax.f32 %v3532_v0, 0.0  ;;  %v11907_v0 = vld [vmem:[#allocation6 + $0x1448] sm:$0xf0] }
 0x4f5   :  { %v11910_v15 = vor.u32 %v15192_v63, %v11907_v0  ;;  %v11905_v63 = vld [vmem:[#allocation6 + $0x1440] sm:$0xf]  ;;  %v15193_v0 = vld [vmem:[#allocation6 + $0x1444] sm:$0xf0] }
 0x4f6   :  { %v3539_v23 = vpack.c.bf16 %v3537_v60, %v3535_v2  ;;  %v15211_v2 = vld [vmem:[#allocation6 + $0x14d4] sm:$0xf0]  ;;  %v11966_v60 = vor.u32 %v15206_v45, %v11963_v1  ;;  %v11894_v45 = vor.u32 %v15188_v38, %v11891_v39 }
 0x4f7   :  { %v11978_v57 = vor.u32 %v15211_v2, %v11977_v62  ;;  %4033 = vmatpush.bf16.msra.mxu0 %v11910_v15  ;;  %v15207_v1 = vld [vmem:[#allocation6 + $0x14b4] sm:$0xf0]  ;;  %v11883_v62 = vld [vmem:[#allocation6 + $0x1418] sm:$0xf0]  ;;  %v11875_v15 = vld [vmem:[#allocation6 + $0x1408] sm:$0xf0] }
 0x4f8   :  { %3762 = vmatmul.bf16.vlgmr.msra.gmra.mxu3 %v3539_v23  ;;  %3790 = vmatmul.bf16.vlgmr.msrb.gmra.mxu1 %v3539_v23  ;;  %v11921_v23 = vld [vmem:[#allocation6 + $0x1460] sm:$0xf]  ;;  %v11962_v55 = vor.u32 %v15207_v1, %v11961_v52  ;;  %v11886_v2 = vor.u32 %v15186_v59, %v11883_v62  ;;  %v15259_v38 = vld [vmem:[#allocation6 + $0x3d4] sm:$0xf0]  ;;  %v15257_v59 = vld [vmem:[#allocation6 + $0x3c4] sm:$0xf0] }
 0x4f9   :  { %v11922_v13 = vor.u32 %v15197_v4, %v11921_v23  ;;  %4048 = vmatpush.bf16.msra.mxu1 %v11966_v60  ;;  %4018 = vmatpush.bf16.msrb.mxu3 %v11978_v57  ;;  %v11906_v60 = vor.u32 %v15193_v0, %v11905_v63  ;;  %v11953_v23 = vld [vmem:[#allocation6 + $0x14a0] sm:$0xf]  ;;  %v15205_v4 = vld [vmem:[#allocation6 + $0x14a4] sm:$0xf0]  ;;  %v11881_v62 = vld [vmem:[#allocation6 + $0x1410] sm:$0xf] }
 0x4fa   :  { %v11954_v10 = vor.u32 %v15205_v4, %v11953_v23  ;;  %v15261_v57 = vld [vmem:[#allocation6 + $0x3e4] sm:$0xf0]  ;;  %v11937_v1 = vld [vmem:[#allocation6 + $0x1480] sm:$0xf]  ;;  %v15187_v63 = vld [vmem:[#allocation6 + $0x1414] sm:$0xf0] }
 0x4fb   :  { %4003 = vmatpush.bf16.msrb.mxu2 %v11922_v13  ;;  %4034 = vmatpush.bf16.msra.mxu0 %v11902_v37  ;;  %v15184_v13 = vld [vmem:[#allocation6 + $0x1404] sm:$0xf]  ;;  %v12178_v19 = vor.u32 %v15261_v57, %v12177_v9  ;;  %v12169_v37 = vld [vmem:[#allocation6 + $0x3d0] sm:$0xf]  ;;  %v15255_v9 = vld [vmem:[#allocation6 + $0x3b4] sm:$0xf0] }
 0x4fc   :  { %v11878_v51 = vor.u32 %v15184_v13, %v11875_v15  ;;  %v12170_v39 = vor.u32 %v15259_v38, %v12169_v37  ;;  %v12105_v0 = vld [vmem:[#allocation6 + $0x350] sm:$0xf]  ;;  %v11873_v57 = vld [vmem:[#allocation6 + $0x1400] sm:$0xf]  ;;  %v15185_v13 = vld [vmem:[#allocation6 + $0x1404] sm:$0xf0] }
 0x4fd   :  { %4049 = vmatpush.bf16.msra.mxu1 %v11958_v12  ;;  %4019 = vmatpush.bf16.msrb.mxu3 %v11970_v36  ;;  %v15247_v12 = vld [vmem:[#allocation6 + $0x374] sm:$0xf0]  ;;  %v11946_v36 = vor.u32 %v15203_v35, %v11945_v6  ;;  %v12153_v4 = vld [vmem:[#allocation6 + $0x3b0] sm:$0xf]  ;;  %v12097_v15 = vld [vmem:[#allocation6 + $0x340] sm:$0xf] }
 0x4fe   :  { %v12137_v35 = vld [vmem:[#allocation6 + $0x390] sm:$0xf]  ;;  %v12081_v37 = vld [vmem:[#allocation6 + $0x320] sm:$0xf] }
 0x4ff   :  { %4004 = vmatpush.bf16.msrb.mxu2 %v11914_v32  ;;  %4035 = vmatpush.bf16.msra.mxu0 %v11894_v45  ;;  %v12122_v32 = vor.u32 %v15247_v12, %v12121_v26  ;;  %v15253_v26 = vld [vmem:[#allocation6 + $0x3a4] sm:$0xf0]  ;;  %v12089_v12 = vld [vmem:[#allocation6 + $0x330] sm:$0xf] }
 0x501   :  { %4050 = vmatpush.bf16.msra.mxu1 %v11950_v40  ;;  %4020 = vmatpush.bf16.msrb.mxu3 %v11962_v55  ;;  %v11889_v40 = vld [vmem:[#allocation6 + $0x1420] sm:$0xf]  ;;  %v15201_v55 = vld [vmem:[#allocation6 + $0x1484] sm:$0xf0] }
 0x502   :  { %v11890_v45 = vor.u32 %v15189_v41, %v11889_v40  ;;  %v11938_v58 = vor.u32 %v15201_v55, %v11937_v1  ;;  %v12129_v40 = vld [vmem:[#allocation6 + $0x380] sm:$0xf]  ;;  %v15249_v41 = vld [vmem:[#allocation6 + $0x384] sm:$0xf0] }
 0x503   :  { %4036 = vmatpush.bf16.msra.mxu0 %v11886_v2  ;;  %4005 = vmatpush.bf16.msrb.mxu2 %v11906_v60  ;;  %v11882_v2 = vor.u32 %v15187_v63, %v11881_v62  ;;  %v15243_v60 = vld [vmem:[#allocation6 + $0x354] sm:$0xf0]  ;;  %v12130_v1 = vor.u32 %v15249_v41, %v12129_v40 }
 0x504   :  { %v12106_v23 = vor.u32 %v15243_v60, %v12105_v0  ;;  %v15220_v40 = vld [vmem:[#allocation9 + $0x120] sm:$0xff] }
 0x505   :  { %4051 = vmatpush.bf16.msra.mxu1 %v11942_v50  ;;  %4021 = vmatpush.bf16.msrb.mxu3 %v11954_v10  ;;  %v15245_v50 = vld [vmem:[#allocation6 + $0x364] sm:$0xf0]  ;;  %v12154_v10 = vor.u32 %v15255_v9, %v12153_v4  ;;  %v15231_v4 = vld [vmem:[#allocation9 + $0x178] sm:$0xff]  ;;  %v15228_v41 = vld [vmem:[#allocation9 + $0x160] sm:$0xff] }
 0x506   :  { %v12114_v52 = vor.u32 %v15245_v50, %v12113_v42  ;;  %v15235_v50 = vld [vmem:[#allocation6 + $0x314] sm:$0xf0] }
 0x507   :  { %4037 = vmatpush.bf16.msra.mxu0 %v11878_v51  ;;  %4006 = vmatpush.bf16.msrb.mxu2 %v11898_v5  ;;  %v15241_v51 = vld [vmem:[#allocation6 + $0x344] sm:$0xf0]  ;;  %v12146_v5 = vor.u32 %v15253_v26, %v12145_v27 }
 0x508   :  { %v12098_v20 = vor.u32 %v15241_v51, %v12097_v15  ;;  %v15222_v15 = vld [vmem:[#allocation9 + $0x130] sm:$0xff] }
 0x509   :  { %4471 = vmatpush.bf16.msrb.mxu1 %v12186_v61  ;;  %4022 = vmatpush.bf16.msrb.mxu3 %v11946_v36  ;;  %v12162_v61 = vor.u32 %v15257_v59, %v12161_v56  ;;  %v15251_v36 = vld [vmem:[#allocation6 + $0x394] sm:$0xf0]  ;;  %v12065_v56 = vld [vmem:[#allocation6 + $0x300] sm:$0xf]  ;;  %v3574_v59 = vld [vmem:[#allocation7 + $0x16] sm:$0x3] }
 0x50a   :  { %v12138_v38 = vor.u32 %v15251_v36, %v12137_v35  ;;  %v3577_v0 = vperm.slane %v3574_v59, 1 }
 0x50b   :  { %4457 = vmatpush.bf16.msrb.mxu0 %v12122_v32  ;;  %4007 = vmatpush.bf16.msrb.mxu2 %v11890_v45  ;;  %v15239_v32 = vld [vmem:[#allocation6 + $0x334] sm:$0xf0]  ;;  %v12073_v45 = vld [vmem:[#allocation6 + $0x310] sm:$0xf] }
 0x50c   :  { %v12090_v6 = vor.u32 %v15239_v32, %v12089_v12  ;;  %v12074_v55 = vor.u32 %v15235_v50, %v12073_v45  ;;  %v15221_v32 = vld [vmem:[#allocation9 + $0x128] sm:$0xff] }
 0x50d   :  { %4472 = vmatpush.bf16.msrb.mxu1 %v12178_v19  ;;  %4023 = vmatpush.bf16.msrb.mxu3 %v11938_v58  ;;  %v11874_v19 = vor.u32 %v15185_v13, %v11873_v57  ;;  %v15233_v58 = vld [vmem:[#allocation6 + $0x304] sm:$0xf0] }
 0x50e   :  { %v12066_v63 = vor.u32 %v15233_v58, %v12065_v56  ;;  %v15226_v56 = vld [vmem:[#allocation9 + $0x150] sm:$0xff]  ;;  %v15217_v58 = vld [vmem:[#allocation9 + $0x108] sm:$0xff] }
 0x50f   :  { %4458 = vmatpush.bf16.msrb.mxu0 %v12114_v52  ;;  %4008 = vmatpush.bf16.msrb.mxu2 %v11882_v2  ;;  %v3777_v52 = vpop.f32.mrf.mxu0 }
 0x510   :  { %v3778_v60 = vadd.f32 %v3777_v52, %v3577_v0  ;;  %v15219_v52 = vld [vmem:[#allocation9 + $0x118] sm:$0xff] }
 0x511   :  { %4473 = vmatpush.bf16.msrb.mxu1 %v12170_v39  ;;  %v15237_v39 = vld [vmem:[#allocation6 + $0x324] sm:$0xf0]  ;;  %4212 = vmatpush.bf16.msra.mxu3 %v15231_v4  ;;  %v15224_v4 = vld [vmem:[#allocation9 + $0x140] sm:$0xff] }
 0x512   :  { %v12082_v42 = vor.u32 %v15237_v39, %v12081_v37 }
 0x513   :  { %4459 = vmatpush.bf16.msrb.mxu0 %v12106_v23  ;;  %4009 = vmatpush.bf16.msrb.mxu2 %v11874_v19  ;;  %v15223_v23 = vld [vmem:[#allocation9 + $0x138] sm:$0xff]  ;;  %v15230_v19 = vld [vmem:[#allocation9 + $0x170] sm:$0xff] }
 0x515   :  { %4474 = vmatpush.bf16.msrb.mxu1 %v12162_v61  ;;  %v3749_v61 = vpop.f32.mrf.mxu2  ;;  %4213 = vmatpush.bf16.msra.mxu3 %v15230_v19  ;;  %v15242_v19 = vld [vmem:[#allocation6 + $0x354] sm:$0xf] }
 0x517   :  { %4460 = vmatpush.bf16.msrb.mxu0 %v12098_v20  ;;  %v3779_v2 = vpop.f32.mrf.mxu0  ;;  %4198 = vmatpush.bf16.msra.mxu2 %v15223_v23 }
 0x518   :  { %v3780_v57 = vadd.f32 %v3779_v2, %v3577_v0  ;;  %v15225_v0 = vld [vmem:[#allocation9 + $0x148] sm:$0xff] }
 0x519   :  { %4475 = vmatpush.bf16.msrb.mxu1 %v12154_v10  ;;  %v3576_v10 = vperm.slane %v3574_v59, 0  ;;  %v15216_v59 = vld [vmem:[#allocation9 + $0x100] sm:$0xff]  ;;  %v15244_v2 = vld [vmem:[#allocation6 + $0x364] sm:$0xf] }
 0x51b   :  { %4461 = vmatpush.bf16.msrb.mxu0 %v12090_v6  ;;  %v3750_v26 = vadd.f32 %v3749_v61, %v3576_v10  ;;  %4199 = vmatpush.bf16.msra.mxu2 %v15222_v15  ;;  %v15229_v6 = vld [vmem:[#allocation9 + $0x168] sm:$0xff]  ;;  %v15246_v61 = vld [vmem:[#allocation6 + $0x374] sm:$0xf]  ;;  %v15279_v15 = vld [vmem:[#allocation6 + $0xc74] sm:$0xf0] }
 0x51c   :  { %4214 = vmatpush.bf16.msra.mxu3 %v15229_v6  ;;  %v15277_v6 = vld [vmem:[#allocation6 + $0xc64] sm:$0xf0] }
 0x51d   :  { %4476 = vmatpush.bf16.msrb.mxu1 %v12146_v5  ;;  %v3751_v27 = vpop.f32.mrf.mxu2 }
 0x51e   :  { %v3752_v35 = vadd.f32 %v3751_v27, %v3576_v10  ;;  %v12187_v10 = vld [vmem:[#allocation6 + $0x3f8] sm:$0xf0] }
 0x51f   :  { %4462 = vmatpush.bf16.msrb.mxu0 %v12082_v42  ;;  %4200 = vmatpush.bf16.msra.mxu2 %v15221_v32 }
 0x520   :  { %4215 = vmatpush.bf16.msra.mxu3 %v15228_v41  ;;  %v12233_v41 = vld [vmem:[#allocation6 + $0xc50] sm:$0xf] }
 0x521   :  { %4477 = vmatpush.bf16.msrb.mxu1 %v12138_v38 }
 0x523   :  { %4463 = vmatpush.bf16.msrb.mxu0 %v12074_v55  ;;  %4201 = vmatpush.bf16.msra.mxu2 %v15220_v40  ;;  %v15218_v55 = vld [vmem:[#allocation9 + $0x110] sm:$0xff]  ;;  %v12171_v40 = vld [vmem:[#allocation6 + $0x3d8] sm:$0xf0] }
 0x525   :  { %4478 = vmatpush.bf16.msrb.mxu1 %v12130_v1  ;;  %v15227_v1 = vld [vmem:[#allocation9 + $0x158] sm:$0xff] }
 0x526   :  { %4216 = vmatpush.bf16.msra.mxu3 %v15227_v1 }
 0x527   :  { %4464 = vmatpush.bf16.msrb.mxu0 %v12066_v63  ;;  %4202 = vmatpush.bf16.msra.mxu2 %v15219_v52  ;;  %v12091_v52 = vld [vmem:[#allocation6 + $0x338] sm:$0xf0] }
 0x52a   :  { %4217 = vmatpush.bf16.msra.mxu3 %v15226_v56  ;;  %v15256_v56 = vld [vmem:[#allocation6 + $0x3c4] sm:$0xf] }
 0x52b   :  { %4203 = vmatpush.bf16.msra.mxu2 %v15218_v55 }
 0x52e   :  { %4218 = vmatpush.bf16.msra.mxu3 %v15225_v0  ;;  %v12083_v0 = vld [vmem:[#allocation6 + $0x328] sm:$0xf0] }
 0x52f   :  { %4204 = vmatpush.bf16.msra.mxu2 %v15217_v58  ;;  %v12163_v58 = vld [vmem:[#allocation6 + $0x3c8] sm:$0xf0] }
 0x532   :  { %4219 = vmatpush.bf16.msra.mxu3 %v15224_v4  ;;  %v12155_v4 = vld [vmem:[#allocation6 + $0x3b8] sm:$0xf0] }
 0x533   :  { %4205 = vmatpush.bf16.msra.mxu2 %v15216_v59  ;;  %v12225_v59 = vld [vmem:[#allocation6 + $0xc40] sm:$0xf] }
 0x575   :  { %v3791_v62 = vpop.f32.mrf.mxu1 }
 0x576   :  { %v3792_v13 = vadd.f32 %v3791_v62, %v3778_v60  ;;  %v12123_v62 = vld [vmem:[#allocation6 + $0x378] sm:$0xf0]  ;;  %v12115_v60 = vld [vmem:[#allocation6 + $0x368] sm:$0xf0] }
 0x577   :  { %v12126_v63 = vor.u32 %v15246_v61, %v12123_v62  ;;  %v12118_v23 = vor.u32 %v15244_v2, %v12115_v60  ;;  %v12166_v61 = vor.u32 %v15256_v56, %v12163_v58  ;;  %v15273_v62 = vld [vmem:[#allocation6 + $0xc44] sm:$0xf0] }
 0x578   :  { %v3797_v5 = vmax.f32 %v3792_v13, 0.0  ;;  %v12249_v13 = vld [vmem:[#allocation6 + $0xc70] sm:$0xf]  ;;  %v12226_v2 = vor.u32 %v15273_v62, %v12225_v59  ;;  %v15265_v56 = vld [vmem:[#allocation6 + $0xc04] sm:$0xf0] }
 0x579   :  { %v3836_v58 = vld [vmem:[#allocation7 + $0x28] sm:$0x3] }
 0x57a   :  { %v3839_v62 = vperm.slane %v3836_v58, 1 }
 0x57b   :  { %v3763_v9 = vpop.f32.mrf.mxu3 }
 0x57c   :  { %v3764_v36 = vadd.f32 %v3763_v9, %v3750_v26  ;;  %v15262_v9 = vld [vmem:[#allocation6 + $0x3f4] sm:$0xf]  ;;  %v15260_v26 = vld [vmem:[#allocation6 + $0x3e4] sm:$0xf] }
 0x57d   :  { %v3793_v51 = vpop.f32.mrf.mxu1 }
 0x57e   :  { %v3794_v20 = vadd.f32 %v3793_v51, %v3780_v57  ;;  %v3796_v42 = vmax.f32 %v3764_v36, 0.0  ;;  %v12190_v57 = vor.u32 %v15262_v9, %v12187_v10  ;;  %v12250_v51 = vor.u32 %v15279_v15, %v12249_v13  ;;  %v12217_v10 = vld [vmem:[#allocation6 + $0xc30] sm:$0xf]  ;;  %v15234_v13 = vld [vmem:[#allocation6 + $0x314] sm:$0xf] }
 0x580   :  { %v3799_v12 = vmax.f32 %v3794_v20, 0.0  ;;  %v12107_v20 = vld [vmem:[#allocation6 + $0x358] sm:$0xf0] }
 0x581   :  { %v12110_v27 = vor.u32 %v15242_v19, %v12107_v20  ;;  %v12075_v19 = vld [vmem:[#allocation6 + $0x318] sm:$0xf0]  ;;  %v15252_v20 = vld [vmem:[#allocation6 + $0x3a4] sm:$0xf] }
 0x582   :  { %v3801_v37 = vpack.c.bf16 %v3799_v12, %v3797_v5  ;;  %v12179_v5 = vld [vmem:[#allocation6 + $0x3e8] sm:$0xf0]  ;;  %v12241_v12 = vld [vmem:[#allocation6 + $0xc60] sm:$0xf] }
 0x583   :  { %v3765_v38 = vpop.f32.mrf.mxu3  ;;  %v12182_v32 = vor.u32 %v15260_v26, %v12179_v5  ;;  %v12242_v36 = vor.u32 %v15277_v6, %v12241_v12  ;;  %v12209_v26 = vld [vmem:[#allocation6 + $0xc20] sm:$0xf]  ;;  %v15269_v12 = vld [vmem:[#allocation6 + $0xc24] sm:$0xf0]  ;;  %v12067_v6 = vld [vmem:[#allocation6 + $0x308] sm:$0xf0] }
 0x584   :  { %v3766_v39 = vadd.f32 %v3765_v38, %v3752_v35  ;;  %4024 = vmatmul.bf16.vlgmr.msrb.gmra.mxu3 %v3801_v37  ;;  %4052 = vmatmul.bf16.vlgmr.msra.gmra.mxu1 %v3801_v37  ;;  %v15240_v35 = vld [vmem:[#allocation6 + $0x344] sm:$0xf]  ;;  %v12099_v37 = vld [vmem:[#allocation6 + $0x348] sm:$0xf0] }
 0x585   :  { %4499 = vmatpush.bf16.msrb.mxu3 %v12190_v57  ;;  %v12102_v38 = vor.u32 %v15240_v35, %v12099_v37  ;;  %v15271_v57 = vld [vmem:[#allocation6 + $0xc34] sm:$0xf0]  ;;  %v12210_v35 = vor.u32 %v15269_v12, %v12209_v26  ;;  %v15250_v37 = vld [vmem:[#allocation6 + $0x394] sm:$0xf] }
 0x586   :  { %v3798_v45 = vmax.f32 %v3766_v39, 0.0  ;;  %v15258_v39 = vld [vmem:[#allocation6 + $0x3d4] sm:$0xf]  ;;  %v12218_v15 = vor.u32 %v15271_v57, %v12217_v10 }
 0x588   :  { %v3800_v50 = vpack.c.bf16 %v3798_v45, %v3796_v42  ;;  %v12174_v42 = vor.u32 %v15258_v39, %v12171_v40  ;;  %v15275_v45 = vld [vmem:[#allocation6 + $0xc54] sm:$0xf0]  ;;  %v12201_v39 = vld [vmem:[#allocation6 + $0xc10] sm:$0xf] }
 0x589   :  { %4500 = vmatpush.bf16.msrb.mxu3 %v12182_v32  ;;  %v12234_v1 = vor.u32 %v15275_v45, %v12233_v41  ;;  %v15232_v32 = vld [vmem:[#allocation6 + $0x304] sm:$0xf]  ;;  %v15267_v41 = vld [vmem:[#allocation6 + $0xc14] sm:$0xf0] }
 0x58a   :  { %4010 = vmatmul.bf16.vlgmr.msrb.gmra.mxu2 %v3800_v50  ;;  %4038 = vmatmul.bf16.vlgmr.msra.gmra.mxu0 %v3800_v50  ;;  %v15238_v50 = vld [vmem:[#allocation6 + $0x334] sm:$0xf] }
 0x58b   :  { %4485 = vmatpush.bf16.msrb.mxu2 %v12126_v63  ;;  %4719 = vmatpush.bf16.msra.mxu0 %v12250_v51  ;;  %v12094_v55 = vor.u32 %v15238_v50, %v12091_v52  ;;  %v15236_v63 = vld [vmem:[#allocation6 + $0x324] sm:$0xf]  ;;  %v12078_v51 = vor.u32 %v15234_v13, %v12075_v19  ;;  %v12131_v52 = vld [vmem:[#allocation6 + $0x388] sm:$0xf0] }
 0x58c   :  { %v12086_v60 = vor.u32 %v15236_v63, %v12083_v0  ;;  %v15248_v50 = vld [vmem:[#allocation6 + $0x384] sm:$0xf] }
 0x58d   :  { %4501 = vmatpush.bf16.msrb.mxu3 %v12174_v42  ;;  %v12202_v42 = vor.u32 %v15267_v41, %v12201_v39 }
 0x58f   :  { %4486 = vmatpush.bf16.msrb.mxu2 %v12118_v23  ;;  %4720 = vmatpush.bf16.msra.mxu0 %v12242_v36  ;;  %v15254_v23 = vld [vmem:[#allocation6 + $0x3b4] sm:$0xf]  ;;  %v12070_v36 = vor.u32 %v15232_v32, %v12067_v6 }
 0x590   :  { %v12158_v9 = vor.u32 %v15254_v23, %v12155_v4  ;;  %v3838_v23 = vperm.slane %v3836_v58, 0 }
 0x591   :  { %4502 = vmatpush.bf16.msrb.mxu3 %v12166_v61 }
 0x593   :  { %4487 = vmatpush.bf16.msrb.mxu2 %v12110_v27  ;;  %4721 = vmatpush.bf16.msra.mxu0 %v12234_v1  ;;  %v12147_v27 = vld [vmem:[#allocation6 + $0x3a8] sm:$0xf0]  ;;  %v12193_v1 = vld [vmem:[#allocation6 + $0xc00] sm:$0xf] }
 0x594   :  { %4479 = vmatmul.bf16.vlgmr.msrb.gmra.mxu1 %v16273_v24  ;;  %v12150_v5 = vor.u32 %v15252_v20, %v12147_v27  ;;  %v12194_v59 = vor.u32 %v15265_v56, %v12193_v1  ;;  %v16374_v20 = vld [vmem:[#allocation7 + $0x6] sm:$0x3] }
 0x595   :  { %4503 = vmatpush.bf16.msrb.mxu3 %v12158_v9 }
 0x597   :  { %4488 = vmatpush.bf16.msrb.mxu2 %v12102_v38  ;;  %4722 = vmatpush.bf16.msra.mxu0 %v12226_v2  ;;  %v12139_v38 = vld [vmem:[#allocation6 + $0x398] sm:$0xf0] }
 0x598   :  { %v12142_v40 = vor.u32 %v15250_v37, %v12139_v38  ;;  %v15278_v37 = vld [vmem:[#allocation6 + $0xc74] sm:$0xf]  ;;  %v12251_v38 = vld [vmem:[#allocation6 + $0xc78] sm:$0xf0] }
 0x599   :  { %4504 = vmatpush.bf16.msrb.mxu3 %v12150_v5  ;;  %v12254_v41 = vor.u32 %v15278_v37, %v12251_v38  ;;  %v15294_v37 = vld [vmem:[#allocation6 + $0xcf4] sm:$0xf] }
 0x59a   :  { %4465 = vmatmul.bf16.vlgmr.msrb.gmra.mxu0 %v16271_v22 }
 0x59b   :  { %4489 = vmatpush.bf16.msrb.mxu2 %v12094_v55  ;;  %4723 = vmatpush.bf16.msra.mxu0 %v12218_v15  ;;  %v12134_v55 = vor.u32 %v15248_v50, %v12131_v52  ;;  %v15276_v50 = vld [vmem:[#allocation6 + $0xc64] sm:$0xf]  ;;  %v12243_v52 = vld [vmem:[#allocation6 + $0xc68] sm:$0xf0] }
 0x59d   :  { %4505 = vmatpush.bf16.msrb.mxu3 %v12142_v40 }
 0x59f   :  { %4490 = vmatpush.bf16.msrb.mxu2 %v12086_v60  ;;  %4724 = vmatpush.bf16.msra.mxu0 %v12210_v35 }
 0x5a1   :  { %4506 = vmatpush.bf16.msrb.mxu3 %v12134_v55  ;;  %v12246_v55 = vor.u32 %v15276_v50, %v12243_v52  ;;  %v12307_v50 = vld [vmem:[#allocation6 + $0xce8] sm:$0xf0] }
 0x5a3   :  { %4491 = vmatpush.bf16.msrb.mxu2 %v12078_v51  ;;  %4725 = vmatpush.bf16.msra.mxu0 %v12202_v42 }
 0x5a7   :  { %4492 = vmatpush.bf16.msrb.mxu2 %v12070_v36  ;;  %4726 = vmatpush.bf16.msra.mxu0 %v12194_v59  ;;  %v4293_v36 = vperm.slane %v16374_v20, 0  ;;  %v15274_v59 = vld [vmem:[#allocation6 + $0xc54] sm:$0xf] }
 0x601   :  { %v4053_v45 = vpop.f32.mrf.mxu1 }
 0x607   :  { %v4039_v61 = vpop.f32.mrf.mxu0  ;;  %v4025_v63 = vpop.f32.mrf.mxu3 }
 0x608   :  { %v4040_v0 = vadd.f32 %v4039_v61, %v3839_v62  ;;  %v12235_v61 = vld [vmem:[#allocation6 + $0xc58] sm:$0xf0] }
 0x609   :  { %v4055_v2 = vpop.f32.mrf.mxu1 }
 0x60a   :  { %v4054_v9 = vadd.f32 %v4053_v45, %v4040_v0  ;;  %v12238_v0 = vor.u32 %v15274_v59, %v12235_v61  ;;  %v12299_v59 = vld [vmem:[#allocation6 + $0xcd8] sm:$0xf0] }
 0x60c   :  { %v4059_v15 = vmax.f32 %v4054_v9, 0.0 }
 0x60d   :  { %v4011_v60 = vpop.f32.mrf.mxu2 }
 0x60e   :  { %v4012_v57 = vadd.f32 %v4011_v60, %v3838_v23 }
 0x60f   :  { %v4041_v4 = vpop.f32.mrf.mxu0  ;;  %v4027_v26 = vpop.f32.mrf.mxu3 }
 0x610   :  { %v4042_v10 = vadd.f32 %v4041_v4, %v3839_v62  ;;  %v4026_v27 = vadd.f32 %v4025_v63, %v4012_v57  ;;  %v12227_v4 = vld [vmem:[#allocation6 + $0xc48] sm:$0xf0]  ;;  %v15270_v57 = vld [vmem:[#allocation6 + $0xc34] sm:$0xf] }
 0x611   :  { %v4480_v32 = vpop.f32.mrf.mxu1 }
 0x612   :  { %v4056_v13 = vadd.f32 %v4055_v2, %v4042_v10  ;;  %v4058_v39 = vmax.f32 %v4026_v27, 0.0 }
 0x614   :  { %v4061_v19 = vmax.f32 %v4056_v13, 0.0  ;;  %v12219_v13 = vld [vmem:[#allocation6 + $0xc38] sm:$0xf0] }
 0x615   :  { %v4013_v51 = vpop.f32.mrf.mxu2 }
 0x616   :  { %v4063_v5 = vpack.c.bf16 %v4061_v19, %v4059_v15  ;;  %v4014_v12 = vadd.f32 %v4013_v51, %v3838_v23  ;;  %v15272_v23 = vld [vmem:[#allocation6 + $0xc44] sm:$0xf]  ;;  %v12222_v15 = vor.u32 %v15270_v57, %v12219_v13  ;;  %v12211_v51 = vld [vmem:[#allocation6 + $0xc28] sm:$0xf0]  ;;  %v12283_v13 = vld [vmem:[#allocation6 + $0xcb8] sm:$0xf0] }
 0x617   :  { %v4466_v6 = vpop.f32.mrf.mxu0  ;;  %v12230_v10 = vor.u32 %v15272_v23, %v12227_v4  ;;  %v15268_v19 = vld [vmem:[#allocation6 + $0xc24] sm:$0xf]  ;;  %v12281_v4 = vld [vmem:[#allocation6 + $0xcb0] sm:$0xf] }
 0x618   :  { %v4028_v35 = vadd.f32 %v4027_v26, %v4014_v12  ;;  %4220 = vmatmul.bf16.vlgmr.msra.gmra.mxu3 %v4063_v5  ;;  %v4467_v45 = vadd.f32 %v4466_v6, %v4293_v36  ;;  %v12214_v27 = vor.u32 %v15268_v19, %v12211_v51  ;;  %v15266_v26 = vld [vmem:[#allocation6 + $0xc14] sm:$0xf]  ;;  %v12203_v5 = vld [vmem:[#allocation6 + $0xc18] sm:$0xf0]  ;;  %v12195_v6 = vld [vmem:[#allocation6 + $0xc08] sm:$0xf0] }
 0x619   :  { %v4482_v62 = vpop.f32.mrf.mxu1  ;;  %v12206_v12 = vor.u32 %v15266_v26, %v12203_v5  ;;  %v12273_v19 = vld [vmem:[#allocation6 + $0xca0] sm:$0xf]  ;;  %v15285_v51 = vld [vmem:[#allocation6 + $0xca4] sm:$0xf0]  ;;  %v12275_v5 = vld [vmem:[#allocation6 + $0xca8] sm:$0xf0] }
 0x61a   :  { %v4060_v40 = vmax.f32 %v4028_v35, 0.0  ;;  %v4481_v56 = vadd.f32 %v4480_v32, %v4467_v45  ;;  %v15264_v32 = vld [vmem:[#allocation6 + $0xc04] sm:$0xf]  ;;  %v12274_v26 = vor.u32 %v15285_v51, %v12273_v19 }
 0x61b   :  { %v12198_v35 = vor.u32 %v15264_v32, %v12195_v6  ;;  %v12265_v32 = vld [vmem:[#allocation6 + $0xc90] sm:$0xf]  ;;  %v15283_v6 = vld [vmem:[#allocation6 + $0xc94] sm:$0xf0] }
 0x61c   :  { %v4062_v42 = vpack.c.bf16 %v4060_v40, %v4058_v39  ;;  %v4513_v2 = vmax.f32 %v4481_v56, 0.0  ;;  %v12315_v39 = vld [vmem:[#allocation6 + $0xcf8] sm:$0xf0]  ;;  %v15290_v56 = vld [vmem:[#allocation6 + $0xcd4] sm:$0xf] }
 0x61d   :  { %v12318_v40 = vor.u32 %v15294_v37, %v12315_v39  ;;  %v12302_v61 = vor.u32 %v15290_v56, %v12299_v59  ;;  %v12257_v39 = vld [vmem:[#allocation6 + $0xc80] sm:$0xf] }
 0x61e   :  { %4206 = vmatmul.bf16.vlgmr.msra.gmra.mxu2 %v4062_v42  ;;  %v15292_v42 = vld [vmem:[#allocation6 + $0xce4] sm:$0xf] }
 0x61f   :  { %v4468_v1 = vpop.f32.mrf.mxu0  ;;  %4747 = vmatpush.bf16.msra.mxu2 %v12254_v41  ;;  %4761 = vmatpush.bf16.msra.mxu3 %v12318_v40  ;;  %v15293_v41 = vld [vmem:[#allocation6 + $0xce4] sm:$0xf0]  ;;  %v12310_v52 = vor.u32 %v15292_v42, %v12307_v50 }
 0x620   :  { %v4469_v58 = vadd.f32 %v4468_v1, %v4293_v36  ;;  %v15295_v36 = vld [vmem:[#allocation6 + $0xcf4] sm:$0xf0]  ;;  %v12297_v1 = vld [vmem:[#allocation6 + $0xcd0] sm:$0xf]  ;;  %v15281_v40 = vld [vmem:[#allocation6 + $0xc84] sm:$0xf0] }
 0x621   :  { %v12258_v42 = vor.u32 %v15281_v40, %v12257_v39  ;;  %v15324_v39 = vld [vmem:[#allocation6 + $0x15e4] sm:$0xf] }
 0x622   :  { %v4483_v63 = vadd.f32 %v4482_v62, %v4469_v58  ;;  %v12289_v62 = vld [vmem:[#allocation6 + $0xcc0] sm:$0xf] }
 0x623   :  { %4748 = vmatpush.bf16.msra.mxu2 %v12246_v55  ;;  %4762 = vmatpush.bf16.msra.mxu3 %v12310_v52  ;;  %v15291_v55 = vld [vmem:[#allocation6 + $0xcd4] sm:$0xf0] }
 0x624   :  { %v4515_v60 = vmax.f32 %v4483_v63, 0.0  ;;  %v12298_v58 = vor.u32 %v15291_v55, %v12297_v1  ;;  %v15289_v63 = vld [vmem:[#allocation6 + $0xcc4] sm:$0xf0] }
 0x626   :  { %v4517_v9 = vpack.c.bf16 %v4515_v60, %v4513_v2  ;;  %v12290_v2 = vor.u32 %v15289_v63, %v12289_v62  ;;  %v12291_v60 = vld [vmem:[#allocation6 + $0xcc8] sm:$0xf0] }
 0x627   :  { %4749 = vmatpush.bf16.msra.mxu2 %v12238_v0  ;;  %4763 = vmatpush.bf16.msra.mxu3 %v12302_v61  ;;  %v15288_v0 = vld [vmem:[#allocation6 + $0xcc4] sm:$0xf] }
 0x628   :  { %4507 = vmatmul.bf16.vlgmr.msrb.gmra.mxu3 %v16273_v24  ;;  %4727 = vmatmul.bf16.vlgmr.msra.gmra.mxu0 %v4517_v9  ;;  %v12313_v24 = vld [vmem:[#allocation6 + $0xcf0] sm:$0xf]  ;;  %v12294_v23 = vor.u32 %v15288_v0, %v12291_v60 }
 0x629   :  { %v12314_v38 = vor.u32 %v15295_v36, %v12313_v24  ;;  %v12266_v24 = vor.u32 %v15283_v6, %v12265_v32  ;;  %v12267_v36 = vld [vmem:[#allocation6 + $0xc98] sm:$0xf0]  ;;  %v15308_v32 = vld [vmem:[#allocation6 + $0x1564] sm:$0xf]  ;;  %v12371_v6 = vld [vmem:[#allocation6 + $0x1568] sm:$0xf0] }
 0x62b   :  { %4750 = vmatpush.bf16.msra.mxu2 %v12230_v10  ;;  %4733 = vmatpush.bf16.msra.mxu1 %v12314_v38  ;;  %v15286_v10 = vld [vmem:[#allocation6 + $0xcb4] sm:$0xf] }
 0x62c   :  { %4764 = vmatpush.bf16.msra.mxu3 %v12294_v23  ;;  %v4294_v23 = vperm.slane %v16374_v20, 1  ;;  %v12443_v20 = vld [vmem:[#allocation6 + $0x15f8] sm:$0xf0] }
 0x62e   :  { %4493 = vmatmul.bf16.vlgmr.msrb.gmra.mxu2 %v16271_v22  ;;  %v12305_v22 = vld [vmem:[#allocation6 + $0xce0] sm:$0xf] }
 0x62f   :  { %4751 = vmatpush.bf16.msra.mxu2 %v12222_v15  ;;  %v12306_v45 = vor.u32 %v15293_v41, %v12305_v22  ;;  %v12286_v15 = vor.u32 %v15286_v10, %v12283_v13  ;;  %v15280_v22 = vld [vmem:[#allocation6 + $0xc84] sm:$0xf]  ;;  %v15922_v41 = vld [vmem:[#allocation10 + $0x2] ss:$0 sm:$0xff] }
 0x631   :  { %4734 = vmatpush.bf16.msra.mxu1 %v12306_v45  ;;  %4765 = vmatpush.bf16.msra.mxu3 %v12286_v15  ;;  %v12259_v45 = vld [vmem:[#allocation6 + $0xc88] sm:$0xf0] }
 0x632   :  { %v12262_v50 = vor.u32 %v15280_v22, %v12259_v45  ;;  %v12435_v22 = vld [vmem:[#allocation6 + $0x15e8] sm:$0xf0] }
 0x633   :  { %4752 = vmatpush.bf16.msra.mxu2 %v12214_v27  ;;  %v15284_v27 = vld [vmem:[#allocation6 + $0xca4] sm:$0xf]  ;;  %v12438_v45 = vor.u32 %v15324_v39, %v12435_v22  ;;  %v12425_v39 = vld [vmem:[#allocation6 + $0x15d0] sm:$0xf]  ;;  %v12411_v22 = vld [vmem:[#allocation6 + $0x15b8] sm:$0xf0] }
 0x635   :  { %4735 = vmatpush.bf16.msra.mxu1 %v12298_v58 }
 0x637   :  { %4753 = vmatpush.bf16.msra.mxu2 %v12206_v12  ;;  %v12278_v12 = vor.u32 %v15284_v27, %v12275_v5  ;;  %v12379_v5 = vld [vmem:[#allocation6 + $0x1578] sm:$0xf0] }
 0x639   :  { %4736 = vmatpush.bf16.msra.mxu1 %v12290_v2  ;;  %4766 = vmatpush.bf16.msra.mxu3 %v12278_v12 }
 0x63b   :  { %4754 = vmatpush.bf16.msra.mxu2 %v12198_v35  ;;  %v15282_v35 = vld [vmem:[#allocation6 + $0xc94] sm:$0xf] }
 0x63c   :  { %v12270_v37 = vor.u32 %v15282_v35, %v12267_v36  ;;  %v12374_v35 = vor.u32 %v15308_v32, %v12371_v6  ;;  %v15325_v32 = vld [vmem:[#allocation6 + $0x15e4] sm:$0xf0]  ;;  %v15300_v6 = vld [vmem:[#allocation6 + $0x1524] sm:$0xf] }
 0x63e   :  { %4755 = vmatmul.bf16.vlgmr.msra.gmra.mxu2 %v4517_v9  ;;  %v15287_v9 = vld [vmem:[#allocation6 + $0xcb4] sm:$0xf0]  ;;  %4767 = vmatpush.bf16.msra.mxu3 %v12270_v37  ;;  %v15306_v37 = vld [vmem:[#allocation6 + $0x1554] sm:$0xf] }
 0x63f   :  { %v12282_v57 = vor.u32 %v15287_v9, %v12281_v4 }
 0x641   :  { %4737 = vmatpush.bf16.msra.mxu1 %v12282_v57 }
 0x642   :  { %4768 = vmatpush.bf16.msra.mxu3 %v12262_v50  ;;  %v12377_v50 = vld [vmem:[#allocation6 + $0x1570] sm:$0xf] }
 0x645   :  { %4738 = vmatpush.bf16.msra.mxu1 %v12274_v26  ;;  %v15310_v26 = vld [vmem:[#allocation6 + $0x1574] sm:$0xf] }
 0x646   :  { %v12382_v12 = vor.u32 %v15310_v26, %v12379_v5  ;;  %v15307_v26 = vld [vmem:[#allocation6 + $0x1554] sm:$0xf0] }
 0x648   :  { %5009 = vmatpush.bf16.msrb.mxu2 %v12382_v12  ;;  %v12433_v12 = vld [vmem:[#allocation6 + $0x15e0] sm:$0xf] }
 0x649   :  { %4739 = vmatpush.bf16.msra.mxu1 %v12266_v24  ;;  %v15326_v24 = vld [vmem:[#allocation6 + $0x15f4] sm:$0xf] }
 0x64a   :  { %v12446_v36 = vor.u32 %v15326_v24, %v12443_v20  ;;  %v12434_v20 = vor.u32 %v15325_v32, %v12433_v12  ;;  %v15321_v12 = vld [vmem:[#allocation6 + $0x15c4] sm:$0xf0] }
 0x64c   :  { %5010 = vmatpush.bf16.msrb.mxu2 %v12374_v35  ;;  %5023 = vmatpush.bf16.msrb.mxu3 %v12446_v36  ;;  %v12339_v35 = vld [vmem:[#allocation6 + $0x1528] sm:$0xf0] }
 0x64d   :  { %4740 = vmatpush.bf16.msra.mxu1 %v12258_v42  ;;  %v12355_v42 = vld [vmem:[#allocation6 + $0x1548] sm:$0xf0] }
 0x650   :  { %5024 = vmatpush.bf16.msrb.mxu3 %v12438_v45 }
 0x69b   :  { %v4221_v38 = vpop.f32.mrf.mxu3 }
 0x6a1   :  { %v4207_v52 = vpop.f32.mrf.mxu2 }
 0x6a2   :  { %v4208_v1 = vadd.f32 %v15922_v41, %v4207_v52  ;;  %v15311_v52 = vld [vmem:[#allocation6 + $0x1574] sm:$0xf0] }
 0x6a3   :  { %v4223_v59 = vpop.f32.mrf.mxu3 }
 0x6a4   :  { %v16385_v56 = vadd.f32 %v4221_v38, %v4208_v1  ;;  %v12363_v38 = vld [vmem:[#allocation6 + $0x1558] sm:$0xf0]  ;;  %v12378_v1 = vor.u32 %v15311_v52, %v12377_v50  ;;  %v15298_v50 = vld [vmem:[#allocation6 + $0x1514] sm:$0xf] }
 0x6a5   :  { %v12366_v40 = vor.u32 %v15306_v37, %v12363_v38  ;;  %v12353_v37 = vld [vmem:[#allocation6 + $0x1540] sm:$0xf]  ;;  %v15305_v38 = vld [vmem:[#allocation6 + $0x1544] sm:$0xf0]  ;;  %v12331_v52 = vld [vmem:[#allocation6 + $0x1518] sm:$0xf0] }
 0x6a6   :  { %v16390_v58 = vsel %vm16381_vm6, %v16385_v56, -inf  ;;  %4981 = vmatpush.bf16.msrb.mxu0 %v12378_v1  ;;  %v12354_v1 = vor.u32 %v15305_v38, %v12353_v37  ;;  %v15357_v37 = vld [vmem:[#allocation6 + $0x464] sm:$0xf0]  ;;  %v15312_v38 = vld [vmem:[#allocation6 + $0x1584] sm:$0xf] }
 0x6a7   :  { %4231 = vmax.xlane.f32.xlu2 %v16390_v58  ;;  %5011 = vmatpush.bf16.msrb.mxu2 %v12366_v40  ;;  %v15318_v40 = vld [vmem:[#allocation6 + $0x15b4] sm:$0xf] }
 0x6a9   :  { %v4209_v61 = vpop.f32.mrf.mxu2 }
 0x6aa   :  { %v4210_v62 = vadd.f32 %v15922_v41, %v4209_v61  ;;  %v15304_v41 = vld [vmem:[#allocation6 + $0x1544] sm:$0xf]  ;;  %v12427_v61 = vld [vmem:[#allocation6 + $0x15d8] sm:$0xf0] }
 0x6ab   :  { %v4508_v2 = vpop.f32.mrf.mxu3 }
 0x6ac   :  { %v16393_v63 = vadd.f32 %v4223_v59, %v4210_v62  ;;  %v15322_v59 = vld [vmem:[#allocation6 + $0x15d4] sm:$0xf]  ;;  %v12358_v62 = vor.u32 %v15304_v41, %v12355_v42  ;;  %v15323_v41 = vld [vmem:[#allocation6 + $0x15d4] sm:$0xf0]  ;;  %v12342_v42 = vor.u32 %v15300_v6, %v12339_v35  ;;  %v12337_v35 = vld [vmem:[#allocation6 + $0x1520] sm:$0xf] }
 0x6ad   :  { %v12426_v45 = vor.u32 %v15323_v41, %v12425_v39  ;;  %v12387_v39 = vld [vmem:[#allocation6 + $0x1588] sm:$0xf0]  ;;  %v12409_v41 = vld [vmem:[#allocation6 + $0x15b0] sm:$0xf] }
 0x6ae   :  { %v16398_v0 = vsel %vm16381_vm6, %v16393_v63, -inf  ;;  %5012 = vmatpush.bf16.msrb.mxu2 %v12358_v62  ;;  %v12403_v62 = vld [vmem:[#allocation6 + $0x15a8] sm:$0xf0] }
 0x6af   :  { %4233 = vmax.xlane.f32.xlu2 %v16398_v0 }
 0x6b1   :  { %v4494_v60 = vpop.f32.mrf.mxu2 }
 0x6b2   :  { %v4495_v4 = vadd.f32 %v4494_v60, %v4294_v23  ;;  %v12369_v60 = vld [vmem:[#allocation6 + $0x1560] sm:$0xf] }
 0x6b3   :  { %v4510_v13 = vpop.f32.mrf.mxu3 }
 0x6b4   :  { %v4509_v10 = vadd.f32 %v4508_v2, %v4495_v4  ;;  %v15302_v2 = vld [vmem:[#allocation6 + $0x1534] sm:$0xf]  ;;  %v12347_v4 = vld [vmem:[#allocation6 + $0x1538] sm:$0xf0] }
 0x6b5   :  { %v12350_v5 = vor.u32 %v15302_v2, %v12347_v4  ;;  %v12334_v2 = vor.u32 %v15298_v50, %v12331_v52  ;;  %v15375_v52 = vld [vmem:[#allocation6 + $0x4f4] sm:$0xf0] }
 0x6b6   :  { %v4514_v19 = vmax.f32 %v4509_v10, 0.0  ;;  %v12441_v10 = vld [vmem:[#allocation6 + $0x15f0] sm:$0xf] }
 0x6b7   :  { %5013 = vmatpush.bf16.msrb.mxu2 %v12350_v5  ;;  %v12417_v5 = vld [vmem:[#allocation6 + $0x15c0] sm:$0xf] }
 0x6b8   :  { %v12418_v6 = vor.u32 %v15321_v12, %v12417_v5  ;;  %v15353_v5 = vld [vmem:[#allocation6 + $0x444] sm:$0xf0] }
 0x6b9   :  { %v4496_v9 = vpop.f32.mrf.mxu2 }
 0x6ba   :  { %v4497_v57 = vadd.f32 %v4496_v9, %v4294_v23  ;;  %v15309_v23 = vld [vmem:[#allocation6 + $0x1564] sm:$0xf0] }
 0x6bb   :  { %v12370_v9 = vor.u32 %v15309_v23, %v12369_v60  ;;  %5014 = vmatpush.bf16.msrb.mxu2 %v12342_v42  ;;  %v15296_v60 = vld [vmem:[#allocation6 + $0x1504] sm:$0xf]  ;;  %v12323_v23 = vld [vmem:[#allocation6 + $0x1508] sm:$0xf0]  ;;  %v15319_v42 = vld [vmem:[#allocation6 + $0x15b4] sm:$0xf0] }
 0x6bc   :  { %v4511_v15 = vadd.f32 %v4510_v13, %v4497_v57  ;;  %v15327_v57 = vld [vmem:[#allocation6 + $0x15f4] sm:$0xf0]  ;;  %v12430_v13 = vor.u32 %v15322_v59, %v12427_v61  ;;  %v12414_v59 = vor.u32 %v15318_v40, %v12411_v22  ;;  %v15316_v61 = vld [vmem:[#allocation6 + $0x15a4] sm:$0xf]  ;;  %v12390_v22 = vor.u32 %v15312_v38, %v12387_v39 }
 0x6bd   :  { %4982 = vmatpush.bf16.msrb.mxu0 %v12370_v9  ;;  %v12406_v4 = vor.u32 %v15316_v61, %v12403_v62  ;;  %v12326_v9 = vor.u32 %v15296_v60, %v12323_v23  ;;  %v12410_v50 = vor.u32 %v15319_v42, %v12409_v41  ;;  %v15299_v61 = vld [vmem:[#allocation6 + $0x1514] sm:$0xf0]  ;;  %v12609_v41 = vld [vmem:[#allocation6 + $0x4c0] sm:$0xf] }
 0x6be   :  { %v4516_v51 = vmax.f32 %v4511_v15, 0.0  ;;  %v12442_v15 = vor.u32 %v15327_v57, %v12441_v10  ;;  %5025 = vmatpush.bf16.msrb.mxu3 %v12430_v13  ;;  %v12345_v10 = vld [vmem:[#allocation6 + $0x1530] sm:$0xf]  ;;  %v15303_v57 = vld [vmem:[#allocation6 + $0x1534] sm:$0xf0] }
 0x6bf   :  { %5015 = vmatpush.bf16.msrb.mxu2 %v12334_v2  ;;  %v12346_v13 = vor.u32 %v15303_v57, %v12345_v10  ;;  %v12553_v2 = vld [vmem:[#allocation6 + $0x450] sm:$0xf]  ;;  %v15355_v60 = vld [vmem:[#allocation6 + $0x454] sm:$0xf0]  ;;  %v12625_v10 = vld [vmem:[#allocation6 + $0x4e0] sm:$0xf] }
 0x6c0   :  { %v4518_v27 = vpack.c.bf16 %v4516_v51, %v4514_v19  ;;  %v12361_v19 = vld [vmem:[#allocation6 + $0x1550] sm:$0xf]  ;;  %v15320_v51 = vld [vmem:[#allocation6 + $0x15c4] sm:$0xf]  ;;  %4995 = vmatpush.bf16.msrb.mxu1 %v12442_v15  ;;  %v12554_v23 = vor.u32 %v15355_v60, %v12553_v2  ;;  %v15351_v38 = vld [vmem:[#allocation6 + $0x434] sm:$0xf0] }
 0x6c1   :  { %v12362_v24 = vor.u32 %v15307_v26, %v12361_v19  ;;  %v12569_v15 = vld [vmem:[#allocation6 + $0x470] sm:$0xf]  ;;  %v15359_v19 = vld [vmem:[#allocation6 + $0x474] sm:$0xf0]  ;;  %v12395_v26 = vld [vmem:[#allocation6 + $0x1598] sm:$0xf0] }
 0x6c2   :  { %4741 = vmatmul.bf16.vlgmr.msra.gmra.mxu1 %v4518_v27  ;;  %4769 = vmatmul.bf16.vlgmr.msra.gmra.mxu3 %v4518_v27  ;;  %v12419_v27 = vld [vmem:[#allocation6 + $0x15c8] sm:$0xf0]  ;;  %v12521_v60 = vld [vmem:[#allocation6 + $0x410] sm:$0xf] }
 0x6c3   :  { %v12422_v36 = vor.u32 %v15320_v51, %v12419_v27  ;;  %4983 = vmatpush.bf16.msrb.mxu0 %v12362_v24  ;;  %v15314_v51 = vld [vmem:[#allocation6 + $0x1594] sm:$0xf]  ;;  %5016 = vmatpush.bf16.msrb.mxu2 %v12326_v9  ;;  %v12570_v27 = vor.u32 %v15359_v19, %v12569_v15  ;;  %v15301_v24 = vld [vmem:[#allocation6 + $0x1524] sm:$0xf0]  ;;  %v12321_v19 = vld [vmem:[#allocation6 + $0x1500] sm:$0xf] }
 0x6c4   :  { %4996 = vmatpush.bf16.msrb.mxu1 %v12434_v20  ;;  %v12398_v32 = vor.u32 %v15314_v51, %v12395_v26  ;;  %v12561_v20 = vld [vmem:[#allocation6 + $0x460] sm:$0xf]  ;;  %v15317_v9 = vld [vmem:[#allocation6 + $0x15a4] sm:$0xf0] }
 0x6c5   :  { %5026 = vmatpush.bf16.msrb.mxu3 %v12422_v36  ;;  %v12338_v36 = vor.u32 %v15301_v24, %v12337_v35  ;;  %v12562_v40 = vor.u32 %v15357_v37, %v12561_v20  ;;  %v15297_v51 = vld [vmem:[#allocation6 + $0x1504] sm:$0xf0]  ;;  %v12617_v35 = vld [vmem:[#allocation6 + $0x4d0] sm:$0xf]  ;;  %v15371_v20 = vld [vmem:[#allocation6 + $0x4d4] sm:$0xf0] }
 0x6c6   :  { %v12322_v26 = vor.u32 %v15297_v51, %v12321_v19  ;;  %v12537_v37 = vld [vmem:[#allocation6 + $0x430] sm:$0xf]  ;;  %v15363_v51 = vld [vmem:[#allocation6 + $0x494] sm:$0xf0] }
 0x6c7   :  { %4984 = vmatpush.bf16.msrb.mxu0 %v12354_v1  ;;  %5436 = vmatpush.bf16.msra.mxu2 %v12570_v27  ;;  %v12545_v27 = vld [vmem:[#allocation6 + $0x440] sm:$0xf]  ;;  %v12538_v39 = vor.u32 %v15351_v38, %v12537_v37  ;;  %v12585_v19 = vld [vmem:[#allocation6 + $0x490] sm:$0xf] }
 0x6c8   :  { %4997 = vmatpush.bf16.msrb.mxu1 %v12426_v45  ;;  %v12633_v45 = vld [vmem:[#allocation6 + $0x4f0] sm:$0xf]  ;;  %v12546_v12 = vor.u32 %v15353_v5, %v12545_v27  ;;  %v4728_v27 = vpop.f32.mrf.mxu0  ;;  %v12586_v5 = vor.u32 %v15363_v51, %v12585_v19  ;;  %v15332_v19 = vld [vmem:[#allocation9 + $0x1a0] sm:$0xff] }
 0x6c9   :  { %5027 = vmatpush.bf16.msrb.mxu3 %v12414_v59  ;;  %v12634_v1 = vor.u32 %v15375_v52, %v12633_v45  ;;  %v12329_v59 = vld [vmem:[#allocation6 + $0x1510] sm:$0xf]  ;;  %v15369_v45 = vld [vmem:[#allocation6 + $0x4c4] sm:$0xf0]  ;;  %v12529_v52 = vld [vmem:[#allocation6 + $0x420] sm:$0xf] }
 0x6ca   :  { %v12330_v62 = vor.u32 %v15299_v61, %v12329_v59  ;;  %v12601_v61 = vld [vmem:[#allocation6 + $0x4b0] sm:$0xf]  ;;  %v15340_v51 = vld [vmem:[#allocation9 + $0x1e0] sm:$0xff] }
 0x6cb   :  { %4985 = vmatpush.bf16.msrb.mxu0 %v12346_v13  ;;  %5437 = vmatpush.bf16.msra.mxu2 %v12562_v40  ;;  %v15373_v13 = vld [vmem:[#allocation6 + $0x4e4] sm:$0xf0]  ;;  %v12385_v40 = vld [vmem:[#allocation6 + $0x1580] sm:$0xf] }
 0x6cc   :  { %4998 = vmatpush.bf16.msrb.mxu1 %v12418_v6  ;;  %v12626_v15 = vor.u32 %v15373_v13, %v12625_v10  ;;  %v15315_v6 = vld [vmem:[#allocation6 + $0x1594] sm:$0xf0]  ;;  %v15365_v10 = vld [vmem:[#allocation6 + $0x4a4] sm:$0xf0] }
 0x6cd   :  { %5028 = vmatpush.bf16.msrb.mxu3 %v12406_v4  ;;  %v12401_v4 = vld [vmem:[#allocation6 + $0x15a0] sm:$0xf]  ;;  %v15345_v13 = vld [vmem:[#allocation6 + $0x404] sm:$0xf0] }
 0x6ce   :  { %v12402_v57 = vor.u32 %v15317_v9, %v12401_v4  ;;  %v12593_v4 = vld [vmem:[#allocation6 + $0x4a0] sm:$0xf] }
 0x6cf   :  { %4986 = vmatpush.bf16.msrb.mxu0 %v12338_v36  ;;  %5438 = vmatpush.bf16.msra.mxu2 %v12554_v23  ;;  %v12618_v36 = vor.u32 %v15371_v20, %v12617_v35  ;;  %v15347_v23 = vld [vmem:[#allocation6 + $0x414] sm:$0xf0]  ;;  %v4756_v35 = vpop.f32.mrf.mxu2 }
 0x6d0   :  { %4999 = vmatpush.bf16.msrb.mxu1 %v12410_v50  ;;  %v12610_v50 = vor.u32 %v15369_v45, %v12609_v41  ;;  %v12522_v9 = vor.u32 %v15347_v23, %v12521_v60  ;;  %v4730_v37 = vpop.f32.mrf.mxu0  ;;  %v15333_v23 = vld [vmem:[#allocation9 + $0x1a8] sm:$0xff] }
 0x6d1   :  { %5029 = vmatpush.bf16.msrb.mxu3 %v12398_v32  ;;  %v12393_v32 = vld [vmem:[#allocation6 + $0x1590] sm:$0xf] }
 0x6d2   :  { %v12394_v24 = vor.u32 %v15315_v6, %v12393_v32  ;;  %v12577_v32 = vld [vmem:[#allocation6 + $0x480] sm:$0xf]  ;;  %v15361_v6 = vld [vmem:[#allocation6 + $0x484] sm:$0xf0] }
 0x6d3   :  { %4987 = vmatpush.bf16.msrb.mxu0 %v12330_v62  ;;  %5439 = vmatpush.bf16.msra.mxu2 %v12546_v12  ;;  %v15367_v62 = vld [vmem:[#allocation6 + $0x4b4] sm:$0xf0]  ;;  %v12578_v20 = vor.u32 %v15361_v6, %v12577_v32  ;;  %v15331_v6 = vld [vmem:[#allocation9 + $0x198] sm:$0xff] }
 0x6d4   :  { %5000 = vmatpush.bf16.msrb.mxu1 %v12402_v57  ;;  %v12602_v2 = vor.u32 %v15367_v62, %v12601_v61  ;;  %v12513_v57 = vld [vmem:[#allocation6 + $0x400] sm:$0xf]  ;;  %v4553_v12 = vld [vmem:[#allocation7 + $0x18] sm:$0x3] }
 0x6d5   :  { %5030 = vmatpush.bf16.msrb.mxu3 %v12390_v22  ;;  %v15313_v22 = vld [vmem:[#allocation6 + $0x1584] sm:$0xf0] }
 0x6d6   :  { %v12386_v42 = vor.u32 %v15313_v22, %v12385_v40  ;;  %v15343_v22 = vld [vmem:[#allocation9 + $0x1f8] sm:$0xff] }
 0x6d7   :  { %4988 = vmatpush.bf16.msrb.mxu0 %v12322_v26  ;;  %5440 = vmatpush.bf16.msra.mxu2 %v12538_v39  ;;  %v12514_v26 = vor.u32 %v15345_v13, %v12513_v57  ;;  %v15335_v39 = vld [vmem:[#allocation9 + $0x1b8] sm:$0xff]  ;;  %v4758_v61 = vpop.f32.mrf.mxu2 }
 0x6d8   :  { %5001 = vmatpush.bf16.msrb.mxu1 %v12394_v24 }
 0x6d9   :  { %5450 = vmatpush.bf16.msra.mxu3 %v12634_v1  ;;  %v15349_v1 = vld [vmem:[#allocation6 + $0x424] sm:$0xf0] }
 0x6da   :  { %v12530_v59 = vor.u32 %v15349_v1, %v12529_v52  ;;  %v15342_v1 = vld [vmem:[#allocation9 + $0x1f0] sm:$0xff] }
 0x6db   :  { %5177 = vmatpush.bf16.msra.mxu0 %v15335_v39 }
 0x6dc   :  { %5002 = vmatpush.bf16.msrb.mxu1 %v12386_v42  ;;  %5441 = vmatpush.bf16.msra.mxu2 %v12530_v59  ;;  %v4556_v42 = vperm.slane %v4553_v12, 1 }
 0x6dd   :  { %5451 = vmatpush.bf16.msra.mxu3 %v12626_v15  ;;  %v12594_v15 = vor.u32 %v15365_v10, %v12593_v4  ;;  %v15341_v4 = vld [vmem:[#allocation9 + $0x1e8] sm:$0xff] }
 0x6de   :  { %v4757_v62 = vadd.f32 %v4756_v35, %v4556_v42  ;;  %v15339_v35 = vld [vmem:[#allocation9 + $0x1d8] sm:$0xff] }
 0x6e0   :  { %5442 = vmatpush.bf16.msra.mxu2 %v12522_v9  ;;  %5191 = vmatpush.bf16.msra.mxu1 %v15343_v22  ;;  %v4759_v9 = vadd.f32 %v4758_v61, %v4556_v42  ;;  %v12563_v61 = vld [vmem:[#allocation6 + $0x468] sm:$0xf0] }
 0x6e1   :  { %5452 = vmatpush.bf16.msra.mxu3 %v12618_v36  ;;  %v4555_v36 = vperm.slane %v4553_v12, 0 }
 0x6e3   :  { %v4729_v38 = vadd.f32 %v4728_v27, %v4555_v36  ;;  %v4731_v41 = vadd.f32 %v4730_v37, %v4555_v36  ;;  %v16002_v27 = vld [vmem:[#allocation4 + $0x8] sm:$0xff]  ;;  %v15330_v37 = vld [vmem:[#allocation9 + $0x190] sm:$0xff] }
 0x6e4   :  { %5443 = vmatpush.bf16.msra.mxu2 %v12514_v26  ;;  %5192 = vmatpush.bf16.msra.mxu1 %v15342_v1  ;;  %v280_v26 = vperm.slane %v16002_v27, 0  ;;  %v281_v36 = vperm.slane %v16002_v27, 1  ;;  %v15374_v27 = vld [vmem:[#allocation6 + $0x4f4] sm:$0xf] }
 0x6e5   :  { %5453 = vmatpush.bf16.msra.mxu3 %v12610_v50  ;;  %v15334_v50 = vld [vmem:[#allocation9 + $0x1b0] sm:$0xff] }
 0x6e6   :  { %5178 = vmatpush.bf16.msra.mxu0 %v15334_v50  ;;  %v1172_v22 = vadd.f32 %v16285_v34, %v281_v36  ;;  %v15354_v34 = vld [vmem:[#allocation6 + $0x454] sm:$0xf] }
 0x6e8   :  { %5193 = vmatpush.bf16.msra.mxu1 %v15341_v4  ;;  %v15352_v4 = vld [vmem:[#allocation6 + $0x444] sm:$0xf] }
 0x6e9   :  { %5454 = vmatpush.bf16.msra.mxu3 %v12602_v2 }
 0x6ea   :  { %5179 = vmatpush.bf16.msra.mxu0 %v15333_v23  ;;  %v15338_v23 = vld [vmem:[#allocation9 + $0x1d0] sm:$0xff] }
 0x6ec   :  { %5194 = vmatpush.bf16.msra.mxu1 %v15340_v51  ;;  %v15336_v51 = vld [vmem:[#allocation9 + $0x1c0] sm:$0xff] }
 0x6ed   :  { %5455 = vmatpush.bf16.msra.mxu3 %v12594_v15 }
 0x6ee   :  { %5180 = vmatpush.bf16.msra.mxu0 %v15332_v19 }
 0x6f0   :  { %5195 = vmatpush.bf16.msra.mxu1 %v15339_v35  ;;  %v12531_v35 = vld [vmem:[#allocation6 + $0x428] sm:$0xf0] }
 0x6f1   :  { %5456 = vmatpush.bf16.msra.mxu3 %v12586_v5 }
 0x6f2   :  { %5181 = vmatpush.bf16.msra.mxu0 %v15331_v6  ;;  %v15348_v6 = vld [vmem:[#allocation6 + $0x424] sm:$0xf] }
 0x6f4   :  { %5196 = vmatpush.bf16.msra.mxu1 %v15338_v23  ;;  %v12611_v23 = vld [vmem:[#allocation6 + $0x4c8] sm:$0xf0] }
 0x6f5   :  { %5457 = vmatpush.bf16.msra.mxu3 %v12578_v20  ;;  %v1158_v20 = vadd.f32 %v16283_v33, %v280_v26  ;;  %v1313_v33 = vmax.f32 %v1172_v22, 0.0  ;;  %v15346_v22 = vld [vmem:[#allocation6 + $0x414] sm:$0xf] }
 0x6f6   :  { %5182 = vmatpush.bf16.msra.mxu0 %v15330_v37  ;;  %v12627_v37 = vld [vmem:[#allocation6 + $0x4e8] sm:$0xf0] }
 0x6f7   :  { %v1312_v39 = vmax.f32 %v1158_v20, 0.0  ;;  %v12534_v20 = vor.u32 %v15348_v6, %v12531_v35  ;;  %v15381_v35 = vld [vmem:[#allocation6 + $0xd24] sm:$0xf0] }
 0x73f   :  { %v4742_v24 = vpop.f32.mrf.mxu1 }
 0x740   :  { %v4743_v45 = vadd.f32 %v4742_v24, %v4729_v38  ;;  %v1156_v24 = vadd.f32 %v16275_v25, %v280_v26  ;;  %v12571_v25 = vld [vmem:[#allocation6 + $0x478] sm:$0xf0] }
 0x741   :  { %v12635_v26 = vld [vmem:[#allocation6 + $0x4f8] sm:$0xf0] }
 0x742   :  { %v4775_v2 = vmax.f32 %v4743_v45, 0.0  ;;  %v1294_v38 = vmax.f32 %v1156_v24, 0.0  ;;  %v15358_v45 = vld [vmem:[#allocation6 + $0x474] sm:$0xf] }
 0x743   :  { %v12574_v1 = vor.u32 %v15358_v45, %v12571_v25 }
 0x744   :  { %v16406_v42 = vpack.c.bf16 %v1312_v39, %v1294_v38  ;;  %v12689_v38 = vld [vmem:[#allocation6 + $0xd60] sm:$0xf] }
 0x745   :  { %v4770_v40 = vpop.f32.mrf.mxu3 }
 0x746   :  { %v4771_v10 = vadd.f32 %v4770_v40, %v4757_v62  ;;  %v1170_v40 = vadd.f32 %v16279_v3, %v281_v36  ;;  %v15372_v36 = vld [vmem:[#allocation6 + $0x4e4] sm:$0xf] }
 0x747   :  { %v4744_v52 = vpop.f32.mrf.mxu1  ;;  %v12630_v39 = vor.u32 %v15372_v36, %v12627_v37  ;;  %v15362_v36 = vld [vmem:[#allocation6 + $0x494] sm:$0xf]  ;;  %v12587_v37 = vld [vmem:[#allocation6 + $0x498] sm:$0xf0] }
 0x748   :  { %v4745_v59 = vadd.f32 %v4744_v52, %v4731_v41  ;;  %v4776_v5 = vmax.f32 %v4771_v10, 0.0  ;;  %v15329_v41 = vld [vmem:[#allocation9 + $0x188] sm:$0xff]  ;;  %v1295_v50 = vmax.f32 %v1170_v40, 0.0  ;;  %v15328_v52 = vld [vmem:[#allocation9 + $0x180] sm:$0xff]  ;;  %v15389_v40 = vld [vmem:[#allocation6 + $0xd64] sm:$0xf0] }
 0x749   :  { %5183 = vmatpush.bf16.msra.mxu0 %v15329_v41  ;;  %v12523_v41 = vld [vmem:[#allocation6 + $0x418] sm:$0xf0]  ;;  %v12690_v45 = vor.u32 %v15389_v40, %v12689_v38  ;;  %v12649_v38 = vld [vmem:[#allocation6 + $0xd10] sm:$0xf]  ;;  %v15379_v40 = vld [vmem:[#allocation6 + $0xd14] sm:$0xf0] }
 0x74a   :  { %v4777_v60 = vmax.f32 %v4745_v59, 0.0  ;;  %v15356_v59 = vld [vmem:[#allocation6 + $0x464] sm:$0xf]  ;;  %v16409_v62 = vpack.c.bf16 %v1313_v33, %v1295_v50  ;;  %v12526_v25 = vor.u32 %v15346_v22, %v12523_v41  ;;  %v15370_v50 = vld [vmem:[#allocation6 + $0x4d4] sm:$0xf]  ;;  %v12650_v41 = vor.u32 %v15379_v40, %v12649_v38 }
 0x74b   :  { %v12566_v3 = vor.u32 %v15356_v59, %v12563_v61  ;;  %v12619_v33 = vld [vmem:[#allocation6 + $0x4d8] sm:$0xf0]  ;;  %v15387_v59 = vld [vmem:[#allocation6 + $0xd54] sm:$0xf0]  ;;  %v15344_v61 = vld [vmem:[#allocation6 + $0x404] sm:$0xf] }
 0x74c   :  { %v4779_v57 = vpack.c.bf16 %v4777_v60, %v4775_v2  ;;  %v12555_v2 = vld [vmem:[#allocation6 + $0x458] sm:$0xf0]  ;;  %v4815_v22 = vld [vmem:[#allocation7 + $0x2a] sm:$0x3] }
 0x74d   :  { %v4772_v13 = vpop.f32.mrf.mxu3  ;;  %5184 = vmatpush.bf16.msra.mxu0 %v15328_v52  ;;  %v12558_v60 = vor.u32 %v15354_v34, %v12555_v2  ;;  %v12681_v52 = vld [vmem:[#allocation6 + $0xd50] sm:$0xf] }
 0x74e   :  { %v4773_v15 = vadd.f32 %v4772_v13, %v4759_v9  ;;  %4989 = vmatmul.bf16.vlgmr.msrb.gmra.mxu0 %v4779_v57  ;;  %5017 = vmatmul.bf16.vlgmr.msrb.gmra.mxu2 %v4779_v57  ;;  %v12547_v9 = vld [vmem:[#allocation6 + $0x448] sm:$0xf0]  ;;  %v15337_v57 = vld [vmem:[#allocation9 + $0x1c8] sm:$0xff]  ;;  %v15350_v13 = vld [vmem:[#allocation6 + $0x434] sm:$0xf]  ;;  %v12682_v34 = vor.u32 %v15387_v59, %v12681_v52 }
 0x74f   :  { %v12550_v10 = vor.u32 %v15352_v4, %v12547_v9  ;;  %5197 = vmatpush.bf16.msra.mxu1 %v15337_v57  ;;  %v12673_v9 = vld [vmem:[#allocation6 + $0xd40] sm:$0xf] }
 0x750   :  { %v4778_v12 = vmax.f32 %v4773_v15, 0.0  ;;  %v12539_v15 = vld [vmem:[#allocation6 + $0x438] sm:$0xf0]  ;;  %v12641_v52 = vld [vmem:[#allocation6 + $0xd00] sm:$0xf] }
 0x751   :  { %5464 = vmatpush.bf16.msrb.mxu0 %v12574_v1  ;;  %v12542_v19 = vor.u32 %v15350_v13, %v12539_v15  ;;  %v12622_v1 = vor.u32 %v15370_v50, %v12619_v33  ;;  %v15366_v13 = vld [vmem:[#allocation6 + $0x4b4] sm:$0xf]  ;;  %v12603_v15 = vld [vmem:[#allocation6 + $0x4b8] sm:$0xf0]  ;;  %v15360_v50 = vld [vmem:[#allocation6 + $0x484] sm:$0xf] }
 0x752   :  { %v4780_v32 = vpack.c.bf16 %v4778_v12, %v4776_v5  ;;  %v12697_v5 = vld [vmem:[#allocation6 + $0xd70] sm:$0xf]  ;;  %v12638_v12 = vor.u32 %v15374_v27, %v12635_v26  ;;  %v15383_v27 = vld [vmem:[#allocation6 + $0xd34] sm:$0xf0]  ;;  %v12579_v33 = vld [vmem:[#allocation6 + $0x488] sm:$0xf0] }
 0x753   :  { %5198 = vmatpush.bf16.msra.mxu1 %v15336_v51  ;;  %v12606_v51 = vor.u32 %v15366_v13, %v12603_v15  ;;  %v12582_v59 = vor.u32 %v15360_v50, %v12579_v33  ;;  %v15390_v15 = vld [vmem:[#allocation6 + $0xd74] sm:$0xf]  ;;  %v16412_v50 = vld [vmem:[#allocation7 + $0x8] sm:$0x3]  ;;  %v15384_v33 = vld [vmem:[#allocation6 + $0xd44] sm:$0xf] }
 0x754   :  { %5003 = vmatmul.bf16.vlgmr.msrb.gmra.mxu1 %v4780_v32  ;;  %5031 = vmatmul.bf16.vlgmr.msrb.gmra.mxu3 %v4780_v32  ;;  %v15391_v32 = vld [vmem:[#allocation6 + $0xd74] sm:$0xf0] }
 0x755   :  { %5465 = vmatpush.bf16.msrb.mxu0 %v12566_v3  ;;  %v12698_v24 = vor.u32 %v15391_v32, %v12697_v5  ;;  %v12515_v3 = vld [vmem:[#allocation6 + $0x408] sm:$0xf0]  ;;  %v15364_v5 = vld [vmem:[#allocation6 + $0x4a4] sm:$0xf]  ;;  %v12657_v32 = vld [vmem:[#allocation6 + $0xd20] sm:$0xf] }
 0x756   :  { %v12518_v2 = vor.u32 %v15344_v61, %v12515_v3  ;;  %v15377_v61 = vld [vmem:[#allocation6 + $0xd04] sm:$0xf0] }
 0x757   :  { %5478 = vmatpush.bf16.msrb.mxu1 %v12638_v12  ;;  %5698 = vmatpush.bf16.msrb.mxu2 %v12698_v24  ;;  %v12595_v12 = vld [vmem:[#allocation6 + $0x4a8] sm:$0xf0]  ;;  %v12642_v3 = vor.u32 %v15377_v61, %v12641_v52 }
 0x758   :  { %v12598_v6 = vor.u32 %v15364_v5, %v12595_v12  ;;  %v12675_v52 = vld [vmem:[#allocation6 + $0xd48] sm:$0xf0] }
 0x759   :  { %5466 = vmatpush.bf16.msrb.mxu0 %v12558_v60  ;;  %v15368_v60 = vld [vmem:[#allocation6 + $0x4c4] sm:$0xf]  ;;  %v12678_v61 = vor.u32 %v15384_v33, %v12675_v52  ;;  %v12745_v33 = vld [vmem:[#allocation6 + $0xdd0] sm:$0xf]  ;;  %v15403_v52 = vld [vmem:[#allocation6 + $0xdd4] sm:$0xf0] }
 0x75a   :  { %v12614_v4 = vor.u32 %v15368_v60, %v12611_v23 }
 0x75b   :  { %5479 = vmatpush.bf16.msrb.mxu1 %v12630_v39  ;;  %5699 = vmatpush.bf16.msrb.mxu2 %v12690_v45  ;;  %v12590_v39 = vor.u32 %v15362_v36, %v12587_v37 }
 0x75d   :  { %5467 = vmatpush.bf16.msrb.mxu0 %v12550_v10  ;;  %v15385_v10 = vld [vmem:[#allocation6 + $0xd44] sm:$0xf0] }
 0x75e   :  { %5444 = vmatmul.bf16.vlgmr.msra.gmra.mxu2 %v16406_v42  ;;  %v12674_v57 = vor.u32 %v15385_v10, %v12673_v9 }
 0x75f   :  { %5480 = vmatpush.bf16.msrb.mxu1 %v12622_v1  ;;  %5700 = vmatpush.bf16.msrb.mxu2 %v12682_v34  ;;  %v4817_v1 = vperm.slane %v4815_v22, 0 }
 0x761   :  { %5468 = vmatpush.bf16.msrb.mxu0 %v12542_v19  ;;  %v12665_v19 = vld [vmem:[#allocation6 + $0xd30] sm:$0xf] }
 0x762   :  { %v12666_v26 = vor.u32 %v15383_v27, %v12665_v19  ;;  %v12699_v19 = vld [vmem:[#allocation6 + $0xd78] sm:$0xf0] }
 0x763   :  { %5481 = vmatpush.bf16.msrb.mxu1 %v12614_v4  ;;  %5701 = vmatpush.bf16.msrb.mxu2 %v12674_v57  ;;  %v4818_v4 = vperm.slane %v4815_v22, 1  ;;  %v12702_v5 = vor.u32 %v15390_v15, %v12699_v19  ;;  %v15386_v22 = vld [vmem:[#allocation6 + $0xd54] sm:$0xf] }
 0x764   :  { %5458 = vmatmul.bf16.vlgmr.msra.gmra.mxu3 %v16409_v62 }
 0x765   :  { %5469 = vmatpush.bf16.msrb.mxu0 %v12534_v20  ;;  %v12658_v20 = vor.u32 %v15381_v35, %v12657_v32  ;;  %v15388_v35 = vld [vmem:[#allocation6 + $0xd64] sm:$0xf] }
 0x767   :  { %5482 = vmatpush.bf16.msrb.mxu1 %v12606_v51  ;;  %5702 = vmatpush.bf16.msrb.mxu2 %v12666_v26 }
 0x769   :  { %5470 = vmatpush.bf16.msrb.mxu0 %v12526_v25 }
 0x76b   :  { %5483 = vmatpush.bf16.msrb.mxu1 %v12598_v6  ;;  %5703 = vmatpush.bf16.msrb.mxu2 %v12658_v20  ;;  %v12691_v20 = vld [vmem:[#allocation6 + $0xd68] sm:$0xf0] }
 0x76c   :  { %v12694_v38 = vor.u32 %v15388_v35, %v12691_v20  ;;  %v12643_v35 = vld [vmem:[#allocation6 + $0xd08] sm:$0xf0] }
 0x76d   :  { %5471 = vmatpush.bf16.msrb.mxu0 %v12518_v2 }
 0x76f   :  { %5484 = vmatpush.bf16.msrb.mxu1 %v12590_v39  ;;  %5704 = vmatpush.bf16.msrb.mxu2 %v12650_v41  ;;  %v12683_v41 = vld [vmem:[#allocation6 + $0xd58] sm:$0xf0] }
 0x773   :  { %5485 = vmatpush.bf16.msrb.mxu1 %v12582_v59  ;;  %5705 = vmatpush.bf16.msrb.mxu2 %v12642_v3  ;;  %v5272_v59 = vperm.slane %v16412_v50, 0  ;;  %v15382_v3 = vld [vmem:[#allocation6 + $0xd34] sm:$0xf] }
 0x7cb   :  { %v4990_v24 = vpop.f32.mrf.mxu0 }
 0x7cc   :  { %v4991_v2 = vadd.f32 %v4990_v24, %v4817_v1 }
 0x7d1   :  { %v5004_v45 = vpop.f32.mrf.mxu1  ;;  %v5018_v25 = vpop.f32.mrf.mxu2 }
 0x7d2   :  { %v5005_v23 = vadd.f32 %v5004_v45, %v4991_v2  ;;  %v5019_v27 = vadd.f32 %v5018_v25, %v4818_v4  ;;  %v12686_v25 = vor.u32 %v15386_v22, %v12683_v41  ;;  %v15405_v22 = vld [vmem:[#allocation6 + $0xde4] sm:$0xf0]  ;;  %v15404_v41 = vld [vmem:[#allocation6 + $0xde4] sm:$0xf] }
 0x7d3   :  { %v4992_v34 = vpop.f32.mrf.mxu0 }
 0x7d4   :  { %v4993_v9 = vadd.f32 %v4992_v34, %v4817_v1  ;;  %v5037_v51 = vmax.f32 %v5005_v23, 0.0  ;;  %v12667_v34 = vld [vmem:[#allocation6 + $0xd38] sm:$0xf0] }
 0x7d5   :  { %v12670_v23 = vor.u32 %v15382_v3, %v12667_v34  ;;  %v12737_v34 = vld [vmem:[#allocation6 + $0xdc0] sm:$0xf] }
 0x7d7   :  { %v5032_v60 = vpop.f32.mrf.mxu3 }
 0x7d8   :  { %v5033_v12 = vadd.f32 %v5032_v60, %v5019_v27 }
 0x7d9   :  { %v5006_v10 = vpop.f32.mrf.mxu1  ;;  %v5020_v57 = vpop.f32.mrf.mxu2 }
 0x7da   :  { %v5007_v13 = vadd.f32 %v5006_v10, %v4993_v9  ;;  %v5021_v6 = vadd.f32 %v5020_v57, %v4818_v4  ;;  %v5038_v39 = vmax.f32 %v5033_v12, 0.0  ;;  %v15380_v10 = vld [vmem:[#allocation6 + $0xd24] sm:$0xf]  ;;  %v12659_v57 = vld [vmem:[#allocation6 + $0xd28] sm:$0xf0] }
 0x7db   :  { %v12662_v19 = vor.u32 %v15380_v10, %v12659_v57  ;;  %v12729_v10 = vld [vmem:[#allocation6 + $0xdb0] sm:$0xf]  ;;  %v15399_v57 = vld [vmem:[#allocation6 + $0xdb4] sm:$0xf0] }
 0x7dc   :  { %v5039_v26 = vmax.f32 %v5007_v13, 0.0 }
 0x7de   :  { %v5041_v32 = vpack.c.bf16 %v5039_v26, %v5037_v51  ;;  %v15378_v26 = vld [vmem:[#allocation6 + $0xd14] sm:$0xf] }
 0x7df   :  { %v5034_v36 = vpop.f32.mrf.mxu3 }
 0x7e0   :  { %v5035_v24 = vadd.f32 %v5034_v36, %v5021_v6  ;;  %5185 = vmatmul.bf16.vlgmr.msra.gmra.mxu0 %v5041_v32  ;;  %v15376_v6 = vld [vmem:[#allocation6 + $0xd04] sm:$0xf]  ;;  %v12761_v36 = vld [vmem:[#allocation6 + $0xdf0] sm:$0xf] }
 0x7e1   :  { %v5445_v37 = vpop.f32.mrf.mxu2  ;;  %5726 = vmatpush.bf16.msra.mxu0 %v12702_v5  ;;  %v12651_v5 = vld [vmem:[#allocation6 + $0xd18] sm:$0xf0]  ;;  %v12646_v20 = vor.u32 %v15376_v6, %v12643_v35  ;;  %v12713_v35 = vld [vmem:[#allocation6 + $0xd90] sm:$0xf] }
 0x7e2   :  { %v5040_v40 = vmax.f32 %v5035_v24, 0.0  ;;  %v5446_v60 = vadd.f32 %v5445_v37, %v5272_v59  ;;  %v12654_v32 = vor.u32 %v15378_v26, %v12651_v5  ;;  %v15406_v24 = vld [vmem:[#allocation6 + $0xdf4] sm:$0xf]  ;;  %v15397_v26 = vld [vmem:[#allocation6 + $0xda4] sm:$0xf0] }
 0x7e3   :  { %v15396_v5 = vld [vmem:[#allocation6 + $0xda4] sm:$0xf] }
 0x7e4   :  { %v5042_v45 = vpack.c.bf16 %v5040_v40, %v5038_v39  ;;  %v12753_v40 = vld [vmem:[#allocation6 + $0xde0] sm:$0xf] }
 0x7e5   :  { %5727 = vmatpush.bf16.msra.mxu0 %v12694_v38  ;;  %v12763_v38 = vld [vmem:[#allocation6 + $0xdf8] sm:$0xf0] }
 0x7e6   :  { %5199 = vmatmul.bf16.vlgmr.msra.gmra.mxu1 %v5042_v45  ;;  %v12766_v39 = vor.u32 %v15406_v24, %v12763_v38  ;;  %v12754_v45 = vor.u32 %v15405_v22, %v12753_v40  ;;  %v12715_v24 = vld [vmem:[#allocation6 + $0xd98] sm:$0xf0]  ;;  %v15393_v40 = vld [vmem:[#allocation6 + $0xd84] sm:$0xf0]  ;;  %v15923_v22 = vld [vmem:[#allocation10 + $0x3] ss:$0 sm:$0xff] }
 0x7e7   :  { %v5459_v1 = vpop.f32.mrf.mxu3 }
 0x7e8   :  { %v5460_v4 = vadd.f32 %v5459_v1, %v5446_v60  ;;  %5740 = vmatpush.bf16.msra.mxu1 %v12766_v39  ;;  %v15402_v1 = vld [vmem:[#allocation6 + $0xdd4] sm:$0xf]  ;;  %v15400_v60 = vld [vmem:[#allocation6 + $0xdc4] sm:$0xf]  ;;  %v12705_v39 = vld [vmem:[#allocation6 + $0xd80] sm:$0xf] }
 0x7e9   :  { %5728 = vmatpush.bf16.msra.mxu0 %v12686_v25  ;;  %v5447_v2 = vpop.f32.mrf.mxu2 }
 0x7ea   :  { %v5448_v9 = vadd.f32 %v5447_v2, %v5272_v59  ;;  %v5492_v51 = vmax.f32 %v5460_v4, 0.0  ;;  %v12746_v59 = vor.u32 %v15403_v52, %v12745_v33  ;;  %v15401_v2 = vld [vmem:[#allocation6 + $0xdc4] sm:$0xf0]  ;;  %v12739_v4 = vld [vmem:[#allocation6 + $0xdc8] sm:$0xf0] }
 0x7ed   :  { %5729 = vmatpush.bf16.msra.mxu0 %v12678_v61  ;;  %v12747_v61 = vld [vmem:[#allocation6 + $0xdd8] sm:$0xf0] }
 0x7ee   :  { %v12750_v3 = vor.u32 %v15402_v1, %v12747_v61 }
 0x7ef   :  { %v5461_v13 = vpop.f32.mrf.mxu3 }
 0x7f0   :  { %v5462_v15 = vadd.f32 %v5461_v13, %v5448_v9  ;;  %5472 = vmatmul.bf16.vlgmr.msrb.gmra.mxu0 %v16406_v42  ;;  %v15407_v42 = vld [vmem:[#allocation6 + $0xdf4] sm:$0xf0]  ;;  %v12742_v9 = vor.u32 %v15400_v60, %v12739_v4  ;;  %v15398_v13 = vld [vmem:[#allocation6 + $0xdb4] sm:$0xf] }
 0x7f1   :  { %5730 = vmatpush.bf16.msra.mxu0 %v12670_v23  ;;  %v12762_v37 = vor.u32 %v15407_v42, %v12761_v36  ;;  %v12738_v23 = vor.u32 %v15401_v2, %v12737_v34  ;;  %v15394_v36 = vld [vmem:[#allocation6 + $0xd94] sm:$0xf] }
 0x7f2   :  { %v5494_v27 = vmax.f32 %v5462_v15, 0.0  ;;  %v12730_v15 = vor.u32 %v15399_v57, %v12729_v10  ;;  %v5273_v10 = vperm.slane %v16412_v50, 1  ;;  %v12827_v50 = vld [vmem:[#allocation6 + $0x1678] sm:$0xf0] }
 0x7f3   :  { %5712 = vmatpush.bf16.msrb.mxu3 %v12762_v37  ;;  %v12718_v37 = vor.u32 %v15394_v36, %v12715_v24  ;;  %v12883_v36 = vld [vmem:[#allocation6 + $0x16e8] sm:$0xf0]  ;;  %v15422_v24 = vld [vmem:[#allocation6 + $0x1674] sm:$0xf] }
 0x7f4   :  { %v5496_v12 = vpack.c.bf16 %v5494_v27, %v5492_v51  ;;  %v12721_v27 = vld [vmem:[#allocation6 + $0xda0] sm:$0xf] }
 0x7f5   :  { %5731 = vmatpush.bf16.msra.mxu0 %v12662_v19  ;;  %v12731_v19 = vld [vmem:[#allocation6 + $0xdb8] sm:$0xf0] }
 0x7f6   :  { %5486 = vmatmul.bf16.vlgmr.msrb.gmra.mxu1 %v16409_v62  ;;  %5706 = vmatmul.bf16.vlgmr.msrb.gmra.mxu2 %v5496_v12  ;;  %v12755_v62 = vld [vmem:[#allocation6 + $0xde8] sm:$0xf0]  ;;  %v12734_v51 = vor.u32 %v15398_v13, %v12731_v19 }
 0x7f7   :  { %v12758_v25 = vor.u32 %v15404_v41, %v12755_v62  ;;  %5713 = vmatpush.bf16.msrb.mxu3 %v12754_v45  ;;  %v12706_v41 = vor.u32 %v15393_v40, %v12705_v39  ;;  %v15392_v45 = vld [vmem:[#allocation6 + $0xd84] sm:$0xf]  ;;  %v12707_v62 = vld [vmem:[#allocation6 + $0xd88] sm:$0xf0]  ;;  %v12875_v39 = vld [vmem:[#allocation6 + $0x16d8] sm:$0xf0] }
 0x7f8   :  { %v15420_v40 = vld [vmem:[#allocation6 + $0x1664] sm:$0xf] }
 0x7f9   :  { %5732 = vmatpush.bf16.msra.mxu0 %v12654_v32  ;;  %5741 = vmatpush.bf16.msra.mxu1 %v12758_v25  ;;  %v12723_v32 = vld [vmem:[#allocation6 + $0xda8] sm:$0xf0]  ;;  %v12710_v25 = vor.u32 %v15392_v45, %v12707_v62  ;;  %v15432_v45 = vld [vmem:[#allocation6 + $0x16c4] sm:$0xf] }
 0x7fa   :  { %v12726_v6 = vor.u32 %v15396_v5, %v12723_v32  ;;  %v15438_v32 = vld [vmem:[#allocation6 + $0x16f4] sm:$0xf]  ;;  %v12867_v62 = vld [vmem:[#allocation6 + $0x16c8] sm:$0xf0] }
 0x7fb   :  { %5714 = vmatpush.bf16.msrb.mxu3 %v12746_v59 }
 0x7fd   :  { %5733 = vmatpush.bf16.msra.mxu0 %v12646_v20  ;;  %5742 = vmatpush.bf16.msra.mxu1 %v12750_v3  ;;  %v15395_v20 = vld [vmem:[#allocation6 + $0xd94] sm:$0xf0] }
 0x7fe   :  { %v12714_v42 = vor.u32 %v15395_v20, %v12713_v35  ;;  %v15436_v20 = vld [vmem:[#allocation6 + $0x16e4] sm:$0xf] }
 0x7ff   :  { %5715 = vmatpush.bf16.msrb.mxu3 %v12738_v23 }
 0x800   :  { %5734 = vmatmul.bf16.vlgmr.msra.gmra.mxu0 %v5496_v12  ;;  %v12722_v12 = vor.u32 %v15397_v26, %v12721_v27 }
 0x801   :  { %5743 = vmatpush.bf16.msra.mxu1 %v12742_v9 }
 0x803   :  { %5716 = vmatpush.bf16.msrb.mxu3 %v12730_v15 }
 0x805   :  { %5744 = vmatpush.bf16.msra.mxu1 %v12734_v51 }
 0x807   :  { %5717 = vmatpush.bf16.msrb.mxu3 %v12722_v12 }
 0x809   :  { %5745 = vmatpush.bf16.msra.mxu1 %v12726_v6  ;;  %v12891_v6 = vld [vmem:[#allocation6 + $0x16f8] sm:$0xf0] }
 0x80a   :  { %v12894_v35 = vor.u32 %v15438_v32, %v12891_v6  ;;  %v12803_v32 = vld [vmem:[#allocation6 + $0x1648] sm:$0xf0]  ;;  %v15435_v6 = vld [vmem:[#allocation6 + $0x16d4] sm:$0xf0] }
 0x80b   :  { %5718 = vmatpush.bf16.msrb.mxu3 %v12714_v42  ;;  %v12886_v42 = vor.u32 %v15436_v20, %v12883_v36  ;;  %v12817_v20 = vld [vmem:[#allocation6 + $0x1660] sm:$0xf]  ;;  %v15421_v36 = vld [vmem:[#allocation6 + $0x1664] sm:$0xf0] }
 0x80d   :  { %5746 = vmatpush.bf16.msra.mxu1 %v12718_v37  ;;  %v12830_v37 = vor.u32 %v15422_v24, %v12827_v50  ;;  %v12851_v24 = vld [vmem:[#allocation6 + $0x16a8] sm:$0xf0] }
 0x80f   :  { %5719 = vmatpush.bf16.msrb.mxu3 %v12706_v41  ;;  %v12819_v41 = vld [vmem:[#allocation6 + $0x1668] sm:$0xf0]  ;;  %5988 = vmatpush.bf16.msrb.mxu0 %v12830_v37  ;;  %v12818_v37 = vor.u32 %v15421_v36, %v12817_v20  ;;  %v12801_v20 = vld [vmem:[#allocation6 + $0x1640] sm:$0xf]  ;;  %v15417_v36 = vld [vmem:[#allocation6 + $0x1644] sm:$0xf0] }
 0x811   :  { %5747 = vmatpush.bf16.msra.mxu1 %v12710_v25  ;;  %v12822_v25 = vor.u32 %v15420_v40, %v12819_v41  ;;  %v15433_v40 = vld [vmem:[#allocation6 + $0x16c4] sm:$0xf0]  ;;  %v15414_v41 = vld [vmem:[#allocation6 + $0x1634] sm:$0xf] }
 0x813   :  { %5989 = vmatpush.bf16.msrb.mxu0 %v12822_v25 }
 0x815   :  { %6002 = vmatpush.bf16.msrb.mxu1 %v12894_v35 }
 0x819   :  { %6003 = vmatpush.bf16.msrb.mxu1 %v12886_v42  ;;  %v15428_v42 = vld [vmem:[#allocation6 + $0x16a4] sm:$0xf] }
 0x81a   :  { %v12854_v25 = vor.u32 %v15428_v42, %v12851_v24  ;;  %v12802_v24 = vor.u32 %v15417_v36, %v12801_v20  ;;  %v15481_v36 = vld [vmem:[#allocation6 + $0x5c4] sm:$0xf0] }
 0x85d   :  { %v5186_v38 = vpop.f32.mrf.mxu0 }
 0x85e   :  { %v5187_v33 = vadd.f32 %v15923_v22, %v5186_v38  ;;  %v15434_v38 = vld [vmem:[#allocation6 + $0x16d4] sm:$0xf] }
 0x863   :  { %v5200_v52 = vpop.f32.mrf.mxu1 }
 0x864   :  { %v16423_v59 = vadd.f32 %v5200_v52, %v5187_v33  ;;  %v12889_v33 = vld [vmem:[#allocation6 + $0x16f0] sm:$0xf]  ;;  %v15439_v52 = vld [vmem:[#allocation6 + $0x16f4] sm:$0xf0] }
 0x865   :  { %v5188_v61 = vpop.f32.mrf.mxu0 }
 0x866   :  { %v16428_v3 = vsel %vm16419_vm9, %v16423_v59, -inf  ;;  %v5189_v34 = vadd.f32 %v15923_v22, %v5188_v61  ;;  %v12878_v22 = vor.u32 %v15434_v38, %v12875_v39  ;;  %v12890_v61 = vor.u32 %v15439_v52, %v12889_v33  ;;  %v12865_v39 = vld [vmem:[#allocation6 + $0x16c0] sm:$0xf]  ;;  %v15426_v52 = vld [vmem:[#allocation6 + $0x1694] sm:$0xf] }
 0x867   :  { %5210 = vmax.xlane.f32.xlu0 %v16428_v3 }
 0x868   :  { %6004 = vmatpush.bf16.msrb.mxu1 %v12878_v22  ;;  %5974 = vmatpush.bf16.msra.mxu3 %v12890_v61  ;;  %v12809_v22 = vld [vmem:[#allocation6 + $0x1650] sm:$0xf]  ;;  %v12843_v61 = vld [vmem:[#allocation6 + $0x1698] sm:$0xf0] }
 0x86b   :  { %v5202_v2 = vpop.f32.mrf.mxu1 }
 0x86c   :  { %v16431_v60 = vadd.f32 %v5202_v2, %v5189_v34  ;;  %v15418_v34 = vld [vmem:[#allocation6 + $0x1654] sm:$0xf]  ;;  %v12811_v2 = vld [vmem:[#allocation6 + $0x1658] sm:$0xf0] }
 0x86d   :  { %v5473_v23 = vpop.f32.mrf.mxu0 }
 0x86e   :  { %v16436_v4 = vsel %vm16419_vm9, %v16431_v60, -inf  ;;  %v5474_v13 = vadd.f32 %v5473_v23, %v5273_v10  ;;  %v12870_v23 = vor.u32 %v15432_v45, %v12867_v62  ;;  %v12795_v45 = vld [vmem:[#allocation6 + $0x1638] sm:$0xf0]  ;;  %v15419_v62 = vld [vmem:[#allocation6 + $0x1654] sm:$0xf0] }
 0x86f   :  { %5212 = vmax.xlane.f32.xlu1 %v16436_v4  ;;  %v12810_v33 = vor.u32 %v15419_v62, %v12809_v22  ;;  %v15408_v22 = vld [vmem:[#allocation6 + $0x1604] sm:$0xf] }
 0x870   :  { %6005 = vmatpush.bf16.msrb.mxu1 %v12870_v23  ;;  %v15412_v23 = vld [vmem:[#allocation6 + $0x1624] sm:$0xf] }
 0x873   :  { %v5487_v9 = vpop.f32.mrf.mxu1 }
 0x874   :  { %v5488_v15 = vadd.f32 %v5487_v9, %v5474_v13  ;;  %v15430_v9 = vld [vmem:[#allocation6 + $0x16b4] sm:$0xf]  ;;  %v12859_v13 = vld [vmem:[#allocation6 + $0x16b8] sm:$0xf0] }
 0x875   :  { %v5475_v57 = vpop.f32.mrf.mxu0  ;;  %v12862_v35 = vor.u32 %v15430_v9, %v12859_v13  ;;  %v12787_v9 = vld [vmem:[#allocation6 + $0x1628] sm:$0xf0] }
 0x876   :  { %v5476_v19 = vadd.f32 %v5475_v57, %v5273_v10  ;;  %v5493_v26 = vmax.f32 %v5488_v15, 0.0  ;;  %v12881_v10 = vld [vmem:[#allocation6 + $0x16e0] sm:$0xf]  ;;  %v15437_v57 = vld [vmem:[#allocation6 + $0x16e4] sm:$0xf0] }
 0x877   :  { %v12882_v15 = vor.u32 %v15437_v57, %v12881_v10  ;;  %6006 = vmatpush.bf16.msrb.mxu1 %v12862_v35  ;;  %v12846_v10 = vor.u32 %v15426_v52, %v12843_v61  ;;  %v15424_v57 = vld [vmem:[#allocation6 + $0x1684] sm:$0xf]  ;;  %v12835_v13 = vld [vmem:[#allocation6 + $0x1688] sm:$0xf0]  ;;  %v12779_v35 = vld [vmem:[#allocation6 + $0x1618] sm:$0xf0] }
 0x878   :  { %v13017_v52 = vld [vmem:[#allocation6 + $0x570] sm:$0xf] }
 0x879   :  { %5975 = vmatpush.bf16.msra.mxu3 %v12882_v15  ;;  %v12790_v15 = vor.u32 %v15412_v23, %v12787_v9  ;;  %v12841_v23 = vld [vmem:[#allocation6 + $0x1690] sm:$0xf]  ;;  %v15427_v9 = vld [vmem:[#allocation6 + $0x1694] sm:$0xf0] }
 0x87b   :  { %v5489_v51 = vpop.f32.mrf.mxu1  ;;  %6007 = vmatpush.bf16.msrb.mxu1 %v12854_v25  ;;  %v12793_v25 = vld [vmem:[#allocation6 + $0x1630] sm:$0xf] }
 0x87c   :  { %v5490_v27 = vadd.f32 %v5489_v51, %v5476_v19  ;;  %v12825_v19 = vld [vmem:[#allocation6 + $0x1670] sm:$0xf]  ;;  %v15423_v51 = vld [vmem:[#allocation6 + $0x1674] sm:$0xf0] }
 0x87e   :  { %v5495_v5 = vmax.f32 %v5490_v27, 0.0  ;;  %v12814_v27 = vor.u32 %v15418_v34, %v12811_v2  ;;  %v12866_v34 = vor.u32 %v15433_v40, %v12865_v39  ;;  %v12798_v2 = vor.u32 %v15414_v41, %v12795_v45  ;;  %v15485_v40 = vld [vmem:[#allocation6 + $0x5e4] sm:$0xf0]  ;;  %v12771_v41 = vld [vmem:[#allocation6 + $0x1608] sm:$0xf0] }
 0x87f   :  { %6008 = vmatpush.bf16.msrb.mxu1 %v12846_v10  ;;  %v12774_v62 = vor.u32 %v15408_v22, %v12771_v41  ;;  %v12842_v10 = vor.u32 %v15427_v9, %v12841_v23  ;;  %v13049_v22 = vld [vmem:[#allocation6 + $0x5b0] sm:$0xf]  ;;  %v15479_v41 = vld [vmem:[#allocation6 + $0x5b4] sm:$0xf0]  ;;  %v15477_v23 = vld [vmem:[#allocation6 + $0x5a4] sm:$0xf0] }
 0x880   :  { %v5497_v12 = vpack.c.bf16 %v5495_v5, %v5493_v26  ;;  %v12826_v26 = vor.u32 %v15423_v51, %v12825_v19  ;;  %v12873_v5 = vld [vmem:[#allocation6 + $0x16d0] sm:$0xf]  ;;  %5990 = vmatpush.bf16.msrb.mxu0 %v12814_v27  ;;  %v12838_v19 = vor.u32 %v15424_v57, %v12835_v13  ;;  %v15431_v27 = vld [vmem:[#allocation6 + $0x16b4] sm:$0xf0] }
 0x881   :  { %v12874_v50 = vor.u32 %v15435_v6, %v12873_v5  ;;  %v12857_v51 = vld [vmem:[#allocation6 + $0x16b0] sm:$0xf]  ;;  %v15483_v13 = vld [vmem:[#allocation6 + $0x5d4] sm:$0xf0] }
 0x882   :  { %5720 = vmatmul.bf16.vlgmr.msrb.gmra.mxu3 %v5497_v12  ;;  %5748 = vmatmul.bf16.vlgmr.msra.gmra.mxu1 %v5497_v12  ;;  %v15416_v12 = vld [vmem:[#allocation6 + $0x1644] sm:$0xf]  ;;  %v13081_v5 = vld [vmem:[#allocation6 + $0x5f0] sm:$0xf] }
 0x883   :  { %5960 = vmatpush.bf16.msra.mxu2 %v12826_v26  ;;  %v12806_v38 = vor.u32 %v15416_v12, %v12803_v32  ;;  %5976 = vmatpush.bf16.msra.mxu3 %v12874_v50  ;;  %v12858_v26 = vor.u32 %v15431_v27, %v12857_v51  ;;  %v15487_v12 = vld [vmem:[#allocation6 + $0x5f4] sm:$0xf0]  ;;  %v15410_v32 = vld [vmem:[#allocation6 + $0x1614] sm:$0xf]  ;;  %v12849_v50 = vld [vmem:[#allocation6 + $0x16a0] sm:$0xf] }
 0x884   :  { %6009 = vmatpush.bf16.msrb.mxu1 %v12838_v19  ;;  %v13082_v6 = vor.u32 %v15487_v12, %v13081_v5  ;;  %v12782_v42 = vor.u32 %v15410_v32, %v12779_v35  ;;  %v13065_v57 = vld [vmem:[#allocation6 + $0x5d0] sm:$0xf]  ;;  %v12785_v19 = vld [vmem:[#allocation6 + $0x1620] sm:$0xf]  ;;  %v15413_v51 = vld [vmem:[#allocation6 + $0x1624] sm:$0xf0] }
 0x885   :  { %5991 = vmatpush.bf16.msrb.mxu0 %v12806_v38  ;;  %v13073_v38 = vld [vmem:[#allocation6 + $0x5e0] sm:$0xf]  ;;  %v15469_v5 = vld [vmem:[#allocation6 + $0x564] sm:$0xf0] }
 0x886   :  { %v13074_v45 = vor.u32 %v15485_v40, %v13073_v38  ;;  %v13009_v27 = vld [vmem:[#allocation6 + $0x560] sm:$0xf] }
 0x887   :  { %5961 = vmatpush.bf16.msra.mxu2 %v12818_v37  ;;  %5977 = vmatpush.bf16.msra.mxu3 %v12866_v34  ;;  %v15429_v37 = vld [vmem:[#allocation6 + $0x16a4] sm:$0xf0]  ;;  %v15471_v34 = vld [vmem:[#allocation6 + $0x574] sm:$0xf0]  ;;  %v13010_v12 = vor.u32 %v15469_v5, %v13009_v27  ;;  %v12833_v32 = vld [vmem:[#allocation6 + $0x1680] sm:$0xf] }
 0x888   :  { %6429 = vmatpush.bf16.msra.mxu1 %v13082_v6  ;;  %v12850_v39 = vor.u32 %v15429_v37, %v12849_v50  ;;  %v15425_v6 = vld [vmem:[#allocation6 + $0x1684] sm:$0xf0]  ;;  %v13057_v35 = vld [vmem:[#allocation6 + $0x5c0] sm:$0xf]  ;;  %v15411_v50 = vld [vmem:[#allocation6 + $0x1614] sm:$0xf0] }
 0x889   :  { %5992 = vmatpush.bf16.msrb.mxu0 %v12798_v2  ;;  %v13018_v2 = vor.u32 %v15471_v34, %v13017_v52  ;;  %v12834_v20 = vor.u32 %v15425_v6, %v12833_v32  ;;  %v13001_v37 = vld [vmem:[#allocation6 + $0x550] sm:$0xf]  ;;  %v13025_v5 = vld [vmem:[#allocation6 + $0x580] sm:$0xf] }
 0x88a   :  { %v12969_v6 = vld [vmem:[#allocation6 + $0x510] sm:$0xf] }
 0x88b   :  { %5962 = vmatpush.bf16.msra.mxu2 %v12810_v33  ;;  %5978 = vmatpush.bf16.msra.mxu3 %v12858_v26  ;;  %v15415_v33 = vld [vmem:[#allocation6 + $0x1634] sm:$0xf0]  ;;  %v12786_v26 = vor.u32 %v15413_v51, %v12785_v19  ;;  %v12977_v51 = vld [vmem:[#allocation6 + $0x520] sm:$0xf] }
 0x88c   :  { %v12794_v61 = vor.u32 %v15415_v33, %v12793_v25  ;;  %6430 = vmatpush.bf16.msra.mxu1 %v13074_v45  ;;  %v13050_v45 = vor.u32 %v15479_v41, %v13049_v22  ;;  %v15409_v25 = vld [vmem:[#allocation6 + $0x1604] sm:$0xf0]  ;;  %v12993_v33 = vld [vmem:[#allocation6 + $0x540] sm:$0xf]  ;;  %v15475_v19 = vld [vmem:[#allocation6 + $0x594] sm:$0xf0] }
 0x88d   :  { %5993 = vmatpush.bf16.msrb.mxu0 %v12790_v15  ;;  %v13066_v15 = vor.u32 %v15483_v13, %v13065_v57  ;;  %v15463_v57 = vld [vmem:[#allocation6 + $0x534] sm:$0xf0] }
 0x88f   :  { %5963 = vmatpush.bf16.msra.mxu2 %v12802_v24  ;;  %5979 = vmatpush.bf16.msra.mxu3 %v12850_v39  ;;  %v12777_v24 = vld [vmem:[#allocation6 + $0x1610] sm:$0xf]  ;;  %v15467_v39 = vld [vmem:[#allocation6 + $0x554] sm:$0xf0] }
 0x890   :  { %6431 = vmatpush.bf16.msra.mxu1 %v13066_v15  ;;  %v12778_v38 = vor.u32 %v15411_v50, %v12777_v24  ;;  %v13002_v40 = vor.u32 %v15467_v39, %v13001_v37  ;;  %v13033_v15 = vld [vmem:[#allocation6 + $0x590] sm:$0xf]  ;;  %v12961_v24 = vld [vmem:[#allocation6 + $0x500] sm:$0xf]  ;;  %v15457_v50 = vld [vmem:[#allocation6 + $0x504] sm:$0xf0] }
 0x891   :  { %5994 = vmatpush.bf16.msrb.mxu0 %v12782_v42  ;;  %v13058_v42 = vor.u32 %v15481_v36, %v13057_v35  ;;  %v13034_v27 = vor.u32 %v15475_v19, %v13033_v15  ;;  %v15459_v35 = vld [vmem:[#allocation6 + $0x514] sm:$0xf0] }
 0x892   :  { %v5532_v37 = vld [vmem:[#allocation7 + $0x1a] sm:$0x3] }
 0x893   :  { %5964 = vmatpush.bf16.msra.mxu2 %v12794_v61  ;;  %5980 = vmatpush.bf16.msra.mxu3 %v12842_v10  ;;  %v15465_v61 = vld [vmem:[#allocation6 + $0x544] sm:$0xf0]  ;;  %v12985_v10 = vld [vmem:[#allocation6 + $0x530] sm:$0xf]  ;;  %v5535_v22 = vperm.slane %v5532_v37, 1 }
 0x894   :  { %6432 = vmatpush.bf16.msra.mxu1 %v13058_v42  ;;  %v12994_v34 = vor.u32 %v15465_v61, %v12993_v33  ;;  %v12986_v13 = vor.u32 %v15463_v57, %v12985_v10  ;;  %v12970_v42 = vor.u32 %v15459_v35, %v12969_v6  ;;  %v15444_v35 = vld [vmem:[#allocation9 + $0x220] sm:$0xff] }
 0x895   :  { %5995 = vmatpush.bf16.msrb.mxu0 %v12774_v62  ;;  %v12769_v62 = vld [vmem:[#allocation6 + $0x1600] sm:$0xf] }
 0x896   :  { %v12770_v52 = vor.u32 %v15409_v25, %v12769_v62  ;;  %v15447_v62 = vld [vmem:[#allocation9 + $0x238] sm:$0xff] }
 0x897   :  { %5965 = vmatpush.bf16.msra.mxu2 %v12786_v26  ;;  %5981 = vmatpush.bf16.msra.mxu3 %v12834_v20  ;;  %v15461_v26 = vld [vmem:[#allocation6 + $0x524] sm:$0xf0]  ;;  %v5735_v20 = vpop.f32.mrf.mxu0  ;;  %v15455_v25 = vld [vmem:[#allocation9 + $0x278] sm:$0xff] }
 0x898   :  { %6433 = vmatpush.bf16.msra.mxu1 %v13050_v45  ;;  %v12978_v32 = vor.u32 %v15461_v26, %v12977_v51  ;;  %v5736_v45 = vadd.f32 %v5735_v20, %v5535_v22  ;;  %v15445_v51 = vld [vmem:[#allocation9 + $0x228] sm:$0xff]  ;;  %v15452_v20 = vld [vmem:[#allocation9 + $0x260] sm:$0xff] }
 0x899   :  { %6415 = vmatpush.bf16.msra.mxu0 %v13018_v2  ;;  %v13041_v2 = vld [vmem:[#allocation6 + $0x5a0] sm:$0xf] }
 0x89a   :  { %v13042_v9 = vor.u32 %v15477_v23, %v13041_v2  ;;  %v15446_v2 = vld [vmem:[#allocation9 + $0x230] sm:$0xff] }
 0x89b   :  { %5966 = vmatpush.bf16.msra.mxu2 %v12778_v38  ;;  %v5707_v38 = vpop.f32.mrf.mxu2  ;;  %6170 = vmatpush.bf16.msrb.mxu3 %v15455_v25  ;;  %v15454_v23 = vld [vmem:[#allocation9 + $0x270] sm:$0xff]  ;;  %v15449_v25 = vld [vmem:[#allocation9 + $0x248] sm:$0xff] }
 0x89c   :  { %6434 = vmatpush.bf16.msra.mxu1 %v13042_v9 }
 0x89d   :  { %6416 = vmatpush.bf16.msra.mxu0 %v13010_v12  ;;  %v15473_v12 = vld [vmem:[#allocation6 + $0x584] sm:$0xf0] }
 0x89e   :  { %v13026_v36 = vor.u32 %v15473_v12, %v13025_v5 }
 0x89f   :  { %5967 = vmatpush.bf16.msra.mxu2 %v12770_v52  ;;  %v5737_v41 = vpop.f32.mrf.mxu0  ;;  %v5534_v52 = vperm.slane %v5532_v37, 0  ;;  %6171 = vmatpush.bf16.msrb.mxu3 %v15454_v23  ;;  %v15451_v37 = vld [vmem:[#allocation9 + $0x258] sm:$0xff]  ;;  %v13083_v23 = vld [vmem:[#allocation6 + $0x5f8] sm:$0xf0] }
 0x8a0   :  { %6435 = vmatpush.bf16.msra.mxu1 %v13034_v27  ;;  %v5738_v61 = vadd.f32 %v5737_v41, %v5535_v22  ;;  %v15453_v27 = vld [vmem:[#allocation9 + $0x268] sm:$0xff]  ;;  %v15440_v22 = vld [vmem:[#allocation9 + $0x200] sm:$0xff] }
 0x8a1   :  { %6417 = vmatpush.bf16.msra.mxu0 %v13002_v40  ;;  %v12962_v40 = vor.u32 %v15457_v50, %v12961_v24  ;;  %v15443_v50 = vld [vmem:[#allocation9 + $0x218] sm:$0xff] }
 0x8a2   :  { %v15470_v41 = vld [vmem:[#allocation6 + $0x574] sm:$0xf] }
 0x8a3   :  { %6156 = vmatpush.bf16.msrb.mxu2 %v15447_v62  ;;  %v5709_v57 = vpop.f32.mrf.mxu2  ;;  %6172 = vmatpush.bf16.msrb.mxu3 %v15453_v27  ;;  %v15484_v27 = vld [vmem:[#allocation6 + $0x5e4] sm:$0xf] }
 0x8a4   :  { %6436 = vmatpush.bf16.msra.mxu1 %v13026_v36  ;;  %v5710_v26 = vadd.f32 %v5709_v57, %v5534_v52  ;;  %v15503_v57 = vld [vmem:[#allocation6 + $0xe74] sm:$0xf0] }
 0x8a5   :  { %6418 = vmatpush.bf16.msra.mxu0 %v12994_v34 }
 0x8a7   :  { %6157 = vmatpush.bf16.msrb.mxu2 %v15446_v2  ;;  %6173 = vmatpush.bf16.msrb.mxu3 %v15452_v20  ;;  %v15486_v2 = vld [vmem:[#allocation6 + $0x5f4] sm:$0xf]  ;;  %v12995_v20 = vld [vmem:[#allocation6 + $0x548] sm:$0xf0] }
 0x8a9   :  { %6419 = vmatpush.bf16.msra.mxu0 %v12986_v13  ;;  %v5708_v13 = vadd.f32 %v5707_v38, %v5534_v52  ;;  %v15442_v38 = vld [vmem:[#allocation9 + $0x210] sm:$0xff] }
 0x8aa   :  { %v13011_v52 = vld [vmem:[#allocation6 + $0x568] sm:$0xf0] }
 0x8ab   :  { %6158 = vmatpush.bf16.msrb.mxu2 %v15445_v51  ;;  %6174 = vmatpush.bf16.msrb.mxu3 %v15451_v37 }
 0x8ad   :  { %6420 = vmatpush.bf16.msra.mxu0 %v12978_v32 }
 0x8af   :  { %6159 = vmatpush.bf16.msrb.mxu2 %v15444_v35 }
 0x8b1   :  { %6421 = vmatpush.bf16.msra.mxu0 %v12970_v42 }
 0x8b3   :  { %6160 = vmatpush.bf16.msrb.mxu2 %v15443_v50  ;;  %v13129_v50 = vld [vmem:[#allocation6 + $0xe50] sm:$0xf] }
 0x8b5   :  { %6422 = vmatpush.bf16.msra.mxu0 %v12962_v40  ;;  %v15441_v40 = vld [vmem:[#allocation9 + $0x208] sm:$0xff] }
 0x8b7   :  { %6161 = vmatpush.bf16.msrb.mxu2 %v15442_v38  ;;  %v15499_v38 = vld [vmem:[#allocation6 + $0xe54] sm:$0xf0] }
 0x8bb   :  { %6162 = vmatpush.bf16.msrb.mxu2 %v15441_v40  ;;  %v12987_v40 = vld [vmem:[#allocation6 + $0x538] sm:$0xf0] }
 0x8bf   :  { %6163 = vmatpush.bf16.msrb.mxu2 %v15440_v22  ;;  %v13130_v22 = vor.u32 %v15499_v38, %v13129_v50  ;;  %v15474_v50 = vld [vmem:[#allocation6 + $0x594] sm:$0xf]  ;;  %v13097_v38 = vld [vmem:[#allocation6 + $0xe10] sm:$0xf] }
 0x8ff   :  { %v5749_v39 = vpop.f32.mrf.mxu1 }
 0x900   :  { %v5750_v34 = vadd.f32 %v5749_v39, %v5736_v45  ;;  %v15450_v39 = vld [vmem:[#allocation9 + $0x250] sm:$0xff]  ;;  %v13019_v45 = vld [vmem:[#allocation6 + $0x578] sm:$0xf0] }
 0x901   :  { %6175 = vmatpush.bf16.msrb.mxu3 %v15450_v39  ;;  %v13022_v62 = vor.u32 %v15470_v41, %v13019_v45  ;;  %v15462_v39 = vld [vmem:[#allocation6 + $0x534] sm:$0xf]  ;;  %v15480_v45 = vld [vmem:[#allocation6 + $0x5c4] sm:$0xf] }
 0x902   :  { %v5755_v15 = vmax.f32 %v5750_v34, 0.0  ;;  %v15448_v34 = vld [vmem:[#allocation9 + $0x240] sm:$0xff]  ;;  %v12990_v41 = vor.u32 %v15462_v39, %v12987_v40 }
 0x903   :  { %v15491_v40 = vld [vmem:[#allocation6 + $0xe14] sm:$0xf0] }
 0x905   :  { %v5721_v33 = vpop.f32.mrf.mxu3  ;;  %6176 = vmatpush.bf16.msrb.mxu3 %v15449_v25  ;;  %v13121_v25 = vld [vmem:[#allocation6 + $0xe40] sm:$0xf] }
 0x906   :  { %v5722_v5 = vadd.f32 %v5721_v33, %v5708_v13  ;;  %v15468_v33 = vld [vmem:[#allocation6 + $0x564] sm:$0xf]  ;;  %v15466_v13 = vld [vmem:[#allocation6 + $0x554] sm:$0xf] }
 0x907   :  { %v5751_v9 = vpop.f32.mrf.mxu1 }
 0x908   :  { %v5752_v10 = vadd.f32 %v5751_v9, %v5738_v61  ;;  %v5754_v36 = vmax.f32 %v5722_v5, 0.0  ;;  %v13014_v61 = vor.u32 %v15468_v33, %v13011_v52  ;;  %v13086_v9 = vor.u32 %v15486_v2, %v13083_v23  ;;  %v13137_v5 = vld [vmem:[#allocation6 + $0xe60] sm:$0xf]  ;;  %v15497_v52 = vld [vmem:[#allocation6 + $0xe44] sm:$0xf0] }
 0x909   :  { %6177 = vmatpush.bf16.msrb.mxu3 %v15448_v34  ;;  %v12979_v34 = vld [vmem:[#allocation6 + $0x528] sm:$0xf0]  ;;  %v13122_v2 = vor.u32 %v15497_v52, %v13121_v25  ;;  %v13089_v25 = vld [vmem:[#allocation6 + $0xe00] sm:$0xf]  ;;  %v15489_v52 = vld [vmem:[#allocation6 + $0xe04] sm:$0xf0] }
 0x90a   :  { %v5757_v19 = vmax.f32 %v5752_v10, 0.0  ;;  %v13145_v10 = vld [vmem:[#allocation6 + $0xe70] sm:$0xf] }
 0x90c   :  { %v5759_v12 = vpack.c.bf16 %v5757_v19, %v5755_v15  ;;  %v13146_v15 = vor.u32 %v15503_v57, %v13145_v10  ;;  %v13003_v19 = vld [vmem:[#allocation6 + $0x558] sm:$0xf0] }
 0x90d   :  { %v5723_v32 = vpop.f32.mrf.mxu3  ;;  %v13006_v51 = vor.u32 %v15466_v13, %v13003_v19  ;;  %v13051_v10 = vld [vmem:[#allocation6 + $0x5b8] sm:$0xf0]  ;;  %v13113_v13 = vld [vmem:[#allocation6 + $0xe30] sm:$0xf]  ;;  %v15458_v19 = vld [vmem:[#allocation6 + $0x514] sm:$0xf] }
 0x90e   :  { %v5724_v6 = vadd.f32 %v5723_v32, %v5710_v26  ;;  %5982 = vmatmul.bf16.vlgmr.msra.gmra.mxu3 %v5759_v12  ;;  %6010 = vmatmul.bf16.vlgmr.msrb.gmra.mxu1 %v5759_v12  ;;  %v13075_v26 = vld [vmem:[#allocation6 + $0x5e8] sm:$0xf0]  ;;  %v15501_v32 = vld [vmem:[#allocation6 + $0xe64] sm:$0xf0] }
 0x90f   :  { %6457 = vmatpush.bf16.msra.mxu3 %v13086_v9  ;;  %v13078_v12 = vor.u32 %v15484_v27, %v13075_v26  ;;  %v13138_v35 = vor.u32 %v15501_v32, %v13137_v5  ;;  %v15478_v9 = vld [vmem:[#allocation6 + $0x5b4] sm:$0xf]  ;;  %v12971_v27 = vld [vmem:[#allocation6 + $0x518] sm:$0xf0]  ;;  %v15476_v5 = vld [vmem:[#allocation6 + $0x5a4] sm:$0xf] }
 0x910   :  { %v5756_v42 = vmax.f32 %v5724_v6, 0.0  ;;  %v15464_v6 = vld [vmem:[#allocation6 + $0x544] sm:$0xf]  ;;  %v13054_v57 = vor.u32 %v15478_v9, %v13051_v10  ;;  %v12974_v26 = vor.u32 %v15458_v19, %v12971_v27  ;;  %v13105_v32 = vld [vmem:[#allocation6 + $0xe20] sm:$0xf] }
 0x912   :  { %v5758_v24 = vpack.c.bf16 %v5756_v42, %v5754_v36  ;;  %v12998_v36 = vor.u32 %v15464_v6, %v12995_v20  ;;  %v15482_v42 = vld [vmem:[#allocation6 + $0x5d4] sm:$0xf]  ;;  %v15456_v20 = vld [vmem:[#allocation6 + $0x504] sm:$0xf] }
 0x913   :  { %6458 = vmatpush.bf16.msra.mxu3 %v13078_v12  ;;  %v13043_v12 = vld [vmem:[#allocation6 + $0x5a8] sm:$0xf0] }
 0x914   :  { %5968 = vmatmul.bf16.vlgmr.msra.gmra.mxu2 %v5758_v24  ;;  %5996 = vmatmul.bf16.vlgmr.msrb.gmra.mxu0 %v5758_v24  ;;  %v13067_v24 = vld [vmem:[#allocation6 + $0x5d8] sm:$0xf0]  ;;  %v13046_v6 = vor.u32 %v15476_v5, %v13043_v12 }
 0x915   :  { %6443 = vmatpush.bf16.msra.mxu2 %v13022_v62  ;;  %6677 = vmatpush.bf16.msrb.mxu0 %v13146_v15  ;;  %v13070_v37 = vor.u32 %v15482_v42, %v13067_v24  ;;  %v13059_v62 = vld [vmem:[#allocation6 + $0x5c8] sm:$0xf0]  ;;  %v15495_v15 = vld [vmem:[#allocation6 + $0xe34] sm:$0xf0] }
 0x916   :  { %v13062_v33 = vor.u32 %v15480_v45, %v13059_v62  ;;  %v15472_v45 = vld [vmem:[#allocation6 + $0x584] sm:$0xf]  ;;  %v13027_v62 = vld [vmem:[#allocation6 + $0x588] sm:$0xf0] }
 0x917   :  { %6459 = vmatpush.bf16.msra.mxu3 %v13070_v37  ;;  %v13035_v37 = vld [vmem:[#allocation6 + $0x598] sm:$0xf0] }
 0x918   :  { %v13038_v39 = vor.u32 %v15474_v50, %v13035_v37 }
 0x919   :  { %6444 = vmatpush.bf16.msra.mxu2 %v13014_v61  ;;  %6678 = vmatpush.bf16.msrb.mxu0 %v13138_v35  ;;  %v15460_v61 = vld [vmem:[#allocation6 + $0x524] sm:$0xf]  ;;  %v15493_v35 = vld [vmem:[#allocation6 + $0xe24] sm:$0xf0] }
 0x91a   :  { %v12982_v23 = vor.u32 %v15460_v61, %v12979_v34  ;;  %v13106_v42 = vor.u32 %v15493_v35, %v13105_v32  ;;  %v5794_v61 = vld [vmem:[#allocation7 + $0x2c] sm:$0x3]  ;;  %v13090_v34 = vor.u32 %v15489_v52, %v13089_v25  ;;  %v16442_v35 = vld [vmem:[#allocation7 + $0xa] sm:$0x3]  ;;  %v15500_v52 = vld [vmem:[#allocation6 + $0xe64] sm:$0xf] }
 0x91b   :  { %6460 = vmatpush.bf16.msra.mxu3 %v13062_v33  ;;  %v13030_v33 = vor.u32 %v15472_v45, %v13027_v62 }
 0x91d   :  { %6445 = vmatpush.bf16.msra.mxu2 %v13006_v51  ;;  %6679 = vmatpush.bf16.msrb.mxu0 %v13130_v22  ;;  %v13114_v51 = vor.u32 %v15495_v15, %v13113_v13  ;;  %v13098_v22 = vor.u32 %v15491_v40, %v13097_v38  ;;  %v5796_v15 = vperm.slane %v5794_v61, 0  ;;  %v15502_v40 = vld [vmem:[#allocation6 + $0xe74] sm:$0xf] }
 0x91e   :  { %6437 = vmatmul.bf16.vlgmr.msra.gmra.mxu1 %v16291_v49 }
 0x91f   :  { %6461 = vmatpush.bf16.msra.mxu3 %v13054_v57 }
 0x921   :  { %6446 = vmatpush.bf16.msra.mxu2 %v12998_v36  ;;  %6680 = vmatpush.bf16.msrb.mxu0 %v13122_v2  ;;  %v12963_v36 = vld [vmem:[#allocation6 + $0x508] sm:$0xf0] }
 0x922   :  { %v12966_v24 = vor.u32 %v15456_v20, %v12963_v36 }
 0x923   :  { %6462 = vmatpush.bf16.msra.mxu3 %v13046_v6 }
 0x924   :  { %6423 = vmatmul.bf16.vlgmr.msra.gmra.mxu0 %v16289_v46 }
 0x925   :  { %6447 = vmatpush.bf16.msra.mxu2 %v12990_v41  ;;  %6681 = vmatpush.bf16.msrb.mxu0 %v13114_v51 }
 0x927   :  { %6463 = vmatpush.bf16.msra.mxu3 %v13038_v39  ;;  %v6251_v39 = vperm.slane %v16442_v35, 0 }
 0x929   :  { %6448 = vmatpush.bf16.msra.mxu2 %v12982_v23  ;;  %6682 = vmatpush.bf16.msrb.mxu0 %v13106_v42  ;;  %v5797_v23 = vperm.slane %v5794_v61, 1  ;;  %v13139_v61 = vld [vmem:[#allocation6 + $0xe68] sm:$0xf0] }
 0x92b   :  { %6464 = vmatpush.bf16.msra.mxu3 %v13030_v33 }
 0x92d   :  { %6449 = vmatpush.bf16.msra.mxu2 %v12974_v26  ;;  %6683 = vmatpush.bf16.msrb.mxu0 %v13098_v22  ;;  %v13147_v22 = vld [vmem:[#allocation6 + $0xe78] sm:$0xf0] }
 0x92e   :  { %v13150_v62 = vor.u32 %v15502_v40, %v13147_v22  ;;  %v15488_v40 = vld [vmem:[#allocation6 + $0xe04] sm:$0xf]  ;;  %v13091_v22 = vld [vmem:[#allocation6 + $0xe08] sm:$0xf0] }
 0x931   :  { %6450 = vmatpush.bf16.msra.mxu2 %v12966_v24  ;;  %6684 = vmatpush.bf16.msrb.mxu0 %v13090_v34 }
 0x98b   :  { %v6011_v41 = vpop.f32.mrf.mxu1 }
 0x991   :  { %v5997_v2 = vpop.f32.mrf.mxu0  ;;  %v5983_v9 = vpop.f32.mrf.mxu3 }
 0x992   :  { %v5998_v10 = vadd.f32 %v5997_v2, %v5797_v23  ;;  %v13142_v2 = vor.u32 %v15500_v52, %v13139_v61  ;;  %v15517_v61 = vld [vmem:[#allocation6 + $0xee4] sm:$0xf0] }
 0x993   :  { %v6013_v57 = vpop.f32.mrf.mxu1 }
 0x994   :  { %v6012_v51 = vadd.f32 %v6011_v41, %v5998_v10  ;;  %v15498_v10 = vld [vmem:[#allocation6 + $0xe54] sm:$0xf] }
 0x996   :  { %v6017_v12 = vmax.f32 %v6012_v51, 0.0 }
 0x997   :  { %v5969_v13 = vpop.f32.mrf.mxu2 }
 0x998   :  { %v5970_v26 = vadd.f32 %v5969_v13, %v5796_v15 }
 0x999   :  { %v5999_v19 = vpop.f32.mrf.mxu0  ;;  %v5985_v36 = vpop.f32.mrf.mxu3 }
 0x99a   :  { %v6000_v27 = vadd.f32 %v5999_v19, %v5797_v23  ;;  %v5984_v20 = vadd.f32 %v5983_v9, %v5970_v26  ;;  %v15496_v26 = vld [vmem:[#allocation6 + $0xe44] sm:$0xf] }
 0x99b   :  { %v6438_v50 = vpop.f32.mrf.mxu1 }
 0x99c   :  { %v6014_v5 = vadd.f32 %v6013_v57, %v6000_v27  ;;  %v6016_v41 = vmax.f32 %v5984_v20, 0.0  ;;  %v13131_v57 = vld [vmem:[#allocation6 + $0xe58] sm:$0xf0] }
 0x99d   :  { %v13134_v19 = vor.u32 %v15498_v10, %v13131_v57  ;;  %v13115_v20 = vld [vmem:[#allocation6 + $0xe38] sm:$0xf0]  ;;  %v13193_v10 = vld [vmem:[#allocation6 + $0xed0] sm:$0xf]  ;;  %v15515_v57 = vld [vmem:[#allocation6 + $0xed4] sm:$0xf0] }
 0x99e   :  { %v6019_v32 = vmax.f32 %v6014_v5, 0.0  ;;  %v13123_v5 = vld [vmem:[#allocation6 + $0xe48] sm:$0xf0] }
 0x99f   :  { %v5971_v6 = vpop.f32.mrf.mxu2 }
 0x9a0   :  { %v6021_v42 = vpack.c.bf16 %v6019_v32, %v6017_v12  ;;  %v5972_v24 = vadd.f32 %v5971_v6, %v5796_v15  ;;  %v13126_v32 = vor.u32 %v15496_v26, %v13123_v5  ;;  %v15494_v6 = vld [vmem:[#allocation6 + $0xe34] sm:$0xf]  ;;  %v15513_v26 = vld [vmem:[#allocation6 + $0xec4] sm:$0xf0]  ;;  %v15512_v5 = vld [vmem:[#allocation6 + $0xec4] sm:$0xf] }
 0x9a1   :  { %v6424_v37 = vpop.f32.mrf.mxu0 }
 0x9a2   :  { %v5986_v38 = vadd.f32 %v5985_v36, %v5972_v24  ;;  %6178 = vmatmul.bf16.vlgmr.msrb.gmra.mxu3 %v6021_v42  ;;  %v6425_v33 = vadd.f32 %v6424_v37, %v6251_v39  ;;  %v13118_v36 = vor.u32 %v15494_v6, %v13115_v20  ;;  %v15492_v42 = vld [vmem:[#allocation6 + $0xe24] sm:$0xf]  ;;  %v13107_v24 = vld [vmem:[#allocation6 + $0xe28] sm:$0xf0]  ;;  %v15490_v37 = vld [vmem:[#allocation6 + $0xe14] sm:$0xf] }
 0x9a3   :  { %v6440_v13 = vpop.f32.mrf.mxu1  ;;  %v13177_v20 = vld [vmem:[#allocation6 + $0xeb0] sm:$0xf] }
 0x9a4   :  { %v6018_v45 = vmax.f32 %v5986_v38, 0.0  ;;  %v6439_v23 = vadd.f32 %v6438_v50, %v6425_v33  ;;  %v13110_v50 = vor.u32 %v15492_v42, %v13107_v24  ;;  %v13099_v38 = vld [vmem:[#allocation6 + $0xe18] sm:$0xf0]  ;;  %v15510_v42 = vld [vmem:[#allocation6 + $0xeb4] sm:$0xf] }
 0x9a5   :  { %v13211_v33 = vld [vmem:[#allocation6 + $0xef8] sm:$0xf0] }
 0x9a6   :  { %v6020_v25 = vpack.c.bf16 %v6018_v45, %v6016_v41  ;;  %v6471_v51 = vmax.f32 %v6439_v23, 0.0  ;;  %v13094_v41 = vor.u32 %v15488_v40, %v13091_v22  ;;  %v15519_v45 = vld [vmem:[#allocation6 + $0xef4] sm:$0xf0]  ;;  %v13203_v23 = vld [vmem:[#allocation6 + $0xee8] sm:$0xf0] }
 0x9a7   :  { %v15508_v40 = vld [vmem:[#allocation6 + $0xea4] sm:$0xf] }
 0x9a8   :  { %6164 = vmatmul.bf16.vlgmr.msrb.gmra.mxu2 %v6020_v25 }
 0x9a9   :  { %v6426_v34 = vpop.f32.mrf.mxu0  ;;  %6705 = vmatpush.bf16.msrb.mxu2 %v13150_v62  ;;  %v15518_v62 = vld [vmem:[#allocation6 + $0xef4] sm:$0xf] }
 0x9aa   :  { %v6427_v9 = vadd.f32 %v6426_v34, %v6251_v39  ;;  %v13102_v39 = vor.u32 %v15490_v37, %v13099_v38  ;;  %v13214_v52 = vor.u32 %v15518_v62, %v13211_v33  ;;  %v15516_v34 = vld [vmem:[#allocation6 + $0xee4] sm:$0xf]  ;;  %v13169_v38 = vld [vmem:[#allocation6 + $0xea0] sm:$0xf]  ;;  %v15507_v62 = vld [vmem:[#allocation6 + $0xe94] sm:$0xf0] }
 0x9ac   :  { %v6441_v15 = vadd.f32 %v6440_v13, %v6427_v9  ;;  %6719 = vmatpush.bf16.msrb.mxu3 %v13214_v52  ;;  %v13206_v9 = vor.u32 %v15516_v34, %v13203_v23  ;;  %v15514_v13 = vld [vmem:[#allocation6 + $0xed4] sm:$0xf]  ;;  %v13163_v52 = vld [vmem:[#allocation6 + $0xe98] sm:$0xf0]  ;;  %v13153_v34 = vld [vmem:[#allocation6 + $0xe80] sm:$0xf] }
 0x9ad   :  { %6706 = vmatpush.bf16.msrb.mxu2 %v13142_v2  ;;  %v15504_v23 = vld [vmem:[#allocation6 + $0xe84] sm:$0xf] }
 0x9ae   :  { %v6473_v27 = vmax.f32 %v6441_v15, 0.0  ;;  %v13194_v15 = vor.u32 %v15515_v57, %v13193_v10  ;;  %v13155_v57 = vld [vmem:[#allocation6 + $0xe88] sm:$0xf0] }
 0x9b0   :  { %v6475_v12 = vpack.c.bf16 %v6473_v27, %v6471_v51  ;;  %6720 = vmatpush.bf16.msrb.mxu3 %v13206_v9  ;;  %v13185_v27 = vld [vmem:[#allocation6 + $0xec0] sm:$0xf]  ;;  %v15924_v9 = vld [vmem:[#allocation10 + $0x4] ss:$0 sm:$0xff] }
 0x9b1   :  { %6707 = vmatpush.bf16.msrb.mxu2 %v13134_v19  ;;  %v13195_v19 = vld [vmem:[#allocation6 + $0xed8] sm:$0xf0] }
 0x9b2   :  { %6465 = vmatmul.bf16.vlgmr.msra.gmra.mxu3 %v16291_v49  ;;  %6685 = vmatmul.bf16.vlgmr.msrb.gmra.mxu0 %v6475_v12  ;;  %v13209_v49 = vld [vmem:[#allocation6 + $0xef0] sm:$0xf]  ;;  %v13198_v51 = vor.u32 %v15514_v13, %v13195_v19  ;;  %v13158_v13 = vor.u32 %v15504_v23, %v13155_v57  ;;  %v15530_v23 = vld [vmem:[#allocation6 + $0x1754] sm:$0xf] }
 0x9b3   :  { %v13210_v25 = vor.u32 %v15519_v45, %v13209_v49  ;;  %v13161_v45 = vld [vmem:[#allocation6 + $0xe90] sm:$0xf] }
 0x9b4   :  { %6721 = vmatpush.bf16.msrb.mxu3 %v13198_v51  ;;  %v13162_v33 = vor.u32 %v15507_v62, %v13161_v45  ;;  %v15534_v62 = vld [vmem:[#allocation6 + $0x1774] sm:$0xf] }
 0x9b5   :  { %6708 = vmatpush.bf16.msrb.mxu2 %v13126_v32  ;;  %6691 = vmatpush.bf16.msrb.mxu1 %v13210_v25  ;;  %v13187_v32 = vld [vmem:[#allocation6 + $0xec8] sm:$0xf0]  ;;  %v15506_v25 = vld [vmem:[#allocation6 + $0xe94] sm:$0xf] }
 0x9b6   :  { %v13190_v6 = vor.u32 %v15512_v5, %v13187_v32 }
 0x9b8   :  { %6451 = vmatmul.bf16.vlgmr.msra.gmra.mxu2 %v16289_v46  ;;  %v13201_v46 = vld [vmem:[#allocation6 + $0xee0] sm:$0xf]  ;;  %6722 = vmatpush.bf16.msrb.mxu3 %v13190_v6 }
 0x9b9   :  { %6709 = vmatpush.bf16.msrb.mxu2 %v13118_v36  ;;  %v13202_v2 = vor.u32 %v15517_v61, %v13201_v46  ;;  %v15511_v36 = vld [vmem:[#allocation6 + $0xeb4] sm:$0xf0]  ;;  %v13166_v46 = vor.u32 %v15506_v25, %v13163_v52  ;;  %v13275_v25 = vld [vmem:[#allocation6 + $0x1778] sm:$0xf0]  ;;  %v15532_v52 = vld [vmem:[#allocation6 + $0x1764] sm:$0xf] }
 0x9ba   :  { %v13178_v24 = vor.u32 %v15511_v36, %v13177_v20 }
 0x9bb   :  { %6692 = vmatpush.bf16.msrb.mxu1 %v13202_v2  ;;  %v15505_v2 = vld [vmem:[#allocation6 + $0xe84] sm:$0xf0] }
 0x9bc   :  { %v13154_v10 = vor.u32 %v15505_v2, %v13153_v34  ;;  %v15550_v34 = vld [vmem:[#allocation6 + $0x17f4] sm:$0xf] }
 0x9bd   :  { %6710 = vmatpush.bf16.msrb.mxu2 %v13110_v50  ;;  %v13179_v50 = vld [vmem:[#allocation6 + $0xeb8] sm:$0xf0] }
 0x9be   :  { %v13182_v37 = vor.u32 %v15510_v42, %v13179_v50 }
 0x9bf   :  { %6693 = vmatpush.bf16.msrb.mxu1 %v13194_v15 }
 0x9c0   :  { %6723 = vmatpush.bf16.msrb.mxu3 %v13182_v37 }
 0x9c1   :  { %6711 = vmatpush.bf16.msrb.mxu2 %v13102_v39  ;;  %v15509_v39 = vld [vmem:[#allocation6 + $0xea4] sm:$0xf0] }
 0x9c2   :  { %v13170_v22 = vor.u32 %v15509_v39, %v13169_v38 }
 0x9c5   :  { %6712 = vmatpush.bf16.msrb.mxu2 %v13094_v41  ;;  %v13171_v41 = vld [vmem:[#allocation6 + $0xea8] sm:$0xf0] }
 0x9c6   :  { %v13174_v49 = vor.u32 %v15508_v40, %v13171_v41 }
 0x9c8   :  { %6713 = vmatmul.bf16.vlgmr.msrb.gmra.mxu2 %v6475_v12  ;;  %v13186_v12 = vor.u32 %v15513_v26, %v13185_v27  ;;  %6724 = vmatpush.bf16.msrb.mxu3 %v13174_v49 }
 0x9ca   :  { %6694 = vmatpush.bf16.msrb.mxu1 %v13186_v12 }
 0x9cc   :  { %6725 = vmatpush.bf16.msrb.mxu3 %v13166_v46  ;;  %v13267_v46 = vld [vmem:[#allocation6 + $0x1768] sm:$0xf0] }
 0x9ce   :  { %6695 = vmatpush.bf16.msrb.mxu1 %v13178_v24  ;;  %v6252_v24 = vperm.slane %v16442_v35, 1  ;;  %v13339_v35 = vld [vmem:[#allocation6 + $0x17f8] sm:$0xf0] }
 0x9cf   :  { %v13342_v2 = vor.u32 %v15550_v34, %v13339_v35  ;;  %v13329_v34 = vld [vmem:[#allocation6 + $0x17e0] sm:$0xf]  ;;  %v15549_v35 = vld [vmem:[#allocation6 + $0x17e4] sm:$0xf0] }
 0x9d0   :  { %6726 = vmatpush.bf16.msrb.mxu3 %v13158_v13  ;;  %v13331_v13 = vld [vmem:[#allocation6 + $0x17e8] sm:$0xf0] }
 0x9d2   :  { %6696 = vmatpush.bf16.msrb.mxu1 %v13170_v22 }
 0x9d4   :  { %6981 = vmatpush.bf16.msra.mxu3 %v13342_v2  ;;  %v15524_v2 = vld [vmem:[#allocation6 + $0x1724] sm:$0xf] }
 0x9d6   :  { %6697 = vmatpush.bf16.msrb.mxu1 %v13162_v33  ;;  %v13278_v33 = vor.u32 %v15534_v62, %v13275_v25  ;;  %v13257_v25 = vld [vmem:[#allocation6 + $0x1750] sm:$0xf] }
 0x9d8   :  { %6967 = vmatpush.bf16.msra.mxu2 %v13278_v33  ;;  %v15544_v33 = vld [vmem:[#allocation6 + $0x17c4] sm:$0xf] }
 0x9da   :  { %6698 = vmatpush.bf16.msrb.mxu1 %v13154_v10  ;;  %v15548_v10 = vld [vmem:[#allocation6 + $0x17e4] sm:$0xf] }
 0xa25   :  { %v6179_v61 = vpop.f32.mrf.mxu3 }
 0xa2b   :  { %v6165_v15 = vpop.f32.mrf.mxu2 }
 0xa2c   :  { %v6166_v19 = vadd.f32 %v15924_v9, %v6165_v15  ;;  %v15528_v15 = vld [vmem:[#allocation6 + $0x1744] sm:$0xf] }
 0xa2d   :  { %v6181_v5 = vpop.f32.mrf.mxu3 }
 0xa2e   :  { %v16453_v27 = vadd.f32 %v6179_v61, %v6166_v19  ;;  %v13270_v61 = vor.u32 %v15532_v52, %v13267_v46  ;;  %v13251_v19 = vld [vmem:[#allocation6 + $0x1748] sm:$0xf0]  ;;  %v15531_v46 = vld [vmem:[#allocation6 + $0x1754] sm:$0xf0] }
 0xa2f   :  { %v13315_v52 = vld [vmem:[#allocation6 + $0x17c8] sm:$0xf0] }
 0xa30   :  { %v16458_v26 = vsel %vm16449_vm12, %v16453_v27, -inf  ;;  %6968 = vmatpush.bf16.msra.mxu2 %v13270_v61 }
 0xa31   :  { %6189 = vmax.xlane.f32.xlu2 %v16458_v26 }
 0xa33   :  { %v6167_v12 = vpop.f32.mrf.mxu2 }
 0xa34   :  { %v6168_v32 = vadd.f32 %v15924_v9, %v6167_v12  ;;  %v13259_v9 = vld [vmem:[#allocation6 + $0x1758] sm:$0xf0]  ;;  %v13273_v12 = vld [vmem:[#allocation6 + $0x1770] sm:$0xf] }
 0xa35   :  { %v6466_v36 = vpop.f32.mrf.mxu3  ;;  %v13262_v57 = vor.u32 %v15530_v23, %v13259_v9  ;;  %v13235_v23 = vld [vmem:[#allocation6 + $0x1728] sm:$0xf0]  ;;  %v13258_v9 = vor.u32 %v15531_v46, %v13257_v25  ;;  %v13241_v25 = vld [vmem:[#allocation6 + $0x1730] sm:$0xf] }
 0xa36   :  { %v16461_v6 = vadd.f32 %v6181_v5, %v6168_v32  ;;  %v13334_v5 = vor.u32 %v15548_v10, %v13331_v13  ;;  %v15535_v32 = vld [vmem:[#allocation6 + $0x1774] sm:$0xf0]  ;;  %v13330_v10 = vor.u32 %v15549_v35, %v13329_v34  ;;  %v13249_v13 = vld [vmem:[#allocation6 + $0x1740] sm:$0xf]  ;;  %v13465_v46 = vld [vmem:[#allocation6 + $0x670] sm:$0xf] }
 0xa37   :  { %6969 = vmatpush.bf16.msra.mxu2 %v13262_v57  ;;  %v13318_v57 = vor.u32 %v15544_v33, %v13315_v52  ;;  %v15527_v33 = vld [vmem:[#allocation6 + $0x1734] sm:$0xf0]  ;;  %v15538_v34 = vld [vmem:[#allocation6 + $0x1794] sm:$0xf] }
 0xa38   :  { %v16466_v20 = vsel %vm16449_vm12, %v16461_v6, -inf  ;;  %6982 = vmatpush.bf16.msra.mxu3 %v13334_v5  ;;  %v15542_v5 = vld [vmem:[#allocation6 + $0x17b4] sm:$0xf]  ;;  %v13242_v52 = vor.u32 %v15527_v33, %v13241_v25  ;;  %v15579_v25 = vld [vmem:[#allocation6 + $0x654] sm:$0xf0] }
 0xa39   :  { %6191 = vmax.xlane.f32.xlu0 %v16466_v20 }
 0xa3b   :  { %v6452_v42 = vpop.f32.mrf.mxu2 }
 0xa3c   :  { %v6453_v50 = vadd.f32 %v6452_v42, %v6252_v24  ;;  %v15546_v42 = vld [vmem:[#allocation6 + $0x17d4] sm:$0xf] }
 0xa3d   :  { %v6468_v40 = vpop.f32.mrf.mxu3 }
 0xa3e   :  { %v6467_v38 = vadd.f32 %v6466_v36, %v6453_v50  ;;  %v13274_v36 = vor.u32 %v15535_v32, %v13273_v12  ;;  %v13254_v50 = vor.u32 %v15528_v15, %v13251_v19  ;;  %v15529_v15 = vld [vmem:[#allocation6 + $0x1744] sm:$0xf0]  ;;  %v13321_v19 = vld [vmem:[#allocation6 + $0x17d0] sm:$0xf]  ;;  %v13307_v12 = vld [vmem:[#allocation6 + $0x17b8] sm:$0xf0] }
 0xa3f   :  { %v15547_v32 = vld [vmem:[#allocation6 + $0x17d4] sm:$0xf0] }
 0xa40   :  { %v6472_v41 = vmax.f32 %v6467_v38, 0.0  ;;  %v13265_v38 = vld [vmem:[#allocation6 + $0x1760] sm:$0xf]  ;;  %6939 = vmatpush.bf16.msra.mxu0 %v13274_v36  ;;  %6970 = vmatpush.bf16.msra.mxu2 %v13254_v50  ;;  %v13238_v36 = vor.u32 %v15524_v2, %v13235_v23  ;;  %v13227_v50 = vld [vmem:[#allocation6 + $0x1718] sm:$0xf0] }
 0xa41   :  { %v13291_v2 = vld [vmem:[#allocation6 + $0x1798] sm:$0xf0]  ;;  %v13313_v23 = vld [vmem:[#allocation6 + $0x17c0] sm:$0xf] }
 0xa43   :  { %v6454_v37 = vpop.f32.mrf.mxu2 }
 0xa44   :  { %v6455_v39 = vadd.f32 %v6454_v37, %v6252_v24  ;;  %v13323_v24 = vld [vmem:[#allocation6 + $0x17d8] sm:$0xf0]  ;;  %v15526_v37 = vld [vmem:[#allocation6 + $0x1734] sm:$0xf] }
 0xa46   :  { %v6469_v22 = vadd.f32 %v6468_v40, %v6455_v39  ;;  %v15533_v39 = vld [vmem:[#allocation6 + $0x1764] sm:$0xf0]  ;;  %v13243_v40 = vld [vmem:[#allocation6 + $0x1738] sm:$0xf0] }
 0xa47   :  { %v13246_v61 = vor.u32 %v15526_v37, %v13243_v40  ;;  %v13250_v37 = vor.u32 %v15529_v15, %v13249_v13  ;;  %v13299_v40 = vld [vmem:[#allocation6 + $0x17a8] sm:$0xf0]  ;;  %v13233_v13 = vld [vmem:[#allocation6 + $0x1720] sm:$0xf]  ;;  %v15525_v15 = vld [vmem:[#allocation6 + $0x1724] sm:$0xf0] }
 0xa48   :  { %v6474_v49 = vmax.f32 %v6469_v22, 0.0  ;;  %v13266_v22 = vor.u32 %v15533_v39, %v13265_v38  ;;  %v13310_v38 = vor.u32 %v15542_v5, %v13307_v12  ;;  %v15540_v39 = vld [vmem:[#allocation6 + $0x17a4] sm:$0xf]  ;;  %v13234_v5 = vor.u32 %v15525_v15, %v13233_v13  ;;  %v15581_v12 = vld [vmem:[#allocation6 + $0x664] sm:$0xf0] }
 0xa49   :  { %6971 = vmatpush.bf16.msra.mxu2 %v13246_v61  ;;  %v15583_v61 = vld [vmem:[#allocation6 + $0x674] sm:$0xf0]  ;;  %v15577_v13 = vld [vmem:[#allocation6 + $0x644] sm:$0xf0] }
 0xa4a   :  { %v6476_v45 = vpack.c.bf16 %v6474_v49, %v6472_v41  ;;  %v13337_v41 = vld [vmem:[#allocation6 + $0x17f0] sm:$0xf]  ;;  %v15551_v49 = vld [vmem:[#allocation6 + $0x17f4] sm:$0xf0]  ;;  %6940 = vmatpush.bf16.msra.mxu0 %v13266_v22  ;;  %v13466_v35 = vor.u32 %v15583_v61, %v13465_v46  ;;  %v15541_v46 = vld [vmem:[#allocation6 + $0x17a4] sm:$0xf0] }
 0xa4b   :  { %v13338_v62 = vor.u32 %v15551_v49, %v13337_v41  ;;  %v15520_v41 = vld [vmem:[#allocation6 + $0x1704] sm:$0xf]  ;;  %v13219_v49 = vld [vmem:[#allocation6 + $0x1708] sm:$0xf0]  ;;  %v13521_v61 = vld [vmem:[#allocation6 + $0x6e0] sm:$0xf] }
 0xa4c   :  { %6699 = vmatmul.bf16.vlgmr.msrb.gmra.mxu1 %v6476_v45  ;;  %6727 = vmatmul.bf16.vlgmr.msrb.gmra.mxu3 %v6476_v45  ;;  %v13326_v45 = vor.u32 %v15546_v42, %v13323_v24  ;;  %v13322_v42 = vor.u32 %v15547_v32, %v13321_v19  ;;  %v15522_v24 = vld [vmem:[#allocation6 + $0x1714] sm:$0xf]  ;;  %v13457_v19 = vld [vmem:[#allocation6 + $0x660] sm:$0xf]  ;;  %v15536_v32 = vld [vmem:[#allocation6 + $0x1784] sm:$0xf] }
 0xa4d   :  { %6953 = vmatpush.bf16.msra.mxu1 %v13338_v62  ;;  %6972 = vmatpush.bf16.msra.mxu2 %v13238_v36  ;;  %v13230_v22 = vor.u32 %v15522_v24, %v13227_v50  ;;  %v13222_v62 = vor.u32 %v15520_v41, %v13219_v49  ;;  %v13283_v36 = vld [vmem:[#allocation6 + $0x1788] sm:$0xf0]  ;;  %v13305_v50 = vld [vmem:[#allocation6 + $0x17b0] sm:$0xf]  ;;  %v15523_v49 = vld [vmem:[#allocation6 + $0x1714] sm:$0xf0] }
 0xa4e   :  { %6983 = vmatpush.bf16.msra.mxu3 %v13326_v45  ;;  %6941 = vmatpush.bf16.msra.mxu0 %v13258_v9  ;;  %v13302_v45 = vor.u32 %v15540_v39, %v13299_v40  ;;  %v15545_v9 = vld [vmem:[#allocation6 + $0x17c4] sm:$0xf0]  ;;  %v13286_v24 = vor.u32 %v15536_v32, %v13283_v36  ;;  %v15599_v40 = vld [vmem:[#allocation6 + $0x6f4] sm:$0xf0]  ;;  %v13225_v41 = vld [vmem:[#allocation6 + $0x1710] sm:$0xf] }
 0xa4f   :  { %v15595_v36 = vld [vmem:[#allocation6 + $0x6d4] sm:$0xf0] }
 0xa51   :  { %6954 = vmatpush.bf16.msra.mxu1 %v13330_v10  ;;  %6973 = vmatpush.bf16.msra.mxu2 %v13230_v22  ;;  %v13294_v10 = vor.u32 %v15538_v34, %v13291_v2 }
 0xa52   :  { %6984 = vmatpush.bf16.msra.mxu3 %v13318_v57  ;;  %6942 = vmatpush.bf16.msra.mxu0 %v13250_v37  ;;  %v13314_v57 = vor.u32 %v15545_v9, %v13313_v23  ;;  %v15543_v37 = vld [vmem:[#allocation6 + $0x17b4] sm:$0xf0]  ;;  %v13217_v23 = vld [vmem:[#allocation6 + $0x1700] sm:$0xf]  ;;  %v15521_v9 = vld [vmem:[#allocation6 + $0x1704] sm:$0xf0] }
 0xa53   :  { %v13306_v39 = vor.u32 %v15543_v37, %v13305_v50  ;;  %v15575_v50 = vld [vmem:[#allocation6 + $0x634] sm:$0xf0] }
 0xa55   :  { %6955 = vmatpush.bf16.msra.mxu1 %v13322_v42  ;;  %6974 = vmatpush.bf16.msra.mxu2 %v13222_v62  ;;  %v13458_v42 = vor.u32 %v15581_v12, %v13457_v19  ;;  %v13449_v62 = vld [vmem:[#allocation6 + $0x650] sm:$0xf] }
 0xa56   :  { %6985 = vmatpush.bf16.msra.mxu3 %v13310_v38  ;;  %6943 = vmatpush.bf16.msra.mxu0 %v13242_v52  ;;  %v13529_v38 = vld [vmem:[#allocation6 + $0x6f0] sm:$0xf]  ;;  %v13450_v33 = vor.u32 %v15579_v25, %v13449_v62  ;;  %v13297_v52 = vld [vmem:[#allocation6 + $0x17a0] sm:$0xf]  ;;  %v15573_v62 = vld [vmem:[#allocation6 + $0x624] sm:$0xf0] }
 0xa57   :  { %v13530_v22 = vor.u32 %v15599_v40, %v13529_v38  ;;  %v13298_v34 = vor.u32 %v15541_v46, %v13297_v52  ;;  %v13289_v19 = vld [vmem:[#allocation6 + $0x1790] sm:$0xf]  ;;  %v13281_v38 = vld [vmem:[#allocation6 + $0x1780] sm:$0xf]  ;;  %v15591_v52 = vld [vmem:[#allocation6 + $0x6b4] sm:$0xf0] }
 0xa58   :  { %v13513_v12 = vld [vmem:[#allocation6 + $0x6d0] sm:$0xf]  ;;  %v13505_v40 = vld [vmem:[#allocation6 + $0x6c0] sm:$0xf] }
 0xa59   :  { %7394 = vmatpush.bf16.msrb.mxu2 %v13466_v35  ;;  %6956 = vmatpush.bf16.msra.mxu1 %v13314_v57  ;;  %v15597_v35 = vld [vmem:[#allocation6 + $0x6e4] sm:$0xf0]  ;;  %v13218_v57 = vor.u32 %v15521_v9, %v13217_v23  ;;  %v13409_v9 = vld [vmem:[#allocation6 + $0x600] sm:$0xf] }
 0xa5a   :  { %6986 = vmatpush.bf16.msra.mxu3 %v13302_v45  ;;  %6944 = vmatpush.bf16.msra.mxu0 %v13234_v5  ;;  %v13226_v45 = vor.u32 %v15523_v49, %v13225_v41  ;;  %v13522_v2 = vor.u32 %v15597_v35, %v13521_v61  ;;  %v15539_v5 = vld [vmem:[#allocation6 + $0x1794] sm:$0xf0]  ;;  %v15593_v41 = vld [vmem:[#allocation6 + $0x6c4] sm:$0xf0]  ;;  %v13417_v61 = vld [vmem:[#allocation6 + $0x610] sm:$0xf] }
 0xa5b   :  { %v13290_v32 = vor.u32 %v15539_v5, %v13289_v19  ;;  %v13506_v49 = vor.u32 %v15593_v41, %v13505_v40  ;;  %v13489_v35 = vld [vmem:[#allocation6 + $0x6a0] sm:$0xf]  ;;  %v15589_v23 = vld [vmem:[#allocation6 + $0x6a4] sm:$0xf0]  ;;  %v6686_v19 = vpop.f32.mrf.mxu0 }
 0xa5d   :  { %7395 = vmatpush.bf16.msrb.mxu2 %v13458_v42  ;;  %6957 = vmatpush.bf16.msra.mxu1 %v13306_v39  ;;  %v13514_v42 = vor.u32 %v15595_v36, %v13513_v12  ;;  %v15537_v39 = vld [vmem:[#allocation6 + $0x1784] sm:$0xf0]  ;;  %v13473_v36 = vld [vmem:[#allocation6 + $0x680] sm:$0xf] }
 0xa5e   :  { %6987 = vmatpush.bf16.msra.mxu3 %v13294_v10  ;;  %6945 = vmatpush.bf16.msra.mxu0 %v13226_v45  ;;  %v13441_v10 = vld [vmem:[#allocation6 + $0x640] sm:$0xf] }
 0xa5f   :  { %v13442_v15 = vor.u32 %v15577_v13, %v13441_v10  ;;  %v13425_v45 = vld [vmem:[#allocation6 + $0x620] sm:$0xf]  ;;  %v15569_v10 = vld [vmem:[#allocation6 + $0x604] sm:$0xf0]  ;;  %v13481_v13 = vld [vmem:[#allocation6 + $0x690] sm:$0xf] }
 0xa60   :  { %v13426_v25 = vor.u32 %v15573_v62, %v13425_v45  ;;  %v13410_v5 = vor.u32 %v15569_v10, %v13409_v9  ;;  %v15557_v9 = vld [vmem:[#allocation9 + $0x2a8] sm:$0xff] }
 0xa61   :  { %7396 = vmatpush.bf16.msrb.mxu2 %v13450_v33  ;;  %6958 = vmatpush.bf16.msra.mxu1 %v13298_v34  ;;  %v13497_v33 = vld [vmem:[#allocation6 + $0x6b0] sm:$0xf]  ;;  %v15571_v34 = vld [vmem:[#allocation6 + $0x614] sm:$0xf0]  ;;  %v15565_v10 = vld [vmem:[#allocation9 + $0x2e8] sm:$0xff] }
 0xa62   :  { %6988 = vmatpush.bf16.msra.mxu3 %v13286_v24  ;;  %6946 = vmatpush.bf16.msra.mxu0 %v13218_v57  ;;  %v13433_v24 = vld [vmem:[#allocation6 + $0x630] sm:$0xf]  ;;  %v13498_v46 = vor.u32 %v15591_v52, %v13497_v33  ;;  %v13490_v57 = vor.u32 %v15589_v23, %v13489_v35  ;;  %v15558_v33 = vld [vmem:[#allocation9 + $0x2b0] sm:$0xff] }
 0xa63   :  { %v13434_v37 = vor.u32 %v15575_v50, %v13433_v24  ;;  %v6714_v24 = vpop.f32.mrf.mxu2 }
 0xa65   :  { %7397 = vmatpush.bf16.msrb.mxu2 %v13442_v15  ;;  %6959 = vmatpush.bf16.msra.mxu1 %v13290_v32  ;;  %v15587_v15 = vld [vmem:[#allocation6 + $0x694] sm:$0xf0]  ;;  %v6511_v32 = vld [vmem:[#allocation7 + $0x1c] sm:$0x3] }
 0xa66   :  { %7408 = vmatpush.bf16.msrb.mxu3 %v13530_v22  ;;  %v13282_v22 = vor.u32 %v15537_v39, %v13281_v38  ;;  %v13482_v12 = vor.u32 %v15587_v15, %v13481_v13  ;;  %v6513_v38 = vperm.slane %v6511_v32, 0  ;;  %v6688_v39 = vpop.f32.mrf.mxu0  ;;  %v6514_v62 = vperm.slane %v6511_v32, 1  ;;  %v15564_v32 = vld [vmem:[#allocation9 + $0x2e0] sm:$0xff] }
 0xa68   :  { %v6687_v40 = vadd.f32 %v6686_v19, %v6513_v38  ;;  %v6689_v45 = vadd.f32 %v6688_v39, %v6513_v38  ;;  %v6715_v35 = vadd.f32 %v6714_v24, %v6514_v62  ;;  %v15554_v38 = vld [vmem:[#allocation9 + $0x290] sm:$0xff]  ;;  %v15553_v39 = vld [vmem:[#allocation9 + $0x288] sm:$0xff] }
 0xa69   :  { %7398 = vmatpush.bf16.msrb.mxu2 %v13434_v37  ;;  %6960 = vmatpush.bf16.msra.mxu1 %v13282_v22  ;;  %v15559_v22 = vld [vmem:[#allocation9 + $0x2b8] sm:$0xff] }
 0xa6a   :  { %7409 = vmatpush.bf16.msrb.mxu3 %v13522_v2  ;;  %v13418_v2 = vor.u32 %v15571_v34, %v13417_v61  ;;  %7135 = vmatpush.bf16.msrb.mxu0 %v15559_v22  ;;  %v13467_v22 = vld [vmem:[#allocation6 + $0x678] sm:$0xf0] }
 0xa6b   :  { %v6716_v34 = vpop.f32.mrf.mxu2 }
 0xa6d   :  { %7399 = vmatpush.bf16.msrb.mxu2 %v13426_v25 }
 0xa6e   :  { %7410 = vmatpush.bf16.msrb.mxu3 %v13514_v42  ;;  %v15585_v42 = vld [vmem:[#allocation6 + $0x684] sm:$0xf0]  ;;  %7136 = vmatpush.bf16.msrb.mxu0 %v15558_v33  ;;  %v15578_v33 = vld [vmem:[#allocation6 + $0x654] sm:$0xf] }
 0xa6f   :  { %v13474_v37 = vor.u32 %v15585_v42, %v13473_v36 }
 0xa71   :  { %7400 = vmatpush.bf16.msrb.mxu2 %v13418_v2 }
 0xa72   :  { %7411 = vmatpush.bf16.msrb.mxu3 %v13506_v49  ;;  %v15567_v49 = vld [vmem:[#allocation9 + $0x2f8] sm:$0xff]  ;;  %7137 = vmatpush.bf16.msrb.mxu0 %v15557_v9 }
 0xa73   :  { %7149 = vmatpush.bf16.msrb.mxu1 %v15567_v49  ;;  %v15574_v9 = vld [vmem:[#allocation6 + $0x634] sm:$0xf] }
 0xa75   :  { %7401 = vmatpush.bf16.msrb.mxu2 %v13410_v5 }
 0xa76   :  { %7412 = vmatpush.bf16.msrb.mxu3 %v13498_v46  ;;  %v15566_v46 = vld [vmem:[#allocation9 + $0x2f0] sm:$0xff] }
 0xa77   :  { %7150 = vmatpush.bf16.msrb.mxu1 %v15566_v46 }
 0xa7a   :  { %7413 = vmatpush.bf16.msrb.mxu3 %v13490_v57  ;;  %v6717_v57 = vadd.f32 %v6716_v34, %v6514_v62  ;;  %v13459_v62 = vld [vmem:[#allocation6 + $0x668] sm:$0xf0]  ;;  %v15576_v34 = vld [vmem:[#allocation6 + $0x644] sm:$0xf] }
 0xa7b   :  { %7151 = vmatpush.bf16.msrb.mxu1 %v15565_v10  ;;  %v13435_v10 = vld [vmem:[#allocation6 + $0x638] sm:$0xf0] }
 0xa7e   :  { %7414 = vmatpush.bf16.msrb.mxu3 %v13482_v12  ;;  %v15556_v12 = vld [vmem:[#allocation9 + $0x2a0] sm:$0xff] }
 0xa7f   :  { %7138 = vmatpush.bf16.msrb.mxu0 %v15556_v12  ;;  %7152 = vmatpush.bf16.msrb.mxu1 %v15564_v32  ;;  %v15615_v32 = vld [vmem:[#allocation6 + $0xf74] sm:$0xf0] }
 0xa82   :  { %7415 = vmatpush.bf16.msrb.mxu3 %v13474_v37  ;;  %v15563_v37 = vld [vmem:[#allocation9 + $0x2d8] sm:$0xff] }
 0xa83   :  { %7153 = vmatpush.bf16.msrb.mxu1 %v15563_v37  ;;  %v15596_v37 = vld [vmem:[#allocation6 + $0x6e4] sm:$0xf] }
 0xac9   :  { %v6700_v50 = vpop.f32.mrf.mxu1 }
 0xaca   :  { %v6701_v25 = vadd.f32 %v6700_v50, %v6687_v40  ;;  %v15555_v50 = vld [vmem:[#allocation9 + $0x298] sm:$0xff] }
 0xacb   :  { %7139 = vmatpush.bf16.msrb.mxu0 %v15555_v50  ;;  %v15582_v40 = vld [vmem:[#allocation6 + $0x674] sm:$0xf] }
 0xacc   :  { %v6733_v2 = vmax.f32 %v6701_v25, 0.0  ;;  %v13470_v49 = vor.u32 %v15582_v40, %v13467_v22  ;;  %v15613_v22 = vld [vmem:[#allocation6 + $0xf64] sm:$0xf0] }
 0xacf   :  { %v6728_v41 = vpop.f32.mrf.mxu3  ;;  %7140 = vmatpush.bf16.msrb.mxu0 %v15554_v38  ;;  %v13523_v38 = vld [vmem:[#allocation6 + $0x6e8] sm:$0xf0] }
 0xad0   :  { %v6729_v13 = vadd.f32 %v6728_v41, %v6715_v35  ;;  %v15552_v41 = vld [vmem:[#allocation9 + $0x280] sm:$0xff]  ;;  %v13443_v35 = vld [vmem:[#allocation6 + $0x648] sm:$0xf0]  ;;  %v13526_v40 = vor.u32 %v15596_v37, %v13523_v38  ;;  %v13553_v38 = vld [vmem:[#allocation6 + $0xf20] sm:$0xf] }
 0xad1   :  { %v6702_v52 = vpop.f32.mrf.mxu1  ;;  %v13491_v37 = vld [vmem:[#allocation6 + $0x6a8] sm:$0xf0] }
 0xad2   :  { %v6703_v61 = vadd.f32 %v6702_v52, %v6689_v45  ;;  %v6734_v36 = vmax.f32 %v6729_v13, 0.0  ;;  %v15580_v45 = vld [vmem:[#allocation6 + $0x664] sm:$0xf]  ;;  %v13451_v52 = vld [vmem:[#allocation6 + $0x658] sm:$0xf0] }
 0xad3   :  { %7141 = vmatpush.bf16.msrb.mxu0 %v15553_v39  ;;  %v13462_v25 = vor.u32 %v15580_v45, %v13459_v62  ;;  %v13454_v46 = vor.u32 %v15578_v33, %v13451_v52  ;;  %v15560_v13 = vld [vmem:[#allocation9 + $0x2c0] sm:$0xff]  ;;  %v13585_v39 = vld [vmem:[#allocation6 + $0xf60] sm:$0xf]  ;;  %v13577_v52 = vld [vmem:[#allocation6 + $0xf50] sm:$0xf] }
 0xad4   :  { %v6735_v23 = vmax.f32 %v6703_v61, 0.0  ;;  %v15562_v61 = vld [vmem:[#allocation9 + $0x2d0] sm:$0xff]  ;;  %v13586_v45 = vor.u32 %v15613_v22, %v13585_v39  ;;  %v13515_v33 = vld [vmem:[#allocation6 + $0x6d8] sm:$0xf0] }
 0xad5   :  { %7154 = vmatpush.bf16.msrb.mxu1 %v15562_v61  ;;  %v15611_v61 = vld [vmem:[#allocation6 + $0xf54] sm:$0xf0] }
 0xad6   :  { %v6737_v15 = vpack.c.bf16 %v6735_v23, %v6733_v2  ;;  %v13446_v2 = vor.u32 %v15576_v34, %v13443_v35  ;;  %v15561_v23 = vld [vmem:[#allocation9 + $0x2c8] sm:$0xff]  ;;  %v13411_v35 = vld [vmem:[#allocation6 + $0x608] sm:$0xf0] }
 0xad7   :  { %v6730_v19 = vpop.f32.mrf.mxu3  ;;  %7142 = vmatpush.bf16.msrb.mxu0 %v15552_v41  ;;  %v15570_v41 = vld [vmem:[#allocation6 + $0x614] sm:$0xf]  ;;  %v15568_v34 = vld [vmem:[#allocation6 + $0x604] sm:$0xf] }
 0xad8   :  { %v6731_v5 = vadd.f32 %v6730_v19, %v6717_v57  ;;  %6947 = vmatmul.bf16.vlgmr.msra.gmra.mxu0 %v6737_v15  ;;  %6975 = vmatmul.bf16.vlgmr.msra.gmra.mxu2 %v6737_v15  ;;  %v13438_v57 = vor.u32 %v15574_v9, %v13435_v10  ;;  %v15598_v15 = vld [vmem:[#allocation6 + $0x6f4] sm:$0xf]  ;;  %v13531_v19 = vld [vmem:[#allocation6 + $0x6f8] sm:$0xf0]  ;;  %v15592_v9 = vld [vmem:[#allocation6 + $0x6c4] sm:$0xf] }
 0xad9   :  { %7155 = vmatpush.bf16.msrb.mxu1 %v15561_v23  ;;  %v13534_v12 = vor.u32 %v15598_v15, %v13531_v19  ;;  %v13414_v23 = vor.u32 %v15568_v34, %v13411_v35  ;;  %v13507_v10 = vld [vmem:[#allocation6 + $0x6c8] sm:$0xf0]  ;;  %v15609_v15 = vld [vmem:[#allocation6 + $0xf44] sm:$0xf0]  ;;  %v15584_v35 = vld [vmem:[#allocation6 + $0x684] sm:$0xf] }
 0xada   :  { %v6736_v42 = vmax.f32 %v6731_v5, 0.0  ;;  %v13593_v5 = vld [vmem:[#allocation6 + $0xf70] sm:$0xf] }
 0xadb   :  { %7422 = vmatpush.bf16.msra.mxu0 %v13470_v49  ;;  %v13419_v49 = vld [vmem:[#allocation6 + $0x618] sm:$0xf0] }
 0xadc   :  { %v6738_v24 = vpack.c.bf16 %v6736_v42, %v6734_v36  ;;  %v15572_v36 = vld [vmem:[#allocation6 + $0x624] sm:$0xf]  ;;  %v13427_v42 = vld [vmem:[#allocation6 + $0x628] sm:$0xf0]  ;;  %v13422_v62 = vor.u32 %v15570_v41, %v13419_v49  ;;  %v15586_v49 = vld [vmem:[#allocation6 + $0x694] sm:$0xf] }
 0xadd   :  { %7156 = vmatpush.bf16.msrb.mxu1 %v15560_v13  ;;  %v13430_v50 = vor.u32 %v15572_v36, %v13427_v42  ;;  %v13569_v13 = vld [vmem:[#allocation6 + $0xf40] sm:$0xf]  ;;  %v15607_v42 = vld [vmem:[#allocation6 + $0xf34] sm:$0xf0] }
 0xade   :  { %6961 = vmatmul.bf16.vlgmr.msra.gmra.mxu1 %v6738_v24  ;;  %6989 = vmatmul.bf16.vlgmr.msra.gmra.mxu3 %v6738_v24  ;;  %v13594_v24 = vor.u32 %v15615_v32, %v13593_v5  ;;  %v13570_v19 = vor.u32 %v15609_v15, %v13569_v13  ;;  %v15590_v5 = vld [vmem:[#allocation6 + $0x6b4] sm:$0xf]  ;;  %v13561_v32 = vld [vmem:[#allocation6 + $0xf30] sm:$0xf] }
 0xadf   :  { %7423 = vmatpush.bf16.msra.mxu0 %v13462_v25  ;;  %v15594_v25 = vld [vmem:[#allocation6 + $0x6d4] sm:$0xf] }
 0xae0   :  { %7656 = vmatpush.bf16.msra.mxu2 %v13594_v24  ;;  %v13562_v24 = vor.u32 %v15607_v42, %v13561_v32 }
 0xae1   :  { %7436 = vmatpush.bf16.msra.mxu1 %v13534_v12  ;;  %v13499_v12 = vld [vmem:[#allocation6 + $0x6b8] sm:$0xf0] }
 0xae2   :  { %v13502_v36 = vor.u32 %v15590_v5, %v13499_v12 }
 0xae3   :  { %7424 = vmatpush.bf16.msra.mxu0 %v13454_v46  ;;  %v13518_v46 = vor.u32 %v15594_v25, %v13515_v33  ;;  %v15603_v33 = vld [vmem:[#allocation6 + $0xf14] sm:$0xf0] }
 0xae4   :  { %7657 = vmatpush.bf16.msra.mxu2 %v13586_v45  ;;  %v13483_v45 = vld [vmem:[#allocation6 + $0x698] sm:$0xf0] }
 0xae5   :  { %7437 = vmatpush.bf16.msra.mxu1 %v13526_v40  ;;  %v15605_v40 = vld [vmem:[#allocation6 + $0xf24] sm:$0xf0]  ;;  %v13486_v25 = vor.u32 %v15586_v49, %v13483_v45 }
 0xae6   :  { %v13554_v41 = vor.u32 %v15605_v40, %v13553_v38  ;;  %v13595_v38 = vld [vmem:[#allocation6 + $0xf78] sm:$0xf0] }
 0xae7   :  { %7425 = vmatpush.bf16.msra.mxu0 %v13446_v2  ;;  %v13578_v2 = vor.u32 %v15611_v61, %v13577_v52  ;;  %v6773_v52 = vld [vmem:[#allocation7 + $0x2e] sm:$0x3] }
 0xae8   :  { %7402 = vmatmul.bf16.vlgmr.msrb.gmra.mxu2 %v16295_v16  ;;  %v6776_v32 = vperm.slane %v6773_v52, 1 }
 0xae9   :  { %7438 = vmatpush.bf16.msra.mxu1 %v13518_v46  ;;  %7658 = vmatpush.bf16.msra.mxu2 %v13578_v2  ;;  %v13475_v2 = vld [vmem:[#allocation6 + $0x688] sm:$0xf0] }
 0xaeb   :  { %7426 = vmatpush.bf16.msra.mxu0 %v13438_v57  ;;  %v13510_v57 = vor.u32 %v15592_v9, %v13507_v10  ;;  %v6775_v9 = vperm.slane %v6773_v52, 0  ;;  %v13478_v10 = vor.u32 %v15584_v35, %v13475_v2 }
 0xaed   :  { %7439 = vmatpush.bf16.msra.mxu1 %v13510_v57  ;;  %7659 = vmatpush.bf16.msra.mxu2 %v13570_v19  ;;  %v15601_v57 = vld [vmem:[#allocation6 + $0xf04] sm:$0xf0] }
 0xaee   :  { %7416 = vmatmul.bf16.vlgmr.msrb.gmra.mxu3 %v16297_v21 }
 0xaef   :  { %7427 = vmatpush.bf16.msra.mxu0 %v13430_v50  ;;  %v15588_v50 = vld [vmem:[#allocation6 + $0x6a4] sm:$0xf] }
 0xaf0   :  { %v13494_v39 = vor.u32 %v15588_v50, %v13491_v37  ;;  %v15614_v37 = vld [vmem:[#allocation6 + $0xf74] sm:$0xf] }
 0xaf1   :  { %7440 = vmatpush.bf16.msra.mxu1 %v13502_v36  ;;  %7660 = vmatpush.bf16.msra.mxu2 %v13562_v24  ;;  %v13598_v49 = vor.u32 %v15614_v37, %v13595_v38 }
 0xaf3   :  { %7428 = vmatpush.bf16.msra.mxu0 %v13422_v62  ;;  %v13545_v62 = vld [vmem:[#allocation6 + $0xf10] sm:$0xf] }
 0xaf4   :  { %v13546_v46 = vor.u32 %v15603_v33, %v13545_v62  ;;  %v15612_v33 = vld [vmem:[#allocation6 + $0xf64] sm:$0xf] }
 0xaf5   :  { %7441 = vmatpush.bf16.msra.mxu1 %v13494_v39  ;;  %7661 = vmatpush.bf16.msra.mxu2 %v13554_v41 }
 0xaf7   :  { %7429 = vmatpush.bf16.msra.mxu0 %v13414_v23  ;;  %v13537_v23 = vld [vmem:[#allocation6 + $0xf00] sm:$0xf] }
 0xaf8   :  { %v13538_v13 = vor.u32 %v15601_v57, %v13537_v23 }
 0xaf9   :  { %7442 = vmatpush.bf16.msra.mxu1 %v13486_v25  ;;  %7662 = vmatpush.bf16.msra.mxu2 %v13546_v46  ;;  %v13587_v46 = vld [vmem:[#allocation6 + $0xf68] sm:$0xf0] }
 0xafa   :  { %v13590_v52 = vor.u32 %v15612_v33, %v13587_v46  ;;  %v15602_v46 = vld [vmem:[#allocation6 + $0xf14] sm:$0xf] }
 0xafd   :  { %7443 = vmatpush.bf16.msra.mxu1 %v13478_v10  ;;  %7663 = vmatpush.bf16.msra.mxu2 %v13538_v13  ;;  %v13579_v10 = vld [vmem:[#allocation6 + $0xf58] sm:$0xf0]  ;;  %v16472_v13 = vld [vmem:[#allocation7 + $0xc] sm:$0x3] }
 0xb55   :  { %v6948_v22 = vpop.f32.mrf.mxu0 }
 0xb56   :  { %v6949_v19 = vadd.f32 %v6948_v22, %v6775_v9 }
 0xb5b   :  { %v6962_v61 = vpop.f32.mrf.mxu1  ;;  %v6976_v34 = vpop.f32.mrf.mxu2 }
 0xb5c   :  { %v6963_v12 = vadd.f32 %v6962_v61, %v6949_v19  ;;  %v6977_v40 = vadd.f32 %v6976_v34, %v6776_v32  ;;  %v13571_v19 = vld [vmem:[#allocation6 + $0xf48] sm:$0xf0] }
 0xb5d   :  { %v6950_v15 = vpop.f32.mrf.mxu0 }
 0xb5e   :  { %v6951_v36 = vadd.f32 %v6950_v15, %v6775_v9  ;;  %v6995_v39 = vmax.f32 %v6963_v12, 0.0  ;;  %v15610_v9 = vld [vmem:[#allocation6 + $0xf54] sm:$0xf]  ;;  %v15608_v15 = vld [vmem:[#allocation6 + $0xf44] sm:$0xf]  ;;  %v7230_v12 = vperm.slane %v16472_v13, 0 }
 0xb5f   :  { %v13582_v34 = vor.u32 %v15610_v9, %v13579_v10  ;;  %v13657_v9 = vld [vmem:[#allocation6 + $0xff0] sm:$0xf]  ;;  %v15630_v10 = vld [vmem:[#allocation6 + $0xff4] sm:$0xf] }
 0xb61   :  { %v6990_v5 = vpop.f32.mrf.mxu3 }
 0xb62   :  { %v6991_v45 = vadd.f32 %v6990_v5, %v6977_v40  ;;  %v15604_v40 = vld [vmem:[#allocation6 + $0xf24] sm:$0xf] }
 0xb63   :  { %v6964_v42 = vpop.f32.mrf.mxu1  ;;  %v6978_v24 = vpop.f32.mrf.mxu2 }
 0xb64   :  { %v6965_v50 = vadd.f32 %v6964_v42, %v6951_v36  ;;  %v6979_v25 = vadd.f32 %v6978_v24, %v6776_v32  ;;  %v6996_v2 = vmax.f32 %v6991_v45, 0.0  ;;  %v13574_v32 = vor.u32 %v15608_v15, %v13571_v19  ;;  %v15606_v36 = vld [vmem:[#allocation6 + $0xf34] sm:$0xf]  ;;  %v13563_v42 = vld [vmem:[#allocation6 + $0xf38] sm:$0xf0] }
 0xb65   :  { %v13566_v37 = vor.u32 %v15606_v36, %v13563_v42  ;;  %v13649_v19 = vld [vmem:[#allocation6 + $0xfe0] sm:$0xf]  ;;  %v13641_v42 = vld [vmem:[#allocation6 + $0xfd0] sm:$0xf] }
 0xb66   :  { %v6997_v41 = vmax.f32 %v6965_v50, 0.0 }
 0xb68   :  { %v6999_v62 = vpack.c.bf16 %v6997_v41, %v6995_v39  ;;  %v13555_v41 = vld [vmem:[#allocation6 + $0xf28] sm:$0xf0] }
 0xb69   :  { %v6992_v35 = vpop.f32.mrf.mxu3 }
 0xb6a   :  { %v6993_v22 = vadd.f32 %v6992_v35, %v6979_v25  ;;  %7143 = vmatmul.bf16.vlgmr.msrb.gmra.mxu0 %v6999_v62  ;;  %v13558_v62 = vor.u32 %v15604_v40, %v13555_v41  ;;  %v13547_v35 = vld [vmem:[#allocation6 + $0xf18] sm:$0xf0]  ;;  %v13633_v40 = vld [vmem:[#allocation6 + $0xfc0] sm:$0xf]  ;;  %v15625_v41 = vld [vmem:[#allocation6 + $0xfc4] sm:$0xf0] }
 0xb6b   :  { %v7403_v61 = vpop.f32.mrf.mxu2  ;;  %7684 = vmatpush.bf16.msrb.mxu0 %v13598_v49 }
 0xb6c   :  { %v6998_v23 = vmax.f32 %v6993_v22, 0.0  ;;  %v7404_v50 = vadd.f32 %v7403_v61, %v7230_v12  ;;  %v15600_v61 = vld [vmem:[#allocation6 + $0xf04] sm:$0xf] }
 0xb6e   :  { %v7000_v57 = vpack.c.bf16 %v6998_v23, %v6996_v2  ;;  %v13539_v2 = vld [vmem:[#allocation6 + $0xf08] sm:$0xf0] }
 0xb6f   :  { %7685 = vmatpush.bf16.msrb.mxu0 %v13590_v52  ;;  %v13550_v52 = vor.u32 %v15602_v46, %v13547_v35  ;;  %v13542_v23 = vor.u32 %v15600_v61, %v13539_v2  ;;  %v15623_v46 = vld [vmem:[#allocation6 + $0xfb4] sm:$0xf0]  ;;  %v15622_v35 = vld [vmem:[#allocation6 + $0xfb4] sm:$0xf]  ;;  %v13617_v2 = vld [vmem:[#allocation6 + $0xfa0] sm:$0xf] }
 0xb70   :  { %7157 = vmatmul.bf16.vlgmr.msrb.gmra.mxu1 %v7000_v57 }
 0xb71   :  { %v7417_v5 = vpop.f32.mrf.mxu3 }
 0xb72   :  { %v7418_v38 = vadd.f32 %v7417_v5, %v7404_v50  ;;  %v15629_v5 = vld [vmem:[#allocation6 + $0xfe4] sm:$0xf0]  ;;  %v15626_v50 = vld [vmem:[#allocation6 + $0xfd4] sm:$0xf] }
 0xb73   :  { %7686 = vmatpush.bf16.msrb.mxu0 %v13582_v34  ;;  %v7405_v24 = vpop.f32.mrf.mxu2  ;;  %v13659_v34 = vld [vmem:[#allocation6 + $0xff8] sm:$0xf0] }
 0xb74   :  { %v7406_v39 = vadd.f32 %v7405_v24, %v7230_v12  ;;  %v7450_v25 = vmax.f32 %v7418_v38, 0.0  ;;  %v13662_v15 = vor.u32 %v15630_v10, %v13659_v34  ;;  %v15628_v12 = vld [vmem:[#allocation6 + $0xfe4] sm:$0xf]  ;;  %v15627_v24 = vld [vmem:[#allocation6 + $0xfd4] sm:$0xf0] }
 0xb75   :  { %v13643_v38 = vld [vmem:[#allocation6 + $0xfd8] sm:$0xf0]  ;;  %v13619_v10 = vld [vmem:[#allocation6 + $0xfa8] sm:$0xf0]  ;;  %v13609_v34 = vld [vmem:[#allocation6 + $0xf90] sm:$0xf] }
 0xb76   :  { %7698 = vmatpush.bf16.msrb.mxu1 %v13662_v15  ;;  %v15619_v15 = vld [vmem:[#allocation6 + $0xf94] sm:$0xf0] }
 0xb77   :  { %7687 = vmatpush.bf16.msrb.mxu0 %v13574_v32  ;;  %v13650_v32 = vor.u32 %v15629_v5, %v13649_v19  ;;  %v15618_v19 = vld [vmem:[#allocation6 + $0xf94] sm:$0xf]  ;;  %v13610_v5 = vor.u32 %v15619_v15, %v13609_v34 }
 0xb79   :  { %v7419_v49 = vpop.f32.mrf.mxu3 }
 0xb7a   :  { %v7420_v45 = vadd.f32 %v7419_v49, %v7406_v39  ;;  %7430 = vmatmul.bf16.vlgmr.msra.gmra.mxu0 %v16295_v16  ;;  %v15631_v16 = vld [vmem:[#allocation6 + $0xff4] sm:$0xf0]  ;;  %v13646_v39 = vor.u32 %v15626_v50, %v13643_v38  ;;  %v15624_v49 = vld [vmem:[#allocation6 + $0xfc4] sm:$0xf]  ;;  %v13603_v38 = vld [vmem:[#allocation6 + $0xf88] sm:$0xf0] }
 0xb7b   :  { %7688 = vmatpush.bf16.msrb.mxu0 %v13566_v37  ;;  %v13658_v57 = vor.u32 %v15631_v16, %v13657_v9  ;;  %v13642_v37 = vor.u32 %v15627_v24, %v13641_v42  ;;  %v15620_v9 = vld [vmem:[#allocation6 + $0xfa4] sm:$0xf]  ;;  %v15617_v42 = vld [vmem:[#allocation6 + $0xf84] sm:$0xf0]  ;;  %v15925_v24 = vld [vmem:[#allocation10 + $0x5] ss:$0 sm:$0xff] }
 0xb7c   :  { %v7452_v33 = vmax.f32 %v7420_v45, 0.0  ;;  %v13634_v45 = vor.u32 %v15625_v41, %v13633_v40 }
 0xb7d   :  { %7670 = vmatpush.bf16.msra.mxu3 %v13658_v57  ;;  %v13622_v57 = vor.u32 %v15620_v9, %v13619_v10 }
 0xb7e   :  { %v7454_v22 = vpack.c.bf16 %v7452_v33, %v7450_v25  ;;  %v13625_v33 = vld [vmem:[#allocation6 + $0xfb0] sm:$0xf] }
 0xb7f   :  { %7689 = vmatpush.bf16.msrb.mxu0 %v13558_v62  ;;  %v13635_v62 = vld [vmem:[#allocation6 + $0xfc8] sm:$0xf0] }
 0xb80   :  { %7444 = vmatmul.bf16.vlgmr.msra.gmra.mxu1 %v16297_v21  ;;  %7664 = vmatmul.bf16.vlgmr.msra.gmra.mxu2 %v7454_v22  ;;  %v13651_v21 = vld [vmem:[#allocation6 + $0xfe8] sm:$0xf0]  ;;  %v13638_v25 = vor.u32 %v15624_v49, %v13635_v62 }
 0xb81   :  { %v13654_v36 = vor.u32 %v15628_v12, %v13651_v21  ;;  %7671 = vmatpush.bf16.msra.mxu3 %v13650_v32  ;;  %v13611_v12 = vld [vmem:[#allocation6 + $0xf98] sm:$0xf0] }
 0xb82   :  { %v13614_v32 = vor.u32 %v15618_v19, %v13611_v12  ;;  %v15662_v12 = vld [vmem:[#allocation6 + $0x18f4] sm:$0xf] }
 0xb83   :  { %7690 = vmatpush.bf16.msrb.mxu0 %v13550_v52  ;;  %7699 = vmatpush.bf16.msrb.mxu1 %v13654_v36  ;;  %v13627_v52 = vld [vmem:[#allocation6 + $0xfb8] sm:$0xf0]  ;;  %v13601_v36 = vld [vmem:[#allocation6 + $0xf80] sm:$0xf] }
 0xb84   :  { %v13630_v61 = vor.u32 %v15622_v35, %v13627_v52  ;;  %v13602_v50 = vor.u32 %v15617_v42, %v13601_v36  ;;  %v15660_v36 = vld [vmem:[#allocation6 + $0x18e4] sm:$0xf]  ;;  %v13779_v42 = vld [vmem:[#allocation6 + $0x18e8] sm:$0xf0] }
 0xb85   :  { %7672 = vmatpush.bf16.msra.mxu3 %v13642_v37  ;;  %v15616_v37 = vld [vmem:[#allocation6 + $0xf84] sm:$0xf] }
 0xb87   :  { %7691 = vmatpush.bf16.msrb.mxu0 %v13542_v23  ;;  %7700 = vmatpush.bf16.msrb.mxu1 %v13646_v39  ;;  %v15621_v23 = vld [vmem:[#allocation6 + $0xfa4] sm:$0xf0]  ;;  %v13606_v39 = vor.u32 %v15616_v37, %v13603_v38  ;;  %v15658_v38 = vld [vmem:[#allocation6 + $0x18d4] sm:$0xf] }
 0xb88   :  { %v13618_v16 = vor.u32 %v15621_v23, %v13617_v2  ;;  %v7231_v2 = vperm.slane %v16472_v13, 1  ;;  %v13723_v13 = vld [vmem:[#allocation6 + $0x1878] sm:$0xf0] }
 0xb89   :  { %7673 = vmatpush.bf16.msra.mxu3 %v13634_v45 }
 0xb8a   :  { %7692 = vmatmul.bf16.vlgmr.msrb.gmra.mxu0 %v7454_v22  ;;  %v13626_v22 = vor.u32 %v15623_v46, %v13625_v33 }
 0xb8b   :  { %7701 = vmatpush.bf16.msrb.mxu1 %v13638_v25 }
 0xb8d   :  { %7674 = vmatpush.bf16.msra.mxu3 %v13626_v22 }
 0xb8f   :  { %7702 = vmatpush.bf16.msrb.mxu1 %v13630_v61 }
 0xb91   :  { %7675 = vmatpush.bf16.msra.mxu3 %v13618_v16 }
 0xb93   :  { %7703 = vmatpush.bf16.msrb.mxu1 %v13622_v57 }
 0xb95   :  { %7676 = vmatpush.bf16.msra.mxu3 %v13610_v5 }
 0xb97   :  { %7704 = vmatpush.bf16.msrb.mxu1 %v13614_v32  ;;  %v13787_v32 = vld [vmem:[#allocation6 + $0x18f8] sm:$0xf0] }
 0xb99   :  { %7677 = vmatpush.bf16.msra.mxu3 %v13602_v50  ;;  %v15646_v50 = vld [vmem:[#allocation6 + $0x1874] sm:$0xf] }
 0xb9a   :  { %v13726_v37 = vor.u32 %v15646_v50, %v13723_v13  ;;  %v13699_v50 = vld [vmem:[#allocation6 + $0x1848] sm:$0xf0]  ;;  %v15659_v13 = vld [vmem:[#allocation6 + $0x18d4] sm:$0xf0] }
 0xb9b   :  { %7705 = vmatpush.bf16.msrb.mxu1 %v13606_v39  ;;  %v13771_v39 = vld [vmem:[#allocation6 + $0x18d8] sm:$0xf0] }
 0xb9c   :  { %7946 = vmatpush.bf16.msra.mxu0 %v13726_v37 }
 0xbe7   :  { %v7144_v21 = vpop.f32.mrf.mxu0 }
 0xbe8   :  { %v7145_v40 = vadd.f32 %v15925_v24, %v7144_v21  ;;  %v13790_v21 = vor.u32 %v15662_v12, %v13787_v32  ;;  %v13721_v12 = vld [vmem:[#allocation6 + $0x1870] sm:$0xf]  ;;  %v15647_v32 = vld [vmem:[#allocation6 + $0x1874] sm:$0xf0] }
 0xbea   :  { %7960 = vmatpush.bf16.msra.mxu1 %v13790_v21 }
 0xbed   :  { %v7158_v41 = vpop.f32.mrf.mxu1 }
 0xbee   :  { %v16483_v45 = vadd.f32 %v7158_v41, %v7145_v40  ;;  %v15644_v40 = vld [vmem:[#allocation6 + $0x1864] sm:$0xf]  ;;  %v13774_v41 = vor.u32 %v15658_v38, %v13771_v39  ;;  %v13713_v38 = vld [vmem:[#allocation6 + $0x1860] sm:$0xf]  ;;  %v15645_v39 = vld [vmem:[#allocation6 + $0x1864] sm:$0xf0] }
 0xbef   :  { %v7146_v62 = vpop.f32.mrf.mxu0 }
 0xbf0   :  { %v16488_v25 = vsel %vm16479_vm15, %v16483_v45, -inf  ;;  %v7147_v33 = vadd.f32 %v15925_v24, %v7146_v62  ;;  %v13782_v24 = vor.u32 %v15660_v36, %v13779_v42  ;;  %v13715_v62 = vld [vmem:[#allocation6 + $0x1868] sm:$0xf0]  ;;  %v13722_v36 = vor.u32 %v15647_v32, %v13721_v12  ;;  %v13769_v42 = vld [vmem:[#allocation6 + $0x18d0] sm:$0xf] }
 0xbf1   :  { %7168 = vmax.xlane.f32.xlu1 %v16488_v25  ;;  %v15636_v12 = vld [vmem:[#allocation6 + $0x1824] sm:$0xf]  ;;  %v13683_v32 = vld [vmem:[#allocation6 + $0x1828] sm:$0xf0] }
 0xbf2   :  { %7961 = vmatpush.bf16.msra.mxu1 %v13782_v24  ;;  %v15640_v24 = vld [vmem:[#allocation6 + $0x1844] sm:$0xf]  ;;  %7918 = vmatpush.bf16.msrb.mxu2 %v13722_v36 }
 0xbf3   :  { %v15648_v36 = vld [vmem:[#allocation6 + $0x1884] sm:$0xf] }
 0xbf5   :  { %v7160_v46 = vpop.f32.mrf.mxu1 }
 0xbf6   :  { %v16491_v35 = vadd.f32 %v7160_v46, %v7147_v33  ;;  %v15656_v33 = vld [vmem:[#allocation6 + $0x18c4] sm:$0xf]  ;;  %v13763_v46 = vld [vmem:[#allocation6 + $0x18c8] sm:$0xf0]  ;;  %7962 = vmatpush.bf16.msra.mxu1 %v13774_v41 }
 0xbf7   :  { %v7431_v22 = vpop.f32.mrf.mxu0  ;;  %v13747_v41 = vld [vmem:[#allocation6 + $0x18a8] sm:$0xf0] }
 0xbf8   :  { %v16496_v52 = vsel %vm16479_vm15, %v16491_v35, -inf  ;;  %v7432_v9 = vadd.f32 %v7431_v22, %v7231_v2  ;;  %v13718_v22 = vor.u32 %v15644_v40, %v13715_v62  ;;  %v15652_v40 = vld [vmem:[#allocation6 + $0x18a4] sm:$0xf]  ;;  %v13770_v62 = vor.u32 %v15659_v13, %v13769_v42  ;;  %v13731_v42 = vld [vmem:[#allocation6 + $0x1888] sm:$0xf0] }
 0xbf9   :  { %7170 = vmax.xlane.f32.xlu2 %v16496_v52  ;;  %v13753_v13 = vld [vmem:[#allocation6 + $0x18b0] sm:$0xf] }
 0xbfa   :  { %7947 = vmatpush.bf16.msra.mxu0 %v13718_v22  ;;  %v15657_v22 = vld [vmem:[#allocation6 + $0x18c4] sm:$0xf0] }
 0xbfd   :  { %v7445_v61 = vpop.f32.mrf.mxu1 }
 0xbfe   :  { %v7446_v16 = vadd.f32 %v7445_v61, %v7432_v9  ;;  %v13785_v61 = vld [vmem:[#allocation6 + $0x18f0] sm:$0xf]  ;;  %v15642_v9 = vld [vmem:[#allocation6 + $0x1854] sm:$0xf] }
 0xbff   :  { %v7433_v23 = vpop.f32.mrf.mxu0 }
 0xc00   :  { %v7434_v10 = vadd.f32 %v7433_v23, %v7231_v2  ;;  %v7451_v15 = vmax.f32 %v7446_v16, 0.0  ;;  %v15663_v2 = vld [vmem:[#allocation6 + $0x18f4] sm:$0xf0]  ;;  %v13707_v16 = vld [vmem:[#allocation6 + $0x1858] sm:$0xf0] }
 0xc01   :  { %v13786_v23 = vor.u32 %v15663_v2, %v13785_v61  ;;  %v13710_v21 = vor.u32 %v15642_v9, %v13707_v16  ;;  %v13761_v61 = vld [vmem:[#allocation6 + $0x18c0] sm:$0xf]  ;;  %v13705_v2 = vld [vmem:[#allocation6 + $0x1850] sm:$0xf]  ;;  %v13691_v9 = vld [vmem:[#allocation6 + $0x1838] sm:$0xf0] }
 0xc02   :  { %v15643_v16 = vld [vmem:[#allocation6 + $0x1854] sm:$0xf0] }
 0xc03   :  { %7932 = vmatpush.bf16.msrb.mxu3 %v13786_v23  ;;  %7948 = vmatpush.bf16.msra.mxu0 %v13710_v21  ;;  %v15638_v23 = vld [vmem:[#allocation6 + $0x1834] sm:$0xf] }
 0xc05   :  { %v7447_v57 = vpop.f32.mrf.mxu1 }
 0xc06   :  { %v7448_v34 = vadd.f32 %v7447_v57, %v7434_v10  ;;  %v13766_v10 = vor.u32 %v15656_v33, %v13763_v46  ;;  %v15654_v57 = vld [vmem:[#allocation6 + $0x18b4] sm:$0xf]  ;;  %v13714_v33 = vor.u32 %v15645_v39, %v13713_v38  ;;  %v13702_v46 = vor.u32 %v15640_v24, %v13699_v50  ;;  %v13977_v39 = vld [vmem:[#allocation6 + $0x7f0] sm:$0xf] }
 0xc07   :  { %v13686_v24 = vor.u32 %v15636_v12, %v13683_v32  ;;  %v13734_v50 = vor.u32 %v15648_v36, %v13731_v42  ;;  %v13689_v12 = vld [vmem:[#allocation6 + $0x1830] sm:$0xf]  ;;  %v15639_v32 = vld [vmem:[#allocation6 + $0x1834] sm:$0xf0] }
 0xc08   :  { %v7453_v19 = vmax.f32 %v7448_v34, 0.0  ;;  %v13777_v34 = vld [vmem:[#allocation6 + $0x18e0] sm:$0xf]  ;;  %7963 = vmatpush.bf16.msra.mxu1 %v13766_v10  ;;  %7919 = vmatpush.bf16.msrb.mxu2 %v13714_v33  ;;  %v13706_v10 = vor.u32 %v15643_v16, %v13705_v2  ;;  %v13675_v33 = vld [vmem:[#allocation6 + $0x1818] sm:$0xf0]  ;;  %v13690_v36 = vor.u32 %v15639_v32, %v13689_v12 }
 0xc09   :  { %7949 = vmatpush.bf16.msra.mxu0 %v13702_v46  ;;  %v13697_v46 = vld [vmem:[#allocation6 + $0x1840] sm:$0xf]  ;;  %v15695_v42 = vld [vmem:[#allocation6 + $0x774] sm:$0xf0] }
 0xc0a   :  { %v7455_v5 = vpack.c.bf16 %v7453_v19, %v7451_v15  ;;  %v15661_v15 = vld [vmem:[#allocation6 + $0x18e4] sm:$0xf0]  ;;  %v13755_v19 = vld [vmem:[#allocation6 + $0x18b8] sm:$0xf0]  ;;  %v13969_v16 = vld [vmem:[#allocation6 + $0x7e0] sm:$0xf] }
 0xc0b   :  { %v13758_v37 = vor.u32 %v15654_v57, %v13755_v19  ;;  %v15650_v57 = vld [vmem:[#allocation6 + $0x1894] sm:$0xf]  ;;  %v13762_v19 = vor.u32 %v15657_v22, %v13761_v61  ;;  %v15641_v61 = vld [vmem:[#allocation6 + $0x1844] sm:$0xf0]  ;;  %v15691_v12 = vld [vmem:[#allocation6 + $0x754] sm:$0xf0] }
 0xc0c   :  { %7678 = vmatmul.bf16.vlgmr.msra.gmra.mxu3 %v7455_v5  ;;  %7706 = vmatmul.bf16.vlgmr.msrb.gmra.mxu1 %v7455_v5  ;;  %v13778_v5 = vor.u32 %v15661_v15, %v13777_v34  ;;  %v13750_v34 = vor.u32 %v15652_v40, %v13747_v41  ;;  %v13739_v15 = vld [vmem:[#allocation6 + $0x1898] sm:$0xf0]  ;;  %v15711_v40 = vld [vmem:[#allocation6 + $0x7f4] sm:$0xf0]  ;;  %v15634_v41 = vld [vmem:[#allocation6 + $0x1814] sm:$0xf]  ;;  %v13698_v2 = vor.u32 %v15641_v61, %v13697_v46 }
 0xc0d   :  { %7964 = vmatpush.bf16.msra.mxu1 %v13758_v37  ;;  %v13742_v21 = vor.u32 %v15650_v57, %v13739_v15  ;;  %7920 = vmatpush.bf16.msrb.mxu2 %v13706_v10  ;;  %v15655_v37 = vld [vmem:[#allocation6 + $0x18b4] sm:$0xf0]  ;;  %v13678_v22 = vor.u32 %v15634_v41, %v13675_v33  ;;  %v15709_v10 = vld [vmem:[#allocation6 + $0x7e4] sm:$0xf0]  ;;  %v15632_v57 = vld [vmem:[#allocation6 + $0x1804] sm:$0xf] }
 0xc0e   :  { %7933 = vmatpush.bf16.msrb.mxu3 %v13778_v5  ;;  %v13694_v5 = vor.u32 %v15638_v23, %v13691_v9  ;;  %v13754_v38 = vor.u32 %v15655_v37, %v13753_v13  ;;  %v13745_v23 = vld [vmem:[#allocation6 + $0x18a0] sm:$0xf]  ;;  %v15653_v9 = vld [vmem:[#allocation6 + $0x18a4] sm:$0xf0]  ;;  %v13667_v15 = vld [vmem:[#allocation6 + $0x1808] sm:$0xf0] }
 0xc0f   :  { %v15651_v13 = vld [vmem:[#allocation6 + $0x1894] sm:$0xf0]  ;;  %v13681_v41 = vld [vmem:[#allocation6 + $0x1820] sm:$0xf]  ;;  %v15693_v61 = vld [vmem:[#allocation6 + $0x764] sm:$0xf0] }
 0xc10   :  { %7950 = vmatpush.bf16.msra.mxu0 %v13694_v5  ;;  %v13670_v5 = vor.u32 %v15632_v57, %v13667_v15  ;;  %v13905_v33 = vld [vmem:[#allocation6 + $0x760] sm:$0xf]  ;;  %v13673_v57 = vld [vmem:[#allocation6 + $0x1810] sm:$0xf]  ;;  %v15635_v15 = vld [vmem:[#allocation6 + $0x1814] sm:$0xf0] }
 0xc11   :  { %7965 = vmatpush.bf16.msra.mxu1 %v13750_v34  ;;  %7921 = vmatpush.bf16.msrb.mxu2 %v13698_v2  ;;  %v13746_v34 = vor.u32 %v15653_v9, %v13745_v23  ;;  %v13729_v2 = vld [vmem:[#allocation6 + $0x1880] sm:$0xf]  ;;  %v15649_v23 = vld [vmem:[#allocation6 + $0x1884] sm:$0xf0] }
 0xc12   :  { %7934 = vmatpush.bf16.msrb.mxu3 %v13770_v62  ;;  %v13978_v62 = vor.u32 %v15711_v40, %v13977_v39  ;;  %v15707_v39 = vld [vmem:[#allocation6 + $0x7d4] sm:$0xf0]  ;;  %v13953_v9 = vld [vmem:[#allocation6 + $0x7c0] sm:$0xf] }
 0xc14   :  { %7951 = vmatpush.bf16.msra.mxu0 %v13686_v24 }
 0xc15   :  { %7966 = vmatpush.bf16.msra.mxu1 %v13742_v21  ;;  %v13913_v21 = vld [vmem:[#allocation6 + $0x770] sm:$0xf]  ;;  %7922 = vmatpush.bf16.msrb.mxu2 %v13690_v36  ;;  %v15703_v36 = vld [vmem:[#allocation6 + $0x7b4] sm:$0xf0] }
 0xc16   :  { %7935 = vmatpush.bf16.msrb.mxu3 %v13762_v19  ;;  %v13970_v19 = vor.u32 %v15709_v10, %v13969_v16  ;;  %v13914_v24 = vor.u32 %v15695_v42, %v13913_v21  ;;  %v13730_v16 = vor.u32 %v15649_v23, %v13729_v2  ;;  %v13945_v21 = vld [vmem:[#allocation6 + $0x7b0] sm:$0xf]  ;;  %v15699_v2 = vld [vmem:[#allocation6 + $0x794] sm:$0xf0]  ;;  %v13873_v23 = vld [vmem:[#allocation6 + $0x720] sm:$0xf] }
 0xc17   :  { %v13946_v42 = vor.u32 %v15703_v36, %v13945_v21  ;;  %v13857_v21 = vld [vmem:[#allocation6 + $0x700] sm:$0xf]  ;;  %v15681_v36 = vld [vmem:[#allocation6 + $0x704] sm:$0xf0] }
 0xc18   :  { %7952 = vmatpush.bf16.msra.mxu0 %v13678_v22  ;;  %v13906_v22 = vor.u32 %v15693_v61, %v13905_v33  ;;  %v13881_v33 = vld [vmem:[#allocation6 + $0x730] sm:$0xf] }
 0xc19   :  { %7967 = vmatpush.bf16.msra.mxu1 %v13734_v50  ;;  %v13737_v50 = vld [vmem:[#allocation6 + $0x1890] sm:$0xf] }
 0xc1a   :  { %7936 = vmatpush.bf16.msrb.mxu3 %v13754_v38  ;;  %v13738_v37 = vor.u32 %v15651_v13, %v13737_v50  ;;  %v13961_v38 = vld [vmem:[#allocation6 + $0x7d0] sm:$0xf]  ;;  %v15633_v50 = vld [vmem:[#allocation6 + $0x1804] sm:$0xf0]  ;;  %v13889_v13 = vld [vmem:[#allocation6 + $0x740] sm:$0xf] }
 0xc1b   :  { %v13962_v40 = vor.u32 %v15707_v39, %v13961_v38  ;;  %v15689_v38 = vld [vmem:[#allocation6 + $0x744] sm:$0xf0] }
 0xc1c   :  { %7953 = vmatpush.bf16.msra.mxu0 %v13670_v5  ;;  %v13674_v5 = vor.u32 %v15635_v15, %v13673_v57  ;;  %v13890_v39 = vor.u32 %v15689_v38, %v13889_v13  ;;  %v13865_v15 = vld [vmem:[#allocation6 + $0x710] sm:$0xf]  ;;  %v13858_v13 = vor.u32 %v15681_v36, %v13857_v21 }
 0xc1d   :  { %8387 = vmatpush.bf16.msrb.mxu1 %v13978_v62  ;;  %v15637_v62 = vld [vmem:[#allocation6 + $0x1824] sm:$0xf0] }
 0xc1e   :  { %7937 = vmatpush.bf16.msrb.mxu3 %v13746_v34  ;;  %v13682_v46 = vor.u32 %v15637_v62, %v13681_v41  ;;  %v15705_v34 = vld [vmem:[#allocation6 + $0x7c4] sm:$0xf0] }
 0xc1f   :  { %v13954_v10 = vor.u32 %v15705_v34, %v13953_v9  ;;  %v15701_v41 = vld [vmem:[#allocation6 + $0x7a4] sm:$0xf0]  ;;  %v13921_v34 = vld [vmem:[#allocation6 + $0x780] sm:$0xf] }
 0xc20   :  { %8373 = vmatpush.bf16.msrb.mxu0 %v13914_v24  ;;  %7923 = vmatpush.bf16.msrb.mxu2 %v13682_v46  ;;  %v13665_v24 = vld [vmem:[#allocation6 + $0x1800] sm:$0xf]  ;;  %v15687_v46 = vld [vmem:[#allocation6 + $0x734] sm:$0xf0] }
 0xc21   :  { %8388 = vmatpush.bf16.msrb.mxu1 %v13970_v19  ;;  %v13897_v19 = vld [vmem:[#allocation6 + $0x750] sm:$0xf]  ;;  %v13882_v61 = vor.u32 %v15687_v46, %v13881_v33 }
 0xc22   :  { %7938 = vmatpush.bf16.msrb.mxu3 %v13738_v37  ;;  %v13898_v32 = vor.u32 %v15691_v12, %v13897_v19  ;;  %v13666_v37 = vor.u32 %v15633_v50, %v13665_v24  ;;  %v15683_v19 = vld [vmem:[#allocation6 + $0x714] sm:$0xf0]  ;;  %v7665_v24 = vpop.f32.mrf.mxu2 }
 0xc24   :  { %8374 = vmatpush.bf16.msrb.mxu0 %v13906_v22  ;;  %7924 = vmatpush.bf16.msrb.mxu2 %v13674_v5  ;;  %v13929_v22 = vld [vmem:[#allocation6 + $0x790] sm:$0xf]  ;;  %v7693_v5 = vpop.f32.mrf.mxu0 }
 0xc25   :  { %8389 = vmatpush.bf16.msrb.mxu1 %v13962_v40  ;;  %v13937_v40 = vld [vmem:[#allocation6 + $0x7a0] sm:$0xf]  ;;  %v13930_v9 = vor.u32 %v15699_v2, %v13929_v22  ;;  %v15670_v22 = vld [vmem:[#allocation9 + $0x330] sm:$0xff] }
 0xc26   :  { %7939 = vmatpush.bf16.msrb.mxu3 %v13730_v16  ;;  %v13938_v62 = vor.u32 %v15701_v41, %v13937_v40  ;;  %v15685_v16 = vld [vmem:[#allocation6 + $0x724] sm:$0xf0]  ;;  %v15671_v40 = vld [vmem:[#allocation9 + $0x338] sm:$0xff] }
 0xc27   :  { %v13874_v57 = vor.u32 %v15685_v16, %v13873_v23  ;;  %v15679_v41 = vld [vmem:[#allocation9 + $0x378] sm:$0xff]  ;;  %v15678_v2 = vld [vmem:[#allocation9 + $0x370] sm:$0xff] }
 0xc28   :  { %8375 = vmatpush.bf16.msrb.mxu0 %v13898_v32  ;;  %7925 = vmatpush.bf16.msrb.mxu2 %v13666_v37  ;;  %v13866_v32 = vor.u32 %v15683_v19, %v13865_v15  ;;  %v15669_v15 = vld [vmem:[#allocation9 + $0x328] sm:$0xff] }
 0xc29   :  { %8390 = vmatpush.bf16.msrb.mxu1 %v13954_v10  ;;  %v15697_v10 = vld [vmem:[#allocation6 + $0x784] sm:$0xf0]  ;;  %v15677_v19 = vld [vmem:[#allocation9 + $0x368] sm:$0xff] }
 0xc2a   :  { %v13922_v12 = vor.u32 %v15697_v10, %v13921_v34  ;;  %8128 = vmatpush.bf16.msra.mxu3 %v15679_v41  ;;  %v7667_v16 = vpop.f32.mrf.mxu2  ;;  %v15674_v41 = vld [vmem:[#allocation9 + $0x350] sm:$0xff] }
 0xc2c   :  { %8376 = vmatpush.bf16.msrb.mxu0 %v13890_v39  ;;  %v7695_v38 = vpop.f32.mrf.mxu0  ;;  %8114 = vmatpush.bf16.msra.mxu2 %v15671_v40  ;;  %v15666_v40 = vld [vmem:[#allocation9 + $0x310] sm:$0xff] }
 0xc2d   :  { %8391 = vmatpush.bf16.msrb.mxu1 %v13946_v42  ;;  %v7490_v42 = vld [vmem:[#allocation7 + $0x1e] sm:$0x3] }
 0xc2e   :  { %v7493_v37 = vperm.slane %v7490_v42, 1  ;;  %v7492_v33 = vperm.slane %v7490_v42, 0  ;;  %8129 = vmatpush.bf16.msra.mxu3 %v15678_v2  ;;  %v15668_v42 = vld [vmem:[#allocation9 + $0x320] sm:$0xff]  ;;  %v15673_v2 = vld [vmem:[#allocation9 + $0x348] sm:$0xff] }
 0xc30   :  { %8377 = vmatpush.bf16.msrb.mxu0 %v13882_v61  ;;  %v7694_v39 = vadd.f32 %v7693_v5, %v7493_v37  ;;  %v7696_v46 = vadd.f32 %v7695_v38, %v7493_v37  ;;  %v7666_v34 = vadd.f32 %v7665_v24, %v7492_v33  ;;  %8115 = vmatpush.bf16.msra.mxu2 %v15670_v22  ;;  %v15667_v38 = vld [vmem:[#allocation9 + $0x318] sm:$0xff] }
 0xc31   :  { %8392 = vmatpush.bf16.msrb.mxu1 %v13938_v62  ;;  %v7668_v5 = vadd.f32 %v7667_v16, %v7492_v33  ;;  %v15664_v33 = vld [vmem:[#allocation9 + $0x300] sm:$0xff] }
 0xc32   :  { %8130 = vmatpush.bf16.msra.mxu3 %v15677_v19  ;;  %v14041_v19 = vld [vmem:[#allocation6 + $0x1070] sm:$0xf] }
 0xc34   :  { %8378 = vmatpush.bf16.msrb.mxu0 %v13874_v57  ;;  %8116 = vmatpush.bf16.msra.mxu2 %v15669_v15 }
 0xc35   :  { %8393 = vmatpush.bf16.msrb.mxu1 %v13930_v9 }
 0xc38   :  { %8379 = vmatpush.bf16.msrb.mxu0 %v13866_v32  ;;  %8117 = vmatpush.bf16.msra.mxu2 %v15668_v42  ;;  %v15708_v42 = vld [vmem:[#allocation6 + $0x7e4] sm:$0xf] }
 0xc39   :  { %8394 = vmatpush.bf16.msrb.mxu1 %v13922_v12 }
 0xc3c   :  { %8380 = vmatpush.bf16.msrb.mxu0 %v13858_v13  ;;  %8118 = vmatpush.bf16.msra.mxu2 %v15667_v38  ;;  %v15688_v38 = vld [vmem:[#allocation6 + $0x744] sm:$0xf] }
 0xc40   :  { %8119 = vmatpush.bf16.msra.mxu2 %v15666_v40  ;;  %v13891_v40 = vld [vmem:[#allocation6 + $0x748] sm:$0xf0] }
 0xc89   :  { %v7707_v50 = vpop.f32.mrf.mxu1 }
 0xc8a   :  { %v7708_v61 = vadd.f32 %v7707_v50, %v7694_v39  ;;  %v15676_v50 = vld [vmem:[#allocation9 + $0x360] sm:$0xff]  ;;  %v15675_v39 = vld [vmem:[#allocation9 + $0x358] sm:$0xff] }
 0xc8b   :  { %8131 = vmatpush.bf16.msra.mxu3 %v15676_v50  ;;  %v13971_v50 = vld [vmem:[#allocation6 + $0x7e8] sm:$0xf0] }
 0xc8c   :  { %v7713_v10 = vmax.f32 %v7708_v61, 0.0  ;;  %v13915_v61 = vld [vmem:[#allocation6 + $0x778] sm:$0xf0] }
 0xc8f   :  { %v7679_v62 = vpop.f32.mrf.mxu3  ;;  %8132 = vmatpush.bf16.msra.mxu3 %v15675_v39 }
 0xc90   :  { %v7680_v12 = vadd.f32 %v7679_v62, %v7666_v34  ;;  %v15665_v62 = vld [vmem:[#allocation9 + $0x308] sm:$0xff]  ;;  %v15672_v34 = vld [vmem:[#allocation9 + $0x340] sm:$0xff] }
 0xc91   :  { %v7709_v23 = vpop.f32.mrf.mxu1  ;;  %8120 = vmatpush.bf16.msra.mxu2 %v15665_v62  ;;  %v15706_v62 = vld [vmem:[#allocation6 + $0x7d4] sm:$0xf] }
 0xc92   :  { %v7710_v9 = vadd.f32 %v7709_v23, %v7696_v46  ;;  %v7712_v13 = vmax.f32 %v7680_v12, 0.0  ;;  %v15694_v46 = vld [vmem:[#allocation6 + $0x774] sm:$0xf]  ;;  %v15692_v23 = vld [vmem:[#allocation6 + $0x764] sm:$0xf] }
 0xc93   :  { %8133 = vmatpush.bf16.msra.mxu3 %v15674_v41  ;;  %v13918_v22 = vor.u32 %v15694_v46, %v13915_v61  ;;  %v15690_v12 = vld [vmem:[#allocation6 + $0x754] sm:$0xf]  ;;  %v13894_v41 = vor.u32 %v15688_v38, %v13891_v40  ;;  %v14025_v46 = vld [vmem:[#allocation6 + $0x1050] sm:$0xf] }
 0xc94   :  { %v7715_v57 = vmax.f32 %v7710_v9, 0.0  ;;  %v13907_v9 = vld [vmem:[#allocation6 + $0x768] sm:$0xf0] }
 0xc95   :  { %8121 = vmatpush.bf16.msra.mxu2 %v15664_v33  ;;  %v13910_v16 = vor.u32 %v15692_v23, %v13907_v9  ;;  %v13963_v33 = vld [vmem:[#allocation6 + $0x7d8] sm:$0xf0] }
 0xc96   :  { %v7717_v32 = vpack.c.bf16 %v7715_v57, %v7713_v10  ;;  %v15710_v10 = vld [vmem:[#allocation6 + $0x7f4] sm:$0xf]  ;;  %v13979_v57 = vld [vmem:[#allocation6 + $0x7f8] sm:$0xf0]  ;;  %v13966_v61 = vor.u32 %v15706_v62, %v13963_v33  ;;  %v13939_v62 = vld [vmem:[#allocation6 + $0x7a8] sm:$0xf0] }
 0xc97   :  { %v7681_v21 = vpop.f32.mrf.mxu3  ;;  %8134 = vmatpush.bf16.msra.mxu3 %v15673_v2  ;;  %v13982_v15 = vor.u32 %v15710_v10, %v13979_v57  ;;  %v15686_v2 = vld [vmem:[#allocation6 + $0x734] sm:$0xf]  ;;  %v13883_v23 = vld [vmem:[#allocation6 + $0x738] sm:$0xf0]  ;;  %v13955_v10 = vld [vmem:[#allocation6 + $0x7c8] sm:$0xf0] }
 0xc98   :  { %v7682_v36 = vadd.f32 %v7681_v21, %v7668_v5  ;;  %7940 = vmatmul.bf16.vlgmr.msrb.gmra.mxu3 %v7717_v32  ;;  %7968 = vmatmul.bf16.vlgmr.msra.gmra.mxu1 %v7717_v32  ;;  %v15727_v5 = vld [vmem:[#allocation6 + $0x1074] sm:$0xf0]  ;;  %v13899_v21 = vld [vmem:[#allocation6 + $0x758] sm:$0xf0]  ;;  %v14017_v57 = vld [vmem:[#allocation6 + $0x1040] sm:$0xf] }
 0xc99   :  { %v14042_v32 = vor.u32 %v15727_v5, %v14041_v19  ;;  %v15721_v19 = vld [vmem:[#allocation6 + $0x1044] sm:$0xf0]  ;;  %v15684_v5 = vld [vmem:[#allocation6 + $0x724] sm:$0xf]  ;;  %v14001_v33 = vld [vmem:[#allocation6 + $0x1020] sm:$0xf] }
 0xc9a   :  { %v7714_v37 = vmax.f32 %v7682_v36, 0.0  ;;  %v13902_v36 = vor.u32 %v15690_v12, %v13899_v21  ;;  %v13875_v12 = vld [vmem:[#allocation6 + $0x728] sm:$0xf0] }
 0xc9b   :  { %8135 = vmatpush.bf16.msra.mxu3 %v15672_v34  ;;  %v15704_v34 = vld [vmem:[#allocation6 + $0x7c4] sm:$0xf]  ;;  %v13878_v21 = vor.u32 %v15684_v5, %v13875_v12 }
 0xc9c   :  { %v7716_v24 = vpack.c.bf16 %v7714_v37, %v7712_v13  ;;  %v14033_v13 = vld [vmem:[#allocation6 + $0x1060] sm:$0xf]  ;;  %v13974_v37 = vor.u32 %v15708_v42, %v13971_v50  ;;  %v13947_v42 = vld [vmem:[#allocation6 + $0x7b8] sm:$0xf0]  ;;  %v15696_v12 = vld [vmem:[#allocation6 + $0x784] sm:$0xf] }
 0xc9e   :  { %7926 = vmatmul.bf16.vlgmr.msrb.gmra.mxu2 %v7716_v24  ;;  %7954 = vmatmul.bf16.vlgmr.msra.gmra.mxu0 %v7716_v24  ;;  %v15725_v24 = vld [vmem:[#allocation6 + $0x1064] sm:$0xf0] }
 0xc9f   :  { %8401 = vmatpush.bf16.msrb.mxu2 %v13918_v22  ;;  %8415 = vmatpush.bf16.msrb.mxu3 %v13982_v15  ;;  %v14034_v39 = vor.u32 %v15725_v24, %v14033_v13  ;;  %v15723_v22 = vld [vmem:[#allocation6 + $0x1054] sm:$0xf0]  ;;  %v13958_v15 = vor.u32 %v15704_v34, %v13955_v10  ;;  %v14009_v13 = vld [vmem:[#allocation6 + $0x1030] sm:$0xf]  ;;  %v15682_v24 = vld [vmem:[#allocation6 + $0x714] sm:$0xf] }
 0xca0   :  { %8635 = vmatpush.bf16.msra.mxu0 %v14042_v32  ;;  %v14026_v9 = vor.u32 %v15723_v22, %v14025_v46  ;;  %v14018_v32 = vor.u32 %v15721_v19, %v14017_v57  ;;  %v15680_v22 = vld [vmem:[#allocation6 + $0x704] sm:$0xf]  ;;  %v13931_v34 = vld [vmem:[#allocation6 + $0x798] sm:$0xf0]  ;;  %v13993_v10 = vld [vmem:[#allocation6 + $0x1010] sm:$0xf] }
 0xca3   :  { %8402 = vmatpush.bf16.msrb.mxu2 %v13910_v16  ;;  %8416 = vmatpush.bf16.msrb.mxu3 %v13974_v37  ;;  %v13886_v16 = vor.u32 %v15686_v2, %v13883_v23  ;;  %v15719_v37 = vld [vmem:[#allocation6 + $0x1034] sm:$0xf0]  ;;  %v13859_v2 = vld [vmem:[#allocation6 + $0x708] sm:$0xf0] }
 0xca4   :  { %8636 = vmatpush.bf16.msra.mxu0 %v14034_v39  ;;  %v14010_v38 = vor.u32 %v15719_v37, %v14009_v13  ;;  %v13867_v39 = vld [vmem:[#allocation6 + $0x718] sm:$0xf0] }
 0xca5   :  { %v13870_v40 = vor.u32 %v15682_v24, %v13867_v39 }
 0xca7   :  { %8403 = vmatpush.bf16.msrb.mxu2 %v13902_v36  ;;  %8417 = vmatpush.bf16.msrb.mxu3 %v13966_v61  ;;  %v15702_v36 = vld [vmem:[#allocation6 + $0x7b4] sm:$0xf]  ;;  %v15717_v61 = vld [vmem:[#allocation6 + $0x1024] sm:$0xf0] }
 0xca8   :  { %8395 = vmatmul.bf16.vlgmr.msrb.gmra.mxu1 %v16305_v31  ;;  %8637 = vmatpush.bf16.msra.mxu0 %v14026_v9  ;;  %v13950_v50 = vor.u32 %v15702_v36, %v13947_v42  ;;  %v14002_v23 = vor.u32 %v15717_v61, %v14001_v33  ;;  %v13862_v9 = vor.u32 %v15680_v22, %v13859_v2  ;;  %v15713_v42 = vld [vmem:[#allocation6 + $0x1004] sm:$0xf0] }
 0xcab   :  { %8404 = vmatpush.bf16.msrb.mxu2 %v13894_v41  ;;  %8418 = vmatpush.bf16.msrb.mxu3 %v13958_v15  ;;  %v15700_v41 = vld [vmem:[#allocation6 + $0x7a4] sm:$0xf]  ;;  %v15715_v15 = vld [vmem:[#allocation6 + $0x1014] sm:$0xf0] }
 0xcac   :  { %8638 = vmatpush.bf16.msra.mxu0 %v14018_v32  ;;  %v13942_v46 = vor.u32 %v15700_v41, %v13939_v62  ;;  %v13994_v19 = vor.u32 %v15715_v15, %v13993_v10  ;;  %v13923_v32 = vld [vmem:[#allocation6 + $0x788] sm:$0xf0] }
 0xcad   :  { %v13926_v36 = vor.u32 %v15696_v12, %v13923_v32 }
 0xcae   :  { %8381 = vmatmul.bf16.vlgmr.msrb.gmra.mxu0 %v16303_v30 }
 0xcaf   :  { %8405 = vmatpush.bf16.msrb.mxu2 %v13886_v16  ;;  %8419 = vmatpush.bf16.msrb.mxu3 %v13950_v50  ;;  %v15698_v16 = vld [vmem:[#allocation6 + $0x794] sm:$0xf]  ;;  %v7752_v50 = vld [vmem:[#allocation7 + $0x30] sm:$0x3] }
 0xcb0   :  { %8639 = vmatpush.bf16.msra.mxu0 %v14010_v38  ;;  %v13934_v57 = vor.u32 %v15698_v16, %v13931_v34  ;;  %v7755_v24 = vperm.slane %v7752_v50, 1  ;;  %v7754_v62 = vperm.slane %v7752_v50, 0  ;;  %v16502_v34 = vld [vmem:[#allocation7 + $0xe] sm:$0x3] }
 0xcb3   :  { %8406 = vmatpush.bf16.msrb.mxu2 %v13878_v21  ;;  %8420 = vmatpush.bf16.msrb.mxu3 %v13942_v46  ;;  %v13985_v21 = vld [vmem:[#allocation6 + $0x1000] sm:$0xf] }
 0xcb4   :  { %8640 = vmatpush.bf16.msra.mxu0 %v14002_v23  ;;  %v13986_v13 = vor.u32 %v15713_v42, %v13985_v21  ;;  %v15726_v42 = vld [vmem:[#allocation6 + $0x1074] sm:$0xf] }
 0xcb7   :  { %8407 = vmatpush.bf16.msrb.mxu2 %v13870_v40  ;;  %8421 = vmatpush.bf16.msrb.mxu3 %v13934_v57 }
 0xcb8   :  { %8641 = vmatpush.bf16.msra.mxu0 %v13994_v19 }
 0xcbb   :  { %8408 = vmatpush.bf16.msrb.mxu2 %v13862_v9  ;;  %8422 = vmatpush.bf16.msrb.mxu3 %v13926_v36  ;;  %v8209_v36 = vperm.slane %v16502_v34, 0 }
 0xcbc   :  { %8642 = vmatpush.bf16.msra.mxu0 %v13986_v13 }
 0xd15   :  { %v7969_v5 = vpop.f32.mrf.mxu1 }
 0xd1b   :  { %v7955_v37 = vpop.f32.mrf.mxu0  ;;  %v7941_v38 = vpop.f32.mrf.mxu3 }
 0xd1c   :  { %v7956_v39 = vadd.f32 %v7955_v37, %v7755_v24 }
 0xd1d   :  { %v7971_v40 = vpop.f32.mrf.mxu1 }
 0xd1e   :  { %v7970_v46 = vadd.f32 %v7969_v5, %v7956_v39  ;;  %v14043_v5 = vld [vmem:[#allocation6 + $0x1078] sm:$0xf0] }
 0xd1f   :  { %v14046_v37 = vor.u32 %v15726_v42, %v14043_v5  ;;  %v14011_v42 = vld [vmem:[#allocation6 + $0x1038] sm:$0xf0]  ;;  %v14003_v5 = vld [vmem:[#allocation6 + $0x1028] sm:$0xf0] }
 0xd20   :  { %v7975_v23 = vmax.f32 %v7970_v46, 0.0 }
 0xd21   :  { %v7927_v41 = vpop.f32.mrf.mxu2 }
 0xd22   :  { %v7928_v22 = vadd.f32 %v7927_v41, %v7754_v62  ;;  %v14035_v41 = vld [vmem:[#allocation6 + $0x1068] sm:$0xf0] }
 0xd23   :  { %v7957_v33 = vpop.f32.mrf.mxu0  ;;  %v7943_v57 = vpop.f32.mrf.mxu3 }
 0xd24   :  { %v7958_v61 = vadd.f32 %v7957_v33, %v7755_v24  ;;  %v7942_v10 = vadd.f32 %v7941_v38, %v7928_v22  ;;  %v14027_v22 = vld [vmem:[#allocation6 + $0x1058] sm:$0xf0] }
 0xd25   :  { %v8396_v12 = vpop.f32.mrf.mxu1 }
 0xd26   :  { %v7972_v2 = vadd.f32 %v7971_v40, %v7958_v61  ;;  %v7974_v50 = vmax.f32 %v7942_v10, 0.0  ;;  %v15724_v40 = vld [vmem:[#allocation6 + $0x1064] sm:$0xf]  ;;  %v15722_v61 = vld [vmem:[#allocation6 + $0x1054] sm:$0xf] }
 0xd27   :  { %v14038_v33 = vor.u32 %v15724_v40, %v14035_v41  ;;  %v13987_v40 = vld [vmem:[#allocation6 + $0x1008] sm:$0xf0] }
 0xd28   :  { %v7977_v9 = vmax.f32 %v7972_v2, 0.0 }
 0xd29   :  { %v7929_v16 = vpop.f32.mrf.mxu2 }
 0xd2a   :  { %v7979_v15 = vpack.c.bf16 %v7977_v9, %v7975_v23  ;;  %v7930_v19 = vadd.f32 %v7929_v16, %v7754_v62  ;;  %v14030_v9 = vor.u32 %v15722_v61, %v14027_v22  ;;  %v15741_v22 = vld [vmem:[#allocation6 + $0x10e4] sm:$0xf0] }
 0xd2b   :  { %v8382_v32 = vpop.f32.mrf.mxu0 }
 0xd2c   :  { %v7944_v21 = vadd.f32 %v7943_v57, %v7930_v19  ;;  %8136 = vmatmul.bf16.vlgmr.msra.gmra.mxu3 %v7979_v15  ;;  %v8383_v39 = vadd.f32 %v8382_v32, %v8209_v36  ;;  %v15720_v57 = vld [vmem:[#allocation6 + $0x1044] sm:$0xf]  ;;  %v14019_v15 = vld [vmem:[#allocation6 + $0x1048] sm:$0xf0] }
 0xd2d   :  { %v8398_v2 = vpop.f32.mrf.mxu1  ;;  %v14022_v32 = vor.u32 %v15720_v57, %v14019_v15  ;;  %v15739_v57 = vld [vmem:[#allocation6 + $0x10d4] sm:$0xf0]  ;;  %v15738_v15 = vld [vmem:[#allocation6 + $0x10d4] sm:$0xf] }
 0xd2e   :  { %v7976_v13 = vmax.f32 %v7944_v21, 0.0  ;;  %v8397_v62 = vadd.f32 %v8396_v12, %v8383_v39  ;;  %v15718_v21 = vld [vmem:[#allocation6 + $0x1034] sm:$0xf]  ;;  %v15712_v39 = vld [vmem:[#allocation6 + $0x1004] sm:$0xf] }
 0xd2f   :  { %v14014_v12 = vor.u32 %v15718_v21, %v14011_v42  ;;  %v13990_v41 = vor.u32 %v15712_v39, %v13987_v40  ;;  %v14081_v42 = vld [vmem:[#allocation6 + $0x10c0] sm:$0xf]  ;;  %v15734_v39 = vld [vmem:[#allocation6 + $0x10b4] sm:$0xf] }
 0xd30   :  { %v7978_v24 = vpack.c.bf16 %v7976_v13, %v7974_v50  ;;  %v8429_v16 = vmax.f32 %v8397_v62, 0.0  ;;  %v15714_v13 = vld [vmem:[#allocation6 + $0x1014] sm:$0xf] }
 0xd32   :  { %8122 = vmatmul.bf16.vlgmr.msra.gmra.mxu2 %v7978_v24 }
 0xd33   :  { %v8384_v38 = vpop.f32.mrf.mxu0  ;;  %8663 = vmatpush.bf16.msra.mxu2 %v14046_v37  ;;  %v13995_v37 = vld [vmem:[#allocation6 + $0x1018] sm:$0xf0] }
 0xd34   :  { %v8385_v46 = vadd.f32 %v8384_v38, %v8209_v36  ;;  %v15716_v36 = vld [vmem:[#allocation6 + $0x1024] sm:$0xf]  ;;  %v13998_v24 = vor.u32 %v15714_v13, %v13995_v37  ;;  %v15743_v38 = vld [vmem:[#allocation6 + $0x10f4] sm:$0xf0]  ;;  %v14073_v37 = vld [vmem:[#allocation6 + $0x10b0] sm:$0xf] }
 0xd35   :  { %v14006_v50 = vor.u32 %v15716_v36, %v14003_v5  ;;  %v15736_v36 = vld [vmem:[#allocation6 + $0x10c4] sm:$0xf] }
 0xd36   :  { %v8399_v23 = vadd.f32 %v8398_v2, %v8385_v46  ;;  %v14107_v46 = vld [vmem:[#allocation6 + $0x10f8] sm:$0xf0]  ;;  %v15740_v2 = vld [vmem:[#allocation6 + $0x10e4] sm:$0xf] }
 0xd37   :  { %8664 = vmatpush.bf16.msra.mxu2 %v14038_v33  ;;  %v15742_v33 = vld [vmem:[#allocation6 + $0x10f4] sm:$0xf] }
 0xd38   :  { %v8431_v10 = vmax.f32 %v8399_v23, 0.0  ;;  %v14110_v61 = vor.u32 %v15742_v33, %v14107_v46  ;;  %v15733_v33 = vld [vmem:[#allocation6 + $0x10a4] sm:$0xf0] }
 0xd3a   :  { %v8433_v19 = vpack.c.bf16 %v8431_v10, %v8429_v16  ;;  %8677 = vmatpush.bf16.msra.mxu3 %v14110_v61  ;;  %v14089_v10 = vld [vmem:[#allocation6 + $0x10d0] sm:$0xf]  ;;  %v14067_v61 = vld [vmem:[#allocation6 + $0x10a8] sm:$0xf0] }
 0xd3b   :  { %8665 = vmatpush.bf16.msra.mxu2 %v14030_v9  ;;  %v14099_v9 = vld [vmem:[#allocation6 + $0x10e8] sm:$0xf0] }
 0xd3c   :  { %8423 = vmatmul.bf16.vlgmr.msrb.gmra.mxu3 %v16305_v31  ;;  %8643 = vmatmul.bf16.vlgmr.msra.gmra.mxu0 %v8433_v19  ;;  %v14105_v31 = vld [vmem:[#allocation6 + $0x10f0] sm:$0xf]  ;;  %v14102_v16 = vor.u32 %v15740_v2, %v14099_v9  ;;  %v15731_v2 = vld [vmem:[#allocation6 + $0x1094] sm:$0xf0] }
 0xd3d   :  { %v14106_v62 = vor.u32 %v15743_v38, %v14105_v31  ;;  %v14065_v38 = vld [vmem:[#allocation6 + $0x10a0] sm:$0xf] }
 0xd3e   :  { %8678 = vmatpush.bf16.msra.mxu3 %v14102_v16  ;;  %v14066_v46 = vor.u32 %v15733_v33, %v14065_v38  ;;  %v14059_v16 = vld [vmem:[#allocation6 + $0x1098] sm:$0xf0] }
 0xd3f   :  { %8666 = vmatpush.bf16.msra.mxu2 %v14022_v32  ;;  %8649 = vmatpush.bf16.msra.mxu1 %v14106_v62  ;;  %v14091_v32 = vld [vmem:[#allocation6 + $0x10d8] sm:$0xf0]  ;;  %v15732_v62 = vld [vmem:[#allocation6 + $0x10a4] sm:$0xf] }
 0xd40   :  { %v14094_v21 = vor.u32 %v15738_v15, %v14091_v32  ;;  %v14049_v15 = vld [vmem:[#allocation6 + $0x1080] sm:$0xf]  ;;  %v15728_v32 = vld [vmem:[#allocation6 + $0x1084] sm:$0xf] }
 0xd42   :  { %8409 = vmatmul.bf16.vlgmr.msrb.gmra.mxu2 %v16303_v30  ;;  %v14097_v30 = vld [vmem:[#allocation6 + $0x10e0] sm:$0xf]  ;;  %8679 = vmatpush.bf16.msra.mxu3 %v14094_v21  ;;  %v15926_v21 = vld [vmem:[#allocation10 + $0x6] ss:$0 sm:$0xff] }
 0xd43   :  { %8667 = vmatpush.bf16.msra.mxu2 %v14014_v12  ;;  %v14098_v23 = vor.u32 %v15741_v22, %v14097_v30  ;;  %v15737_v12 = vld [vmem:[#allocation6 + $0x10c4] sm:$0xf0]  ;;  %v14070_v30 = vor.u32 %v15732_v62, %v14067_v61  ;;  %v14057_v22 = vld [vmem:[#allocation6 + $0x1090] sm:$0xf] }
 0xd44   :  { %v14082_v5 = vor.u32 %v15737_v12, %v14081_v42  ;;  %v14058_v9 = vor.u32 %v15731_v2, %v14057_v22  ;;  %v14051_v12 = vld [vmem:[#allocation6 + $0x1088] sm:$0xf0] }
 0xd45   :  { %8650 = vmatpush.bf16.msra.mxu1 %v14098_v23  ;;  %v15730_v23 = vld [vmem:[#allocation6 + $0x1094] sm:$0xf] }
 0xd47   :  { %8668 = vmatpush.bf16.msra.mxu2 %v14006_v50  ;;  %v14083_v50 = vld [vmem:[#allocation6 + $0x10c8] sm:$0xf0] }
 0xd48   :  { %v14086_v13 = vor.u32 %v15736_v36, %v14083_v50  ;;  %v14054_v36 = vor.u32 %v15728_v32, %v14051_v12 }
 0xd4a   :  { %8680 = vmatpush.bf16.msra.mxu3 %v14086_v13 }
 0xd4b   :  { %8669 = vmatpush.bf16.msra.mxu2 %v13998_v24  ;;  %v15735_v24 = vld [vmem:[#allocation6 + $0x10b4] sm:$0xf0] }
 0xd4c   :  { %v14074_v40 = vor.u32 %v15735_v24, %v14073_v37 }
 0xd4f   :  { %8670 = vmatpush.bf16.msra.mxu2 %v13990_v41  ;;  %v14075_v41 = vld [vmem:[#allocation6 + $0x10b8] sm:$0xf0] }
 0xd50   :  { %v14078_v31 = vor.u32 %v15734_v39, %v14075_v41 }
 0xd52   :  { %8671 = vmatmul.bf16.vlgmr.msra.gmra.mxu2 %v8433_v19  ;;  %v14090_v19 = vor.u32 %v15739_v57, %v14089_v10  ;;  %8681 = vmatpush.bf16.msra.mxu3 %v14078_v31  ;;  %v14062_v10 = vor.u32 %v15730_v23, %v14059_v16 }
 0xd54   :  { %8651 = vmatpush.bf16.msra.mxu1 %v14090_v19  ;;  %v15729_v19 = vld [vmem:[#allocation6 + $0x1084] sm:$0xf0] }
 0xd55   :  { %v14050_v42 = vor.u32 %v15729_v19, %v14049_v15  ;;  %v15758_v15 = vld [vmem:[#allocation6 + $0x1974] sm:$0xf]  ;;  %v14171_v19 = vld [vmem:[#allocation6 + $0x1978] sm:$0xf0] }
 0xd56   :  { %8682 = vmatpush.bf16.msra.mxu3 %v14070_v30  ;;  %v14174_v32 = vor.u32 %v15758_v15, %v14171_v19  ;;  %v15757_v15 = vld [vmem:[#allocation6 + $0x1964] sm:$0xf0]  ;;  %v14139_v19 = vld [vmem:[#allocation6 + $0x1938] sm:$0xf0] }
 0xd58   :  { %8652 = vmatpush.bf16.msra.mxu1 %v14082_v5  ;;  %8925 = vmatpush.bf16.msrb.mxu2 %v14174_v32 }
 0xd5a   :  { %8683 = vmatpush.bf16.msra.mxu3 %v14062_v10 }
 0xd5c   :  { %8653 = vmatpush.bf16.msra.mxu1 %v14074_v40 }
 0xd5e   :  { %8684 = vmatpush.bf16.msra.mxu3 %v14054_v36  ;;  %v15774_v36 = vld [vmem:[#allocation6 + $0x19f4] sm:$0xf] }
 0xd60   :  { %8654 = vmatpush.bf16.msra.mxu1 %v14066_v46  ;;  %v8210_v46 = vperm.slane %v16502_v34, 1  ;;  %v14235_v34 = vld [vmem:[#allocation6 + $0x19f8] sm:$0xf0] }
 0xd64   :  { %8655 = vmatpush.bf16.msra.mxu1 %v14058_v9 }
 0xd68   :  { %8656 = vmatpush.bf16.msra.mxu1 %v14050_v42  ;;  %v14163_v42 = vld [vmem:[#allocation6 + $0x1968] sm:$0xf0] }
 0xdaf   :  { %v8137_v57 = vpop.f32.mrf.mxu3 }
 0xdb5   :  { %v8123_v5 = vpop.f32.mrf.mxu2 }
 0xdb6   :  { %v8124_v50 = vadd.f32 %v15926_v21, %v8123_v5  ;;  %v14238_v5 = vor.u32 %v15774_v36, %v14235_v34  ;;  %v14153_v34 = vld [vmem:[#allocation6 + $0x1950] sm:$0xf] }
 0xdb7   :  { %v8139_v39 = vpop.f32.mrf.mxu3 }
 0xdb8   :  { %v16513_v37 = vadd.f32 %v8137_v57, %v8124_v50  ;;  %v15754_v50 = vld [vmem:[#allocation6 + $0x1954] sm:$0xf]  ;;  %8939 = vmatpush.bf16.msrb.mxu3 %v14238_v5  ;;  %v15768_v5 = vld [vmem:[#allocation6 + $0x19c4] sm:$0xf] }
 0xdba   :  { %v16518_v24 = vsel %vm16509_vm4, %v16513_v37, -inf }
 0xdbb   :  { %8147 = vmax.xlane.f32.xlu0 %v16518_v24 }
 0xdbd   :  { %v8125_v40 = vpop.f32.mrf.mxu2 }
 0xdbe   :  { %v8126_v41 = vadd.f32 %v15926_v21, %v8125_v40  ;;  %v15756_v21 = vld [vmem:[#allocation6 + $0x1964] sm:$0xf] }
 0xdbf   :  { %v8424_v33 = vpop.f32.mrf.mxu3  ;;  %v14166_v12 = vor.u32 %v15756_v21, %v14163_v42  ;;  %v15772_v40 = vld [vmem:[#allocation6 + $0x19e4] sm:$0xf]  ;;  %v14233_v21 = vld [vmem:[#allocation6 + $0x19f0] sm:$0xf]  ;;  %v15775_v42 = vld [vmem:[#allocation6 + $0x19f4] sm:$0xf0] }
 0xdc0   :  { %v16521_v31 = vadd.f32 %v8139_v39, %v8126_v41  ;;  %v14155_v39 = vld [vmem:[#allocation6 + $0x1958] sm:$0xf0]  ;;  %v14234_v36 = vor.u32 %v15775_v42, %v14233_v21  ;;  %v15771_v21 = vld [vmem:[#allocation6 + $0x19d4] sm:$0xf0] }
 0xdc1   :  { %8926 = vmatpush.bf16.msrb.mxu2 %v14166_v12  ;;  %v14158_v41 = vor.u32 %v15754_v50, %v14155_v39  ;;  %v14211_v50 = vld [vmem:[#allocation6 + $0x19c8] sm:$0xf0]  ;;  %v15755_v39 = vld [vmem:[#allocation6 + $0x1954] sm:$0xf0] }
 0xdc2   :  { %v16526_v38 = vsel %vm16509_vm4, %v16521_v31, -inf  ;;  %8911 = vmatpush.bf16.msrb.mxu1 %v14234_v36 }
 0xdc3   :  { %8149 = vmax.xlane.f32.xlu1 %v16526_v38 }
 0xdc5   :  { %v8410_v62 = vpop.f32.mrf.mxu2  ;;  %8927 = vmatpush.bf16.msrb.mxu2 %v14158_v41  ;;  %v14225_v41 = vld [vmem:[#allocation6 + $0x19e0] sm:$0xf] }
 0xdc6   :  { %v8411_v61 = vadd.f32 %v8410_v62, %v8210_v46  ;;  %v15752_v62 = vld [vmem:[#allocation6 + $0x1944] sm:$0xf] }
 0xdc7   :  { %v8426_v23 = vpop.f32.mrf.mxu3 }
 0xdc8   :  { %v8425_v22 = vadd.f32 %v8424_v33, %v8411_v61  ;;  %v14227_v33 = vld [vmem:[#allocation6 + $0x19e8] sm:$0xf0] }
 0xdc9   :  { %v14230_v61 = vor.u32 %v15772_v40, %v14227_v33  ;;  %v15773_v33 = vld [vmem:[#allocation6 + $0x19e4] sm:$0xf0] }
 0xdca   :  { %v8430_v16 = vmax.f32 %v8425_v22, 0.0  ;;  %v15759_v22 = vld [vmem:[#allocation6 + $0x1974] sm:$0xf0] }
 0xdcb   :  { %8940 = vmatpush.bf16.msrb.mxu3 %v14230_v61  ;;  %v15753_v61 = vld [vmem:[#allocation6 + $0x1944] sm:$0xf0] }
 0xdcd   :  { %v8412_v30 = vpop.f32.mrf.mxu2 }
 0xdce   :  { %v8413_v2 = vadd.f32 %v8412_v30, %v8210_v46  ;;  %v14147_v46 = vld [vmem:[#allocation6 + $0x1948] sm:$0xf0]  ;;  %v14169_v30 = vld [vmem:[#allocation6 + $0x1970] sm:$0xf] }
 0xdd0   :  { %v8427_v9 = vadd.f32 %v8426_v23, %v8413_v2  ;;  %v14170_v2 = vor.u32 %v15759_v22, %v14169_v30  ;;  %v15770_v23 = vld [vmem:[#allocation6 + $0x19d4] sm:$0xf]  ;;  %v14154_v30 = vor.u32 %v15755_v39, %v14153_v34  ;;  %v14226_v22 = vor.u32 %v15773_v33, %v14225_v41  ;;  %v15764_v34 = vld [vmem:[#allocation6 + $0x19a4] sm:$0xf]  ;;  %v14195_v39 = vld [vmem:[#allocation6 + $0x19a8] sm:$0xf0] }
 0xdd1   :  { %v14198_v41 = vor.u32 %v15764_v34, %v14195_v39  ;;  %v14137_v33 = vld [vmem:[#allocation6 + $0x1930] sm:$0xf]  ;;  %v14179_v34 = vld [vmem:[#allocation6 + $0x1988] sm:$0xf0] }
 0xdd2   :  { %v8432_v10 = vmax.f32 %v8427_v9, 0.0  ;;  %v14219_v9 = vld [vmem:[#allocation6 + $0x19d8] sm:$0xf0]  ;;  %8897 = vmatpush.bf16.msrb.mxu0 %v14170_v2  ;;  %v14214_v2 = vor.u32 %v15768_v5, %v14211_v50  ;;  %8912 = vmatpush.bf16.msrb.mxu1 %v14226_v22  ;;  %v15744_v5 = vld [vmem:[#allocation6 + $0x1904] sm:$0xf] }
 0xdd3   :  { %v14222_v12 = vor.u32 %v15770_v23, %v14219_v9  ;;  %v14217_v23 = vld [vmem:[#allocation6 + $0x19d0] sm:$0xf]  ;;  %v15766_v9 = vld [vmem:[#allocation6 + $0x19b4] sm:$0xf]  ;;  %v14115_v50 = vld [vmem:[#allocation6 + $0x1908] sm:$0xf0] }
 0xdd4   :  { %v8434_v57 = vpack.c.bf16 %v8432_v10, %v8430_v16  ;;  %v14150_v16 = vor.u32 %v15752_v62, %v14147_v46  ;;  %v15750_v10 = vld [vmem:[#allocation6 + $0x1934] sm:$0xf]  ;;  %v15748_v62 = vld [vmem:[#allocation6 + $0x1924] sm:$0xf]  ;;  %v14131_v46 = vld [vmem:[#allocation6 + $0x1928] sm:$0xf0] }
 0xdd5   :  { %v14142_v40 = vor.u32 %v15750_v10, %v14139_v19  ;;  %8941 = vmatpush.bf16.msrb.mxu3 %v14222_v12  ;;  %v14134_v42 = vor.u32 %v15748_v62, %v14131_v46  ;;  %v15746_v10 = vld [vmem:[#allocation6 + $0x1914] sm:$0xf]  ;;  %v14123_v19 = vld [vmem:[#allocation6 + $0x1918] sm:$0xf0]  ;;  %v15751_v62 = vld [vmem:[#allocation6 + $0x1934] sm:$0xf0] }
 0xdd6   :  { %8657 = vmatmul.bf16.vlgmr.msra.gmra.mxu1 %v8434_v57  ;;  %8685 = vmatmul.bf16.vlgmr.msra.gmra.mxu3 %v8434_v57  ;;  %v14161_v57 = vld [vmem:[#allocation6 + $0x1960] sm:$0xf]  ;;  %v14126_v12 = vor.u32 %v15746_v10, %v14123_v19  ;;  %v14138_v46 = vor.u32 %v15751_v62, %v14137_v33  ;;  %v15807_v22 = vld [vmem:[#allocation6 + $0x874] sm:$0xf0] }
 0xdd7   :  { %v14162_v32 = vor.u32 %v15757_v15, %v14161_v57  ;;  %8928 = vmatpush.bf16.msrb.mxu2 %v14150_v16  ;;  %v14145_v57 = vld [vmem:[#allocation6 + $0x1940] sm:$0xf]  ;;  %v14203_v15 = vld [vmem:[#allocation6 + $0x19b8] sm:$0xf0]  ;;  %v14218_v16 = vor.u32 %v15771_v21, %v14217_v23  ;;  %v15823_v33 = vld [vmem:[#allocation6 + $0x8f4] sm:$0xf0] }
 0xdd8   :  { %v14206_v36 = vor.u32 %v15766_v9, %v14203_v15  ;;  %v14209_v23 = vld [vmem:[#allocation6 + $0x19c0] sm:$0xf]  ;;  %v15769_v9 = vld [vmem:[#allocation6 + $0x19c4] sm:$0xf0] }
 0xdd9   :  { %8898 = vmatpush.bf16.msrb.mxu0 %v14162_v32  ;;  %v14146_v32 = vor.u32 %v15753_v61, %v14145_v57  ;;  %8942 = vmatpush.bf16.msrb.mxu3 %v14214_v2  ;;  %v15762_v2 = vld [vmem:[#allocation6 + $0x1994] sm:$0xf]  ;;  %v14187_v61 = vld [vmem:[#allocation6 + $0x1998] sm:$0xf0]  ;;  %v14210_v21 = vor.u32 %v15769_v9, %v14209_v23  ;;  %v14353_v10 = vld [vmem:[#allocation6 + $0x860] sm:$0xf] }
 0xdda   :  { %8913 = vmatpush.bf16.msrb.mxu1 %v14218_v16  ;;  %v14190_v15 = vor.u32 %v15762_v2, %v14187_v61  ;;  %v15749_v16 = vld [vmem:[#allocation6 + $0x1924] sm:$0xf0]  ;;  %v14345_v2 = vld [vmem:[#allocation6 + $0x850] sm:$0xf]  ;;  %v14193_v23 = vld [vmem:[#allocation6 + $0x19a0] sm:$0xf] }
 0xddb   :  { %8929 = vmatpush.bf16.msrb.mxu2 %v14142_v40  ;;  %v14118_v40 = vor.u32 %v15744_v5, %v14115_v50  ;;  %v14201_v5 = vld [vmem:[#allocation6 + $0x19b0] sm:$0xf]  ;;  %v15767_v50 = vld [vmem:[#allocation6 + $0x19b4] sm:$0xf0]  ;;  %v15765_v9 = vld [vmem:[#allocation6 + $0x19a4] sm:$0xf0] }
 0xddd   :  { %8899 = vmatpush.bf16.msrb.mxu0 %v14154_v30  ;;  %8943 = vmatpush.bf16.msrb.mxu3 %v14206_v36  ;;  %v14361_v30 = vld [vmem:[#allocation6 + $0x870] sm:$0xf]  ;;  %v15760_v36 = vld [vmem:[#allocation6 + $0x1984] sm:$0xf] }
 0xdde   :  { %v14362_v57 = vor.u32 %v15807_v22, %v14361_v30  ;;  %8914 = vmatpush.bf16.msrb.mxu1 %v14210_v21  ;;  %v15747_v30 = vld [vmem:[#allocation6 + $0x1914] sm:$0xf0]  ;;  %v14194_v21 = vor.u32 %v15765_v9, %v14193_v23  ;;  %v15817_v23 = vld [vmem:[#allocation6 + $0x8c4] sm:$0xf0] }
 0xddf   :  { %8930 = vmatpush.bf16.msrb.mxu2 %v14134_v42  ;;  %v14129_v42 = vld [vmem:[#allocation6 + $0x1920] sm:$0xf] }
 0xde0   :  { %v14130_v19 = vor.u32 %v15749_v16, %v14129_v42  ;;  %v15821_v42 = vld [vmem:[#allocation6 + $0x8e4] sm:$0xf0] }
 0xde1   :  { %8900 = vmatpush.bf16.msrb.mxu0 %v14146_v32  ;;  %8944 = vmatpush.bf16.msrb.mxu3 %v14198_v41  ;;  %v15805_v32 = vld [vmem:[#allocation6 + $0x864] sm:$0xf0]  ;;  %v14425_v41 = vld [vmem:[#allocation6 + $0x8f0] sm:$0xf] }
 0xde2   :  { %v14354_v39 = vor.u32 %v15805_v32, %v14353_v10  ;;  %v14426_v62 = vor.u32 %v15823_v33, %v14425_v41  ;;  %v14113_v10 = vld [vmem:[#allocation6 + $0x1900] sm:$0xf] }
 0xde3   :  { %8931 = vmatpush.bf16.msrb.mxu2 %v14126_v12  ;;  %v14182_v12 = vor.u32 %v15760_v36, %v14179_v34  ;;  %v14337_v32 = vld [vmem:[#allocation6 + $0x840] sm:$0xf]  ;;  %v15801_v34 = vld [vmem:[#allocation6 + $0x844] sm:$0xf0] }
 0xde5   :  { %8901 = vmatpush.bf16.msrb.mxu0 %v14138_v46  ;;  %8945 = vmatpush.bf16.msrb.mxu3 %v14190_v15  ;;  %v14121_v46 = vld [vmem:[#allocation6 + $0x1910] sm:$0xf]  ;;  %v14417_v15 = vld [vmem:[#allocation6 + $0x8e0] sm:$0xf] }
 0xde6   :  { %v14122_v22 = vor.u32 %v15747_v30, %v14121_v46  ;;  %v14418_v16 = vor.u32 %v15821_v42, %v14417_v15  ;;  %v15799_v46 = vld [vmem:[#allocation6 + $0x834] sm:$0xf0]  ;;  %v14321_v15 = vld [vmem:[#allocation6 + $0x820] sm:$0xf] }
 0xde7   :  { %8932 = vmatpush.bf16.msrb.mxu2 %v14118_v40  ;;  %v14202_v40 = vor.u32 %v15767_v50, %v14201_v5  ;;  %v15763_v5 = vld [vmem:[#allocation6 + $0x1994] sm:$0xf0]  ;;  %v14409_v50 = vld [vmem:[#allocation6 + $0x8d0] sm:$0xf] }
 0xde9   :  { %8902 = vmatpush.bf16.msrb.mxu0 %v14130_v19  ;;  %8946 = vmatpush.bf16.msrb.mxu3 %v14182_v12  ;;  %v15745_v19 = vld [vmem:[#allocation6 + $0x1904] sm:$0xf0]  ;;  %v14185_v12 = vld [vmem:[#allocation6 + $0x1990] sm:$0xf] }
 0xdea   :  { %8915 = vmatpush.bf16.msrb.mxu1 %v14202_v40  ;;  %v14114_v36 = vor.u32 %v15745_v19, %v14113_v10  ;;  %v14186_v41 = vor.u32 %v15763_v5, %v14185_v12  ;;  %v15819_v40 = vld [vmem:[#allocation6 + $0x8d4] sm:$0xf0]  ;;  %v15813_v12 = vld [vmem:[#allocation6 + $0x8a4] sm:$0xf0]  ;;  %v14305_v5 = vld [vmem:[#allocation6 + $0x800] sm:$0xf] }
 0xdeb   :  { %9352 = vmatpush.bf16.msra.mxu2 %v14362_v57  ;;  %v15803_v57 = vld [vmem:[#allocation6 + $0x854] sm:$0xf0]  ;;  %v14410_v33 = vor.u32 %v15819_v40, %v14409_v50  ;;  %v15793_v50 = vld [vmem:[#allocation6 + $0x804] sm:$0xf0]  ;;  %v14377_v40 = vld [vmem:[#allocation6 + $0x890] sm:$0xf] }
 0xdec   :  { %v14346_v61 = vor.u32 %v15803_v57, %v14345_v2  ;;  %v15761_v2 = vld [vmem:[#allocation6 + $0x1984] sm:$0xf0]  ;;  %v14401_v57 = vld [vmem:[#allocation6 + $0x8c0] sm:$0xf]  ;;  %v15815_v10 = vld [vmem:[#allocation6 + $0x8b4] sm:$0xf0] }
 0xded   :  { %9366 = vmatpush.bf16.msra.mxu3 %v14426_v62  ;;  %8903 = vmatpush.bf16.msrb.mxu0 %v14122_v22  ;;  %v14329_v62 = vld [vmem:[#allocation6 + $0x830] sm:$0xf]  ;;  %v14177_v22 = vld [vmem:[#allocation6 + $0x1980] sm:$0xf]  ;;  %v14402_v9 = vor.u32 %v15817_v23, %v14401_v57  ;;  %v15809_v57 = vld [vmem:[#allocation6 + $0x884] sm:$0xf0] }
 0xdee   :  { %8916 = vmatpush.bf16.msrb.mxu1 %v14194_v21  ;;  %v14330_v30 = vor.u32 %v15799_v46, %v14329_v62  ;;  %v15797_v21 = vld [vmem:[#allocation6 + $0x824] sm:$0xf0]  ;;  %v8644_v62 = vpop.f32.mrf.mxu0  ;;  %v14306_v46 = vor.u32 %v15793_v50, %v14305_v5 }
 0xdef   :  { %9353 = vmatpush.bf16.msra.mxu2 %v14354_v39  ;;  %v14338_v39 = vor.u32 %v15801_v34, %v14337_v32  ;;  %v14322_v42 = vor.u32 %v15797_v21, %v14321_v15  ;;  %v14313_v32 = vld [vmem:[#allocation6 + $0x810] sm:$0xf]  ;;  %v14385_v34 = vld [vmem:[#allocation6 + $0x8a0] sm:$0xf]  ;;  %v15790_v5 = vld [vmem:[#allocation9 + $0x3f0] sm:$0xff] }
 0xdf1   :  { %9367 = vmatpush.bf16.msra.mxu3 %v14418_v16  ;;  %8904 = vmatpush.bf16.msrb.mxu0 %v14114_v36  ;;  %v14393_v16 = vld [vmem:[#allocation6 + $0x8b0] sm:$0xf]  ;;  %v15795_v36 = vld [vmem:[#allocation6 + $0x814] sm:$0xf0] }
 0xdf2   :  { %8917 = vmatpush.bf16.msrb.mxu1 %v14186_v41  ;;  %v14394_v19 = vor.u32 %v15815_v10, %v14393_v16  ;;  %v14386_v41 = vor.u32 %v15813_v12, %v14385_v34  ;;  %v15783_v16 = vld [vmem:[#allocation9 + $0x3b8] sm:$0xff] }
 0xdf3   :  { %9354 = vmatpush.bf16.msra.mxu2 %v14346_v61  ;;  %v14178_v61 = vor.u32 %v15761_v2, %v14177_v22  ;;  %v8469_v22 = vld [vmem:[#allocation7 + $0x20] sm:$0x3] }
 0xdf4   :  { %v14369_v2 = vld [vmem:[#allocation6 + $0x880] sm:$0xf]  ;;  %v8471_v15 = vperm.slane %v8469_v22, 0 }
 0xdf5   :  { %9368 = vmatpush.bf16.msra.mxu3 %v14410_v33  ;;  %v15811_v33 = vld [vmem:[#allocation6 + $0x894] sm:$0xf0]  ;;  %9093 = vmatpush.bf16.msra.mxu0 %v15783_v16 }
 0xdf6   :  { %8918 = vmatpush.bf16.msrb.mxu1 %v14178_v61  ;;  %v8672_v61 = vpop.f32.mrf.mxu2  ;;  %v8646_v21 = vpop.f32.mrf.mxu0 }
 0xdf7   :  { %9355 = vmatpush.bf16.msra.mxu2 %v14338_v39  ;;  %v14314_v39 = vor.u32 %v15795_v36, %v14313_v32  ;;  %v8647_v32 = vadd.f32 %v8646_v21, %v8471_v15  ;;  %v8472_v36 = vperm.slane %v8469_v22, 1  ;;  %v15780_v21 = vld [vmem:[#allocation9 + $0x3a0] sm:$0xff] }
 0xdf9   :  { %9369 = vmatpush.bf16.msra.mxu3 %v14402_v9  ;;  %v14370_v9 = vor.u32 %v15809_v57, %v14369_v2 }
 0xdfb   :  { %9356 = vmatpush.bf16.msra.mxu2 %v14330_v30  ;;  %v14378_v30 = vor.u32 %v15811_v33, %v14377_v40  ;;  %v8673_v40 = vadd.f32 %v8672_v61, %v8472_v36 }
 0xdfd   :  { %9370 = vmatpush.bf16.msra.mxu3 %v14394_v19  ;;  %v15791_v19 = vld [vmem:[#allocation9 + $0x3f8] sm:$0xff] }
 0xdfe   :  { %9107 = vmatpush.bf16.msra.mxu1 %v15791_v19 }
 0xdff   :  { %9357 = vmatpush.bf16.msra.mxu2 %v14322_v42  ;;  %v8645_v42 = vadd.f32 %v8644_v62, %v8471_v15  ;;  %v15789_v62 = vld [vmem:[#allocation9 + $0x3e8] sm:$0xff] }
 0xe00   :  { %v268_v15 = vld [vmem:[#allocation4 + $0x10] sm:$0x3] }
 0xe01   :  { %9371 = vmatpush.bf16.msra.mxu3 %v14386_v41  ;;  %v8674_v41 = vpop.f32.mrf.mxu2  ;;  %v288_v16 = vperm.slane %v268_v15, 0 }
 0xe02   :  { %9108 = vmatpush.bf16.msra.mxu1 %v15790_v5  ;;  %v8675_v2 = vadd.f32 %v8674_v41, %v8472_v36  ;;  %v15778_v5 = vld [vmem:[#allocation9 + $0x390] sm:$0xff] }
 0xe03   :  { %9358 = vmatpush.bf16.msra.mxu2 %v14314_v39  ;;  %v15782_v39 = vld [vmem:[#allocation9 + $0x3b0] sm:$0xff]  ;;  %v1270_v36 = vadd.f32 %v16311_v43, %v288_v16 }
 0xe04   :  { %9094 = vmatpush.bf16.msra.mxu0 %v15782_v39  ;;  %v15787_v39 = vld [vmem:[#allocation9 + $0x3d8] sm:$0xff] }
 0xe05   :  { %9372 = vmatpush.bf16.msra.mxu3 %v14378_v30  ;;  %v15781_v30 = vld [vmem:[#allocation9 + $0x3a8] sm:$0xff]  ;;  %v1320_v41 = vmax.f32 %v1270_v36, 0.0 }
 0xe06   :  { %9109 = vmatpush.bf16.msra.mxu1 %v15789_v62  ;;  %v15806_v62 = vld [vmem:[#allocation6 + $0x874] sm:$0xf] }
 0xe07   :  { %9359 = vmatpush.bf16.msra.mxu2 %v14306_v46 }
 0xe08   :  { %9095 = vmatpush.bf16.msra.mxu0 %v15781_v30 }
 0xe09   :  { %9373 = vmatpush.bf16.msra.mxu3 %v14370_v9 }
 0xe0c   :  { %9096 = vmatpush.bf16.msra.mxu0 %v15780_v21  ;;  %v14347_v21 = vld [vmem:[#allocation6 + $0x858] sm:$0xf0] }
 0xe53   :  { %v8658_v23 = vpop.f32.mrf.mxu1 }
 0xe54   :  { %v8659_v34 = vadd.f32 %v8658_v23, %v8645_v42  ;;  %v15788_v42 = vld [vmem:[#allocation9 + $0x3e0] sm:$0xff] }
 0xe55   :  { %9110 = vmatpush.bf16.msra.mxu1 %v15788_v42 }
 0xe56   :  { %v8691_v33 = vmax.f32 %v8659_v34, 0.0  ;;  %v15779_v34 = vld [vmem:[#allocation9 + $0x398] sm:$0xff] }
 0xe57   :  { %9097 = vmatpush.bf16.msra.mxu0 %v15779_v34  ;;  %v15785_v34 = vld [vmem:[#allocation9 + $0x3c8] sm:$0xff] }
 0xe59   :  { %v8686_v10 = vpop.f32.mrf.mxu3  ;;  %9111 = vmatpush.bf16.msra.mxu1 %v15787_v39  ;;  %v15798_v39 = vld [vmem:[#allocation6 + $0x834] sm:$0xf] }
 0xe5a   :  { %v8687_v57 = vadd.f32 %v8686_v10, %v8673_v40  ;;  %v1268_v10 = vadd.f32 %v16307_v7, %v288_v16  ;;  %v14363_v7 = vld [vmem:[#allocation6 + $0x878] sm:$0xf0]  ;;  %v15786_v16 = vld [vmem:[#allocation9 + $0x3d0] sm:$0xff] }
 0xe5b   :  { %v8660_v12 = vpop.f32.mrf.mxu1  ;;  %9098 = vmatpush.bf16.msra.mxu0 %v15778_v5  ;;  %v15822_v5 = vld [vmem:[#allocation6 + $0x8f4] sm:$0xf] }
 0xe5c   :  { %v8661_v50 = vadd.f32 %v8660_v12, %v8647_v32  ;;  %v8692_v61 = vmax.f32 %v8687_v57, 0.0  ;;  %v289_v12 = vperm.slane %v268_v15, 1  ;;  %v15776_v57 = vld [vmem:[#allocation9 + $0x380] sm:$0xff]  ;;  %v15804_v15 = vld [vmem:[#allocation6 + $0x864] sm:$0xf] }
 0xe5d   :  { %9112 = vmatpush.bf16.msra.mxu1 %v15786_v16  ;;  %v15818_v16 = vld [vmem:[#allocation6 + $0x8d4] sm:$0xf] }
 0xe5e   :  { %v8693_v46 = vmax.f32 %v8661_v50, 0.0  ;;  %v1302_v50 = vmax.f32 %v1268_v10, 0.0  ;;  %v1282_v40 = vadd.f32 %v16309_v14, %v289_v12  ;;  %v14331_v10 = vld [vmem:[#allocation6 + $0x838] sm:$0xf0] }
 0xe5f   :  { %v14334_v36 = vor.u32 %v15798_v39, %v14331_v10  ;;  %v15792_v39 = vld [vmem:[#allocation6 + $0x804] sm:$0xf]  ;;  %v14307_v10 = vld [vmem:[#allocation6 + $0x808] sm:$0xf0] }
 0xe60   :  { %v8695_v9 = vpack.c.bf16 %v8693_v46, %v8691_v33  ;;  %v1284_v33 = vadd.f32 %v16313_v47, %v289_v12  ;;  %v15777_v46 = vld [vmem:[#allocation9 + $0x388] sm:$0xff]  ;;  %v16534_v30 = vpack.c.bf16 %v1320_v41, %v1302_v50  ;;  %v15802_v47 = vld [vmem:[#allocation6 + $0x854] sm:$0xf]  ;;  %v14489_v41 = vld [vmem:[#allocation6 + $0x1170] sm:$0xf] }
 0xe61   :  { %v8688_v22 = vpop.f32.mrf.mxu3  ;;  %9099 = vmatpush.bf16.msra.mxu0 %v15777_v46  ;;  %v14350_v42 = vor.u32 %v15802_v47, %v14347_v21  ;;  %9113 = vmatpush.bf16.msra.mxu1 %v15785_v34  ;;  %v15784_v12 = vld [vmem:[#allocation9 + $0x3c0] sm:$0xff]  ;;  %v15796_v46 = vld [vmem:[#allocation6 + $0x824] sm:$0xf] }
 0xe62   :  { %v8689_v23 = vadd.f32 %v8688_v22, %v8675_v2  ;;  %8905 = vmatmul.bf16.vlgmr.msrb.gmra.mxu0 %v8695_v9  ;;  %8933 = vmatmul.bf16.vlgmr.msrb.gmra.mxu2 %v8695_v9  ;;  %v1303_v2 = vmax.f32 %v1282_v40, 0.0  ;;  %v1321_v43 = vmax.f32 %v1284_v33, 0.0  ;;  %v14366_v9 = vor.u32 %v15806_v62, %v14363_v7  ;;  %v14355_v22 = vld [vmem:[#allocation6 + $0x868] sm:$0xf0]  ;;  %v14427_v50 = vld [vmem:[#allocation6 + $0x8f8] sm:$0xf0] }
 0xe63   :  { %v14358_v14 = vor.u32 %v15804_v15, %v14355_v22  ;;  %v14430_v40 = vor.u32 %v15822_v5, %v14427_v50  ;;  %v15839_v33 = vld [vmem:[#allocation6 + $0x1174] sm:$0xf0]  ;;  %v14323_v62 = vld [vmem:[#allocation6 + $0x828] sm:$0xf0]  ;;  %v15837_v22 = vld [vmem:[#allocation6 + $0x1164] sm:$0xf0] }
 0xe64   :  { %v8694_v19 = vmax.f32 %v8689_v23, 0.0  ;;  %v16537_v23 = vpack.c.bf16 %v1321_v43, %v1303_v2  ;;  %v14490_v7 = vor.u32 %v15839_v33, %v14489_v41  ;;  %v14326_v2 = vor.u32 %v15796_v46, %v14323_v62  ;;  %v15820_v43 = vld [vmem:[#allocation6 + $0x8e4] sm:$0xf]  ;;  %v14315_v47 = vld [vmem:[#allocation6 + $0x818] sm:$0xf0] }
 0xe65   :  { %9100 = vmatpush.bf16.msra.mxu0 %v15776_v57  ;;  %9114 = vmatpush.bf16.msra.mxu1 %v15784_v12  ;;  %v14419_v57 = vld [vmem:[#allocation6 + $0x8e8] sm:$0xf0]  ;;  %v15835_v34 = vld [vmem:[#allocation6 + $0x1154] sm:$0xf0]  ;;  %v14310_v12 = vor.u32 %v15792_v39, %v14307_v10  ;;  %v15816_v5 = vld [vmem:[#allocation6 + $0x8c4] sm:$0xf] }
 0xe66   :  { %v8696_v32 = vpack.c.bf16 %v8694_v19, %v8692_v61  ;;  %v15800_v61 = vld [vmem:[#allocation6 + $0x844] sm:$0xf]  ;;  %v14339_v19 = vld [vmem:[#allocation6 + $0x848] sm:$0xf0]  ;;  %9614 = vmatpush.bf16.msrb.mxu2 %v14490_v7  ;;  %v14422_v15 = vor.u32 %v15820_v43, %v14419_v57  ;;  %v15833_v33 = vld [vmem:[#allocation6 + $0x1144] sm:$0xf0] }
 0xe67   :  { %v14403_v50 = vld [vmem:[#allocation6 + $0x8c8] sm:$0xf0]  ;;  %v15814_v62 = vld [vmem:[#allocation6 + $0x8b4] sm:$0xf]  ;;  %v14395_v7 = vld [vmem:[#allocation6 + $0x8b8] sm:$0xf0] }
 0xe68   :  { %8919 = vmatmul.bf16.vlgmr.msrb.gmra.mxu1 %v8696_v32  ;;  %8947 = vmatmul.bf16.vlgmr.msrb.gmra.mxu3 %v8696_v32  ;;  %v14342_v32 = vor.u32 %v15800_v61, %v14339_v19  ;;  %v14411_v61 = vld [vmem:[#allocation6 + $0x8d8] sm:$0xf0]  ;;  %v14473_v19 = vld [vmem:[#allocation6 + $0x1150] sm:$0xf]  ;;  %v14406_v41 = vor.u32 %v15816_v5, %v14403_v50  ;;  %v14398_v43 = vor.u32 %v15814_v62, %v14395_v7  ;;  %v15831_v57 = vld [vmem:[#allocation6 + $0x1134] sm:$0xf0] }
 0xe69   :  { %9380 = vmatpush.bf16.msrb.mxu0 %v14366_v9  ;;  %9394 = vmatpush.bf16.msrb.mxu1 %v14430_v40  ;;  %v14481_v9 = vld [vmem:[#allocation6 + $0x1160] sm:$0xf]  ;;  %v15827_v39 = vld [vmem:[#allocation6 + $0x1114] sm:$0xf0]  ;;  %v8731_v10 = vld [vmem:[#allocation7 + $0x32] sm:$0x3] }
 0xe6a   :  { %v14482_v21 = vor.u32 %v15837_v22, %v14481_v9  ;;  %v14465_v40 = vld [vmem:[#allocation6 + $0x1140] sm:$0xf]  ;;  %v14387_v22 = vld [vmem:[#allocation6 + $0x8a8] sm:$0xf0]  ;;  %v15808_v50 = vld [vmem:[#allocation6 + $0x884] sm:$0xf] }
 0xe6b   :  { %v14466_v46 = vor.u32 %v15833_v33, %v14465_v40  ;;  %v14433_v40 = vld [vmem:[#allocation6 + $0x1100] sm:$0xf]  ;;  %v8733_v33 = vperm.slane %v8731_v10, 0  ;;  %v15825_v62 = vld [vmem:[#allocation6 + $0x1104] sm:$0xf0] }
 0xe6c   :  { %9615 = vmatpush.bf16.msrb.mxu2 %v14482_v21  ;;  %v15829_v21 = vld [vmem:[#allocation6 + $0x1124] sm:$0xf0]  ;;  %v14434_v7 = vor.u32 %v15825_v62, %v14433_v40  ;;  %v15836_v40 = vld [vmem:[#allocation6 + $0x1164] sm:$0xf] }
 0xe6d   :  { %9381 = vmatpush.bf16.msrb.mxu0 %v14358_v14  ;;  %v15794_v14 = vld [vmem:[#allocation6 + $0x814] sm:$0xf]  ;;  %9395 = vmatpush.bf16.msrb.mxu1 %v14422_v15  ;;  %v15812_v15 = vld [vmem:[#allocation6 + $0x8a4] sm:$0xf] }
 0xe71   :  { %9382 = vmatpush.bf16.msrb.mxu0 %v14350_v42  ;;  %v14318_v42 = vor.u32 %v15794_v14, %v14315_v47  ;;  %v14449_v14 = vld [vmem:[#allocation6 + $0x1120] sm:$0xf]  ;;  %v14390_v47 = vor.u32 %v15812_v15, %v14387_v22  ;;  %v8734_v15 = vperm.slane %v8731_v10, 1 }
 0xe72   :  { %9360 = vmatmul.bf16.vlgmr.msra.gmra.mxu2 %v16534_v30 }
 0xe75   :  { %9383 = vmatpush.bf16.msrb.mxu0 %v14342_v32  ;;  %v14414_v32 = vor.u32 %v15818_v16, %v14411_v61  ;;  %v14450_v16 = vor.u32 %v15829_v21, %v14449_v14  ;;  %v15810_v61 = vld [vmem:[#allocation6 + $0x894] sm:$0xf] }
 0xe77   :  { %9396 = vmatpush.bf16.msrb.mxu1 %v14414_v32  ;;  %v14441_v32 = vld [vmem:[#allocation6 + $0x1110] sm:$0xf] }
 0xe78   :  { %9374 = vmatmul.bf16.vlgmr.msra.gmra.mxu3 %v16537_v23 }
 0xe79   :  { %9384 = vmatpush.bf16.msrb.mxu0 %v14334_v36  ;;  %v14474_v36 = vor.u32 %v15835_v34, %v14473_v19  ;;  %v14379_v19 = vld [vmem:[#allocation6 + $0x898] sm:$0xf0] }
 0xe7a   :  { %v14382_v34 = vor.u32 %v15810_v61, %v14379_v19  ;;  %v14491_v61 = vld [vmem:[#allocation6 + $0x1178] sm:$0xf0] }
 0xe7b   :  { %9616 = vmatpush.bf16.msrb.mxu2 %v14474_v36  ;;  %9397 = vmatpush.bf16.msrb.mxu1 %v14406_v41  ;;  %v14442_v36 = vor.u32 %v15827_v39, %v14441_v32  ;;  %v14371_v41 = vld [vmem:[#allocation6 + $0x888] sm:$0xf0] }
 0xe7d   :  { %9385 = vmatpush.bf16.msrb.mxu0 %v14326_v2  ;;  %v14457_v2 = vld [vmem:[#allocation6 + $0x1130] sm:$0xf] }
 0xe7e   :  { %v14458_v9 = vor.u32 %v15831_v57, %v14457_v2 }
 0xe7f   :  { %9617 = vmatpush.bf16.msrb.mxu2 %v14466_v46  ;;  %9398 = vmatpush.bf16.msrb.mxu1 %v14398_v43  ;;  %v14374_v46 = vor.u32 %v15808_v50, %v14371_v41 }
 0xe81   :  { %9386 = vmatpush.bf16.msrb.mxu0 %v14318_v42 }
 0xe83   :  { %9618 = vmatpush.bf16.msrb.mxu2 %v14458_v9  ;;  %9399 = vmatpush.bf16.msrb.mxu1 %v14390_v47 }
 0xe85   :  { %9387 = vmatpush.bf16.msrb.mxu0 %v14310_v12 }
 0xe87   :  { %9619 = vmatpush.bf16.msrb.mxu2 %v14450_v16  ;;  %9400 = vmatpush.bf16.msrb.mxu1 %v14382_v34  ;;  %v15838_v16 = vld [vmem:[#allocation6 + $0x1174] sm:$0xf] }
 0xe88   :  { %v14494_v39 = vor.u32 %v15838_v16, %v14491_v61  ;;  %v15830_v16 = vld [vmem:[#allocation6 + $0x1134] sm:$0xf]  ;;  %v14459_v61 = vld [vmem:[#allocation6 + $0x1138] sm:$0xf0] }
 0xe8b   :  { %9620 = vmatpush.bf16.msrb.mxu2 %v14442_v36  ;;  %9401 = vmatpush.bf16.msrb.mxu1 %v14374_v46  ;;  %v14483_v46 = vld [vmem:[#allocation6 + $0x1168] sm:$0xf0] }
 0xe8c   :  { %v14486_v10 = vor.u32 %v15836_v40, %v14483_v46 }
 0xe8f   :  { %9621 = vmatpush.bf16.msrb.mxu2 %v14434_v7 }
 0xedf   :  { %v8906_v42 = vpop.f32.mrf.mxu0 }
 0xee0   :  { %v8907_v43 = vadd.f32 %v8906_v42, %v8733_v33 }
 0xee5   :  { %v8920_v12 = vpop.f32.mrf.mxu1  ;;  %v8934_v5 = vpop.f32.mrf.mxu2 }
 0xee6   :  { %v8921_v9 = vadd.f32 %v8920_v12, %v8907_v43  ;;  %v8935_v32 = vadd.f32 %v8934_v5, %v8734_v15  ;;  %v14475_v43 = vld [vmem:[#allocation6 + $0x1158] sm:$0xf0] }
 0xee7   :  { %v8908_v2 = vpop.f32.mrf.mxu0 }
 0xee8   :  { %v8909_v22 = vadd.f32 %v8908_v2, %v8733_v33  ;;  %v8953_v19 = vmax.f32 %v8921_v9, 0.0  ;;  %v15834_v2 = vld [vmem:[#allocation6 + $0x1154] sm:$0xf]  ;;  %v16540_v9 = vld [vmem:[#allocation7 + $0x10] sm:$0x3] }
 0xee9   :  { %v14478_v5 = vor.u32 %v15834_v2, %v14475_v43 }
 0xeeb   :  { %v8948_v57 = vpop.f32.mrf.mxu3 }
 0xeec   :  { %v8949_v36 = vadd.f32 %v8948_v57, %v8935_v32  ;;  %v15832_v57 = vld [vmem:[#allocation6 + $0x1144] sm:$0xf] }
 0xeed   :  { %v8922_v14 = vpop.f32.mrf.mxu1  ;;  %v8936_v47 = vpop.f32.mrf.mxu2 }
 0xeee   :  { %v8923_v21 = vadd.f32 %v8922_v14, %v8909_v22  ;;  %v8937_v41 = vadd.f32 %v8936_v47, %v8734_v15  ;;  %v8954_v33 = vmax.f32 %v8949_v36, 0.0  ;;  %v14467_v15 = vld [vmem:[#allocation6 + $0x1148] sm:$0xf0]  ;;  %v9188_v47 = vperm.slane %v16540_v9, 0 }
 0xef0   :  { %v8955_v34 = vmax.f32 %v8923_v21, 0.0  ;;  %v14470_v21 = vor.u32 %v15832_v57, %v14467_v15  ;;  %v14553_v57 = vld [vmem:[#allocation6 + $0x11f0] sm:$0xf]  ;;  %v15854_v15 = vld [vmem:[#allocation6 + $0x11f4] sm:$0xf] }
 0xef2   :  { %v8957_v50 = vpack.c.bf16 %v8955_v34, %v8953_v19  ;;  %v14462_v34 = vor.u32 %v15830_v16, %v14459_v61  ;;  %v14545_v16 = vld [vmem:[#allocation6 + $0x11e0] sm:$0xf]  ;;  %v15853_v61 = vld [vmem:[#allocation6 + $0x11e4] sm:$0xf0] }
 0xef3   :  { %v8950_v62 = vpop.f32.mrf.mxu3 }
 0xef4   :  { %v8951_v42 = vadd.f32 %v8950_v62, %v8937_v41  ;;  %9101 = vmatmul.bf16.vlgmr.msra.gmra.mxu0 %v8957_v50  ;;  %v15828_v50 = vld [vmem:[#allocation6 + $0x1124] sm:$0xf]  ;;  %v14451_v41 = vld [vmem:[#allocation6 + $0x1128] sm:$0xf0] }
 0xef5   :  { %v9361_v12 = vpop.f32.mrf.mxu2  ;;  %9642 = vmatpush.bf16.msra.mxu0 %v14494_v39  ;;  %v14454_v62 = vor.u32 %v15828_v50, %v14451_v41  ;;  %v15850_v50 = vld [vmem:[#allocation6 + $0x11d4] sm:$0xf] }
 0xef6   :  { %v8956_v7 = vmax.f32 %v8951_v42, 0.0  ;;  %v9362_v32 = vadd.f32 %v9361_v12, %v9188_v47  ;;  %v15824_v12 = vld [vmem:[#allocation6 + $0x1104] sm:$0xf] }
 0xef8   :  { %v8958_v22 = vpack.c.bf16 %v8956_v7, %v8954_v33  ;;  %v15826_v33 = vld [vmem:[#allocation6 + $0x1114] sm:$0xf]  ;;  %v14443_v7 = vld [vmem:[#allocation6 + $0x1118] sm:$0xf0] }
 0xef9   :  { %9643 = vmatpush.bf16.msra.mxu0 %v14486_v10  ;;  %v14446_v43 = vor.u32 %v15826_v33, %v14443_v7  ;;  %v14531_v7 = vld [vmem:[#allocation6 + $0x11c8] sm:$0xf0] }
 0xefa   :  { %9115 = vmatmul.bf16.vlgmr.msra.gmra.mxu1 %v8958_v22  ;;  %v14435_v22 = vld [vmem:[#allocation6 + $0x1108] sm:$0xf0] }
 0xefb   :  { %v9375_v14 = vpop.f32.mrf.mxu3 }
 0xefc   :  { %v9376_v39 = vadd.f32 %v9375_v14, %v9362_v32  ;;  %v14546_v32 = vor.u32 %v15853_v61, %v14545_v16  ;;  %v14515_v16 = vld [vmem:[#allocation6 + $0x11a8] sm:$0xf0] }
 0xefd   :  { %9644 = vmatpush.bf16.msra.mxu0 %v14478_v5  ;;  %v9363_v19 = vpop.f32.mrf.mxu2  ;;  %v14438_v5 = vor.u32 %v15824_v12, %v14435_v22  ;;  %v15847_v12 = vld [vmem:[#allocation6 + $0x11b4] sm:$0xf0]  ;;  %v15846_v22 = vld [vmem:[#allocation6 + $0x11b4] sm:$0xf] }
 0xefe   :  { %v9364_v36 = vadd.f32 %v9363_v19, %v9188_v47  ;;  %v9408_v42 = vmax.f32 %v9376_v39, 0.0  ;;  %v14555_v47 = vld [vmem:[#allocation6 + $0x11f8] sm:$0xf0]  ;;  %v15852_v19 = vld [vmem:[#allocation6 + $0x11e4] sm:$0xf] }
 0xeff   :  { %v14537_v39 = vld [vmem:[#allocation6 + $0x11d0] sm:$0xf] }
 0xf01   :  { %9645 = vmatpush.bf16.msra.mxu0 %v14470_v21  ;;  %v14558_v21 = vor.u32 %v15854_v15, %v14555_v47  ;;  %v14513_v15 = vld [vmem:[#allocation6 + $0x11a0] sm:$0xf]  ;;  %v15844_v47 = vld [vmem:[#allocation6 + $0x11a4] sm:$0xf] }
 0xf02   :  { %v14518_v61 = vor.u32 %v15844_v47, %v14515_v16 }
 0xf03   :  { %v9377_v40 = vpop.f32.mrf.mxu3  ;;  %9656 = vmatpush.bf16.msra.mxu1 %v14558_v21 }
 0xf04   :  { %v9378_v46 = vadd.f32 %v9377_v40, %v9364_v36  ;;  %9388 = vmatmul.bf16.vlgmr.msrb.gmra.mxu0 %v16534_v30  ;;  %v15855_v30 = vld [vmem:[#allocation6 + $0x11f4] sm:$0xf0]  ;;  %v14539_v40 = vld [vmem:[#allocation6 + $0x11d8] sm:$0xf0] }
 0xf05   :  { %9646 = vmatpush.bf16.msra.mxu0 %v14462_v34  ;;  %v14554_v14 = vor.u32 %v15855_v30, %v14553_v57  ;;  %v15851_v36 = vld [vmem:[#allocation6 + $0x11d4] sm:$0xf0]  ;;  %v14523_v57 = vld [vmem:[#allocation6 + $0x11b8] sm:$0xf0] }
 0xf06   :  { %v9410_v10 = vmax.f32 %v9378_v46, 0.0  ;;  %v14538_v41 = vor.u32 %v15851_v36, %v14537_v39  ;;  %v14542_v46 = vor.u32 %v15850_v50, %v14539_v40  ;;  %v14526_v30 = vor.u32 %v15846_v22, %v14523_v57  ;;  %v14507_v39 = vld [vmem:[#allocation6 + $0x1198] sm:$0xf0]  ;;  %v15841_v40 = vld [vmem:[#allocation6 + $0x1184] sm:$0xf0] }
 0xf07   :  { %9628 = vmatpush.bf16.msrb.mxu3 %v14554_v14  ;;  %v15845_v14 = vld [vmem:[#allocation6 + $0x11a4] sm:$0xf0] }
 0xf08   :  { %v9412_v2 = vpack.c.bf16 %v9410_v10, %v9408_v42  ;;  %v15849_v42 = vld [vmem:[#allocation6 + $0x11c4] sm:$0xf0]  ;;  %v15848_v10 = vld [vmem:[#allocation6 + $0x11c4] sm:$0xf]  ;;  %v14514_v21 = vor.u32 %v15845_v14, %v14513_v15 }
 0xf09   :  { %9647 = vmatpush.bf16.msra.mxu0 %v14454_v62  ;;  %v14529_v62 = vld [vmem:[#allocation6 + $0x11c0] sm:$0xf] }
 0xf0a   :  { %9402 = vmatmul.bf16.vlgmr.msrb.gmra.mxu1 %v16537_v23  ;;  %9622 = vmatmul.bf16.vlgmr.msrb.gmra.mxu2 %v9412_v2  ;;  %v14547_v23 = vld [vmem:[#allocation6 + $0x11e8] sm:$0xf0]  ;;  %v14530_v33 = vor.u32 %v15849_v42, %v14529_v62  ;;  %v15840_v42 = vld [vmem:[#allocation6 + $0x1184] sm:$0xf] }
 0xf0b   :  { %v14550_v34 = vor.u32 %v15852_v19, %v14547_v23  ;;  %9629 = vmatpush.bf16.msrb.mxu3 %v14546_v32  ;;  %v14505_v19 = vld [vmem:[#allocation6 + $0x1190] sm:$0xf]  ;;  %v15843_v32 = vld [vmem:[#allocation6 + $0x1194] sm:$0xf0]  ;;  %v15842_v23 = vld [vmem:[#allocation6 + $0x1194] sm:$0xf] }
 0xf0c   :  { %v14510_v36 = vor.u32 %v15842_v23, %v14507_v39 }
 0xf0d   :  { %9648 = vmatpush.bf16.msra.mxu0 %v14446_v43  ;;  %9657 = vmatpush.bf16.msra.mxu1 %v14550_v34  ;;  %v14521_v43 = vld [vmem:[#allocation6 + $0x11b0] sm:$0xf]  ;;  %v14506_v34 = vor.u32 %v15843_v32, %v14505_v19 }
 0xf0f   :  { %9630 = vmatpush.bf16.msrb.mxu3 %v14538_v41  ;;  %v14497_v41 = vld [vmem:[#allocation6 + $0x1180] sm:$0xf] }
 0xf10   :  { %v14498_v62 = vor.u32 %v15841_v40, %v14497_v41 }
 0xf11   :  { %9649 = vmatpush.bf16.msra.mxu0 %v14438_v5  ;;  %9658 = vmatpush.bf16.msra.mxu1 %v14542_v46  ;;  %v14522_v5 = vor.u32 %v15847_v12, %v14521_v43  ;;  %v15927_v46 = vld [vmem:[#allocation10 + $0x7] ss:$0 sm:$0xff]  ;;  %v16549_v43 = vpop.xlane.xlu1 %3252 }
 0xf13   :  { %9631 = vmatpush.bf16.msrb.mxu3 %v14530_v33 }
 0xf14   :  { %9650 = vmatmul.bf16.vlgmr.msra.gmra.mxu0 %v9412_v2  ;;  %v14534_v2 = vor.u32 %v15848_v10, %v14531_v7  ;;  %v14499_v10 = vld [vmem:[#allocation6 + $0x1188] sm:$0xf0]  ;;  %v16547_v7 = vpop.xlane.xlu0 %2273 }
 0xf15   :  { %v14502_v33 = vor.u32 %v15840_v42, %v14499_v10  ;;  %v2277_v15 = vsub.f32 %v16330_v18, %v16547_v7 }
 0xf16   :  { %9659 = vmatpush.bf16.msra.mxu1 %v14534_v2 }
 0xf17   :  { %9632 = vmatpush.bf16.msrb.mxu3 %v14522_v5 }
 0xf19   :  { %v16569_v19 = vpop.xlane.xlu1 %3254 }
 0xf1a   :  { %9660 = vmatpush.bf16.msra.mxu1 %v14526_v30  ;;  %v3257_v18 = vsub.f32 %v16368_v54, %v16569_v19 }
 0xf1b   :  { %9633 = vmatpush.bf16.msrb.mxu3 %v14514_v21  ;;  %v2279_v21 = vmul.f32 1.442695, %v2277_v15 }
 0xf1c   :  { %v16565_v16 = vpop.xlane.xlu0 %2275  ;;  %v3260_v39 = vmul.f32 1.442695, %v3257_v18 }
 0xf1d   :  { %15929 = vpow2.f32 %v2279_v21 }
 0xf1e   :  { %9661 = vmatpush.bf16.msra.mxu1 %v14518_v61  ;;  %15931 = vpow2.f32 %v3260_v39 }
 0xf1f   :  { %9634 = vmatpush.bf16.msrb.mxu3 %v14506_v34 }
 0xf22   :  { %9662 = vmatpush.bf16.msra.mxu1 %v14510_v36  ;;  %v9189_v36 = vperm.slane %v16540_v9, 1 }
 0xf23   :  { %9635 = vmatpush.bf16.msrb.mxu3 %v14498_v62  ;;  %v15930_v41 = vpop.eup %15929 }
 0xf26   :  { %9663 = vmatpush.bf16.msra.mxu1 %v14502_v33 }
 0xf71   :  { %v9102_v50 = vpop.f32.mrf.mxu0 }
 0xf72   :  { %v9103_v2 = vadd.f32 %v15927_v46, %v9102_v50  ;;  %v16580_v50 = vpop.xlane.xlu0 %5210 }
 0xf77   :  { %v9116_v12 = vpop.f32.mrf.mxu1 }
 0xf78   :  { %v16555_v5 = vadd.f32 %v9116_v12, %v9103_v2 }
 0xf79   :  { %v9104_v57 = vpop.f32.mrf.mxu0 }
 0xf7a   :  { %v16560_v30 = vsel %vm16551_vm8, %v16555_v5, -inf  ;;  %v9105_v14 = vadd.f32 %v15927_v46, %v9104_v57  ;;  %v5214_v46 = vsub.f32 %v16428_v3, %v16580_v50  ;;  %v16584_v54 = vpop.xlane.xlu0 %6191  ;;  %v15932_v57 = vpop.eup %15931 }
 0xf7b   :  { %9126 = vmax.xlane.f32.xlu2 %v16560_v30 }
 0xf7c   :  { %v5216_v2 = vmul.f32 1.442695, %v5214_v46 }
 0xf7e   :  { %15933 = vpow2.f32 %v5216_v2  ;;  %v15884_v2 = vld [vmem:[#allocation6 + $0x1ae4] sm:$0xf] }
 0xf7f   :  { %v9118_v47 = vpop.f32.mrf.mxu1 }
 0xf80   :  { %v16567_v61 = vadd.f32 %v9118_v47, %v9105_v14  ;;  %v6194_v14 = vsub.f32 %v16466_v20, %v16584_v54  ;;  %v15887_v20 = vld [vmem:[#allocation6 + $0x1af4] sm:$0xf0] }
 0xf81   :  { %v9389_v32 = vpop.f32.mrf.mxu0 }
 0xf82   :  { %16761 = vst [vmem:[#allocation16_spill] sm:$0xff] %v16567_v61  ;;  %v16574_v23 = vsel %vm16551_vm8, %v16567_v61, -inf  ;;  %v9390_v62 = vadd.f32 %v9389_v32, %v9189_v36  ;;  %v6197_v3 = vmul.f32 1.442695, %v6194_v14  ;;  %v16588_v21 = vpop.xlane.xlu0 %8147  ;;  %v15870_v14 = vld [vmem:[#allocation6 + $0x1a74] sm:$0xf] }
 0xf83   :  { %9128 = vmax.xlane.f32.xlu0 %v16574_v23  ;;  %v8151_v18 = vsub.f32 %v16518_v24, %v16588_v21 }
 0xf84   :  { %v15934_v32 = vpop.eup %15933  ;;  %15935 = vpow2.f32 %v6197_v3  ;;  %v14619_v3 = vld [vmem:[#allocation6 + $0x1a78] sm:$0xf0] }
 0xf87   :  { %v9403_v34 = vpop.f32.mrf.mxu1 }
 0xf88   :  { %v9404_v42 = vadd.f32 %v9403_v34, %v9390_v62  ;;  %v8153_v34 = vmul.f32 1.442695, %v8151_v18  ;;  %v14683_v62 = vld [vmem:[#allocation6 + $0x1af8] sm:$0xf0]  ;;  %v14665_v18 = vld [vmem:[#allocation6 + $0x1ad0] sm:$0xf] }
 0xf89   :  { %v9391_v40 = vpop.f32.mrf.mxu0 }
 0xf8a   :  { %v9392_v10 = vadd.f32 %v9391_v40, %v9189_v36  ;;  %v9409_v15 = vmax.f32 %v9404_v42, 0.0  ;;  %v15936_v39 = vpop.eup %15935  ;;  %15937 = vpow2.f32 %v8153_v34  ;;  %v15886_v40 = vld [vmem:[#allocation6 + $0x1af4] sm:$0xf]  ;;  %v15883_v34 = vld [vmem:[#allocation6 + $0x1ad4] sm:$0xf0] }
 0xf8b   :  { %2283 = vadd.xlane.f32.xlu0 %v15930_v41  ;;  %v14681_v41 = vld [vmem:[#allocation6 + $0x1af0] sm:$0xf]  ;;  %v14686_v42 = vor.u32 %v15886_v40, %v14683_v62  ;;  %v14609_v40 = vld [vmem:[#allocation6 + $0x1a60] sm:$0xf]  ;;  %v15868_v62 = vld [vmem:[#allocation6 + $0x1a64] sm:$0xf] }
 0xf8c   :  { %v14682_v46 = vor.u32 %v15887_v20, %v14681_v41  ;;  %v14667_v41 = vld [vmem:[#allocation6 + $0x1ad8] sm:$0xf0] }
 0xf8d   :  { %9918 = vmatpush.bf16.msrb.mxu1 %v14686_v42 }
 0xf8e   :  { %9890 = vmatpush.bf16.msra.mxu3 %v14682_v46  ;;  %v15869_v46 = vld [vmem:[#allocation6 + $0x1a64] sm:$0xf0] }
 0xf8f   :  { %v9405_v33 = vpop.f32.mrf.mxu1  ;;  %v14610_v42 = vor.u32 %v15869_v46, %v14609_v40  ;;  %v14651_v40 = vld [vmem:[#allocation6 + $0x1ab8] sm:$0xf0] }
 0xf90   :  { %v9406_v12 = vadd.f32 %v9405_v33, %v9392_v10  ;;  %v15938_v36 = vpop.eup %15937  ;;  %v14673_v10 = vld [vmem:[#allocation6 + $0x1ae0] sm:$0xf]  ;;  %v15885_v33 = vld [vmem:[#allocation6 + $0x1ae4] sm:$0xf0] }
 0xf92   :  { %v9411_v9 = vmax.f32 %v9406_v12, 0.0  ;;  %v14674_v12 = vor.u32 %v15885_v33, %v14673_v10  ;;  %v14611_v10 = vld [vmem:[#allocation6 + $0x1a68] sm:$0xf0] }
 0xf93   :  { %3264 = vadd.xlane.f32.xlu0 %v15932_v57  ;;  %v14675_v57 = vld [vmem:[#allocation6 + $0x1ae8] sm:$0xf0]  ;;  %v14614_v33 = vor.u32 %v15868_v62, %v14611_v10  ;;  %v14593_v62 = vld [vmem:[#allocation6 + $0x1a40] sm:$0xf]  ;;  %v15864_v10 = vld [vmem:[#allocation6 + $0x1a44] sm:$0xf] }
 0xf94   :  { %v9413_v47 = vpack.c.bf16 %v9411_v9, %v9409_v15  ;;  %v14678_v24 = vor.u32 %v15884_v2, %v14675_v57  ;;  %v14617_v15 = vld [vmem:[#allocation6 + $0x1a70] sm:$0xf]  ;;  %v15871_v9 = vld [vmem:[#allocation6 + $0x1a74] sm:$0xf0]  ;;  %9891 = vmatpush.bf16.msra.mxu3 %v14674_v12  ;;  %v14657_v2 = vld [vmem:[#allocation6 + $0x1ac0] sm:$0xf] }
 0xf95   :  { %v15881_v12 = vld [vmem:[#allocation6 + $0x1ac4] sm:$0xf0]  ;;  %v15880_v57 = vld [vmem:[#allocation6 + $0x1ac4] sm:$0xf] }
 0xf96   :  { %9636 = vmatmul.bf16.vlgmr.msrb.gmra.mxu3 %v9413_v47  ;;  %9664 = vmatmul.bf16.vlgmr.msra.gmra.mxu1 %v9413_v47  ;;  %v14618_v47 = vor.u32 %v15871_v9, %v14617_v15  ;;  %v14659_v15 = vld [vmem:[#allocation6 + $0x1ac8] sm:$0xf0] }
 0xf97   :  { %9919 = vmatpush.bf16.msrb.mxu1 %v14678_v24  ;;  %v14658_v24 = vor.u32 %v15881_v12, %v14657_v2  ;;  %v14662_v9 = vor.u32 %v15880_v57, %v14659_v15  ;;  %v14595_v2 = vld [vmem:[#allocation6 + $0x1a48] sm:$0xf0]  ;;  %v14641_v57 = vld [vmem:[#allocation6 + $0x1aa0] sm:$0xf]  ;;  %v15876_v15 = vld [vmem:[#allocation6 + $0x1aa4] sm:$0xf] }
 0xf98   :  { %9876 = vmatpush.bf16.msra.mxu2 %v14618_v47  ;;  %v15867_v47 = vld [vmem:[#allocation6 + $0x1a54] sm:$0xf0]  ;;  %v14598_v12 = vor.u32 %v15864_v10, %v14595_v2  ;;  %v15874_v10 = vld [vmem:[#allocation6 + $0x1a94] sm:$0xf]  ;;  %v14577_v2 = vld [vmem:[#allocation6 + $0x1a20] sm:$0xf] }
 0xf9b   :  { %5220 = vadd.xlane.f32.xlu0 %v15934_v32  ;;  %v14622_v32 = vor.u32 %v15870_v14, %v14619_v3  ;;  %v14601_v14 = vld [vmem:[#allocation6 + $0x1a50] sm:$0xf]  ;;  %v15866_v3 = vld [vmem:[#allocation6 + $0x1a54] sm:$0xf] }
 0xf9c   :  { %9877 = vmatpush.bf16.msra.mxu2 %v14610_v42  ;;  %v15865_v42 = vld [vmem:[#allocation6 + $0x1a44] sm:$0xf0] }
 0xf9d   :  { %9904 = vmatpush.bf16.msrb.mxu0 %v14622_v32  ;;  %v14602_v32 = vor.u32 %v15867_v47, %v14601_v14  ;;  %v14643_v47 = vld [vmem:[#allocation6 + $0x1aa8] sm:$0xf0] }
 0xfa0   :  { %9878 = vmatpush.bf16.msra.mxu2 %v14602_v32  ;;  %v14646_v32 = vor.u32 %v15876_v15, %v14643_v47  ;;  %v14579_v15 = vld [vmem:[#allocation6 + $0x1a28] sm:$0xf0]  ;;  %v14625_v47 = vld [vmem:[#allocation6 + $0x1a80] sm:$0xf] }
 0xfa1   :  { %9905 = vmatpush.bf16.msrb.mxu0 %v14614_v33  ;;  %v14594_v33 = vor.u32 %v15865_v42, %v14593_v62  ;;  %v15875_v62 = vld [vmem:[#allocation6 + $0x1a94] sm:$0xf0] }
 0xfa3   :  { %6201 = vadd.xlane.f32.xlu0 %v15936_v39  ;;  %v15882_v39 = vld [vmem:[#allocation6 + $0x1ad4] sm:$0xf] }
 0xfa4   :  { %v14670_v20 = vor.u32 %v15882_v39, %v14667_v41  ;;  %v14649_v39 = vld [vmem:[#allocation6 + $0x1ab0] sm:$0xf]  ;;  %9879 = vmatpush.bf16.msra.mxu2 %v14594_v33  ;;  %v14635_v33 = vld [vmem:[#allocation6 + $0x1a98] sm:$0xf0] }
 0xfa6   :  { %9920 = vmatpush.bf16.msrb.mxu1 %v14670_v20  ;;  %v15878_v20 = vld [vmem:[#allocation6 + $0x1ab4] sm:$0xf] }
 0xfa7   :  { %v14654_v46 = vor.u32 %v15878_v20, %v14651_v40 }
 0xfaa   :  { %9921 = vmatpush.bf16.msrb.mxu1 %v14662_v9 }
 0xfab   :  { %8157 = vadd.xlane.f32.xlu0 %v15938_v36  ;;  %v14666_v36 = vor.u32 %v15883_v34, %v14665_v18  ;;  %v14603_v18 = vld [vmem:[#allocation6 + $0x1a58] sm:$0xf0] }
 0xfac   :  { %v14606_v34 = vor.u32 %v15866_v3, %v14603_v18  ;;  %v14585_v18 = vld [vmem:[#allocation6 + $0x1a30] sm:$0xf] }
 0xfad   :  { %9892 = vmatpush.bf16.msra.mxu3 %v14666_v36  ;;  %v15879_v36 = vld [vmem:[#allocation6 + $0x1ab4] sm:$0xf0] }
 0xfae   :  { %v14650_v41 = vor.u32 %v15879_v36, %v14649_v39  ;;  %9906 = vmatpush.bf16.msrb.mxu0 %v14606_v34  ;;  %9922 = vmatpush.bf16.msrb.mxu1 %v14654_v46  ;;  %v15863_v34 = vld [vmem:[#allocation6 + $0x1a34] sm:$0xf0]  ;;  %v15862_v39 = vld [vmem:[#allocation6 + $0x1a34] sm:$0xf]  ;;  %v14633_v46 = vld [vmem:[#allocation6 + $0x1a90] sm:$0xf] }
 0xfaf   :  { %v14586_v36 = vor.u32 %v15863_v34, %v14585_v18  ;;  %v14634_v42 = vor.u32 %v15875_v62, %v14633_v46  ;;  %v14627_v34 = vld [vmem:[#allocation6 + $0x1a88] sm:$0xf0]  ;;  %v14571_v46 = vld [vmem:[#allocation6 + $0x1a18] sm:$0xf0] }
 0xfb1   :  { %9893 = vmatpush.bf16.msra.mxu3 %v14658_v24  ;;  %v15877_v24 = vld [vmem:[#allocation6 + $0x1aa4] sm:$0xf0]  ;;  %9880 = vmatpush.bf16.msra.mxu2 %v14586_v36  ;;  %v14569_v36 = vld [vmem:[#allocation6 + $0x1a10] sm:$0xf] }
 0xfb2   :  { %v14642_v14 = vor.u32 %v15877_v24, %v14641_v57  ;;  %9907 = vmatpush.bf16.msrb.mxu0 %v14598_v12  ;;  %9923 = vmatpush.bf16.msrb.mxu1 %v14646_v32  ;;  %v15861_v12 = vld [vmem:[#allocation6 + $0x1a24] sm:$0xf0]  ;;  %v15860_v57 = vld [vmem:[#allocation6 + $0x1a24] sm:$0xf] }
 0xfb3   :  { %v14578_v24 = vor.u32 %v15861_v12, %v14577_v2  ;;  %v15872_v32 = vld [vmem:[#allocation6 + $0x1a84] sm:$0xf]  ;;  %v14563_v12 = vld [vmem:[#allocation6 + $0x1a08] sm:$0xf0] }
 0xfb5   :  { %9894 = vmatpush.bf16.msra.mxu3 %v14650_v41  ;;  %v14587_v41 = vld [vmem:[#allocation6 + $0x1a38] sm:$0xf0]  ;;  %9881 = vmatpush.bf16.msra.mxu2 %v14578_v24  ;;  %v9651_v24 = vpop.f32.mrf.mxu0 }
 0xfb6   :  { %v14590_v40 = vor.u32 %v15862_v39, %v14587_v41  ;;  %v14630_v39 = vor.u32 %v15872_v32, %v14627_v34  ;;  %v15859_v41 = vld [vmem:[#allocation6 + $0x1a14] sm:$0xf0] }
 0xfb8   :  { %9908 = vmatpush.bf16.msrb.mxu0 %v14590_v40  ;;  %v14570_v40 = vor.u32 %v15859_v41, %v14569_v36 }
 0xfb9   :  { %9895 = vmatpush.bf16.msra.mxu3 %v14642_v14  ;;  %v14582_v14 = vor.u32 %v15860_v57, %v14579_v15  ;;  %v9448_v15 = vld [vmem:[#allocation7 + $0x22] sm:$0x3] }
 0xfba   :  { %9882 = vmatpush.bf16.msra.mxu2 %v14570_v40 }
 0xfbc   :  { %9909 = vmatpush.bf16.msrb.mxu0 %v14582_v14  ;;  %v9623_v14 = vpop.f32.mrf.mxu2 }
 0xfbd   :  { %9896 = vmatpush.bf16.msra.mxu3 %v14634_v42  ;;  %v9653_v32 = vpop.f32.mrf.mxu0 }
 0xff6   :  { %v16592_v9 = vpop.xlane.xlu0 %9128 }
 0xff7   :  { %16762 = vst [vmem:[#allocation17_spill] sm:$0xff] %v16592_v9  ;;  %v9131_v3 = vsub.f32 %v16574_v23, %v16592_v9  ;;  %v14638_v23 = vor.u32 %v15874_v10, %v14635_v33  ;;  %v14561_v10 = vld [vmem:[#allocation6 + $0x1a00] sm:$0xf]  ;;  %v15857_v33 = vld [vmem:[#allocation6 + $0x1a04] sm:$0xf0] }
 0xff8   :  { %v14562_v2 = vor.u32 %v15857_v33, %v14561_v10 }
 0xff9   :  { %v9134_v20 = vmul.f32 1.442695, %v9131_v3  ;;  %9924 = vmatpush.bf16.msrb.mxu1 %v14638_v23  ;;  %v15873_v3 = vld [vmem:[#allocation6 + $0x1a84] sm:$0xf0]  ;;  %v15856_v23 = vld [vmem:[#allocation6 + $0x1a04] sm:$0xf] }
 0xffa   :  { %v14626_v18 = vor.u32 %v15873_v3, %v14625_v47  ;;  %v14566_v57 = vor.u32 %v15856_v23, %v14563_v12  ;;  %9883 = vmatpush.bf16.msra.mxu2 %v14562_v2  ;;  %v9451_v3 = vperm.slane %v9448_v15, 1 }
 0xffb   :  { %15939 = vpow2.f32 %v9134_v20  ;;  %v15858_v20 = vld [vmem:[#allocation6 + $0x1a14] sm:$0xf] }
 0xffc   :  { %9897 = vmatpush.bf16.msra.mxu3 %v14626_v18  ;;  %v14574_v42 = vor.u32 %v15858_v20, %v14571_v46  ;;  %v9652_v18 = vadd.f32 %v9651_v24, %v9451_v3  ;;  %v9654_v36 = vadd.f32 %v9653_v32, %v9451_v3  ;;  %v9625_v46 = vpop.f32.mrf.mxu2  ;;  %v15902_v3 = vld [vmem:[#allocation9 + $0x470] sm:$0xff] }
 0xffd   :  { %9925 = vmatpush.bf16.msrb.mxu1 %v14630_v39  ;;  %v9450_v39 = vperm.slane %v9448_v15, 0  ;;  %v15903_v15 = vld [vmem:[#allocation9 + $0x478] sm:$0xff]  ;;  %v15894_v32 = vld [vmem:[#allocation9 + $0x430] sm:$0xff] }
 0xffe   :  { %9910 = vmatpush.bf16.msrb.mxu0 %v14574_v42 }
 0xfff   :  { %v9626_v33 = vadd.f32 %v9625_v46, %v9450_v39  ;;  %v15889_v46 = vld [vmem:[#allocation9 + $0x408] sm:$0xff] }
0x1000   :  { %10086 = vmatpush.bf16.msrb.mxu3 %v15903_v15 }
0x1001   :  { %v15940_v62 = vpop.eup %15939 }
0x1002   :  { %9138 = vadd.xlane.f32.xlu0 %v15940_v62  ;;  %9911 = vmatpush.bf16.msrb.mxu0 %v14566_v57  ;;  %v9624_v62 = vadd.f32 %v9623_v14, %v9450_v39  ;;  %v15901_v14 = vld [vmem:[#allocation9 + $0x468] sm:$0xff]  ;;  %v15899_v39 = vld [vmem:[#allocation9 + $0x458] sm:$0xff] }
0x1004   :  { %10087 = vmatpush.bf16.msrb.mxu3 %v15902_v3 }
0x1008   :  { %10088 = vmatpush.bf16.msrb.mxu3 %v15901_v14 }
0x1013   :  { %v9665_v47 = vpop.f32.mrf.mxu1 }
0x1014   :  { %v9666_v41 = vadd.f32 %v9665_v47, %v9652_v18  ;;  %v15895_v47 = vld [vmem:[#allocation9 + $0x438] sm:$0xff]  ;;  %v15900_v18 = vld [vmem:[#allocation9 + $0x460] sm:$0xff] }
0x1015   :  { %10072 = vmatpush.bf16.msrb.mxu2 %v15895_v47  ;;  %10089 = vmatpush.bf16.msrb.mxu3 %v15900_v18 }
0x1016   :  { %v9671_v42 = vmax.f32 %v9666_v41, 0.0  ;;  %v15897_v41 = vld [vmem:[#allocation9 + $0x448] sm:$0xff] }
0x1019   :  { %v9637_v34 = vpop.f32.mrf.mxu3  ;;  %10073 = vmatpush.bf16.msrb.mxu2 %v15894_v32  ;;  %10090 = vmatpush.bf16.msrb.mxu3 %v15899_v39 }
0x101a   :  { %v9638_v23 = vadd.f32 %v9637_v34, %v9624_v62  ;;  %v15893_v34 = vld [vmem:[#allocation9 + $0x428] sm:$0xff]  ;;  %v15888_v62 = vld [vmem:[#allocation9 + $0x400] sm:$0xff] }
0x101b   :  { %v9667_v20 = vpop.f32.mrf.mxu1 }
0x101c   :  { %v9668_v40 = vadd.f32 %v9667_v20, %v9654_v36  ;;  %v9670_v61 = vmax.f32 %v9638_v23, 0.0  ;;  %v15892_v36 = vld [vmem:[#allocation9 + $0x420] sm:$0xff]  ;;  %v15890_v20 = vld [vmem:[#allocation9 + $0x410] sm:$0xff] }
0x101d   :  { %10074 = vmatpush.bf16.msrb.mxu2 %v15893_v34 }
0x101e   :  { %v9673_v10 = vmax.f32 %v9668_v40, 0.0  ;;  %v15896_v40 = vld [vmem:[#allocation9 + $0x440] sm:$0xff] }
0x1020   :  { %v9675_v2 = vpack.c.bf16 %v9673_v10, %v9671_v42  ;;  %v9710_v42 = vld [vmem:[#allocation7 + $0x34] sm:$0x3] }
0x1021   :  { %v9639_v12 = vpop.f32.mrf.mxu3  ;;  %10075 = vmatpush.bf16.msrb.mxu2 %v15892_v36  ;;  %v9713_v23 = vperm.slane %v9710_v42, 1 }
0x1022   :  { %v9640_v57 = vadd.f32 %v9639_v12, %v9626_v33  ;;  %9898 = vmatmul.bf16.vlgmr.msra.gmra.mxu3 %v9675_v2  ;;  %9926 = vmatmul.bf16.vlgmr.msrb.gmra.mxu1 %v9675_v2 }
0x1024   :  { %v9672_v9 = vmax.f32 %v9640_v57, 0.0 }
0x1026   :  { %v9674_v24 = vpack.c.bf16 %v9672_v9, %v9670_v61  ;;  %v15898_v61 = vld [vmem:[#allocation9 + $0x450] sm:$0xff]  ;;  %v15891_v9 = vld [vmem:[#allocation9 + $0x418] sm:$0xff] }
0x1027   :  { %10091 = vmatpush.bf16.msrb.mxu3 %v15898_v61  ;;  %10076 = vmatpush.bf16.msrb.mxu2 %v15891_v9 }
0x1028   :  { %9884 = vmatmul.bf16.vlgmr.msra.gmra.mxu2 %v9674_v24  ;;  %9912 = vmatmul.bf16.vlgmr.msrb.gmra.mxu0 %v9674_v24  ;;  %v9712_v24 = vperm.slane %v9710_v42, 0  ;;  %v15928_v42 = vld [vmem:[#allocation10 + $0x8] ss:$0 sm:$0xff] }
0x102b   :  { %10092 = vmatpush.bf16.msrb.mxu3 %v15897_v41  ;;  %10077 = vmatpush.bf16.msrb.mxu2 %v15890_v20 }
0x102f   :  { %10093 = vmatpush.bf16.msrb.mxu3 %v15896_v40  ;;  %10078 = vmatpush.bf16.msrb.mxu2 %v15889_v46 }
0x1033   :  { %10079 = vmatpush.bf16.msrb.mxu2 %v15888_v62 }
0x109f   :  { %v9927_v10 = vpop.f32.mrf.mxu1 }
0x10a5   :  { %v9913_v33 = vpop.f32.mrf.mxu0  ;;  %v9899_v12 = vpop.f32.mrf.mxu3 }
0x10a6   :  { %v9914_v2 = vadd.f32 %v9913_v33, %v9713_v23 }
0x10a7   :  { %v9929_v14 = vpop.f32.mrf.mxu1 }
0x10a8   :  { %v9928_v47 = vadd.f32 %v9927_v10, %v9914_v2  ;;  %v2278_v10 = vsub.f32 %v16338_v29, %v16565_v16 }
0x10aa   :  { %v9933_v34 = vmax.f32 %v9928_v47, 0.0 }
0x10ab   :  { %v9885_v57 = vpop.f32.mrf.mxu2 }
0x10ac   :  { %v9886_v32 = vadd.f32 %v9885_v57, %v9712_v24 }
0x10ad   :  { %v9915_v15 = vpop.f32.mrf.mxu0  ;;  %v9901_v20 = vpop.f32.mrf.mxu3 }
0x10ae   :  { %v9916_v3 = vadd.f32 %v9915_v15, %v9713_v23  ;;  %v9900_v61 = vadd.f32 %v9899_v12, %v9886_v32  ;;  %v16600_v12 = vpop.xlane.xlu2 %4231  ;;  %v2281_v15 = vmul.f32 1.442695, %v2278_v10 }
0x10b0   :  { %v9930_v18 = vadd.f32 %v9929_v14, %v9916_v3  ;;  %v9932_v46 = vmax.f32 %v9900_v61, 0.0  ;;  %v3256_v3 = vsub.f32 %v16360_v48, %v16549_v43  ;;  %15941 = vpow2.f32 %v2281_v15 }
0x10b1   :  { %v4235_v14 = vsub.f32 %v16390_v58, %v16600_v12 }
0x10b2   :  { %v9935_v39 = vmax.f32 %v9930_v18, 0.0 }
0x10b3   :  { %v9887_v36 = vpop.f32.mrf.mxu2 }
0x10b4   :  { %v9937_v9 = vpack.c.bf16 %v9935_v39, %v9933_v34  ;;  %v9888_v41 = vadd.f32 %v9887_v36, %v9712_v24  ;;  %v3258_v34 = vmul.f32 1.442695, %v3256_v3  ;;  %v4237_v36 = vmul.f32 1.442695, %v4235_v14 }
0x10b6   :  { %v9902_v40 = vadd.f32 %v9901_v20, %v9888_v41  ;;  %10094 = vmatmul.bf16.vlgmr.msrb.gmra.mxu3 %v9937_v9  ;;  %v16618_v61 = vpop.xlane.xlu2 %4233  ;;  %v16622_v41 = vpop.xlane.xlu1 %5212  ;;  %15943 = vpow2.f32 %v3258_v34 }
0x10b7   :  { %v15942_v20 = vpop.eup %15941  ;;  %v4236_v58 = vsub.f32 %v16398_v0, %v16618_v61  ;;  %15945 = vpow2.f32 %v4237_v36 }
0x10b8   :  { %v9934_v62 = vmax.f32 %v9902_v40, 0.0  ;;  %v5215_v40 = vsub.f32 %v16436_v4, %v16622_v41 }
0x10ba   :  { %v9936_v33 = vpack.c.bf16 %v9934_v62, %v9932_v46  ;;  %v4239_v46 = vmul.f32 1.442695, %v4236_v58  ;;  %v5218_v62 = vmul.f32 1.442695, %v5215_v40 }
0x10bc   :  { %10080 = vmatmul.bf16.vlgmr.msrb.gmra.mxu2 %v9936_v33  ;;  %15947 = vpow2.f32 %v4239_v46 }
0x10bd   :  { %15949 = vpow2.f32 %v5218_v62 }
0x10be   :  { %v16631_v33 = vpop.xlane.xlu2 %6189  ;;  %v16633_v10 = vpop.xlane.xlu1 %7168 }
0x10bf   :  { %v7172_v0 = vsub.f32 %v16488_v25, %v16633_v10 }
0x10c1   :  { %v7174_v4 = vmul.f32 1.442695, %v7172_v0 }
0x10c6   :  { %v16639_v15 = vpop.xlane.xlu2 %7170  ;;  %v16641_v14 = vpop.xlane.xlu1 %8149 }
0x10ce   :  { %v16647_v36 = vpop.xlane.xlu2 %9126 }
0x10cf   :  { %v9130_v58 = vsub.f32 %v16560_v30, %v16647_v36 }
0x1139   :  { %v10095_v23 = vpop.f32.mrf.mxu3 }
0x113f   :  { %v10081_v2 = vpop.f32.mrf.mxu2 }
0x1140   :  { %v10082_v57 = vadd.f32 %v15928_v42, %v10081_v2  ;;  %v6193_v2 = vsub.f32 %v16458_v26, %v16631_v33  ;;  %v8152_v26 = vsub.f32 %v16526_v38, %v16641_v14 }
0x1141   :  { %v10097_v39 = vpop.f32.mrf.mxu3 }
0x1142   :  { %v16606_v47 = vadd.f32 %v10095_v23, %v10082_v57  ;;  %v6195_v57 = vmul.f32 1.442695, %v6193_v2  ;;  %v8155_v25 = vmul.f32 1.442695, %v8152_v26 }
0x1144   :  { %v16611_v29 = vsel %vm16602_vm13, %v16606_v47, -inf  ;;  %15951 = vpow2.f32 %v6195_v57 }
0x1145   :  { %10105 = vmax.xlane.f32.xlu1 %v16611_v29  ;;  %15953 = vpow2.f32 %v7174_v4 }
0x1147   :  { %v10083_v32 = vpop.f32.mrf.mxu2 }
0x1148   :  { %v10084_v18 = vadd.f32 %v15928_v42, %v10083_v32  ;;  %v15944_v42 = vpop.eup %15943 }
0x1149   :  { %v15946_v23 = vpop.eup %15945 }
0x114a   :  { %v16620_v9 = vadd.f32 %v10097_v39, %v10084_v18  ;;  %v15948_v3 = vpop.eup %15947  ;;  %v7173_v18 = vsub.f32 %v16496_v52, %v16639_v15  ;;  %v9132_v52 = vmul.f32 1.442695, %v9130_v58 }
0x114b   :  { %v15950_v32 = vpop.eup %15949 }
0x114c   :  { %16765 = vst [vmem:[#allocation18_spill] sm:$0xff] %v16620_v9  ;;  %v10104_v48 = vsel %vm16602_vm13, %v16620_v9, -inf  ;;  %v7176_v34 = vmul.f32 1.442695, %v7173_v18  ;;  %v15952_v39 = vpop.eup %15951 }
0x114d   :  { %10107 = vmax.xlane.f32.xlu2 %v10104_v48  ;;  %2285 = vadd.xlane.f32.xlu1 %v15942_v20  ;;  %v15954_v20 = vpop.eup %15953 }
0x114e   :  { %15955 = vpow2.f32 %v7176_v34 }
0x114f   :  { %15957 = vpow2.f32 %v8155_v25 }
0x1150   :  { %15959 = vpow2.f32 %v9132_v52 }
0x1154   :  { %v15956_v40 = vpop.eup %15955 }
0x1155   :  { %3262 = vadd.xlane.f32.xlu2 %v15944_v42  ;;  %4241 = vadd.xlane.f32.xlu1 %v15946_v23  ;;  %v15958_v46 = vpop.eup %15957 }
0x1156   :  { %v15960_v38 = vpop.eup %15959 }
0x115d   :  { %4243 = vadd.xlane.f32.xlu2 %v15948_v3  ;;  %5222 = vadd.xlane.f32.xlu1 %v15950_v32  ;;  %v2284_v32 = vpop.xlane.xlu0 %2283 }
0x1165   :  { %6199 = vadd.xlane.f32.xlu2 %v15952_v39  ;;  %7178 = vadd.xlane.f32.xlu1 %v15954_v20  ;;  %v3265_v34 = vpop.xlane.xlu0 %3264 }
0x116d   :  { %7180 = vadd.xlane.f32.xlu2 %v15956_v40  ;;  %8159 = vadd.xlane.f32.xlu1 %v15958_v46 }
0x1175   :  { %9136 = vadd.xlane.f32.xlu2 %v15960_v38 }
0x11b8   :  { %v16651_v62 = vpop.xlane.xlu1 %10105 }
0x11b9   :  { %v10109_v42 = vsub.f32 %v16611_v29, %v16651_v62  ;;  %v5221_v29 = vpop.xlane.xlu0 %5220 }
0x11bb   :  { %v10111_v23 = vmul.f32 1.442695, %v10109_v42 }
0x11bd   :  { %15961 = vpow2.f32 %v10111_v23 }
0x11c0   :  { %v16655_v2 = vpop.xlane.xlu2 %10107  ;;  %v2286_v18 = vpop.xlane.xlu1 %2285 }
0x11c1   :  { %v10110_v0 = vsub.f32 %v10104_v48, %v16655_v2  ;;  %v6202_v52 = vpop.xlane.xlu0 %6201 }
0x11c3   :  { %v15962_v30 = vpop.eup %15961  ;;  %v10113_v57 = vmul.f32 1.442695, %v10110_v0 }
0x11c4   :  { %10115 = vadd.xlane.f32.xlu1 %v15962_v30 }
0x11c5   :  { %15963 = vpow2.f32 %v10113_v57 }
0x11c6   :  { %15965 = vlog2.f32 %v2284_v32 }
0x11c8   :  { %v3263_v3 = vpop.xlane.xlu2 %3262  ;;  %v4242_v25 = vpop.xlane.xlu1 %4241 }
0x11c9   :  { %15967 = vlog2.f32 %v3263_v3  ;;  %v8158_v3 = vpop.xlane.xlu0 %8157 }
0x11ca   :  { %15969 = vlog2.f32 %v4242_v25 }
0x11cb   :  { %v15964_v4 = vpop.eup %15963  ;;  %15971 = vlog2.f32 %v2286_v18 }
0x11cc   :  { %10117 = vadd.xlane.f32.xlu2 %v15964_v4  ;;  %v15966_v40 = vpop.eup %15965  ;;  %15973 = vlog2.f32 %v3265_v34 }
0x11cd   :  { %v2288_v38 = vmul.f32 0.6931472, %v15966_v40 }
0x11cf   :  { %v15968_v46 = vpop.eup %15967  ;;  %v2291_v4 = vadd.f32 %v2288_v38, %v16547_v7 }
0x11d0   :  { %v4244_v26 = vpop.xlane.xlu2 %4243  ;;  %v5223_v20 = vpop.xlane.xlu1 %5222  ;;  %v3267_v23 = vmul.f32 0.6931472, %v15968_v46 }
0x11d1   :  { %v15970_v42 = vpop.eup %15969 }
0x11d2   :  { %v15972_v0 = vpop.eup %15971  ;;  %v4246_v32 = vmul.f32 0.6931472, %v15970_v42  ;;  %v3270_v18 = vadd.f32 %v3267_v23, %v16549_v43 }
0x11d3   :  { %v15974_v57 = vpop.eup %15973  ;;  %v2290_v34 = vmul.f32 0.6931472, %v15972_v0 }
0x11d4   :  { %v3269_v23 = vmul.f32 0.6931472, %v15974_v57 }
0x11d5   :  { %v2292_v43 = vadd.f32 %v2290_v34, %v16565_v16 }
0x11d6   :  { %v3271_v34 = vadd.f32 %v3269_v23, %v16569_v19 }
0x11d7   :  { %v2294_v57 = vsub.f32 %v16333_v28, %v2292_v43 }
0x11d8   :  { %v6200_v39 = vpop.xlane.xlu2 %6199  ;;  %v7179_v48 = vpop.xlane.xlu1 %7178 }
0x11d9   :  { %15975 = vlog2.f32 %v6200_v39  ;;  %v2296_v19 = vsel %vm2269_vm0, %v2294_v57, 0.0 }
0x11da   :  { %15977 = vlog2.f32 %v5221_v29 }
0x11db   :  { %15979 = vlog2.f32 %v4244_v26  ;;  %v2293_v26 = vsub.f32 %v16325_v17, %v2291_v4 }
0x11dc   :  { %15981 = vlog2.f32 %v7179_v48  ;;  %v4249_v48 = vadd.f32 %v4246_v32, %v16600_v12 }
0x11dd   :  { %15983 = vlog2.f32 %v5223_v20  ;;  %v3272_v20 = vsub.f32 %v16355_v44, %v3270_v18 }
0x11de   :  { %v4251_v17 = vsub.f32 %v16385_v56, %v4249_v48 }
0x11df   :  { %v15976_v25 = vpop.eup %15975 }
0x11e0   :  { %v7181_v58 = vpop.xlane.xlu2 %7180  ;;  %v15978_v9 = vpop.eup %15977  ;;  %v6204_v46 = vmul.f32 0.6931472, %v15976_v25 }
0x11e1   :  { %v8160_v39 = vpop.xlane.xlu1 %8159  ;;  %v15980_v29 = vpop.eup %15979  ;;  %v5225_v7 = vmul.f32 0.6931472, %v15978_v9 }
0x11e2   :  { %v15982_v40 = vpop.eup %15981  ;;  %v4248_v42 = vmul.f32 0.6931472, %v15980_v29  ;;  %v6207_v12 = vadd.f32 %v6204_v46, %v16631_v33  ;;  %v3273_v46 = vsub.f32 %v16363_v53, %v3271_v34 }
0x11e3   :  { %v15984_v38 = vpop.eup %15983  ;;  %v7183_v0 = vmul.f32 0.6931472, %v15982_v40  ;;  %v5228_v9 = vadd.f32 %v5225_v7, %v16580_v50 }
0x11e4   :  { %v5227_v16 = vmul.f32 0.6931472, %v15984_v38  ;;  %v4250_v32 = vadd.f32 %v4248_v42, %v16618_v61  ;;  %v6209_v29 = vsub.f32 %v16453_v27, %v6207_v12  ;;  %v3275_v11 = vsel %vm16351_vm3, %v3273_v46, %v2296_v19 }
0x11e5   :  { %v7186_v56 = vadd.f32 %v7183_v0, %v16633_v10  ;;  %v5230_v28 = vsub.f32 %v16423_v59, %v5228_v9 }
0x11e6   :  { %v5229_v61 = vadd.f32 %v5227_v16, %v16622_v41  ;;  %v4252_v10 = vsub.f32 %v16393_v63, %v4250_v32  ;;  %v16768_v16 = vld [vmem:[#allocation18_spill] sm:$0xff] }
0x11e8   :  { %v9137_v30 = vpop.xlane.xlu2 %9136  ;;  %v5231_v63 = vsub.f32 %v16431_v60, %v5229_v61 }
0x11e9   :  { %15985 = vlog2.f32 %v9137_v30 }
0x11ea   :  { %15987 = vlog2.f32 %v8158_v3  ;;  %v2295_v3 = vsel %vm2269_vm0, %v2293_v26, 0.0 }
0x11eb   :  { %15989 = vlog2.f32 %v7181_v58  ;;  %v3274_v44 = vsel %vm16351_vm3, %v3272_v20, %v2295_v3  ;;  %v7188_v20 = vsub.f32 %v16483_v45, %v7186_v56  ;;  %v4254_v45 = vsel %vm16381_vm6, %v4252_v10, %v3275_v11 }
0x11ec   :  { %15991 = vlog2.f32 %v6202_v52  ;;  %v9139_v52 = vpop.xlane.xlu0 %9138  ;;  %v4253_v50 = vsel %vm16381_vm6, %v4251_v17, %v3274_v44 }
0x11ed   :  { %15993 = vlog2.f32 %v8160_v39  ;;  %v5232_v7 = vsel %vm16419_vm9, %v5230_v28, %v4253_v50 }
0x11ee   :  { %v6211_v41 = vsel %vm16449_vm12, %v6209_v29, %v5232_v7 }
0x11ef   :  { %v15986_v30 = vpop.eup %15985  ;;  %v7190_v0 = vsel %vm16479_vm15, %v7188_v20, %v6211_v41 }
0x11f0   :  { %v15988_v58 = vpop.eup %15987  ;;  %v9141_v33 = vmul.f32 0.6931472, %v15986_v30 }
0x11f1   :  { %v15990_v4 = vpop.eup %15989  ;;  %v8162_v39 = vmul.f32 0.6931472, %v15988_v58 }
0x11f2   :  { %v15992_v18 = vpop.eup %15991  ;;  %v7185_v26 = vmul.f32 0.6931472, %v15990_v4  ;;  %v9144_v27 = vadd.f32 %v9141_v33, %v16647_v36 }
0x11f3   :  { %v15994_v40 = vpop.eup %15993  ;;  %v6206_v48 = vmul.f32 0.6931472, %v15992_v18  ;;  %v8165_v59 = vadd.f32 %v8162_v39, %v16588_v21 }
0x11f4   :  { %v8164_v38 = vmul.f32 0.6931472, %v15994_v40  ;;  %v7187_v53 = vadd.f32 %v7185_v26, %v16639_v15  ;;  %v9146_v30 = vsub.f32 %v16555_v5, %v9144_v27 }
0x11f5   :  { %v6208_v23 = vadd.f32 %v6206_v48, %v16584_v54  ;;  %v8167_v8 = vsub.f32 %v16513_v37, %v8165_v59  ;;  %v5233_v54 = vsel %vm16419_vm9, %v5231_v63, %v4254_v45 }
0x11f6   :  { %v8166_v60 = vadd.f32 %v8164_v38, %v16641_v14  ;;  %v7189_v55 = vsub.f32 %v16491_v35, %v7187_v53  ;;  %v16766_v35 = vld [vmem:[#allocation17_spill] sm:$0xff] }
0x11f7   :  { %v6210_v17 = vsub.f32 %v16461_v6, %v6208_v23  ;;  %v8169_v12 = vsel %vm16509_vm4, %v8167_v8, %v7190_v0 }
0x11f8   :  { %v9148_v37 = vsel %vm16551_vm8, %v9146_v30, %v8169_v12 }
0x11f9   :  { %v6212_v14 = vsel %vm16449_vm12, %v6210_v17, %v5233_v54 }
0x11fa   :  { %v7191_v6 = vsel %vm16479_vm15, %v7189_v55, %v6212_v14 }
0x1237   :  { %v10116_v25 = vpop.xlane.xlu1 %10115 }
0x1238   :  { %15995 = vlog2.f32 %v10116_v25 }
0x1239   :  { %15997 = vlog2.f32 %v9139_v52 }
0x123e   :  { %v15996_v43 = vpop.eup %15995 }
0x123f   :  { %v15998_v42 = vpop.eup %15997  ;;  %v10120_v36 = vmul.f32 0.6931472, %v15996_v43  ;;  %v10118_v21 = vpop.xlane.xlu2 %10117 }
0x1240   :  { %15999 = vlog2.f32 %v10118_v21  ;;  %v9143_v3 = vmul.f32 0.6931472, %v15998_v42 }
0x1241   :  { %v10123_v15 = vadd.f32 %v10120_v36, %v16651_v62  ;;  %v8168_v62 = vsub.f32 %v16521_v31, %v8166_v60  ;;  %v16767_v31 = vld [vmem:[#allocation16_spill] sm:$0xff] }
0x1242   :  { %v9145_v9 = vadd.f32 %v9143_v3, %v16766_v35 }
0x1243   :  { %v10125_v5 = vsub.f32 %v16606_v47, %v10123_v15  ;;  %v8170_v51 = vsel %vm16509_vm4, %v8168_v62, %v7191_v6 }
0x1244   :  { %v9147_v44 = vsub.f32 %v16767_v31, %v9145_v9 }
0x1245   :  { %v10127_v1 = vsel %vm16602_vm13, %v10125_v5, %v9148_v37 }
0x1246   :  { %v16000_v58 = vpop.eup %15999  ;;  %10129 = vst [vmem:[%s16743_s7] sm:$0xff] %v10127_v1  ;;  %v9149_v57 = vsel %vm16551_vm8, %v9147_v44, %v8170_v51 }
0x1247   :  { %v10122_v47 = vmul.f32 0.6931472, %v16000_v58 }
0x1249   :  { %v10124_v52 = vadd.f32 %v10122_v47, %v16655_v2 }
0x124b   :  { %v10126_v4 = vsub.f32 %v16768_v16, %v10124_v52 }
0x124d   :  { %v10128_v49 = vsel %vm16602_vm13, %v10126_v4, %v9149_v57 }
0x124e   :  { %10130 = vst [vmem:[%s16743_s7 + $0x8] sm:$0xff] %v10128_v49 }
0x124f   :  { %10135 = vsyncpa [#allocation3], 1 }
0x1250   :  { %10136 = vsyncpa [#allocation5], 1 }
0x1251   :  { %10137 = vsyncpa [#allocation8], 1 }
0x1252   :  { %10138 = vsyncpa [#allocation11], 1 }

</bundles_post_ra>
